<compile_context>
chip_gen: v7x
topology: tpu7x:2x2x1
jax: 0.10.0
libtpu: 0.0.40
codegen_flags: <defaults>
</compile_context>

<pallas_src>
import functools
import math

import jax
import jax.numpy as jnp
from jax.experimental import pallas as pl
from jax.experimental.pallas import tpu as pltpu

BN_EPS = 1e-5


# ------------------------------ helpers -------------------------------------

def _round_up(v, m):
    return ((v + m - 1) // m) * m


def _pick_div_tile(dim, target, align):
    """Largest multiple of `align` that divides `dim` and is <= target."""
    t = min(target, dim)
    t -= t % align
    while t > align:
        if dim % t == 0:
            return t
        t -= align
    return align


def _spatial_tile(L, C, bytes_per_elem=2, budget=1 << 20, cap=2048):
    """VMEM-budgeted spatial tile (keeps per-ref block ~<=1 MiB; v5e-safe)."""
    per_row = max(1, C * bytes_per_elem)
    tl = min(cap, max(8, budget // per_row))
    tl -= tl % 8
    tl = max(8, min(tl, _round_up(L, 8)))
    return tl


# ---------------- packed (block-diagonal grouped) matmul kernel --------------

def _matmul_kernel(x_ref, w_ref, scale_ref, shift_ref, o_ref, acc_ref, *, act):
    k = pl.program_id(3)
    prod = jnp.dot(x_ref[...], w_ref[0], preferred_element_type=jnp.float32)

    @pl.when(k == 0)
    def _():
        acc_ref[...] = prod                     # direct assign (no zero-fill)

    @pl.when(k > 0)
    def _():
        acc_ref[...] += prod

    @pl.when(k == pl.num_programs(3) - 1)
    def _():
        y = acc_ref[...] * scale_ref[0] + shift_ref[0]     # f32 epilogue
        if act == "relu":
            y = jnp.maximum(y, 0.0)
        elif act == "sigmoid":
            y = jax.nn.sigmoid(y)
        o_ref[...] = y.astype(o_ref.dtype)


def packed_matmul(x_p, w_p, scale_p, shift_p, act="none", out_dtype=jnp.bfloat16,
                  tm_target=256, tn_target=512, tk_target=512):
    """y = act((x_p @ w_p[s]) * scale + shift) per super-group, lane-dense.

    x_p    : (M, S*Ksp)   bf16, per-super-group K slabs concatenated
    w_p    : (S, Ksp, SNp) bf16 (block-diagonal inside for grouped convs)
    scale_p, shift_p : (S, 1, SNp) f32
    returns (M, S*SNp) in out_dtype, output written directly in this layout.
    """
    M, Ktot = x_p.shape
    S, Ksp, SNp = w_p.shape
    assert Ktot == S * Ksp

    tm = min(tm_target, _round_up(M, 8))
    m_pad = _round_up(M, tm)
    if m_pad != M:
        x_p = jnp.pad(x_p, ((0, m_pad - M), (0, 0)))
    tn = _pick_div_tile(SNp, tn_target, 128)
    tk = _pick_div_tile(Ksp, tk_target, 128)
    mt, nt, kt = m_pad // tm, SNp // tn, Ksp // tk

    out = pl.pallas_call(
        functools.partial(_matmul_kernel, act=act),
        out_shape=jax.ShapeDtypeStruct((m_pad, S * SNp), out_dtype),
        grid=(mt, S, nt, kt),
        in_specs=[
            # x: the K slab of super-group s, walked block-diagonally.
            pl.BlockSpec((tm, tk), lambda i, s, j, k, kt=kt: (i, s * kt + k)),
            pl.BlockSpec((1, tk, tn), lambda i, s, j, k: (s, k, j)),
            pl.BlockSpec((1, 1, tn), lambda i, s, j, k: (s, 0, j)),
            pl.BlockSpec((1, 1, tn), lambda i, s, j, k: (s, 0, j)),
        ],
        out_specs=pl.BlockSpec((tm, tn),
                               lambda i, s, j, k, nt=nt: (i, s * nt + j)),
        scratch_shapes=[pltpu.VMEM((tm, tn), jnp.float32)],
        compiler_params=pltpu.CompilerParams(
            dimension_semantics=("parallel", "parallel", "parallel",
                                 "arbitrary")),
    )(x_p, w_p, scale_p, shift_p)
    return out[:M]


# -------------------- conv packing (parameter-load time) ---------------------

def _bn_fold(c):
    gamma = jnp.ones((c,), jnp.float32)
    beta = jnp.zeros((c,), jnp.float32)
    mean = jnp.zeros((c,), jnp.float32)
    var = jnp.ones((c,), jnp.float32)
    scale = gamma / jnp.sqrt(var + BN_EPS)
    shift = beta - mean * scale
    return scale, shift


def pack_conv(w, scale, shift, *, stride, pad, groups, act):
    """Repack PyTorch conv weight + folded BN for packed_matmul (done once)."""
    Cout, cin_g, kh, kw = w.shape
    G = groups
    cout_g = Cout // G
    T = kh * kw
    Kg = T * cin_g
    if G == 1:
        gp = 1
    else:
        gp = max(1, min(G, 128 // max(1, cout_g)))
        while G % gp != 0:
            gp -= 1
    S = G // gp
    tap_major = (S == 1)
    sn = gp * cout_g
    sn_pad = _round_up(sn, 128)
    Ks = gp * Kg
    Ks_pad = _round_up(Ks, 128)

    wg = w.astype(jnp.float32).reshape(G, cout_g, cin_g, kh, kw)
    if tap_major:
        # Super-group K order (tap, group, cin) -> activations need no transpose.
        wt = wg.transpose(3, 4, 0, 2, 1).reshape(T, G, cin_g, cout_g)
        eye = jnp.eye(G, dtype=jnp.float32)
        w_sup = jnp.einsum("tgco,gh->tgcho", wt, eye).reshape(
            1, T * G * cin_g, G * cout_g)
    else:
        # Super-group K order (group_local, tap, cin).
        wk = wg.transpose(0, 3, 4, 2, 1).reshape(S, gp, Kg, cout_g)
        eye = jnp.eye(gp, dtype=jnp.float32)
        w_sup = jnp.einsum("sgko,gh->sgkho", wk, eye).reshape(
            S, gp * Kg, gp * cout_g)
    w_p = jnp.pad(w_sup, ((0, 0), (0, Ks_pad - Ks), (0, sn_pad - sn)))
    sc = jnp.pad(scale.astype(jnp.float32).reshape(S, 1, sn),
                 ((0, 0), (0, 0), (0, sn_pad - sn)))
    sh = jnp.pad(shift.astype(jnp.float32).reshape(S, 1, sn),
                 ((0, 0), (0, 0), (0, sn_pad - sn)))
    return dict(w=w_p.astype(jnp.bfloat16), scale=sc, shift=sh,
                meta=dict(kh=kh, kw=kw, stride=stride, pad=pad, groups=G,
                          gp=gp, S=S, cin_g=cin_g, cout_g=cout_g, Cout=Cout,
                          Kg=Kg, Ks=Ks, Ks_pad=Ks_pad, sn=sn, sn_pad=sn_pad,
                          tap_major=tap_major, act=act))


def conv_apply(x_nhwc, cp):
    """Conv2d(bias=False) + folded BN + activation, NHWC in/out."""
    m = cp["meta"]
    N = x_nhwc.shape[0]
    kh, kw, stride, pad = m["kh"], m["kw"], m["stride"], m["pad"]
    S, gp, cin_g, Kg = m["S"], m["gp"], m["cin_g"], m["Kg"]
    Ks, Ks_pad = m["Ks"], m["Ks_pad"]

    if kh == 1 and kw == 1:
        xs = x_nhwc
        if pad:
            xs = jnp.pad(xs, ((0, 0), (pad, pad), (pad, pad), (0, 0)))
        if stride != 1:
            xs = xs[:, ::stride, ::stride, :]
        _, oh, ow, _ = xs.shape
        M = N * oh * ow
        cols = xs.reshape(M, S, gp * cin_g)          # pure reshape, no im2col
    else:
        xp = x_nhwc
        if pad:
            xp = jnp.pad(xp, ((0, 0), (pad, pad), (pad, pad), (0, 0)))
        _, Hp, Wp, C = xp.shape
        oh = (Hp - kh) // stride + 1
        ow = (Wp - kw) // stride + 1
        taps = []
        for i in range(kh):
            for j in range(kw):
                taps.append(xp[:, i:i + stride * oh:stride,
                               j:j + stride * ow:stride, :])
        stacked = jnp.stack(taps, axis=3)            # (N, oh, ow, T, C)
        M = N * oh * ow
        T = kh * kw
        if m["tap_major"]:
            cols = stacked.reshape(M, 1, T * C)      # single packed cols copy
        else:
            cols = stacked.reshape(N, oh, ow, T, S, gp, cin_g)
            cols = cols.transpose(0, 1, 2, 4, 5, 3, 6)
            cols = cols.reshape(M, S, gp * Kg)
    if Ks_pad != Ks:
        cols = jnp.pad(cols, ((0, 0), (0, 0), (0, Ks_pad - Ks)))
    x_p = cols.reshape(M, S * Ks_pad).astype(jnp.bfloat16)

    y = packed_matmul(x_p, cp["w"], cp["scale"], cp["shift"],
                      act=m["act"], out_dtype=jnp.bfloat16)   # (M, S*sn_pad)
    sn, sn_pad, Cout = m["sn"], m["sn_pad"], m["Cout"]
    if sn_pad != sn:
        y = y.reshape(M, S, sn_pad)[:, :, :sn]
    return y.reshape(N, oh, ow, Cout)


# ---------------- fused SE squeeze-excite (pool + MLP + sigmoid) --------------

def _se_gate_kernel(x_ref, w1_ref, b1_ref, w2_ref, b2_ref, gate_ref, sum_ref,
                    *, inv_l):
    l = pl.program_id(1)
    part = jnp.sum(x_ref[0].astype(jnp.float32), axis=0, keepdims=True)  # (1,C)

    @pl.when(l == 0)
    def _():
        sum_ref[...] = part

    @pl.when(l > 0)
    def _():
        sum_ref[...] += part

    @pl.when(l == pl.num_programs(1) - 1)
    def _():
        C = sum_ref.shape[1]
        pooled = jnp.broadcast_to(sum_ref[...] * inv_l, (8, C))
        h = jnp.dot(pooled, w1_ref[...], preferred_element_type=jnp.float32)
        h = jnp.maximum(h + b1_ref[...], 0.0)
        g = jnp.dot(h, w2_ref[...], preferred_element_type=jnp.float32)
        g = jax.nn.sigmoid(g + b2_ref[...])
        gate_ref[0] = g[0:1]


def se_gate(x_nhwc, sp):
    """Fused AdaptiveAvgPool2d(1) + FC1 + ReLU + FC2 + sigmoid -> (N,1,C) f32."""
    N, H, W, C = x_nhwc.shape
    L = H * W
    tl = _spatial_tile(L, C)
    l_pad = _round_up(L, tl)
    x = x_nhwc.reshape(N, L, C)
    if l_pad != L:
        x = jnp.pad(x, ((0, 0), (0, l_pad - L), (0, 0)))
    midp = sp["w1"].shape[1]
    gate = pl.pallas_call(
        functools.partial(_se_gate_kernel, inv_l=1.0 / L),
        out_shape=jax.ShapeDtypeStruct((N, 1, C), jnp.float32),
        grid=(N, l_pad // tl),
        in_specs=[
            pl.BlockSpec((1, tl, C), lambda n, l: (n, l, 0)),
            pl.BlockSpec((C, midp), lambda n, l: (0, 0)),
            pl.BlockSpec((1, midp), lambda n, l: (0, 0)),
            pl.BlockSpec((midp, C), lambda n, l: (0, 0)),
            pl.BlockSpec((1, C), lambda n, l: (0, 0)),
        ],
        out_specs=pl.BlockSpec((1, 1, C), lambda n, l: (n, 0, 0)),
        scratch_shapes=[pltpu.VMEM((1, C), jnp.float32)],
        compiler_params=pltpu.CompilerParams(
            dimension_semantics=("parallel", "arbitrary")),
    )(x, sp["w1"], sp["b1"], sp["w2"], sp["b2"])
    return gate


# ----------------- fused SE-scale + residual + ReLU kernel -------------------

def _se_residual_relu_kernel(x_ref, g_ref, id_ref, o_ref):
    y = (x_ref[...].astype(jnp.float32) * g_ref[...]
         + id_ref[...].astype(jnp.float32))
    o_ref[...] = jnp.maximum(y, 0.0).astype(o_ref.dtype)


def se_residual_relu(x_nlc, gate_n1c, id_nlc):
    """relu(x * gate + identity); x/id: (N, L, C), gate: (N, 1, C) f32."""
    N, L, C = x_nlc.shape
    tl = _spatial_tile(L, C)                 # VMEM-budgeted (v5e-safe)
    l_pad = _round_up(L, tl)
    if l_pad != L:
        x_nlc = jnp.pad(x_nlc, ((0, 0), (0, l_pad - L), (0, 0)))
        id_nlc = jnp.pad(id_nlc, ((0, 0), (0, l_pad - L), (0, 0)))
    out = pl.pallas_call(
        _se_residual_relu_kernel,
        out_shape=jax.ShapeDtypeStruct((N, l_pad, C), x_nlc.dtype),
        grid=(N, l_pad // tl),
        in_specs=[
            pl.BlockSpec((1, tl, C), lambda n, l: (n, l, 0)),
            pl.BlockSpec((1, 1, C), lambda n, l: (n, 0, 0)),
            pl.BlockSpec((1, tl, C), lambda n, l: (n, l, 0)),
        ],
        out_specs=pl.BlockSpec((1, tl, C), lambda n, l: (n, l, 0)),
        compiler_params=pltpu.CompilerParams(
            dimension_semantics=("parallel", "parallel")),
    )(x_nlc, gate_n1c, id_nlc)
    return out[:, :L, :]


# ------------------------------ pooling kernels -------------------------------

def _maxpool3x3_kernel(x_ref, o_ref):
    x = x_ref[0]                                     # (H+2, W+2, C), -inf pad
    Hp, Wp, _ = x.shape
    H, W = Hp - 2, Wp - 2
    rows = jnp.maximum(jnp.maximum(x[0:H], x[1:H + 1]), x[2:H + 2])
    out = jnp.maximum(jnp.maximum(rows[:, 0:W], rows[:, 1:W + 1]),
                      rows[:, 2:W + 2])
    o_ref[0] = out


def maxpool3x3_s2_p1(x_nhwc):
    """MaxPool2d(3, stride=2, padding=1): one Pallas pass + strided subsample."""
    N, H, W, C = x_nhwc.shape
    xp = jnp.pad(x_nhwc, ((0, 0), (1, 1), (1, 1), (0, 0)),
                 constant_values=-jnp.inf)
    full = pl.pallas_call(
        _maxpool3x3_kernel,
        out_shape=jax.ShapeDtypeStruct((N, H, W, C), x_nhwc.dtype),
        grid=(N,),
        in_specs=[pl.BlockSpec((1, H + 2, W + 2, C), lambda n: (n, 0, 0, 0))],
        out_specs=pl.BlockSpec((1, H, W, C), lambda n: (n, 0, 0, 0)),
        compiler_params=pltpu.CompilerParams(dimension_semantics=("parallel",)),
    )(xp)
    # TODO(synk): stride-2 subsample kept in XLA glue (strided sublane slices
    # inside Mosaic are layout-risky); still ~1 read + ~1.25 writes vs 9+9.
    return full[:, ::2, ::2, :]


def _avgpool_kernel(x_ref, o_ref, *, k):
    x = x_ref[0].astype(jnp.float32)                 # (H, W, C)
    H, W, _ = x.shape
    oh, ow = H - k + 1, W - k + 1
    rows = x[0:oh]                                   # separable: k row adds
    for i in range(1, k):
        rows = rows + x[i:i + oh]
    acc = rows[:, 0:ow]                              # then k column adds
    for j in range(1, k):
        acc = acc + rows[:, j:j + ow]
    o_ref[0] = (acc * (1.0 / (k * k))).astype(o_ref.dtype)


def avgpool2d(x_nhwc, k):
    N, H, W, C = x_nhwc.shape
    oh, ow = H - k + 1, W - k + 1
    return pl.pallas_call(
        functools.partial(_avgpool_kernel, k=k),
        out_shape=jax.ShapeDtypeStruct((N, oh, ow, C), jnp.float32),
        grid=(N,),
        in_specs=[pl.BlockSpec((1, H, W, C), lambda n: (n, 0, 0, 0))],
        out_specs=pl.BlockSpec((1, oh, ow, C), lambda n: (n, 0, 0, 0)),
        compiler_params=pltpu.CompilerParams(dimension_semantics=("parallel",)),
    )(x_nhwc)


# ---------------------------- model components -------------------------------

def se_resnext_unit(x, u):
    identity = conv_apply(x, u["id_conv"]) if u["resize"] else x
    y = conv_apply(x, u["conv1"])
    y = conv_apply(y, u["conv2"])
    y = conv_apply(y, u["conv3"])
    gate = se_gate(y, u["se"])
    N, H, W, C = y.shape
    out = se_residual_relu(y.reshape(N, H * W, C), gate,
                           identity.reshape(N, H * W, C))
    return out.reshape(N, H, W, C)


def fc_apply(x, fp):
    m = fp["meta"]
    N, F = x.shape
    if m["Kp"] != F:
        x = jnp.pad(x, ((0, 0), (0, m["Kp"] - F)))
    y = packed_matmul(x.astype(jnp.bfloat16), fp["w"], fp["scale"], fp["shift"],
                      act="none", out_dtype=jnp.float32)
    return y[:, :m["num_classes"]]


def seresnext_forward(params, x):
    # Single NCHW (PyTorch) -> NHWC layout change; bf16 activations end-to-end.
    x = jnp.transpose(x, (0, 2, 3, 1)).astype(jnp.bfloat16)
    x = conv_apply(x, params["init_block"])
    x = maxpool3x3_s2_p1(x)
    for stage in params["stages"]:
        for unit in stage:
            x = se_resnext_unit(x, unit)
    x = avgpool2d(x, 7)                              # final_pool (f32)
    N, oh, ow, C = x.shape
    # PyTorch flattens in NCHW order; tiny pooled map, transpose once.
    x = jnp.transpose(x, (0, 3, 1, 2)).reshape(N, C * oh * ow)
    # nn.Dropout(0.5) is identity at inference; Linear via the packed matmul.
    return fc_apply(x, params["fc"])


# ---------------------------- parameter setup --------------------------------

def _kaiming_uniform(key, shape):
    fan_in = shape[1] * shape[2] * shape[3]
    bound = math.sqrt(6.0 / fan_in)                  # kaiming_uniform_, a=0
    return jax.random.uniform(key, shape, jnp.float32, -bound, bound)


def pack_se(w1, b1, w2, b2):
    mid, C = w1.shape[0], w1.shape[1]
    midp = _round_up(mid, 128)
    w1_p = jnp.zeros((C, midp), jnp.float32).at[:, :mid].set(w1.reshape(mid, C).T)
    b1_p = jnp.zeros((1, midp), jnp.float32).at[0, :mid].set(b1)
    w2_p = jnp.zeros((midp, C), jnp.float32).at[:mid, :].set(w2.reshape(C, mid).T)
    b2_p = b2.reshape(1, C).astype(jnp.float32)
    return dict(w1=w1_p, b1=b1_p, w2=w2_p, b2=b2_p)


def pack_fc(fc_w, fc_b):
    num_classes, F = fc_w.shape
    Kp = _round_up(F, 128)
    Np = _round_up(num_classes, 128)
    w = jnp.zeros((1, Kp, Np), jnp.float32).at[0, :F, :num_classes].set(fc_w.T)
    scale = jnp.ones((1, 1, Np), jnp.float32)
    shift = jnp.zeros((1, 1, Np), jnp.float32).at[0, 0, :num_classes].set(fc_b)
    return dict(w=w.astype(jnp.bfloat16), scale=scale, shift=shift,
                meta=dict(F=F, Kp=Kp, num_classes=num_classes, Np=Np))


def make_params(key, in_channels, init_block_channels, channels,
                cardinality, bottleneck_width):
    kit = iter(jax.random.split(key, 256))
    params = {}
    s, sh = _bn_fold(init_block_channels)
    params["init_block"] = pack_conv(
        _kaiming_uniform(next(kit), (init_block_channels, in_channels, 7, 7)),
        s, sh, stride=2, pad=3, groups=1, act="relu")

    stages = []
    in_ch = init_block_channels
    for i, stage_channels in enumerate(channels):
        stage = []
        for j, out_ch in enumerate(stage_channels):
            stride = 2 if (j == 0 and i != 0) else 1
            mid = out_ch // 4
            D = int(math.floor(mid * (bottleneck_width / 64.0)))
            gw = cardinality * D
            u = dict(resize=(in_ch != out_ch or stride != 1))
            s1, sh1 = _bn_fold(gw)
            u["conv1"] = pack_conv(
                _kaiming_uniform(next(kit), (gw, in_ch, 1, 1)),
                s1, sh1, stride=1, pad=0, groups=1, act="relu")
            s2, sh2 = _bn_fold(gw)
            u["conv2"] = pack_conv(
                _kaiming_uniform(next(kit), (gw, gw // cardinality, 3, 3)),
                s2, sh2, stride=stride, pad=1, groups=cardinality, act="relu")
            s3, sh3 = _bn_fold(out_ch)
            u["conv3"] = pack_conv(
                _kaiming_uniform(next(kit), (out_ch, gw, 1, 1)),
                s3, sh3, stride=1, pad=0, groups=1, act="none")
            se_mid = max(1, out_ch // 16)
            u["se"] = pack_se(
                _kaiming_uniform(next(kit), (se_mid, out_ch, 1, 1)),
                jnp.zeros((se_mid,), jnp.float32),      # init.constant_(0)
                _kaiming_uniform(next(kit), (out_ch, se_mid, 1, 1)),
                jnp.zeros((out_ch,), jnp.float32))
            if u["resize"]:
                si, shi = _bn_fold(out_ch)
                u["id_conv"] = pack_conv(
                    _kaiming_uniform(next(kit), (out_ch, in_ch, 1, 1)),
                    si, shi, stride=stride, pad=0, groups=1, act="none")
            stage.append(u)
            in_ch = out_ch
        stages.append(stage)
    params["stages"] = stages
    return params, in_ch


# ----------------------------------- main -------------------------------------

if __name__ == "__main__":
    key = jax.random.PRNGKey(0)
    kx, kp, kfcw, kfcb = jax.random.split(key, 4)

    # Small config consistent with the module's structure.
    N, in_channels, H, W = 2, 4, 64, 64
    init_block_channels = 16
    channels = [[16], [32]]
    cardinality = 2
    bottleneck_width = 64
    num_classes = 28

    x = jax.random.normal(kx, (N, in_channels, H, W), jnp.float32)

    params, final_ch = make_params(kp, in_channels, init_block_channels,
                                   channels, cardinality, bottleneck_width)

    # Spatial trace: conv7x7 s2 p3 -> H/2; maxpool3 s2 p1 -> H/4;
    # stride-2 first unit in every stage after the first; AvgPool2d(7, 1).
    spatial = H // 4
    for i in range(1, len(channels)):
        spatial //= 2
    pooled_spatial = spatial - 7 + 1
    flat_features = final_ch * pooled_spatial * pooled_spatial
    # TODO(synk): reference hardcodes nn.Linear(204800, 28) for 512x512 inputs;
    # at this small test shape the Linear is sized to the actual flatten count.
    bound = 1.0 / math.sqrt(flat_features)
    fc_w = jax.random.uniform(kfcw, (num_classes, flat_features), jnp.float32,
                              -bound, bound)
    fc_b = jax.random.uniform(kfcb, (num_classes,), jnp.float32, -bound, bound)
    params["fc"] = pack_fc(fc_w, fc_b)

    fwd = jax.jit(lambda inp: seresnext_forward(params, inp))
    out = jax.block_until_ready(fwd(x))
    assert out.shape == (N, num_classes), out.shape
    assert bool(jnp.all(jnp.isfinite(out)))
    print("KERNEL_OK")
</pallas_src>

<mosaic_0001>
module attributes {stable_mosaic.version = 11 : i64} {
  func.func @_matmul_kernel(%arg0: i32, %arg1: i32, %arg2: i32, %arg3: i32, %arg4: memref<256x256xbf16, #tpu.memory_space<vmem>>, %arg5: memref<1x256x128xbf16, #tpu.memory_space<vmem>>, %arg6: memref<1x1x128xf32, #tpu.memory_space<vmem>>, %arg7: memref<1x1x128xf32, #tpu.memory_space<vmem>>, %arg8: memref<256x128xbf16, #tpu.memory_space<vmem>>, %arg9: memref<256x128xf32, #tpu.memory_space<vmem>>) attributes {dimension_semantics = [#tpu.dimension_semantics<parallel>, #tpu.dimension_semantics<parallel>, #tpu.dimension_semantics<parallel>, #tpu.dimension_semantics<arbitrary>], iteration_bounds = array<i64: 8, 1, 1, 1>, scalar_prefetch = 0 : i64, scratch_operands = 1 : i64, tpu.core_type = #tpu.core_type<tc>, window_params = [{transform_indices = @transform_0, window_bounds = array<i64: 256, 256>}, {transform_indices = @transform_1, window_bounds = array<i64: 1, 256, 128>}, {transform_indices = @transform_2, window_bounds = array<i64: 1, 1, 128>}, {transform_indices = @transform_3, window_bounds = array<i64: 1, 1, 128>}, {transform_indices = @transform_4, window_bounds = array<i64: 256, 128>}]} {
    %c0 = arith.constant 0 : index
    %c0_0 = arith.constant 0 : index
    %0 = vector.load %arg4[%c0, %c0_0] : memref<256x256xbf16, #tpu.memory_space<vmem>>, vector<256x256xbf16>
    %c0_1 = arith.constant 0 : index
    %c0_2 = arith.constant 0 : index
    %c0_3 = arith.constant 0 : index
    %1 = vector.load %arg5[%c0_1, %c0_2, %c0_3] : memref<1x256x128xbf16, #tpu.memory_space<vmem>>, vector<1x256x128xbf16>
    %2 = vector.shape_cast %1 : vector<1x256x128xbf16> to vector<256x128xbf16>
    %cst = arith.constant dense<0.000000e+00> : vector<256x128xf32>
    %3 = tpu.matmul %0, %2, %cst {dimension_numbers = #tpu.dot_dimension_numbers<[1], [0], [0], [1], [0, 0, 1, 1], [], []>} : vector<256x256xbf16>, vector<256x128xbf16>, vector<256x128xf32> -> vector<256x128xf32>
    %c0_i32 = arith.constant 0 : i32
    %4 = arith.cmpi eq, %arg3, %c0_i32 : i32
    %5 = arith.extui %4 : i1 to i32
    %c0_i32_4 = arith.constant 0 : i32
    %6 = arith.cmpi ne, %5, %c0_i32_4 : i32
    scf.if %6 {
      %c0_9 = arith.constant 0 : index
      %c0_10 = arith.constant 0 : index
      %13 = vector.load %arg9[%c0_9, %c0_10] : memref<256x128xf32, #tpu.memory_space<vmem>>, vector<256x128xf32>
      tpu.vector_store %arg9[%c0_9, %c0_10], %3 {strides = array<i32>} : memref<256x128xf32, #tpu.memory_space<vmem>>, vector<256x128xf32>,
    } else {
    }
    %c0_i32_5 = arith.constant 0 : i32
    %7 = arith.cmpi sgt, %arg3, %c0_i32_5 : i32
    %8 = arith.extui %7 : i1 to i32
    %c0_i32_6 = arith.constant 0 : i32
    %9 = arith.cmpi ne, %8, %c0_i32_6 : i32
    scf.if %9 {
      %c0_9 = arith.constant 0 : index
      %c0_10 = arith.constant 0 : index
      %13 = vector.load %arg9[%c0_9, %c0_10] : memref<256x128xf32, #tpu.memory_space<vmem>>, vector<256x128xf32>
      %14 = arith.addf %13, %3 : vector<256x128xf32>
      %c0_11 = arith.constant 0 : index
      %c0_12 = arith.constant 0 : index
      %15 = vector.load %arg9[%c0_11, %c0_12] : memref<256x128xf32, #tpu.memory_space<vmem>>, vector<256x128xf32>
      tpu.vector_store %arg9[%c0_11, %c0_12], %14 {strides = array<i32>} : memref<256x128xf32, #tpu.memory_space<vmem>>, vector<256x128xf32>,
    } else {
    }
    %c0_i32_7 = arith.constant 0 : i32
    %10 = arith.cmpi eq, %arg3, %c0_i32_7 : i32
    %11 = arith.extui %10 : i1 to i32
    %c0_i32_8 = arith.constant 0 : i32
    %12 = arith.cmpi ne, %11, %c0_i32_8 : i32
    scf.if %12 {
      %c0_9 = arith.constant 0 : index
      %c0_10 = arith.constant 0 : index
      %13 = vector.load %arg9[%c0_9, %c0_10] : memref<256x128xf32, #tpu.memory_space<vmem>>, vector<256x128xf32>
      %c0_11 = arith.constant 0 : index
      %c0_12 = arith.constant 0 : index
      %c0_13 = arith.constant 0 : index
      %14 = vector.load %arg6[%c0_11, %c0_12, %c0_13] : memref<1x1x128xf32, #tpu.memory_space<vmem>>, vector<1x1x128xf32>
      %15 = vector.shape_cast %14 : vector<1x1x128xf32> to vector<1x128xf32>
      %16 = vector.broadcast %15 : vector<1x128xf32> to vector<256x128xf32>
      %17 = arith.mulf %13, %16 : vector<256x128xf32>
      %c0_14 = arith.constant 0 : index
      %c0_15 = arith.constant 0 : index
      %c0_16 = arith.constant 0 : index
      %18 = vector.load %arg7[%c0_14, %c0_15, %c0_16] : memref<1x1x128xf32, #tpu.memory_space<vmem>>, vector<1x1x128xf32>
      %19 = vector.shape_cast %18 : vector<1x1x128xf32> to vector<1x128xf32>
      %20 = vector.broadcast %19 : vector<1x128xf32> to vector<256x128xf32>
      %21 = arith.addf %17, %20 : vector<256x128xf32>
      %cst_17 = arith.constant 0.000000e+00 : f32
      %22 = vector.broadcast %cst_17 : f32 to vector<256x128xf32>
      %23 = arith.maximumf %21, %22 : vector<256x128xf32>
      %24 = arith.truncf %23 : vector<256x128xf32> to vector<256x128xbf16>
      %c0_18 = arith.constant 0 : index
      %c0_19 = arith.constant 0 : index
      %25 = vector.load %arg8[%c0_18, %c0_19] : memref<256x128xbf16, #tpu.memory_space<vmem>>, vector<256x128xbf16>
      tpu.vector_store %arg8[%c0_18, %c0_19], %24 {strides = array<i32>} : memref<256x128xbf16, #tpu.memory_space<vmem>>, vector<256x128xbf16>,
    } else {
    }
    return
  }
  func.func @transform_0(%arg0: i32, %arg1: i32, %arg2: i32, %arg3: i32) -> (i32, i32) {
    %c1_i32 = arith.constant 1 : i32
    %0 = arith.muli %arg1, %c1_i32 : i32
    %1 = arith.addi %0, %arg3 : i32
    %c0_i32 = arith.constant 0 : i32
    return %arg0, %1 : i32, i32
  }
  func.func @transform_1(%arg0: i32, %arg1: i32, %arg2: i32, %arg3: i32) -> (i32, i32, i32) {
    %c0_i32 = arith.constant 0 : i32
    return %arg1, %arg3, %arg2 : i32, i32, i32
  }
  func.func @transform_2(%arg0: i32, %arg1: i32, %arg2: i32, %arg3: i32) -> (i32, i32, i32) {
    %c0_i32 = arith.constant 0 : i32
    %c0_i32_0 = arith.constant 0 : i32
    return %arg1, %c0_i32, %arg2 : i32, i32, i32
  }
  func.func @transform_3(%arg0: i32, %arg1: i32, %arg2: i32, %arg3: i32) -> (i32, i32, i32) {
    %c0_i32 = arith.constant 0 : i32
    %c0_i32_0 = arith.constant 0 : i32
    return %arg1, %c0_i32, %arg2 : i32, i32, i32
  }
  func.func @transform_4(%arg0: i32, %arg1: i32, %arg2: i32, %arg3: i32) -> (i32, i32) {
    %c1_i32 = arith.constant 1 : i32
    %0 = arith.muli %arg1, %c1_i32 : i32
    %1 = arith.addi %0, %arg2 : i32
    %c0_i32 = arith.constant 0 : i32
    return %arg0, %1 : i32, i32
  }
}

module attributes {stable_mosaic.version = 11 : i64} {
  func.func @_maxpool3x3_kernel(%arg0: i32, %arg1: memref<1x34x34x16xbf16, #tpu.memory_space<vmem>>, %arg2: memref<1x32x32x16xbf16, #tpu.memory_space<vmem>>) attributes {dimension_semantics = [#tpu.dimension_semantics<parallel>], iteration_bounds = array<i64: 2>, scalar_prefetch = 0 : i64, scratch_operands = 0 : i64, tpu.core_type = #tpu.core_type<tc>, window_params = [{transform_indices = @transform_0, window_bounds = array<i64: 1, 34, 34, 16>}, {transform_indices = @transform_1, window_bounds = array<i64: 1, 32, 32, 16>}]} {
    %c0 = arith.constant 0 : index
    %c0_0 = arith.constant 0 : index
    %c0_1 = arith.constant 0 : index
    %c0_2 = arith.constant 0 : index
    %0 = vector.load %arg1[%c0, %c0_0, %c0_1, %c0_2] : memref<1x34x34x16xbf16, #tpu.memory_space<vmem>>, vector<1x34x34x16xbf16>
    %1 = vector.shape_cast %0 : vector<1x34x34x16xbf16> to vector<34x34x16xbf16>
    %2 = vector.extract_strided_slice %1 {offsets = [0, 0, 0], sizes = [32, 34, 16], strides = [1, 1, 1]} : vector<34x34x16xbf16> to vector<32x34x16xbf16>
    %3 = vector.extract_strided_slice %1 {offsets = [1, 0, 0], sizes = [32, 34, 16], strides = [1, 1, 1]} : vector<34x34x16xbf16> to vector<32x34x16xbf16>
    %4 = arith.maximumf %2, %3 : vector<32x34x16xbf16>
    %5 = vector.extract_strided_slice %1 {offsets = [2, 0, 0], sizes = [32, 34, 16], strides = [1, 1, 1]} : vector<34x34x16xbf16> to vector<32x34x16xbf16>
    %6 = arith.maximumf %4, %5 : vector<32x34x16xbf16>
    %7 = vector.extract_strided_slice %6 {offsets = [0, 0, 0], sizes = [32, 32, 16], strides = [1, 1, 1]} : vector<32x34x16xbf16> to vector<32x32x16xbf16>
    %8 = vector.extract_strided_slice %6 {offsets = [0, 1, 0], sizes = [32, 32, 16], strides = [1, 1, 1]} : vector<32x34x16xbf16> to vector<32x32x16xbf16>
    %9 = arith.maximumf %7, %8 : vector<32x32x16xbf16>
    %10 = vector.extract_strided_slice %6 {offsets = [0, 2, 0], sizes = [32, 32, 16], strides = [1, 1, 1]} : vector<32x34x16xbf16> to vector<32x32x16xbf16>
    %11 = arith.maximumf %9, %10 : vector<32x32x16xbf16>
    %c0_3 = arith.constant 0 : index
    %c0_4 = arith.constant 0 : index
    %c0_5 = arith.constant 0 : index
    %c0_6 = arith.constant 0 : index
    %12 = vector.load %arg2[%c0_3, %c0_4, %c0_5, %c0_6] : memref<1x32x32x16xbf16, #tpu.memory_space<vmem>>, vector<1x32x32x16xbf16>
    %13 = vector.shape_cast %12 : vector<1x32x32x16xbf16> to vector<32x32x16xbf16>
    %14 = vector.shape_cast %11 : vector<32x32x16xbf16> to vector<1x32x32x16xbf16>
    tpu.vector_store %arg2[%c0_3, %c0_4, %c0_5, %c0_6], %14 {strides = array<i32>} : memref<1x32x32x16xbf16, #tpu.memory_space<vmem>>, vector<1x32x32x16xbf16>,
    return
  }
  func.func @transform_0(%arg0: i32) -> (i32, i32, i32, i32) {
    %c0_i32 = arith.constant 0 : i32
    %c0_i32_0 = arith.constant 0 : i32
    %c0_i32_1 = arith.constant 0 : i32
    %c0_i32_2 = arith.constant 0 : i32
    return %arg0, %c0_i32, %c0_i32_0, %c0_i32_1 : i32, i32, i32, i32
  }
  func.func @transform_1(%arg0: i32) -> (i32, i32, i32, i32) {
    %c0_i32 = arith.constant 0 : i32
    %c0_i32_0 = arith.constant 0 : i32
    %c0_i32_1 = arith.constant 0 : i32
    %c0_i32_2 = arith.constant 0 : i32
    return %arg0, %c0_i32, %c0_i32_0, %c0_i32_1 : i32, i32, i32, i32
  }
}

module attributes {stable_mosaic.version = 11 : i64} {
  func.func @_matmul_kernel(%arg0: i32, %arg1: i32, %arg2: i32, %arg3: i32, %arg4: memref<256x128xbf16, #tpu.memory_space<vmem>>, %arg5: memref<1x128x128xbf16, #tpu.memory_space<vmem>>, %arg6: memref<1x1x128xf32, #tpu.memory_space<vmem>>, %arg7: memref<1x1x128xf32, #tpu.memory_space<vmem>>, %arg8: memref<256x128xbf16, #tpu.memory_space<vmem>>, %arg9: memref<256x128xf32, #tpu.memory_space<vmem>>) attributes {dimension_semantics = [#tpu.dimension_semantics<parallel>, #tpu.dimension_semantics<parallel>, #tpu.dimension_semantics<parallel>, #tpu.dimension_semantics<arbitrary>], iteration_bounds = array<i64: 2, 1, 1, 1>, scalar_prefetch = 0 : i64, scratch_operands = 1 : i64, tpu.core_type = #tpu.core_type<tc>, window_params = [{transform_indices = @transform_0, window_bounds = array<i64: 256, 128>}, {transform_indices = @transform_1, window_bounds = array<i64: 1, 128, 128>}, {transform_indices = @transform_2, window_bounds = array<i64: 1, 1, 128>}, {transform_indices = @transform_3, window_bounds = array<i64: 1, 1, 128>}, {transform_indices = @transform_4, window_bounds = array<i64: 256, 128>}]} {
    %c0 = arith.constant 0 : index
    %c0_0 = arith.constant 0 : index
    %0 = vector.load %arg4[%c0, %c0_0] : memref<256x128xbf16, #tpu.memory_space<vmem>>, vector<256x128xbf16>
    %c0_1 = arith.constant 0 : index
    %c0_2 = arith.constant 0 : index
    %c0_3 = arith.constant 0 : index
    %1 = vector.load %arg5[%c0_1, %c0_2, %c0_3] : memref<1x128x128xbf16, #tpu.memory_space<vmem>>, vector<1x128x128xbf16>
    %2 = vector.shape_cast %1 : vector<1x128x128xbf16> to vector<128x128xbf16>
    %cst = arith.constant dense<0.000000e+00> : vector<256x128xf32>
    %3 = tpu.matmul %0, %2, %cst {dimension_numbers = #tpu.dot_dimension_numbers<[1], [0], [0], [1], [0, 0, 1, 1], [], []>} : vector<256x128xbf16>, vector<128x128xbf16>, vector<256x128xf32> -> vector<256x128xf32>
    %c0_i32 = arith.constant 0 : i32
    %4 = arith.cmpi eq, %arg3, %c0_i32 : i32
    %5 = arith.extui %4 : i1 to i32
    %c0_i32_4 = arith.constant 0 : i32
    %6 = arith.cmpi ne, %5, %c0_i32_4 : i32
    scf.if %6 {
      %c0_9 = arith.constant 0 : index
      %c0_10 = arith.constant 0 : index
      %13 = vector.load %arg9[%c0_9, %c0_10] : memref<256x128xf32, #tpu.memory_space<vmem>>, vector<256x128xf32>
      tpu.vector_store %arg9[%c0_9, %c0_10], %3 {strides = array<i32>} : memref<256x128xf32, #tpu.memory_space<vmem>>, vector<256x128xf32>,
    } else {
    }
    %c0_i32_5 = arith.constant 0 : i32
    %7 = arith.cmpi sgt, %arg3, %c0_i32_5 : i32
    %8 = arith.extui %7 : i1 to i32
    %c0_i32_6 = arith.constant 0 : i32
    %9 = arith.cmpi ne, %8, %c0_i32_6 : i32
    scf.if %9 {
      %c0_9 = arith.constant 0 : index
      %c0_10 = arith.constant 0 : index
      %13 = vector.load %arg9[%c0_9, %c0_10] : memref<256x128xf32, #tpu.memory_space<vmem>>, vector<256x128xf32>
      %14 = arith.addf %13, %3 : vector<256x128xf32>
      %c0_11 = arith.constant 0 : index
      %c0_12 = arith.constant 0 : index
      %15 = vector.load %arg9[%c0_11, %c0_12] : memref<256x128xf32, #tpu.memory_space<vmem>>, vector<256x128xf32>
      tpu.vector_store %arg9[%c0_11, %c0_12], %14 {strides = array<i32>} : memref<256x128xf32, #tpu.memory_space<vmem>>, vector<256x128xf32>,
    } else {
    }
    %c0_i32_7 = arith.constant 0 : i32
    %10 = arith.cmpi eq, %arg3, %c0_i32_7 : i32
    %11 = arith.extui %10 : i1 to i32
    %c0_i32_8 = arith.constant 0 : i32
    %12 = arith.cmpi ne, %11, %c0_i32_8 : i32
    scf.if %12 {
      %c0_9 = arith.constant 0 : index
      %c0_10 = arith.constant 0 : index
      %13 = vector.load %arg9[%c0_9, %c0_10] : memref<256x128xf32, #tpu.memory_space<vmem>>, vector<256x128xf32>
      %c0_11 = arith.constant 0 : index
      %c0_12 = arith.constant 0 : index
      %c0_13 = arith.constant 0 : index
      %14 = vector.load %arg6[%c0_11, %c0_12, %c0_13] : memref<1x1x128xf32, #tpu.memory_space<vmem>>, vector<1x1x128xf32>
      %15 = vector.shape_cast %14 : vector<1x1x128xf32> to vector<1x128xf32>
      %16 = vector.broadcast %15 : vector<1x128xf32> to vector<256x128xf32>
      %17 = arith.mulf %13, %16 : vector<256x128xf32>
      %c0_14 = arith.constant 0 : index
      %c0_15 = arith.constant 0 : index
      %c0_16 = arith.constant 0 : index
      %18 = vector.load %arg7[%c0_14, %c0_15, %c0_16] : memref<1x1x128xf32, #tpu.memory_space<vmem>>, vector<1x1x128xf32>
      %19 = vector.shape_cast %18 : vector<1x1x128xf32> to vector<1x128xf32>
      %20 = vector.broadcast %19 : vector<1x128xf32> to vector<256x128xf32>
      %21 = arith.addf %17, %20 : vector<256x128xf32>
      %cst_17 = arith.constant 0.000000e+00 : f32
      %22 = vector.broadcast %cst_17 : f32 to vector<256x128xf32>
      %23 = arith.maximumf %21, %22 : vector<256x128xf32>
      %24 = arith.truncf %23 : vector<256x128xf32> to vector<256x128xbf16>
      %c0_18 = arith.constant 0 : index
      %c0_19 = arith.constant 0 : index
      %25 = vector.load %arg8[%c0_18, %c0_19] : memref<256x128xbf16, #tpu.memory_space<vmem>>, vector<256x128xbf16>
      tpu.vector_store %arg8[%c0_18, %c0_19], %24 {strides = array<i32>} : memref<256x128xbf16, #tpu.memory_space<vmem>>, vector<256x128xbf16>,
    } else {
    }
    return
  }
  func.func @transform_0(%arg0: i32, %arg1: i32, %arg2: i32, %arg3: i32) -> (i32, i32) {
    %c1_i32 = arith.constant 1 : i32
    %0 = arith.muli %arg1, %c1_i32 : i32
    %1 = arith.addi %0, %arg3 : i32
    %c0_i32 = arith.constant 0 : i32
    return %arg0, %1 : i32, i32
  }
  func.func @transform_1(%arg0: i32, %arg1: i32, %arg2: i32, %arg3: i32) -> (i32, i32, i32) {
    %c0_i32 = arith.constant 0 : i32
    return %arg1, %arg3, %arg2 : i32, i32, i32
  }
  func.func @transform_2(%arg0: i32, %arg1: i32, %arg2: i32, %arg3: i32) -> (i32, i32, i32) {
    %c0_i32 = arith.constant 0 : i32
    %c0_i32_0 = arith.constant 0 : i32
    return %arg1, %c0_i32, %arg2 : i32, i32, i32
  }
  func.func @transform_3(%arg0: i32, %arg1: i32, %arg2: i32, %arg3: i32) -> (i32, i32, i32) {
    %c0_i32 = arith.constant 0 : i32
    %c0_i32_0 = arith.constant 0 : i32
    return %arg1, %c0_i32, %arg2 : i32, i32, i32
  }
  func.func @transform_4(%arg0: i32, %arg1: i32, %arg2: i32, %arg3: i32) -> (i32, i32) {
    %c1_i32 = arith.constant 1 : i32
    %0 = arith.muli %arg1, %c1_i32 : i32
    %1 = arith.addi %0, %arg2 : i32
    %c0_i32 = arith.constant 0 : i32
    return %arg0, %1 : i32, i32
  }
}

module attributes {stable_mosaic.version = 11 : i64} {
  func.func @_matmul_kernel(%arg0: i32, %arg1: i32, %arg2: i32, %arg3: i32, %arg4: memref<256x128xbf16, #tpu.memory_space<vmem>>, %arg5: memref<1x128x128xbf16, #tpu.memory_space<vmem>>, %arg6: memref<1x1x128xf32, #tpu.memory_space<vmem>>, %arg7: memref<1x1x128xf32, #tpu.memory_space<vmem>>, %arg8: memref<256x128xbf16, #tpu.memory_space<vmem>>, %arg9: memref<256x128xf32, #tpu.memory_space<vmem>>) attributes {dimension_semantics = [#tpu.dimension_semantics<parallel>, #tpu.dimension_semantics<parallel>, #tpu.dimension_semantics<parallel>, #tpu.dimension_semantics<arbitrary>], iteration_bounds = array<i64: 2, 1, 1, 1>, scalar_prefetch = 0 : i64, scratch_operands = 1 : i64, tpu.core_type = #tpu.core_type<tc>, window_params = [{transform_indices = @transform_0, window_bounds = array<i64: 256, 128>}, {transform_indices = @transform_1, window_bounds = array<i64: 1, 128, 128>}, {transform_indices = @transform_2, window_bounds = array<i64: 1, 1, 128>}, {transform_indices = @transform_3, window_bounds = array<i64: 1, 1, 128>}, {transform_indices = @transform_4, window_bounds = array<i64: 256, 128>}]} {
    %c0 = arith.constant 0 : index
    %c0_0 = arith.constant 0 : index
    %0 = vector.load %arg4[%c0, %c0_0] : memref<256x128xbf16, #tpu.memory_space<vmem>>, vector<256x128xbf16>
    %c0_1 = arith.constant 0 : index
    %c0_2 = arith.constant 0 : index
    %c0_3 = arith.constant 0 : index
    %1 = vector.load %arg5[%c0_1, %c0_2, %c0_3] : memref<1x128x128xbf16, #tpu.memory_space<vmem>>, vector<1x128x128xbf16>
    %2 = vector.shape_cast %1 : vector<1x128x128xbf16> to vector<128x128xbf16>
    %cst = arith.constant dense<0.000000e+00> : vector<256x128xf32>
    %3 = tpu.matmul %0, %2, %cst {dimension_numbers = #tpu.dot_dimension_numbers<[1], [0], [0], [1], [0, 0, 1, 1], [], []>} : vector<256x128xbf16>, vector<128x128xbf16>, vector<256x128xf32> -> vector<256x128xf32>
    %c0_i32 = arith.constant 0 : i32
    %4 = arith.cmpi eq, %arg3, %c0_i32 : i32
    %5 = arith.extui %4 : i1 to i32
    %c0_i32_4 = arith.constant 0 : i32
    %6 = arith.cmpi ne, %5, %c0_i32_4 : i32
    scf.if %6 {
      %c0_9 = arith.constant 0 : index
      %c0_10 = arith.constant 0 : index
      %13 = vector.load %arg9[%c0_9, %c0_10] : memref<256x128xf32, #tpu.memory_space<vmem>>, vector<256x128xf32>
      tpu.vector_store %arg9[%c0_9, %c0_10], %3 {strides = array<i32>} : memref<256x128xf32, #tpu.memory_space<vmem>>, vector<256x128xf32>,
    } else {
    }
    %c0_i32_5 = arith.constant 0 : i32
    %7 = arith.cmpi sgt, %arg3, %c0_i32_5 : i32
    %8 = arith.extui %7 : i1 to i32
    %c0_i32_6 = arith.constant 0 : i32
    %9 = arith.cmpi ne, %8, %c0_i32_6 : i32
    scf.if %9 {
      %c0_9 = arith.constant 0 : index
      %c0_10 = arith.constant 0 : index
      %13 = vector.load %arg9[%c0_9, %c0_10] : memref<256x128xf32, #tpu.memory_space<vmem>>, vector<256x128xf32>
      %14 = arith.addf %13, %3 : vector<256x128xf32>
      %c0_11 = arith.constant 0 : index
      %c0_12 = arith.constant 0 : index
      %15 = vector.load %arg9[%c0_11, %c0_12] : memref<256x128xf32, #tpu.memory_space<vmem>>, vector<256x128xf32>
      tpu.vector_store %arg9[%c0_11, %c0_12], %14 {strides = array<i32>} : memref<256x128xf32, #tpu.memory_space<vmem>>, vector<256x128xf32>,
    } else {
    }
    %c0_i32_7 = arith.constant 0 : i32
    %10 = arith.cmpi eq, %arg3, %c0_i32_7 : i32
    %11 = arith.extui %10 : i1 to i32
    %c0_i32_8 = arith.constant 0 : i32
    %12 = arith.cmpi ne, %11, %c0_i32_8 : i32
    scf.if %12 {
      %c0_9 = arith.constant 0 : index
      %c0_10 = arith.constant 0 : index
      %13 = vector.load %arg9[%c0_9, %c0_10] : memref<256x128xf32, #tpu.memory_space<vmem>>, vector<256x128xf32>
      %c0_11 = arith.constant 0 : index
      %c0_12 = arith.constant 0 : index
      %c0_13 = arith.constant 0 : index
      %14 = vector.load %arg6[%c0_11, %c0_12, %c0_13] : memref<1x1x128xf32, #tpu.memory_space<vmem>>, vector<1x1x128xf32>
      %15 = vector.shape_cast %14 : vector<1x1x128xf32> to vector<1x128xf32>
      %16 = vector.broadcast %15 : vector<1x128xf32> to vector<256x128xf32>
      %17 = arith.mulf %13, %16 : vector<256x128xf32>
      %c0_14 = arith.constant 0 : index
      %c0_15 = arith.constant 0 : index
      %c0_16 = arith.constant 0 : index
      %18 = vector.load %arg7[%c0_14, %c0_15, %c0_16] : memref<1x1x128xf32, #tpu.memory_space<vmem>>, vector<1x1x128xf32>
      %19 = vector.shape_cast %18 : vector<1x1x128xf32> to vector<1x128xf32>
      %20 = vector.broadcast %19 : vector<1x128xf32> to vector<256x128xf32>
      %21 = arith.addf %17, %20 : vector<256x128xf32>
      %22 = arith.truncf %21 : vector<256x128xf32> to vector<256x128xbf16>
      %c0_17 = arith.constant 0 : index
      %c0_18 = arith.constant 0 : index
      %23 = vector.load %arg8[%c0_17, %c0_18] : memref<256x128xbf16, #tpu.memory_space<vmem>>, vector<256x128xbf16>
      tpu.vector_store %arg8[%c0_17, %c0_18], %22 {strides = array<i32>} : memref<256x128xbf16, #tpu.memory_space<vmem>>, vector<256x128xbf16>,
    } else {
    }
    return
  }
  func.func @transform_0(%arg0: i32, %arg1: i32, %arg2: i32, %arg3: i32) -> (i32, i32) {
    %c1_i32 = arith.constant 1 : i32
    %0 = arith.muli %arg1, %c1_i32 : i32
    %1 = arith.addi %0, %arg3 : i32
    %c0_i32 = arith.constant 0 : i32
    return %arg0, %1 : i32, i32
  }
  func.func @transform_1(%arg0: i32, %arg1: i32, %arg2: i32, %arg3: i32) -> (i32, i32, i32) {
    %c0_i32 = arith.constant 0 : i32
    return %arg1, %arg3, %arg2 : i32, i32, i32
  }
  func.func @transform_2(%arg0: i32, %arg1: i32, %arg2: i32, %arg3: i32) -> (i32, i32, i32) {
    %c0_i32 = arith.constant 0 : i32
    %c0_i32_0 = arith.constant 0 : i32
    return %arg1, %c0_i32, %arg2 : i32, i32, i32
  }
  func.func @transform_3(%arg0: i32, %arg1: i32, %arg2: i32, %arg3: i32) -> (i32, i32, i32) {
    %c0_i32 = arith.constant 0 : i32
    %c0_i32_0 = arith.constant 0 : i32
    return %arg1, %c0_i32, %arg2 : i32, i32, i32
  }
  func.func @transform_4(%arg0: i32, %arg1: i32, %arg2: i32, %arg3: i32) -> (i32, i32) {
    %c1_i32 = arith.constant 1 : i32
    %0 = arith.muli %arg1, %c1_i32 : i32
    %1 = arith.addi %0, %arg2 : i32
    %c0_i32 = arith.constant 0 : i32
    return %arg0, %1 : i32, i32
  }
}

module attributes {stable_mosaic.version = 11 : i64} {
  func.func @_se_gate_kernel(%arg0: i32, %arg1: i32, %arg2: memref<1x256x16xbf16, #tpu.memory_space<vmem>>, %arg3: memref<16x128xf32, #tpu.memory_space<vmem>>, %arg4: memref<1x128xf32, #tpu.memory_space<vmem>>, %arg5: memref<128x16xf32, #tpu.memory_space<vmem>>, %arg6: memref<1x16xf32, #tpu.memory_space<vmem>>, %arg7: memref<1x1x16xf32, #tpu.memory_space<vmem>>, %arg8: memref<1x16xf32, #tpu.memory_space<vmem>>) attributes {dimension_semantics = [#tpu.dimension_semantics<parallel>, #tpu.dimension_semantics<arbitrary>], iteration_bounds = array<i64: 2, 1>, scalar_prefetch = 0 : i64, scratch_operands = 1 : i64, tpu.core_type = #tpu.core_type<tc>, window_params = [{transform_indices = @transform_0, window_bounds = array<i64: 1, 256, 16>}, {pipeline_mode = #tpu.pipeline_mode<synchronous>, transform_indices = @transform_1, window_bounds = array<i64: 16, 128>}, {pipeline_mode = #tpu.pipeline_mode<synchronous>, transform_indices = @transform_2, window_bounds = array<i64: 1, 128>}, {pipeline_mode = #tpu.pipeline_mode<synchronous>, transform_indices = @transform_3, window_bounds = array<i64: 128, 16>}, {pipeline_mode = #tpu.pipeline_mode<synchronous>, transform_indices = @transform_4, window_bounds = array<i64: 1, 16>}, {transform_indices = @transform_5, window_bounds = array<i64: 1, 1, 16>}]} {
    %c0 = arith.constant 0 : index
    %c0_0 = arith.constant 0 : index
    %c0_1 = arith.constant 0 : index
    %0 = vector.load %arg2[%c0, %c0_0, %c0_1] : memref<1x256x16xbf16, #tpu.memory_space<vmem>>, vector<1x256x16xbf16>
    %1 = vector.shape_cast %0 : vector<1x256x16xbf16> to vector<256x16xbf16>
    %2 = arith.extf %1 : vector<256x16xbf16> to vector<256x16xf32>
    %cst = arith.constant dense<0.000000e+00> : vector<16xf32>
    %3 = vector.multi_reduction <add>, %2, %cst [0] : vector<256x16xf32> to vector<16xf32>
    %4 = vector.shape_cast %3 : vector<16xf32> to vector<1x16xf32>
    %c0_i32 = arith.constant 0 : i32
    %5 = arith.cmpi eq, %arg1, %c0_i32 : i32
    %6 = arith.extui %5 : i1 to i32
    %c0_i32_2 = arith.constant 0 : i32
    %7 = arith.cmpi ne, %6, %c0_i32_2 : i32
    scf.if %7 {
      %c0_7 = arith.constant 0 : index
      %c0_8 = arith.constant 0 : index
      %14 = vector.load %arg8[%c0_7, %c0_8] : memref<1x16xf32, #tpu.memory_space<vmem>>, vector<1x16xf32>
      tpu.vector_store %arg8[%c0_7, %c0_8], %4 {strides = array<i32>} : memref<1x16xf32, #tpu.memory_space<vmem>>, vector<1x16xf32>,
    } else {
    }
    %c0_i32_3 = arith.constant 0 : i32
    %8 = arith.cmpi sgt, %arg1, %c0_i32_3 : i32
    %9 = arith.extui %8 : i1 to i32
    %c0_i32_4 = arith.constant 0 : i32
    %10 = arith.cmpi ne, %9, %c0_i32_4 : i32
    scf.if %10 {
      %c0_7 = arith.constant 0 : index
      %c0_8 = arith.constant 0 : index
      %14 = vector.load %arg8[%c0_7, %c0_8] : memref<1x16xf32, #tpu.memory_space<vmem>>, vector<1x16xf32>
      %15 = arith.addf %14, %4 : vector<1x16xf32>
      %c0_9 = arith.constant 0 : index
      %c0_10 = arith.constant 0 : index
      %16 = vector.load %arg8[%c0_9, %c0_10] : memref<1x16xf32, #tpu.memory_space<vmem>>, vector<1x16xf32>
      tpu.vector_store %arg8[%c0_9, %c0_10], %15 {strides = array<i32>} : memref<1x16xf32, #tpu.memory_space<vmem>>, vector<1x16xf32>,
    } else {
    }
    %c0_i32_5 = arith.constant 0 : i32
    %11 = arith.cmpi eq, %arg1, %c0_i32_5 : i32
    %12 = arith.extui %11 : i1 to i32
    %c0_i32_6 = arith.constant 0 : i32
    %13 = arith.cmpi ne, %12, %c0_i32_6 : i32
    scf.if %13 {
      %c0_7 = arith.constant 0 : index
      %c0_8 = arith.constant 0 : index
      %14 = vector.load %arg8[%c0_7, %c0_8] : memref<1x16xf32, #tpu.memory_space<vmem>>, vector<1x16xf32>
      %cst_9 = arith.constant 3.906250e-03 : f32
      %15 = vector.broadcast %cst_9 : f32 to vector<1x16xf32>
      %16 = arith.mulf %14, %15 : vector<1x16xf32>
      %17 = vector.shape_cast %16 : vector<1x16xf32> to vector<1x16xf32>
      %18 = vector.broadcast %17 : vector<1x16xf32> to vector<8x16xf32>
      %c0_10 = arith.constant 0 : index
      %c0_11 = arith.constant 0 : index
      %19 = vector.load %arg3[%c0_10, %c0_11] : memref<16x128xf32, #tpu.memory_space<vmem>>, vector<16x128xf32>
      %cst_12 = arith.constant dense<0.000000e+00> : vector<8x128xf32>
      %20 = tpu.matmul %18, %19, %cst_12 {dimension_numbers = #tpu.dot_dimension_numbers<[1], [0], [0], [1], [0, 0, 1, 1], [], []>} : vector<8x16xf32>, vector<16x128xf32>, vector<8x128xf32> -> vector<8x128xf32>
      %c0_13 = arith.constant 0 : index
      %c0_14 = arith.constant 0 : index
      %21 = vector.load %arg4[%c0_13, %c0_14] : memref<1x128xf32, #tpu.memory_space<vmem>>, vector<1x128xf32>
      %22 = vector.broadcast %21 : vector<1x128xf32> to vector<8x128xf32>
      %23 = arith.addf %20, %22 : vector<8x128xf32>
      %cst_15 = arith.constant 0.000000e+00 : f32
      %24 = vector.broadcast %cst_15 : f32 to vector<8x128xf32>
      %25 = arith.maximumf %23, %24 : vector<8x128xf32>
      %c0_16 = arith.constant 0 : index
      %c0_17 = arith.constant 0 : index
      %26 = vector.load %arg5[%c0_16, %c0_17] : memref<128x16xf32, #tpu.memory_space<vmem>>, vector<128x16xf32>
      %cst_18 = arith.constant dense<0.000000e+00> : vector<8x16xf32>
      %27 = tpu.matmul %25, %26, %cst_18 {dimension_numbers = #tpu.dot_dimension_numbers<[1], [0], [0], [1], [0, 0, 1, 1], [], []>} : vector<8x128xf32>, vector<128x16xf32>, vector<8x16xf32> -> vector<8x16xf32>
      %c0_19 = arith.constant 0 : index
      %c0_20 = arith.constant 0 : index
      %28 = vector.load %arg6[%c0_19, %c0_20] : memref<1x16xf32, #tpu.memory_space<vmem>>, vector<1x16xf32>
      %29 = vector.broadcast %28 : vector<1x16xf32> to vector<8x16xf32>
      %30 = arith.addf %27, %29 : vector<8x16xf32>
      %31 = arith.negf %30 : vector<8x16xf32>
      %32 = math.exp %31 : vector<8x16xf32>
      %cst_21 = arith.constant 1.000000e+00 : f32
      %33 = vector.broadcast %cst_21 : f32 to vector<8x16xf32>
      %34 = arith.addf %33, %32 : vector<8x16xf32>
      %35 = arith.divf %33, %34 : vector<8x16xf32>
      %36 = vector.extract_strided_slice %35 {offsets = [0, 0], sizes = [1, 16], strides = [1, 1]} : vector<8x16xf32> to vector<1x16xf32>
      %c0_22 = arith.constant 0 : index
      %c0_23 = arith.constant 0 : index
      %c0_24 = arith.constant 0 : index
      %37 = vector.load %arg7[%c0_22, %c0_23, %c0_24] : memref<1x1x16xf32, #tpu.memory_space<vmem>>, vector<1x1x16xf32>
      %38 = vector.shape_cast %37 : vector<1x1x16xf32> to vector<1x16xf32>
      %39 = vector.shape_cast %36 : vector<1x16xf32> to vector<1x1x16xf32>
      tpu.vector_store %arg7[%c0_22, %c0_23, %c0_24], %39 {strides = array<i32>} : memref<1x1x16xf32, #tpu.memory_space<vmem>>, vector<1x1x16xf32>,
    } else {
    }
    return
  }
  func.func @transform_0(%arg0: i32, %arg1: i32) -> (i32, i32, i32) {
    %c0_i32 = arith.constant 0 : i32
    %c0_i32_0 = arith.constant 0 : i32
    return %arg0, %arg1, %c0_i32 : i32, i32, i32
  }
  func.func @transform_1(%arg0: i32, %arg1: i32) -> (i32, i32) {
    %c0_i32 = arith.constant 0 : i32
    %c0_i32_0 = arith.constant 0 : i32
    %c0_i32_1 = arith.constant 0 : i32
    return %c0_i32, %c0_i32_0 : i32, i32
  }
  func.func @transform_2(%arg0: i32, %arg1: i32) -> (i32, i32) {
    %c0_i32 = arith.constant 0 : i32
    %c0_i32_0 = arith.constant 0 : i32
    %c0_i32_1 = arith.constant 0 : i32
    return %c0_i32, %c0_i32_0 : i32, i32
  }
  func.func @transform_3(%arg0: i32, %arg1: i32) -> (i32, i32) {
    %c0_i32 = arith.constant 0 : i32
    %c0_i32_0 = arith.constant 0 : i32
    %c0_i32_1 = arith.constant 0 : i32
    return %c0_i32, %c0_i32_0 : i32, i32
  }
  func.func @transform_4(%arg0: i32, %arg1: i32) -> (i32, i32) {
    %c0_i32 = arith.constant 0 : i32
    %c0_i32_0 = arith.constant 0 : i32
    %c0_i32_1 = arith.constant 0 : i32
    return %c0_i32, %c0_i32_0 : i32, i32
  }
  func.func @transform_5(%arg0: i32, %arg1: i32) -> (i32, i32, i32) {
    %c0_i32 = arith.constant 0 : i32
    %c0_i32_0 = arith.constant 0 : i32
    %c0_i32_1 = arith.constant 0 : i32
    return %arg0, %c0_i32, %c0_i32_0 : i32, i32, i32
  }
}

module attributes {stable_mosaic.version = 11 : i64} {
  func.func @_se_residual_relu_kernel(%arg0: i32, %arg1: i32, %arg2: memref<1x256x16xbf16, #tpu.memory_space<vmem>>, %arg3: memref<1x1x16xf32, #tpu.memory_space<vmem>>, %arg4: memref<1x256x16xbf16, #tpu.memory_space<vmem>>, %arg5: memref<1x256x16xbf16, #tpu.memory_space<vmem>>) attributes {dimension_semantics = [#tpu.dimension_semantics<parallel>, #tpu.dimension_semantics<parallel>], iteration_bounds = array<i64: 2, 1>, scalar_prefetch = 0 : i64, scratch_operands = 0 : i64, tpu.core_type = #tpu.core_type<tc>, window_params = [{transform_indices = @transform_0, window_bounds = array<i64: 1, 256, 16>}, {transform_indices = @transform_1, window_bounds = array<i64: 1, 1, 16>}, {transform_indices = @transform_2, window_bounds = array<i64: 1, 256, 16>}, {transform_indices = @transform_3, window_bounds = array<i64: 1, 256, 16>}]} {
    %c0 = arith.constant 0 : index
    %c0_0 = arith.constant 0 : index
    %c0_1 = arith.constant 0 : index
    %0 = vector.load %arg2[%c0, %c0_0, %c0_1] : memref<1x256x16xbf16, #tpu.memory_space<vmem>>, vector<1x256x16xbf16>
    %1 = arith.extf %0 : vector<1x256x16xbf16> to vector<1x256x16xf32>
    %c0_2 = arith.constant 0 : index
    %c0_3 = arith.constant 0 : index
    %c0_4 = arith.constant 0 : index
    %2 = vector.load %arg3[%c0_2, %c0_3, %c0_4] : memref<1x1x16xf32, #tpu.memory_space<vmem>>, vector<1x1x16xf32>
    %3 = vector.broadcast %2 : vector<1x1x16xf32> to vector<1x256x16xf32>
    %4 = arith.mulf %1, %3 : vector<1x256x16xf32>
    %c0_5 = arith.constant 0 : index
    %c0_6 = arith.constant 0 : index
    %c0_7 = arith.constant 0 : index
    %5 = vector.load %arg4[%c0_5, %c0_6, %c0_7] : memref<1x256x16xbf16, #tpu.memory_space<vmem>>, vector<1x256x16xbf16>
    %6 = arith.extf %5 : vector<1x256x16xbf16> to vector<1x256x16xf32>
    %7 = arith.addf %4, %6 : vector<1x256x16xf32>
    %cst = arith.constant 0.000000e+00 : f32
    %8 = vector.broadcast %cst : f32 to vector<1x256x16xf32>
    %9 = arith.maximumf %7, %8 : vector<1x256x16xf32>
    %10 = arith.truncf %9 : vector<1x256x16xf32> to vector<1x256x16xbf16>
    %c0_8 = arith.constant 0 : index
    %c0_9 = arith.constant 0 : index
    %c0_10 = arith.constant 0 : index
    %11 = vector.load %arg5[%c0_8, %c0_9, %c0_10] : memref<1x256x16xbf16, #tpu.memory_space<vmem>>, vector<1x256x16xbf16>
    tpu.vector_store %arg5[%c0_8, %c0_9, %c0_10], %10 {strides = array<i32>} : memref<1x256x16xbf16, #tpu.memory_space<vmem>>, vector<1x256x16xbf16>,
    return
  }
  func.func @transform_0(%arg0: i32, %arg1: i32) -> (i32, i32, i32) {
    %c0_i32 = arith.constant 0 : i32
    %c0_i32_0 = arith.constant 0 : i32
    return %arg0, %arg1, %c0_i32 : i32, i32, i32
  }
  func.func @transform_1(%arg0: i32, %arg1: i32) -> (i32, i32, i32) {
    %c0_i32 = arith.constant 0 : i32
    %c0_i32_0 = arith.constant 0 : i32
    %c0_i32_1 = arith.constant 0 : i32
    return %arg0, %c0_i32, %c0_i32_0 : i32, i32, i32
  }
  func.func @transform_2(%arg0: i32, %arg1: i32) -> (i32, i32, i32) {
    %c0_i32 = arith.constant 0 : i32
    %c0_i32_0 = arith.constant 0 : i32
    return %arg0, %arg1, %c0_i32 : i32, i32, i32
  }
  func.func @transform_3(%arg0: i32, %arg1: i32) -> (i32, i32, i32) {
    %c0_i32 = arith.constant 0 : i32
    %c0_i32_0 = arith.constant 0 : i32
    return %arg0, %arg1, %c0_i32 : i32, i32, i32
  }
}

module attributes {stable_mosaic.version = 11 : i64} {
  func.func @_matmul_kernel(%arg0: i32, %arg1: i32, %arg2: i32, %arg3: i32, %arg4: memref<128x256xbf16, #tpu.memory_space<vmem>>, %arg5: memref<1x256x128xbf16, #tpu.memory_space<vmem>>, %arg6: memref<1x1x128xf32, #tpu.memory_space<vmem>>, %arg7: memref<1x1x128xf32, #tpu.memory_space<vmem>>, %arg8: memref<128x128xbf16, #tpu.memory_space<vmem>>, %arg9: memref<128x128xf32, #tpu.memory_space<vmem>>) attributes {dimension_semantics = [#tpu.dimension_semantics<parallel>, #tpu.dimension_semantics<parallel>, #tpu.dimension_semantics<parallel>, #tpu.dimension_semantics<arbitrary>], iteration_bounds = array<i64: 1, 1, 1, 1>, scalar_prefetch = 0 : i64, scratch_operands = 1 : i64, tpu.core_type = #tpu.core_type<tc>, window_params = [{transform_indices = @transform_0, window_bounds = array<i64: 128, 256>}, {transform_indices = @transform_1, window_bounds = array<i64: 1, 256, 128>}, {transform_indices = @transform_2, window_bounds = array<i64: 1, 1, 128>}, {transform_indices = @transform_3, window_bounds = array<i64: 1, 1, 128>}, {transform_indices = @transform_4, window_bounds = array<i64: 128, 128>}]} {
    %c0 = arith.constant 0 : index
    %c0_0 = arith.constant 0 : index
    %0 = vector.load %arg4[%c0, %c0_0] : memref<128x256xbf16, #tpu.memory_space<vmem>>, vector<128x256xbf16>
    %c0_1 = arith.constant 0 : index
    %c0_2 = arith.constant 0 : index
    %c0_3 = arith.constant 0 : index
    %1 = vector.load %arg5[%c0_1, %c0_2, %c0_3] : memref<1x256x128xbf16, #tpu.memory_space<vmem>>, vector<1x256x128xbf16>
    %2 = vector.shape_cast %1 : vector<1x256x128xbf16> to vector<256x128xbf16>
    %cst = arith.constant dense<0.000000e+00> : vector<128x128xf32>
    %3 = tpu.matmul %0, %2, %cst {dimension_numbers = #tpu.dot_dimension_numbers<[1], [0], [0], [1], [0, 0, 1, 1], [], []>} : vector<128x256xbf16>, vector<256x128xbf16>, vector<128x128xf32> -> vector<128x128xf32>
    %c0_i32 = arith.constant 0 : i32
    %4 = arith.cmpi eq, %arg3, %c0_i32 : i32
    %5 = arith.extui %4 : i1 to i32
    %c0_i32_4 = arith.constant 0 : i32
    %6 = arith.cmpi ne, %5, %c0_i32_4 : i32
    scf.if %6 {
      %c0_9 = arith.constant 0 : index
      %c0_10 = arith.constant 0 : index
      %13 = vector.load %arg9[%c0_9, %c0_10] : memref<128x128xf32, #tpu.memory_space<vmem>>, vector<128x128xf32>
      tpu.vector_store %arg9[%c0_9, %c0_10], %3 {strides = array<i32>} : memref<128x128xf32, #tpu.memory_space<vmem>>, vector<128x128xf32>,
    } else {
    }
    %c0_i32_5 = arith.constant 0 : i32
    %7 = arith.cmpi sgt, %arg3, %c0_i32_5 : i32
    %8 = arith.extui %7 : i1 to i32
    %c0_i32_6 = arith.constant 0 : i32
    %9 = arith.cmpi ne, %8, %c0_i32_6 : i32
    scf.if %9 {
      %c0_9 = arith.constant 0 : index
      %c0_10 = arith.constant 0 : index
      %13 = vector.load %arg9[%c0_9, %c0_10] : memref<128x128xf32, #tpu.memory_space<vmem>>, vector<128x128xf32>
      %14 = arith.addf %13, %3 : vector<128x128xf32>
      %c0_11 = arith.constant 0 : index
      %c0_12 = arith.constant 0 : index
      %15 = vector.load %arg9[%c0_11, %c0_12] : memref<128x128xf32, #tpu.memory_space<vmem>>, vector<128x128xf32>
      tpu.vector_store %arg9[%c0_11, %c0_12], %14 {strides = array<i32>} : memref<128x128xf32, #tpu.memory_space<vmem>>, vector<128x128xf32>,
    } else {
    }
    %c0_i32_7 = arith.constant 0 : i32
    %10 = arith.cmpi eq, %arg3, %c0_i32_7 : i32
    %11 = arith.extui %10 : i1 to i32
    %c0_i32_8 = arith.constant 0 : i32
    %12 = arith.cmpi ne, %11, %c0_i32_8 : i32
    scf.if %12 {
      %c0_9 = arith.constant 0 : index
      %c0_10 = arith.constant 0 : index
      %13 = vector.load %arg9[%c0_9, %c0_10] : memref<128x128xf32, #tpu.memory_space<vmem>>, vector<128x128xf32>
      %c0_11 = arith.constant 0 : index
      %c0_12 = arith.constant 0 : index
      %c0_13 = arith.constant 0 : index
      %14 = vector.load %arg6[%c0_11, %c0_12, %c0_13] : memref<1x1x128xf32, #tpu.memory_space<vmem>>, vector<1x1x128xf32>
      %15 = vector.shape_cast %14 : vector<1x1x128xf32> to vector<1x128xf32>
      %16 = vector.broadcast %15 : vector<1x128xf32> to vector<128x128xf32>
      %17 = arith.mulf %13, %16 : vector<128x128xf32>
      %c0_14 = arith.constant 0 : index
      %c0_15 = arith.constant 0 : index
      %c0_16 = arith.constant 0 : index
      %18 = vector.load %arg7[%c0_14, %c0_15, %c0_16] : memref<1x1x128xf32, #tpu.memory_space<vmem>>, vector<1x1x128xf32>
      %19 = vector.shape_cast %18 : vector<1x1x128xf32> to vector<1x128xf32>
      %20 = vector.broadcast %19 : vector<1x128xf32> to vector<128x128xf32>
      %21 = arith.addf %17, %20 : vector<128x128xf32>
      %cst_17 = arith.constant 0.000000e+00 : f32
      %22 = vector.broadcast %cst_17 : f32 to vector<128x128xf32>
      %23 = arith.maximumf %21, %22 : vector<128x128xf32>
      %24 = arith.truncf %23 : vector<128x128xf32> to vector<128x128xbf16>
      %c0_18 = arith.constant 0 : index
      %c0_19 = arith.constant 0 : index
      %25 = vector.load %arg8[%c0_18, %c0_19] : memref<128x128xbf16, #tpu.memory_space<vmem>>, vector<128x128xbf16>
      tpu.vector_store %arg8[%c0_18, %c0_19], %24 {strides = array<i32>} : memref<128x128xbf16, #tpu.memory_space<vmem>>, vector<128x128xbf16>,
    } else {
    }
    return
  }
  func.func @transform_0(%arg0: i32, %arg1: i32, %arg2: i32, %arg3: i32) -> (i32, i32) {
    %c1_i32 = arith.constant 1 : i32
    %0 = arith.muli %arg1, %c1_i32 : i32
    %1 = arith.addi %0, %arg3 : i32
    %c0_i32 = arith.constant 0 : i32
    return %arg0, %1 : i32, i32
  }
  func.func @transform_1(%arg0: i32, %arg1: i32, %arg2: i32, %arg3: i32) -> (i32, i32, i32) {
    %c0_i32 = arith.constant 0 : i32
    return %arg1, %arg3, %arg2 : i32, i32, i32
  }
  func.func @transform_2(%arg0: i32, %arg1: i32, %arg2: i32, %arg3: i32) -> (i32, i32, i32) {
    %c0_i32 = arith.constant 0 : i32
    %c0_i32_0 = arith.constant 0 : i32
    return %arg1, %c0_i32, %arg2 : i32, i32, i32
  }
  func.func @transform_3(%arg0: i32, %arg1: i32, %arg2: i32, %arg3: i32) -> (i32, i32, i32) {
    %c0_i32 = arith.constant 0 : i32
    %c0_i32_0 = arith.constant 0 : i32
    return %arg1, %c0_i32, %arg2 : i32, i32, i32
  }
  func.func @transform_4(%arg0: i32, %arg1: i32, %arg2: i32, %arg3: i32) -> (i32, i32) {
    %c1_i32 = arith.constant 1 : i32
    %0 = arith.muli %arg1, %c1_i32 : i32
    %1 = arith.addi %0, %arg2 : i32
    %c0_i32 = arith.constant 0 : i32
    return %arg0, %1 : i32, i32
  }
}

module attributes {stable_mosaic.version = 11 : i64} {
  func.func @_matmul_kernel(%arg0: i32, %arg1: i32, %arg2: i32, %arg3: i32, %arg4: memref<128x128xbf16, #tpu.memory_space<vmem>>, %arg5: memref<1x128x128xbf16, #tpu.memory_space<vmem>>, %arg6: memref<1x1x128xf32, #tpu.memory_space<vmem>>, %arg7: memref<1x1x128xf32, #tpu.memory_space<vmem>>, %arg8: memref<128x128xbf16, #tpu.memory_space<vmem>>, %arg9: memref<128x128xf32, #tpu.memory_space<vmem>>) attributes {dimension_semantics = [#tpu.dimension_semantics<parallel>, #tpu.dimension_semantics<parallel>, #tpu.dimension_semantics<parallel>, #tpu.dimension_semantics<arbitrary>], iteration_bounds = array<i64: 1, 1, 1, 1>, scalar_prefetch = 0 : i64, scratch_operands = 1 : i64, tpu.core_type = #tpu.core_type<tc>, window_params = [{transform_indices = @transform_0, window_bounds = array<i64: 128, 128>}, {transform_indices = @transform_1, window_bounds = array<i64: 1, 128, 128>}, {transform_indices = @transform_2, window_bounds = array<i64: 1, 1, 128>}, {transform_indices = @transform_3, window_bounds = array<i64: 1, 1, 128>}, {transform_indices = @transform_4, window_bounds = array<i64: 128, 128>}]} {
    %c0 = arith.constant 0 : index
    %c0_0 = arith.constant 0 : index
    %0 = vector.load %arg4[%c0, %c0_0] : memref<128x128xbf16, #tpu.memory_space<vmem>>, vector<128x128xbf16>
    %c0_1 = arith.constant 0 : index
    %c0_2 = arith.constant 0 : index
    %c0_3 = arith.constant 0 : index
    %1 = vector.load %arg5[%c0_1, %c0_2, %c0_3] : memref<1x128x128xbf16, #tpu.memory_space<vmem>>, vector<1x128x128xbf16>
    %2 = vector.shape_cast %1 : vector<1x128x128xbf16> to vector<128x128xbf16>
    %cst = arith.constant dense<0.000000e+00> : vector<128x128xf32>
    %3 = tpu.matmul %0, %2, %cst {dimension_numbers = #tpu.dot_dimension_numbers<[1], [0], [0], [1], [0, 0, 1, 1], [], []>} : vector<128x128xbf16>, vector<128x128xbf16>, vector<128x128xf32> -> vector<128x128xf32>
    %c0_i32 = arith.constant 0 : i32
    %4 = arith.cmpi eq, %arg3, %c0_i32 : i32
    %5 = arith.extui %4 : i1 to i32
    %c0_i32_4 = arith.constant 0 : i32
    %6 = arith.cmpi ne, %5, %c0_i32_4 : i32
    scf.if %6 {
      %c0_9 = arith.constant 0 : index
      %c0_10 = arith.constant 0 : index
      %13 = vector.load %arg9[%c0_9, %c0_10] : memref<128x128xf32, #tpu.memory_space<vmem>>, vector<128x128xf32>
      tpu.vector_store %arg9[%c0_9, %c0_10], %3 {strides = array<i32>} : memref<128x128xf32, #tpu.memory_space<vmem>>, vector<128x128xf32>,
    } else {
    }
    %c0_i32_5 = arith.constant 0 : i32
    %7 = arith.cmpi sgt, %arg3, %c0_i32_5 : i32
    %8 = arith.extui %7 : i1 to i32
    %c0_i32_6 = arith.constant 0 : i32
    %9 = arith.cmpi ne, %8, %c0_i32_6 : i32
    scf.if %9 {
      %c0_9 = arith.constant 0 : index
      %c0_10 = arith.constant 0 : index
      %13 = vector.load %arg9[%c0_9, %c0_10] : memref<128x128xf32, #tpu.memory_space<vmem>>, vector<128x128xf32>
      %14 = arith.addf %13, %3 : vector<128x128xf32>
      %c0_11 = arith.constant 0 : index
      %c0_12 = arith.constant 0 : index
      %15 = vector.load %arg9[%c0_11, %c0_12] : memref<128x128xf32, #tpu.memory_space<vmem>>, vector<128x128xf32>
      tpu.vector_store %arg9[%c0_11, %c0_12], %14 {strides = array<i32>} : memref<128x128xf32, #tpu.memory_space<vmem>>, vector<128x128xf32>,
    } else {
    }
    %c0_i32_7 = arith.constant 0 : i32
    %10 = arith.cmpi eq, %arg3, %c0_i32_7 : i32
    %11 = arith.extui %10 : i1 to i32
    %c0_i32_8 = arith.constant 0 : i32
    %12 = arith.cmpi ne, %11, %c0_i32_8 : i32
    scf.if %12 {
      %c0_9 = arith.constant 0 : index
      %c0_10 = arith.constant 0 : index
      %13 = vector.load %arg9[%c0_9, %c0_10] : memref<128x128xf32, #tpu.memory_space<vmem>>, vector<128x128xf32>
      %c0_11 = arith.constant 0 : index
      %c0_12 = arith.constant 0 : index
      %c0_13 = arith.constant 0 : index
      %14 = vector.load %arg6[%c0_11, %c0_12, %c0_13] : memref<1x1x128xf32, #tpu.memory_space<vmem>>, vector<1x1x128xf32>
      %15 = vector.shape_cast %14 : vector<1x1x128xf32> to vector<1x128xf32>
      %16 = vector.broadcast %15 : vector<1x128xf32> to vector<128x128xf32>
      %17 = arith.mulf %13, %16 : vector<128x128xf32>
      %c0_14 = arith.constant 0 : index
      %c0_15 = arith.constant 0 : index
      %c0_16 = arith.constant 0 : index
      %18 = vector.load %arg7[%c0_14, %c0_15, %c0_16] : memref<1x1x128xf32, #tpu.memory_space<vmem>>, vector<1x1x128xf32>
      %19 = vector.shape_cast %18 : vector<1x1x128xf32> to vector<1x128xf32>
      %20 = vector.broadcast %19 : vector<1x128xf32> to vector<128x128xf32>
      %21 = arith.addf %17, %20 : vector<128x128xf32>
      %22 = arith.truncf %21 : vector<128x128xf32> to vector<128x128xbf16>
      %c0_17 = arith.constant 0 : index
      %c0_18 = arith.constant 0 : index
      %23 = vector.load %arg8[%c0_17, %c0_18] : memref<128x128xbf16, #tpu.memory_space<vmem>>, vector<128x128xbf16>
      tpu.vector_store %arg8[%c0_17, %c0_18], %22 {strides = array<i32>} : memref<128x128xbf16, #tpu.memory_space<vmem>>, vector<128x128xbf16>,
    } else {
    }
    return
  }
  func.func @transform_0(%arg0: i32, %arg1: i32, %arg2: i32, %arg3: i32) -> (i32, i32) {
    %c1_i32 = arith.constant 1 : i32
    %0 = arith.muli %arg1, %c1_i32 : i32
    %1 = arith.addi %0, %arg3 : i32
    %c0_i32 = arith.constant 0 : i32
    return %arg0, %1 : i32, i32
  }
  func.func @transform_1(%arg0: i32, %arg1: i32, %arg2: i32, %arg3: i32) -> (i32, i32, i32) {
    %c0_i32 = arith.constant 0 : i32
    return %arg1, %arg3, %arg2 : i32, i32, i32
  }
  func.func @transform_2(%arg0: i32, %arg1: i32, %arg2: i32, %arg3: i32) -> (i32, i32, i32) {
    %c0_i32 = arith.constant 0 : i32
    %c0_i32_0 = arith.constant 0 : i32
    return %arg1, %c0_i32, %arg2 : i32, i32, i32
  }
  func.func @transform_3(%arg0: i32, %arg1: i32, %arg2: i32, %arg3: i32) -> (i32, i32, i32) {
    %c0_i32 = arith.constant 0 : i32
    %c0_i32_0 = arith.constant 0 : i32
    return %arg1, %c0_i32, %arg2 : i32, i32, i32
  }
  func.func @transform_4(%arg0: i32, %arg1: i32, %arg2: i32, %arg3: i32) -> (i32, i32) {
    %c1_i32 = arith.constant 1 : i32
    %0 = arith.muli %arg1, %c1_i32 : i32
    %1 = arith.addi %0, %arg2 : i32
    %c0_i32 = arith.constant 0 : i32
    return %arg0, %1 : i32, i32
  }
}

module attributes {stable_mosaic.version = 11 : i64} {
  func.func @_se_gate_kernel(%arg0: i32, %arg1: i32, %arg2: memref<1x64x32xbf16, #tpu.memory_space<vmem>>, %arg3: memref<32x128xf32, #tpu.memory_space<vmem>>, %arg4: memref<1x128xf32, #tpu.memory_space<vmem>>, %arg5: memref<128x32xf32, #tpu.memory_space<vmem>>, %arg6: memref<1x32xf32, #tpu.memory_space<vmem>>, %arg7: memref<1x1x32xf32, #tpu.memory_space<vmem>>, %arg8: memref<1x32xf32, #tpu.memory_space<vmem>>) attributes {dimension_semantics = [#tpu.dimension_semantics<parallel>, #tpu.dimension_semantics<arbitrary>], iteration_bounds = array<i64: 2, 1>, scalar_prefetch = 0 : i64, scratch_operands = 1 : i64, tpu.core_type = #tpu.core_type<tc>, window_params = [{transform_indices = @transform_0, window_bounds = array<i64: 1, 64, 32>}, {pipeline_mode = #tpu.pipeline_mode<synchronous>, transform_indices = @transform_1, window_bounds = array<i64: 32, 128>}, {pipeline_mode = #tpu.pipeline_mode<synchronous>, transform_indices = @transform_2, window_bounds = array<i64: 1, 128>}, {pipeline_mode = #tpu.pipeline_mode<synchronous>, transform_indices = @transform_3, window_bounds = array<i64: 128, 32>}, {pipeline_mode = #tpu.pipeline_mode<synchronous>, transform_indices = @transform_4, window_bounds = array<i64: 1, 32>}, {transform_indices = @transform_5, window_bounds = array<i64: 1, 1, 32>}]} {
    %c0 = arith.constant 0 : index
    %c0_0 = arith.constant 0 : index
    %c0_1 = arith.constant 0 : index
    %0 = vector.load %arg2[%c0, %c0_0, %c0_1] : memref<1x64x32xbf16, #tpu.memory_space<vmem>>, vector<1x64x32xbf16>
    %1 = vector.shape_cast %0 : vector<1x64x32xbf16> to vector<64x32xbf16>
    %2 = arith.extf %1 : vector<64x32xbf16> to vector<64x32xf32>
    %cst = arith.constant dense<0.000000e+00> : vector<32xf32>
    %3 = vector.multi_reduction <add>, %2, %cst [0] : vector<64x32xf32> to vector<32xf32>
    %4 = vector.shape_cast %3 : vector<32xf32> to vector<1x32xf32>
    %c0_i32 = arith.constant 0 : i32
    %5 = arith.cmpi eq, %arg1, %c0_i32 : i32
    %6 = arith.extui %5 : i1 to i32
    %c0_i32_2 = arith.constant 0 : i32
    %7 = arith.cmpi ne, %6, %c0_i32_2 : i32
    scf.if %7 {
      %c0_7 = arith.constant 0 : index
      %c0_8 = arith.constant 0 : index
      %14 = vector.load %arg8[%c0_7, %c0_8] : memref<1x32xf32, #tpu.memory_space<vmem>>, vector<1x32xf32>
      tpu.vector_store %arg8[%c0_7, %c0_8], %4 {strides = array<i32>} : memref<1x32xf32, #tpu.memory_space<vmem>>, vector<1x32xf32>,
    } else {
    }
    %c0_i32_3 = arith.constant 0 : i32
    %8 = arith.cmpi sgt, %arg1, %c0_i32_3 : i32
    %9 = arith.extui %8 : i1 to i32
    %c0_i32_4 = arith.constant 0 : i32
    %10 = arith.cmpi ne, %9, %c0_i32_4 : i32
    scf.if %10 {
      %c0_7 = arith.constant 0 : index
      %c0_8 = arith.constant 0 : index
      %14 = vector.load %arg8[%c0_7, %c0_8] : memref<1x32xf32, #tpu.memory_space<vmem>>, vector<1x32xf32>
      %15 = arith.addf %14, %4 : vector<1x32xf32>
      %c0_9 = arith.constant 0 : index
      %c0_10 = arith.constant 0 : index
      %16 = vector.load %arg8[%c0_9, %c0_10] : memref<1x32xf32, #tpu.memory_space<vmem>>, vector<1x32xf32>
      tpu.vector_store %arg8[%c0_9, %c0_10], %15 {strides = array<i32>} : memref<1x32xf32, #tpu.memory_space<vmem>>, vector<1x32xf32>,
    } else {
    }
    %c0_i32_5 = arith.constant 0 : i32
    %11 = arith.cmpi eq, %arg1, %c0_i32_5 : i32
    %12 = arith.extui %11 : i1 to i32
    %c0_i32_6 = arith.constant 0 : i32
    %13 = arith.cmpi ne, %12, %c0_i32_6 : i32
    scf.if %13 {
      %c0_7 = arith.constant 0 : index
      %c0_8 = arith.constant 0 : index
      %14 = vector.load %arg8[%c0_7, %c0_8] : memref<1x32xf32, #tpu.memory_space<vmem>>, vector<1x32xf32>
      %cst_9 = arith.constant 1.562500e-02 : f32
      %15 = vector.broadcast %cst_9 : f32 to vector<1x32xf32>
      %16 = arith.mulf %14, %15 : vector<1x32xf32>
      %17 = vector.shape_cast %16 : vector<1x32xf32> to vector<1x32xf32>
      %18 = vector.broadcast %17 : vector<1x32xf32> to vector<8x32xf32>
      %c0_10 = arith.constant 0 : index
      %c0_11 = arith.constant 0 : index
      %19 = vector.load %arg3[%c0_10, %c0_11] : memref<32x128xf32, #tpu.memory_space<vmem>>, vector<32x128xf32>
      %cst_12 = arith.constant dense<0.000000e+00> : vector<8x128xf32>
      %20 = tpu.matmul %18, %19, %cst_12 {dimension_numbers = #tpu.dot_dimension_numbers<[1], [0], [0], [1], [0, 0, 1, 1], [], []>} : vector<8x32xf32>, vector<32x128xf32>, vector<8x128xf32> -> vector<8x128xf32>
      %c0_13 = arith.constant 0 : index
      %c0_14 = arith.constant 0 : index
      %21 = vector.load %arg4[%c0_13, %c0_14] : memref<1x128xf32, #tpu.memory_space<vmem>>, vector<1x128xf32>
      %22 = vector.broadcast %21 : vector<1x128xf32> to vector<8x128xf32>
      %23 = arith.addf %20, %22 : vector<8x128xf32>
      %cst_15 = arith.constant 0.000000e+00 : f32
      %24 = vector.broadcast %cst_15 : f32 to vector<8x128xf32>
      %25 = arith.maximumf %23, %24 : vector<8x128xf32>
      %c0_16 = arith.constant 0 : index
      %c0_17 = arith.constant 0 : index
      %26 = vector.load %arg5[%c0_16, %c0_17] : memref<128x32xf32, #tpu.memory_space<vmem>>, vector<128x32xf32>
      %cst_18 = arith.constant dense<0.000000e+00> : vector<8x32xf32>
      %27 = tpu.matmul %25, %26, %cst_18 {dimension_numbers = #tpu.dot_dimension_numbers<[1], [0], [0], [1], [0, 0, 1, 1], [], []>} : vector<8x128xf32>, vector<128x32xf32>, vector<8x32xf32> -> vector<8x32xf32>
      %c0_19 = arith.constant 0 : index
      %c0_20 = arith.constant 0 : index
      %28 = vector.load %arg6[%c0_19, %c0_20] : memref<1x32xf32, #tpu.memory_space<vmem>>, vector<1x32xf32>
      %29 = vector.broadcast %28 : vector<1x32xf32> to vector<8x32xf32>
      %30 = arith.addf %27, %29 : vector<8x32xf32>
      %31 = arith.negf %30 : vector<8x32xf32>
      %32 = math.exp %31 : vector<8x32xf32>
      %cst_21 = arith.constant 1.000000e+00 : f32
      %33 = vector.broadcast %cst_21 : f32 to vector<8x32xf32>
      %34 = arith.addf %33, %32 : vector<8x32xf32>
      %35 = arith.divf %33, %34 : vector<8x32xf32>
      %36 = vector.extract_strided_slice %35 {offsets = [0, 0], sizes = [1, 32], strides = [1, 1]} : vector<8x32xf32> to vector<1x32xf32>
      %c0_22 = arith.constant 0 : index
      %c0_23 = arith.constant 0 : index
      %c0_24 = arith.constant 0 : index
      %37 = vector.load %arg7[%c0_22, %c0_23, %c0_24] : memref<1x1x32xf32, #tpu.memory_space<vmem>>, vector<1x1x32xf32>
      %38 = vector.shape_cast %37 : vector<1x1x32xf32> to vector<1x32xf32>
      %39 = vector.shape_cast %36 : vector<1x32xf32> to vector<1x1x32xf32>
      tpu.vector_store %arg7[%c0_22, %c0_23, %c0_24], %39 {strides = array<i32>} : memref<1x1x32xf32, #tpu.memory_space<vmem>>, vector<1x1x32xf32>,
    } else {
    }
    return
  }
  func.func @transform_0(%arg0: i32, %arg1: i32) -> (i32, i32, i32) {
    %c0_i32 = arith.constant 0 : i32
    %c0_i32_0 = arith.constant 0 : i32
    return %arg0, %arg1, %c0_i32 : i32, i32, i32
  }
  func.func @transform_1(%arg0: i32, %arg1: i32) -> (i32, i32) {
    %c0_i32 = arith.constant 0 : i32
    %c0_i32_0 = arith.constant 0 : i32
    %c0_i32_1 = arith.constant 0 : i32
    return %c0_i32, %c0_i32_0 : i32, i32
  }
  func.func @transform_2(%arg0: i32, %arg1: i32) -> (i32, i32) {
    %c0_i32 = arith.constant 0 : i32
    %c0_i32_0 = arith.constant 0 : i32
    %c0_i32_1 = arith.constant 0 : i32
    return %c0_i32, %c0_i32_0 : i32, i32
  }
  func.func @transform_3(%arg0: i32, %arg1: i32) -> (i32, i32) {
    %c0_i32 = arith.constant 0 : i32
    %c0_i32_0 = arith.constant 0 : i32
    %c0_i32_1 = arith.constant 0 : i32
    return %c0_i32, %c0_i32_0 : i32, i32
  }
  func.func @transform_4(%arg0: i32, %arg1: i32) -> (i32, i32) {
    %c0_i32 = arith.constant 0 : i32
    %c0_i32_0 = arith.constant 0 : i32
    %c0_i32_1 = arith.constant 0 : i32
    return %c0_i32, %c0_i32_0 : i32, i32
  }
  func.func @transform_5(%arg0: i32, %arg1: i32) -> (i32, i32, i32) {
    %c0_i32 = arith.constant 0 : i32
    %c0_i32_0 = arith.constant 0 : i32
    %c0_i32_1 = arith.constant 0 : i32
    return %arg0, %c0_i32, %c0_i32_0 : i32, i32, i32
  }
}

module attributes {stable_mosaic.version = 11 : i64} {
  func.func @_se_residual_relu_kernel(%arg0: i32, %arg1: i32, %arg2: memref<1x64x32xbf16, #tpu.memory_space<vmem>>, %arg3: memref<1x1x32xf32, #tpu.memory_space<vmem>>, %arg4: memref<1x64x32xbf16, #tpu.memory_space<vmem>>, %arg5: memref<1x64x32xbf16, #tpu.memory_space<vmem>>) attributes {dimension_semantics = [#tpu.dimension_semantics<parallel>, #tpu.dimension_semantics<parallel>], iteration_bounds = array<i64: 2, 1>, scalar_prefetch = 0 : i64, scratch_operands = 0 : i64, tpu.core_type = #tpu.core_type<tc>, window_params = [{transform_indices = @transform_0, window_bounds = array<i64: 1, 64, 32>}, {transform_indices = @transform_1, window_bounds = array<i64: 1, 1, 32>}, {transform_indices = @transform_2, window_bounds = array<i64: 1, 64, 32>}, {transform_indices = @transform_3, window_bounds = array<i64: 1, 64, 32>}]} {
    %c0 = arith.constant 0 : index
    %c0_0 = arith.constant 0 : index
    %c0_1 = arith.constant 0 : index
    %0 = vector.load %arg2[%c0, %c0_0, %c0_1] : memref<1x64x32xbf16, #tpu.memory_space<vmem>>, vector<1x64x32xbf16>
    %1 = arith.extf %0 : vector<1x64x32xbf16> to vector<1x64x32xf32>
    %c0_2 = arith.constant 0 : index
    %c0_3 = arith.constant 0 : index
    %c0_4 = arith.constant 0 : index
    %2 = vector.load %arg3[%c0_2, %c0_3, %c0_4] : memref<1x1x32xf32, #tpu.memory_space<vmem>>, vector<1x1x32xf32>
    %3 = vector.broadcast %2 : vector<1x1x32xf32> to vector<1x64x32xf32>
    %4 = arith.mulf %1, %3 : vector<1x64x32xf32>
    %c0_5 = arith.constant 0 : index
    %c0_6 = arith.constant 0 : index
    %c0_7 = arith.constant 0 : index
    %5 = vector.load %arg4[%c0_5, %c0_6, %c0_7] : memref<1x64x32xbf16, #tpu.memory_space<vmem>>, vector<1x64x32xbf16>
    %6 = arith.extf %5 : vector<1x64x32xbf16> to vector<1x64x32xf32>
    %7 = arith.addf %4, %6 : vector<1x64x32xf32>
    %cst = arith.constant 0.000000e+00 : f32
    %8 = vector.broadcast %cst : f32 to vector<1x64x32xf32>
    %9 = arith.maximumf %7, %8 : vector<1x64x32xf32>
    %10 = arith.truncf %9 : vector<1x64x32xf32> to vector<1x64x32xbf16>
    %c0_8 = arith.constant 0 : index
    %c0_9 = arith.constant 0 : index
    %c0_10 = arith.constant 0 : index
    %11 = vector.load %arg5[%c0_8, %c0_9, %c0_10] : memref<1x64x32xbf16, #tpu.memory_space<vmem>>, vector<1x64x32xbf16>
    tpu.vector_store %arg5[%c0_8, %c0_9, %c0_10], %10 {strides = array<i32>} : memref<1x64x32xbf16, #tpu.memory_space<vmem>>, vector<1x64x32xbf16>,
    return
  }
  func.func @transform_0(%arg0: i32, %arg1: i32) -> (i32, i32, i32) {
    %c0_i32 = arith.constant 0 : i32
    %c0_i32_0 = arith.constant 0 : i32
    return %arg0, %arg1, %c0_i32 : i32, i32, i32
  }
  func.func @transform_1(%arg0: i32, %arg1: i32) -> (i32, i32, i32) {
    %c0_i32 = arith.constant 0 : i32
    %c0_i32_0 = arith.constant 0 : i32
    %c0_i32_1 = arith.constant 0 : i32
    return %arg0, %c0_i32, %c0_i32_0 : i32, i32, i32
  }
  func.func @transform_2(%arg0: i32, %arg1: i32) -> (i32, i32, i32) {
    %c0_i32 = arith.constant 0 : i32
    %c0_i32_0 = arith.constant 0 : i32
    return %arg0, %arg1, %c0_i32 : i32, i32, i32
  }
  func.func @transform_3(%arg0: i32, %arg1: i32) -> (i32, i32, i32) {
    %c0_i32 = arith.constant 0 : i32
    %c0_i32_0 = arith.constant 0 : i32
    return %arg0, %arg1, %c0_i32 : i32, i32, i32
  }
}

module attributes {stable_mosaic.version = 11 : i64} {
  func.func @_avgpool_kernel(%arg0: i32, %arg1: memref<1x8x8x32xbf16, #tpu.memory_space<vmem>>, %arg2: memref<1x2x2x32xf32, #tpu.memory_space<vmem>>) attributes {dimension_semantics = [#tpu.dimension_semantics<parallel>], iteration_bounds = array<i64: 2>, scalar_prefetch = 0 : i64, scratch_operands = 0 : i64, tpu.core_type = #tpu.core_type<tc>, window_params = [{transform_indices = @transform_0, window_bounds = array<i64: 1, 8, 8, 32>}, {transform_indices = @transform_1, window_bounds = array<i64: 1, 2, 2, 32>}]} {
    %c0 = arith.constant 0 : index
    %c0_0 = arith.constant 0 : index
    %c0_1 = arith.constant 0 : index
    %c0_2 = arith.constant 0 : index
    %0 = vector.load %arg1[%c0, %c0_0, %c0_1, %c0_2] : memref<1x8x8x32xbf16, #tpu.memory_space<vmem>>, vector<1x8x8x32xbf16>
    %1 = vector.shape_cast %0 : vector<1x8x8x32xbf16> to vector<8x8x32xbf16>
    %2 = arith.extf %1 : vector<8x8x32xbf16> to vector<8x8x32xf32>
    %3 = vector.extract_strided_slice %2 {offsets = [0, 0, 0], sizes = [2, 8, 32], strides = [1, 1, 1]} : vector<8x8x32xf32> to vector<2x8x32xf32>
    %4 = vector.extract_strided_slice %2 {offsets = [1, 0, 0], sizes = [2, 8, 32], strides = [1, 1, 1]} : vector<8x8x32xf32> to vector<2x8x32xf32>
    %5 = arith.addf %3, %4 : vector<2x8x32xf32>
    %6 = vector.extract_strided_slice %2 {offsets = [2, 0, 0], sizes = [2, 8, 32], strides = [1, 1, 1]} : vector<8x8x32xf32> to vector<2x8x32xf32>
    %7 = arith.addf %5, %6 : vector<2x8x32xf32>
    %8 = vector.extract_strided_slice %2 {offsets = [3, 0, 0], sizes = [2, 8, 32], strides = [1, 1, 1]} : vector<8x8x32xf32> to vector<2x8x32xf32>
    %9 = arith.addf %7, %8 : vector<2x8x32xf32>
    %10 = vector.extract_strided_slice %2 {offsets = [4, 0, 0], sizes = [2, 8, 32], strides = [1, 1, 1]} : vector<8x8x32xf32> to vector<2x8x32xf32>
    %11 = arith.addf %9, %10 : vector<2x8x32xf32>
    %12 = vector.extract_strided_slice %2 {offsets = [5, 0, 0], sizes = [2, 8, 32], strides = [1, 1, 1]} : vector<8x8x32xf32> to vector<2x8x32xf32>
    %13 = arith.addf %11, %12 : vector<2x8x32xf32>
    %14 = vector.extract_strided_slice %2 {offsets = [6, 0, 0], sizes = [2, 8, 32], strides = [1, 1, 1]} : vector<8x8x32xf32> to vector<2x8x32xf32>
    %15 = arith.addf %13, %14 : vector<2x8x32xf32>
    %16 = vector.extract_strided_slice %15 {offsets = [0, 0, 0], sizes = [2, 2, 32], strides = [1, 1, 1]} : vector<2x8x32xf32> to vector<2x2x32xf32>
    %17 = vector.extract_strided_slice %15 {offsets = [0, 1, 0], sizes = [2, 2, 32], strides = [1, 1, 1]} : vector<2x8x32xf32> to vector<2x2x32xf32>
    %18 = arith.addf %16, %17 : vector<2x2x32xf32>
    %19 = vector.extract_strided_slice %15 {offsets = [0, 2, 0], sizes = [2, 2, 32], strides = [1, 1, 1]} : vector<2x8x32xf32> to vector<2x2x32xf32>
    %20 = arith.addf %18, %19 : vector<2x2x32xf32>
    %21 = vector.extract_strided_slice %15 {offsets = [0, 3, 0], sizes = [2, 2, 32], strides = [1, 1, 1]} : vector<2x8x32xf32> to vector<2x2x32xf32>
    %22 = arith.addf %20, %21 : vector<2x2x32xf32>
    %23 = vector.extract_strided_slice %15 {offsets = [0, 4, 0], sizes = [2, 2, 32], strides = [1, 1, 1]} : vector<2x8x32xf32> to vector<2x2x32xf32>
    %24 = arith.addf %22, %23 : vector<2x2x32xf32>
    %25 = vector.extract_strided_slice %15 {offsets = [0, 5, 0], sizes = [2, 2, 32], strides = [1, 1, 1]} : vector<2x8x32xf32> to vector<2x2x32xf32>
    %26 = arith.addf %24, %25 : vector<2x2x32xf32>
    %27 = vector.extract_strided_slice %15 {offsets = [0, 6, 0], sizes = [2, 2, 32], strides = [1, 1, 1]} : vector<2x8x32xf32> to vector<2x2x32xf32>
    %28 = arith.addf %26, %27 : vector<2x2x32xf32>
    %cst = arith.constant 0.0204081628 : f32
    %29 = vector.broadcast %cst : f32 to vector<2x2x32xf32>
    %30 = arith.mulf %28, %29 : vector<2x2x32xf32>
    %c0_3 = arith.constant 0 : index
    %c0_4 = arith.constant 0 : index
    %c0_5 = arith.constant 0 : index
    %c0_6 = arith.constant 0 : index
    %31 = vector.load %arg2[%c0_3, %c0_4, %c0_5, %c0_6] : memref<1x2x2x32xf32, #tpu.memory_space<vmem>>, vector<1x2x2x32xf32>
    %32 = vector.shape_cast %31 : vector<1x2x2x32xf32> to vector<2x2x32xf32>
    %33 = vector.shape_cast %30 : vector<2x2x32xf32> to vector<1x2x2x32xf32>
    tpu.vector_store %arg2[%c0_3, %c0_4, %c0_5, %c0_6], %33 {strides = array<i32>} : memref<1x2x2x32xf32, #tpu.memory_space<vmem>>, vector<1x2x2x32xf32>,
    return
  }
  func.func @transform_0(%arg0: i32) -> (i32, i32, i32, i32) {
    %c0_i32 = arith.constant 0 : i32
    %c0_i32_0 = arith.constant 0 : i32
    %c0_i32_1 = arith.constant 0 : i32
    %c0_i32_2 = arith.constant 0 : i32
    return %arg0, %c0_i32, %c0_i32_0, %c0_i32_1 : i32, i32, i32, i32
  }
  func.func @transform_1(%arg0: i32) -> (i32, i32, i32, i32) {
    %c0_i32 = arith.constant 0 : i32
    %c0_i32_0 = arith.constant 0 : i32
    %c0_i32_1 = arith.constant 0 : i32
    %c0_i32_2 = arith.constant 0 : i32
    return %arg0, %c0_i32, %c0_i32_0, %c0_i32_1 : i32, i32, i32, i32
  }
}

module attributes {stable_mosaic.version = 11 : i64} {
  func.func @_matmul_kernel(%arg0: i32, %arg1: i32, %arg2: i32, %arg3: i32, %arg4: memref<8x128xbf16, #tpu.memory_space<vmem>>, %arg5: memref<1x128x128xbf16, #tpu.memory_space<vmem>>, %arg6: memref<1x1x128xf32, #tpu.memory_space<vmem>>, %arg7: memref<1x1x128xf32, #tpu.memory_space<vmem>>, %arg8: memref<8x128xf32, #tpu.memory_space<vmem>>, %arg9: memref<8x128xf32, #tpu.memory_space<vmem>>) attributes {dimension_semantics = [#tpu.dimension_semantics<parallel>, #tpu.dimension_semantics<parallel>, #tpu.dimension_semantics<parallel>, #tpu.dimension_semantics<arbitrary>], iteration_bounds = array<i64: 1, 1, 1, 1>, scalar_prefetch = 0 : i64, scratch_operands = 1 : i64, tpu.core_type = #tpu.core_type<tc>, window_params = [{transform_indices = @transform_0, window_bounds = array<i64: 8, 128>}, {transform_indices = @transform_1, window_bounds = array<i64: 1, 128, 128>}, {transform_indices = @transform_2, window_bounds = array<i64: 1, 1, 128>}, {transform_indices = @transform_3, window_bounds = array<i64: 1, 1, 128>}, {transform_indices = @transform_4, window_bounds = array<i64: 8, 128>}]} {
    %c0 = arith.constant 0 : index
    %c0_0 = arith.constant 0 : index
    %0 = vector.load %arg4[%c0, %c0_0] : memref<8x128xbf16, #tpu.memory_space<vmem>>, vector<8x128xbf16>
    %c0_1 = arith.constant 0 : index
    %c0_2 = arith.constant 0 : index
    %c0_3 = arith.constant 0 : index
    %1 = vector.load %arg5[%c0_1, %c0_2, %c0_3] : memref<1x128x128xbf16, #tpu.memory_space<vmem>>, vector<1x128x128xbf16>
    %2 = vector.shape_cast %1 : vector<1x128x128xbf16> to vector<128x128xbf16>
    %cst = arith.constant dense<0.000000e+00> : vector<8x128xf32>
    %3 = tpu.matmul %0, %2, %cst {dimension_numbers = #tpu.dot_dimension_numbers<[1], [0], [0], [1], [0, 0, 1, 1], [], []>} : vector<8x128xbf16>, vector<128x128xbf16>, vector<8x128xf32> -> vector<8x128xf32>
    %c0_i32 = arith.constant 0 : i32
    %4 = arith.cmpi eq, %arg3, %c0_i32 : i32
    %5 = arith.extui %4 : i1 to i32
    %c0_i32_4 = arith.constant 0 : i32
    %6 = arith.cmpi ne, %5, %c0_i32_4 : i32
    scf.if %6 {
      %c0_9 = arith.constant 0 : index
      %c0_10 = arith.constant 0 : index
      %13 = vector.load %arg9[%c0_9, %c0_10] : memref<8x128xf32, #tpu.memory_space<vmem>>, vector<8x128xf32>
      tpu.vector_store %arg9[%c0_9, %c0_10], %3 {strides = array<i32>} : memref<8x128xf32, #tpu.memory_space<vmem>>, vector<8x128xf32>,
    } else {
    }
    %c0_i32_5 = arith.constant 0 : i32
    %7 = arith.cmpi sgt, %arg3, %c0_i32_5 : i32
    %8 = arith.extui %7 : i1 to i32
    %c0_i32_6 = arith.constant 0 : i32
    %9 = arith.cmpi ne, %8, %c0_i32_6 : i32
    scf.if %9 {
      %c0_9 = arith.constant 0 : index
      %c0_10 = arith.constant 0 : index
      %13 = vector.load %arg9[%c0_9, %c0_10] : memref<8x128xf32, #tpu.memory_space<vmem>>, vector<8x128xf32>
      %14 = arith.addf %13, %3 : vector<8x128xf32>
      %c0_11 = arith.constant 0 : index
      %c0_12 = arith.constant 0 : index
      %15 = vector.load %arg9[%c0_11, %c0_12] : memref<8x128xf32, #tpu.memory_space<vmem>>, vector<8x128xf32>
      tpu.vector_store %arg9[%c0_11, %c0_12], %14 {strides = array<i32>} : memref<8x128xf32, #tpu.memory_space<vmem>>, vector<8x128xf32>,
    } else {
    }
    %c0_i32_7 = arith.constant 0 : i32
    %10 = arith.cmpi eq, %arg3, %c0_i32_7 : i32
    %11 = arith.extui %10 : i1 to i32
    %c0_i32_8 = arith.constant 0 : i32
    %12 = arith.cmpi ne, %11, %c0_i32_8 : i32
    scf.if %12 {
      %c0_9 = arith.constant 0 : index
      %c0_10 = arith.constant 0 : index
      %13 = vector.load %arg9[%c0_9, %c0_10] : memref<8x128xf32, #tpu.memory_space<vmem>>, vector<8x128xf32>
      %c0_11 = arith.constant 0 : index
      %c0_12 = arith.constant 0 : index
      %c0_13 = arith.constant 0 : index
      %14 = vector.load %arg6[%c0_11, %c0_12, %c0_13] : memref<1x1x128xf32, #tpu.memory_space<vmem>>, vector<1x1x128xf32>
      %15 = vector.shape_cast %14 : vector<1x1x128xf32> to vector<1x128xf32>
      %16 = vector.broadcast %15 : vector<1x128xf32> to vector<8x128xf32>
      %17 = arith.mulf %13, %16 : vector<8x128xf32>
      %c0_14 = arith.constant 0 : index
      %c0_15 = arith.constant 0 : index
      %c0_16 = arith.constant 0 : index
      %18 = vector.load %arg7[%c0_14, %c0_15, %c0_16] : memref<1x1x128xf32, #tpu.memory_space<vmem>>, vector<1x1x128xf32>
      %19 = vector.shape_cast %18 : vector<1x1x128xf32> to vector<1x128xf32>
      %20 = vector.broadcast %19 : vector<1x128xf32> to vector<8x128xf32>
      %21 = arith.addf %17, %20 : vector<8x128xf32>
      %c0_17 = arith.constant 0 : index
      %c0_18 = arith.constant 0 : index
      %22 = vector.load %arg8[%c0_17, %c0_18] : memref<8x128xf32, #tpu.memory_space<vmem>>, vector<8x128xf32>
      tpu.vector_store %arg8[%c0_17, %c0_18], %21 {strides = array<i32>} : memref<8x128xf32, #tpu.memory_space<vmem>>, vector<8x128xf32>,
    } else {
    }
    return
  }
  func.func @transform_0(%arg0: i32, %arg1: i32, %arg2: i32, %arg3: i32) -> (i32, i32) {
    %c1_i32 = arith.constant 1 : i32
    %0 = arith.muli %arg1, %c1_i32 : i32
    %1 = arith.addi %0, %arg3 : i32
    %c0_i32 = arith.constant 0 : i32
    return %arg0, %1 : i32, i32
  }
  func.func @transform_1(%arg0: i32, %arg1: i32, %arg2: i32, %arg3: i32) -> (i32, i32, i32) {
    %c0_i32 = arith.constant 0 : i32
    return %arg1, %arg3, %arg2 : i32, i32, i32
  }
  func.func @transform_2(%arg0: i32, %arg1: i32, %arg2: i32, %arg3: i32) -> (i32, i32, i32) {
    %c0_i32 = arith.constant 0 : i32
    %c0_i32_0 = arith.constant 0 : i32
    return %arg1, %c0_i32, %arg2 : i32, i32, i32
  }
  func.func @transform_3(%arg0: i32, %arg1: i32, %arg2: i32, %arg3: i32) -> (i32, i32, i32) {
    %c0_i32 = arith.constant 0 : i32
    %c0_i32_0 = arith.constant 0 : i32
    return %arg1, %c0_i32, %arg2 : i32, i32, i32
  }
  func.func @transform_4(%arg0: i32, %arg1: i32, %arg2: i32, %arg3: i32) -> (i32, i32) {
    %c1_i32 = arith.constant 1 : i32
    %0 = arith.muli %arg1, %c1_i32 : i32
    %1 = arith.addi %0, %arg2 : i32
    %c0_i32 = arith.constant 0 : i32
    return %arg0, %1 : i32, i32
  }
}

</mosaic_0001>

<bundles_post_ra>
// kernel: _lambda_.15
= control target key start
LH: loop header
LB: loop body
LE: loop exit
PB: predicated region body
PF: predicated region fallthrough
CT: control target
= control target key end

     0   :  { %s1920_s15 = smov 0   ;;  %s1922_s16 = smov 0   ;;  %s2131_s0 = inlined_call_operand.vmem [shape: bf16[2048,256], index: 0, kind: input, shape index: {}]   ;;  %s2132_s1 = inlined_call_operand.vmem [shape: bf16[1,256,128], index: 1, kind: input, shape index: {}]   ;;  %s2133_s2 = inlined_call_operand.vmem [shape: f32[1,1,128], index: 2, kind: input, shape index: {}]   ;;  %s2134_s3 = inlined_call_operand.vmem [shape: f32[1,1,128], index: 3, kind: input, shape index: {}]   ;;  %s2135_s4 = inlined_call_operand.vmem [shape: bf16[2048,128], index: 4, kind: output, shape index: {}]  }
   0x1   :  { %s1924_s17 = smov 0  }
   0x2 LB: > { %s40_s18 = sadd.s32 1, %s1889_s16  ;;  %p1437_p0 = scmp.ge.s32.totalorder %s1893_s17, 1  ;;  %s1893_s17 = sphi %s1924_s17, %s14_s17   ;;  %s1889_s16 = sphi %s1922_s16, %s2137_s16   ;;  %s1885_s15 = sphi %s1920_s15, %s2136_s15  }
   0x3   : > { %p42_p1 = scmp.ge.s32.totalorder %s40_s18, 8  ;;  %p253_p2 = scmp.lt.s32.totalorder %s1893_s17, 9 }
   0x5   : > { %s2139_s18 = smov (%p42_p1, %s40_s18), 0  ;;  %p254_p3 = pnand %p1437_p0, %p253_p2 }
   0x6   : > { %v1807_v0 = vld [vmem:[%s2132_s1 + $0x40] sm:$0xff] (!%p254_p3)   ;;  %s1438_s21 = sshll.u32 (!%p254_p3), %s1885_s15, 5  ;;  %v1809_v2 = vld [vmem:[%s2132_s1 + $0x48] sm:$0xff] (!%p254_p3)   ;;  %v1811_v4 = vld [vmem:[%s2132_s1 + $0x50] sm:$0xff] (!%p254_p3)  }
   0x7   : > { %257 = sbr.rel (%p254_p3) target bundleno = 322 (0x142), region = 36  ;;  %v1808_v1 = vld [vmem:[%s2132_s1] sm:$0xff] (!%p254_p3)   ;;  %1655 = vmatprep.subr.bf16.mxu0 (!%p254_p3), %v1807_v0  ;;  %1767 = vmatprep.subr.bf16.mxu1 (!%p254_p3), %v1807_v0  ;;  %v1810_v3 = vld [vmem:[%s2132_s1 + $0x8] sm:$0xff] (!%p254_p3)   ;;  %p316_p4 = scmp.lt.s32.totalorder (!%p254_p3), %s1438_s21, 255  ;;  %v1812_v5 = vld [vmem:[%s2132_s1 + $0x10] sm:$0xff] (!%p254_p3)  }
   0x8   : > { %1656 = vmatpush3.bf16.msra.mxu0 (!%p254_p3), %v1808_v1  ;;  %1775 = vmatpush3.bf16.msra.mxu1 (!%p254_p3), %v1808_v1  ;;  %v1813_v6 = vld [vmem:[%s2132_s1 + $0x58] sm:$0xff] (!%p254_p3)   ;;  %v1815_v8 = vld [vmem:[%s2132_s1 + $0x60] sm:$0xff] (!%p254_p3)   ;;  %v1817_v10 = vld [vmem:[%s2132_s1 + $0x68] sm:$0xff] (!%p254_p3)  }
   0x9   : > { %1657 = vmatprep.subr.bf16.mxu0 (!%p254_p3), %v1809_v2  ;;  %1768 = vmatprep.subr.bf16.mxu1 (!%p254_p3), %v1809_v2  ;;  %v1814_v7 = vld [vmem:[%s2132_s1 + $0x18] sm:$0xff] (!%p254_p3)   ;;  %v1816_v9 = vld [vmem:[%s2132_s1 + $0x20] sm:$0xff] (!%p254_p3)   ;;  %v1818_v13 = vld [vmem:[%s2132_s1 + $0x28] sm:$0xff] (!%p254_p3)  }
   0xa   : > { %v1819_v14 = vld [vmem:[%s2132_s1 + $0x70] sm:$0xff] (!%p254_p3)   ;;  %v1821_v16 = vld [vmem:[%s2132_s1 + $0x78] sm:$0xff] (!%p254_p3)   ;;  %v2029_v51 = vld [vmem:[%s2133_s2] ss:$0 sm:$0xff] (!%p254_p3) }
   0xb   : > { %v1820_v15 = vld [vmem:[%s2132_s1 + $0x30] sm:$0xff] (!%p254_p3)   ;;  %v1822_v17 = vld [vmem:[%s2132_s1 + $0x38] sm:$0xff] (!%p254_p3)   ;;  %v2034_v57 = vld [vmem:[%s2134_s3] ss:$0 sm:$0xff] (!%p254_p3) }
   0xc   : > { %1658 = vmatpush3.bf16.msra.mxu0 (!%p254_p3), %v1810_v3  ;;  %1776 = vmatpush3.bf16.msra.mxu1 (!%p254_p3), %v1810_v3 }
   0xd   : > { %1659 = vmatprep.subr.bf16.mxu0 (!%p254_p3), %v1811_v4  ;;  %1769 = vmatprep.subr.bf16.mxu1 (!%p254_p3), %v1811_v4 }
   0xe   : > { %s2141_s21 = smov (!%p316_p4, %s1438_s21), 255 }
   0xf   : > { %s1527_s10 = sshll.u32 %s2141_s21, 3  ;;  %s1442_s12 = sshll.u32 %s2141_s21, 2 }
  0x10   : > { %1660 = vmatpush3.bf16.msra.mxu0 %v1812_v5  ;;  %1777 = vmatpush3.bf16.msra.mxu1 %v1812_v5  ;;  %s1971_s15 = scalar_lea.vmem %s2131_s0, %s1527_s10  ;;  %s2048_s21 = scalar_lea.vmem %s2135_s4, %s1442_s12 }
  0x11   : > { %1661 = vmatprep.subr.bf16.mxu0 %v1813_v6  ;;  %1770 = vmatprep.subr.bf16.mxu1 %v1813_v6  ;;  %v1825_v11 = vld [vmem:[%s1971_s15 + $0x4] ss:$8 sps:$4 sm:$0xff]   ;;  %v1823_v18 = vld [vmem:[%s1971_s15] ss:$8 sps:$4 sm:$0xff]   ;;  %v1829_v20 = vld [vmem:[%s1971_s15 + $0x14] ss:$8 sps:$4 sm:$0xff]  }
  0x12   : > { %v1828_v12 = vld [vmem:[%s1971_s15 + $0x84] ss:$8 sps:$4 sm:$0xff]   ;;  %716 = vmatprep.mubr.bf16.mxu0 %v1825_v11  ;;  %v1826_v19 = vld [vmem:[%s1971_s15 + $0x80] ss:$8 sps:$4 sm:$0xff]   ;;  %v1831_v21 = vld [vmem:[%s1971_s15 + $0x94] ss:$8 sps:$4 sm:$0xff]  }
  0x13   : > { %780 = vmatprep.mubr.bf16.mxu1 %v1828_v12  ;;  %v1833_v22 = vld [vmem:[%s1971_s15 + $0x10] ss:$8 sps:$4 sm:$0xff]   ;;  %v1835_v24 = vld [vmem:[%s1971_s15 + $0x24] ss:$8 sps:$4 sm:$0xff]   ;;  %v1839_v26 = vld [vmem:[%s1971_s15 + $0x20] ss:$8 sps:$4 sm:$0xff]  }
  0x14   : > { %1662 = vmatpush3.bf16.msra.mxu0 %v1814_v7  ;;  %1778 = vmatpush3.bf16.msra.mxu1 %v1814_v7  ;;  %v1834_v23 = vld [vmem:[%s1971_s15 + $0x90] ss:$8 sps:$4 sm:$0xff]   ;;  %v1837_v25 = vld [vmem:[%s1971_s15 + $0xa4] ss:$8 sps:$4 sm:$0xff]   ;;  %v1840_v27 = vld [vmem:[%s1971_s15 + $0xa0] ss:$8 sps:$4 sm:$0xff]  }
  0x15   : > { %1663 = vmatprep.subr.bf16.mxu0 %v1815_v8  ;;  %1771 = vmatprep.subr.bf16.mxu1 %v1815_v8  ;;  %v1841_v28 = vld [vmem:[%s1971_s15 + $0x34] ss:$8 sps:$4 sm:$0xff]   ;;  %v1845_v30 = vld [vmem:[%s1971_s15 + $0x30] ss:$8 sps:$4 sm:$0xff]   ;;  %v1847_v32 = vld [vmem:[%s1971_s15 + $0x44] ss:$8 sps:$4 sm:$0xff]  }
  0x16   : > { %v1843_v29 = vld [vmem:[%s1971_s15 + $0xb4] ss:$8 sps:$4 sm:$0xff]   ;;  %v1846_v31 = vld [vmem:[%s1971_s15 + $0xb0] ss:$8 sps:$4 sm:$0xff]   ;;  %v1849_v33 = vld [vmem:[%s1971_s15 + $0xc4] ss:$8 sps:$4 sm:$0xff]  }
  0x17   : > { %v1851_v34 = vld [vmem:[%s1971_s15 + $0x40] ss:$8 sps:$4 sm:$0xff]   ;;  %v1853_v36 = vld [vmem:[%s1971_s15 + $0x54] ss:$8 sps:$4 sm:$0xff]   ;;  %v1857_v38 = vld [vmem:[%s1971_s15 + $0x50] ss:$8 sps:$4 sm:$0xff]  }
  0x18   : > { %1664 = vmatpush3.bf16.msra.mxu0 %v1816_v9  ;;  %1779 = vmatpush3.bf16.msra.mxu1 %v1816_v9  ;;  %v1852_v35 = vld [vmem:[%s1971_s15 + $0xc0] ss:$8 sps:$4 sm:$0xff]   ;;  %v1855_v37 = vld [vmem:[%s1971_s15 + $0xd4] ss:$8 sps:$4 sm:$0xff]   ;;  %v1858_v39 = vld [vmem:[%s1971_s15 + $0xd0] ss:$8 sps:$4 sm:$0xff]  }
  0x19   : > { %1665 = vmatprep.subr.bf16.mxu0 %v1817_v10  ;;  %1772 = vmatprep.subr.bf16.mxu1 %v1817_v10  ;;  %v1859_v40 = vld [vmem:[%s1971_s15 + $0x64] ss:$8 sps:$4 sm:$0xff]   ;;  %v1863_v42 = vld [vmem:[%s1971_s15 + $0x60] ss:$8 sps:$4 sm:$0xff]   ;;  %v1865_v44 = vld [vmem:[%s1971_s15 + $0x74] ss:$8 sps:$4 sm:$0xff]  }
  0x1a   : > { %v1861_v41 = vld [vmem:[%s1971_s15 + $0xe4] ss:$8 sps:$4 sm:$0xff]   ;;  %v1864_v43 = vld [vmem:[%s1971_s15 + $0xe0] ss:$8 sps:$4 sm:$0xff]   ;;  %v1867_v45 = vld [vmem:[%s1971_s15 + $0xf4] ss:$8 sps:$4 sm:$0xff]  }
  0x1b   : > { %v1869_v46 = vld [vmem:[%s1971_s15 + $0x70] ss:$8 sps:$4 sm:$0xff]  }
  0x1c   : > { %1666 = vmatpush3.bf16.msra.mxu0 %v1818_v13  ;;  %1780 = vmatpush3.bf16.msra.mxu1 %v1818_v13  ;;  %v1870_v47 = vld [vmem:[%s1971_s15 + $0xf0] ss:$8 sps:$4 sm:$0xff]  }
  0x1d   : > { %1667 = vmatprep.subr.bf16.mxu0 %v1819_v14  ;;  %1773 = vmatprep.subr.bf16.mxu1 %v1819_v14 }
  0x20   : > { %1668 = vmatpush3.bf16.msra.mxu0 %v1820_v15  ;;  %1781 = vmatpush3.bf16.msra.mxu1 %v1820_v15 }
  0x21   : > { %1669 = vmatprep.subr.bf16.mxu0 %v1821_v16  ;;  %1774 = vmatprep.subr.bf16.mxu1 %v1821_v16 }
  0x24   : > { %1670 = vmatpush3.bf16.msra.mxu0 %v1822_v17  ;;  %1782 = vmatpush3.bf16.msra.mxu1 %v1822_v17 }
  0x27   : > { %717 = vmatmul.mubr.bf16.vlgmr.msra.gmra.mrb[0].mxu0 %v1823_v18  ;;  %781 = vmatmul.mubr.bf16.vlgmr.msra.gmra.mrb[0].mxu1 %v1826_v19 }
  0x28   : > { %724 = vmatprep.mubr.bf16.mxu0 %v1829_v20  ;;  %788 = vmatprep.mubr.bf16.mxu1 %v1831_v21 }
  0x2f   : > { %725 = vmatmul.mubr.bf16.gmra.mrb[4].mxu0 %v1833_v22  ;;  %789 = vmatmul.mubr.bf16.gmra.mrb[4].mxu1 %v1834_v23 }
  0x30   : > { %732 = vmatprep.mubr.bf16.mxu0 %v1835_v24  ;;  %796 = vmatprep.mubr.bf16.mxu1 %v1837_v25 }
  0x37   : > { %733 = vmatmul.mubr.bf16.gmra.mrb[8].mxu0 %v1839_v26  ;;  %797 = vmatmul.mubr.bf16.gmra.mrb[8].mxu1 %v1840_v27 }
  0x38   : > { %740 = vmatprep.mubr.bf16.mxu0 %v1841_v28  ;;  %804 = vmatprep.mubr.bf16.mxu1 %v1843_v29 }
  0x3f   : > { %741 = vmatmul.mubr.bf16.gmra.mrb[12].mxu0 %v1845_v30  ;;  %805 = vmatmul.mubr.bf16.gmra.mrb[12].mxu1 %v1846_v31 }
  0x40   : > { %748 = vmatprep.mubr.bf16.mxu0 %v1847_v32  ;;  %812 = vmatprep.mubr.bf16.mxu1 %v1849_v33 }
  0x47   : > { %749 = vmatmul.mubr.bf16.gmra.mrb[16].mxu0 %v1851_v34  ;;  %813 = vmatmul.mubr.bf16.gmra.mrb[16].mxu1 %v1852_v35 }
  0x48   : > { %756 = vmatprep.mubr.bf16.mxu0 %v1853_v36  ;;  %820 = vmatprep.mubr.bf16.mxu1 %v1855_v37 }
  0x4f   : > { %757 = vmatmul.mubr.bf16.gmra.mrb[20].mxu0 %v1857_v38  ;;  %821 = vmatmul.mubr.bf16.gmra.mrb[20].mxu1 %v1858_v39 }
  0x50   : > { %764 = vmatprep.mubr.bf16.mxu0 %v1859_v40  ;;  %828 = vmatprep.mubr.bf16.mxu1 %v1861_v41 }
  0x57   : > { %765 = vmatmul.mubr.bf16.gmra.mrb[24].mxu0 %v1863_v42  ;;  %829 = vmatmul.mubr.bf16.gmra.mrb[24].mxu1 %v1864_v43 }
  0x58   : > { %772 = vmatprep.mubr.bf16.mxu0 %v1865_v44  ;;  %836 = vmatprep.mubr.bf16.mxu1 %v1867_v45 }
  0x5f   : > { %773 = vmatmul.mubr.bf16.gmra.mrb[28].mxu0 %v1869_v46  ;;  %837 = vmatmul.mubr.bf16.gmra.mrb[28].mxu1 %v1870_v47 }
  0xfa   : > { %v1671_v48 = vpop.f32.mrb[0].mxu0  ;;  %v1719_v49 = vpop.f32.mrb[0].mxu1 }
  0xfb   : > { %v1672_v50 = vpop.f32.mrb[1].mxu0  ;;  %v1720_v52 = vpop.f32.mrb[1].mxu1 }
  0xfc   : > { %v1673_v53 = vadd.f32 %v1672_v50, %v1671_v48  ;;  %v1721_v54 = vadd.f32 %v1720_v52, %v1719_v49  ;;  %v1674_v55 = vpop.f32.mrb[2].mxu0  ;;  %v1722_v56 = vpop.f32.mrb[2].mxu1 }
  0xfd   : > { %v1675_v58 = vpop.f32.mrb[3].mxu0  ;;  %v1723_v59 = vpop.f32.mrb[3].mxu1 }
  0xfe   : > { %v1023_v60 = vmul.f32 %v1673_v53, %v2029_v51  ;;  %v1039_v61 = vmul.f32 %v1721_v54, %v2029_v51  ;;  %v1676_v62 = vadd.f32 %v1675_v58, %v1674_v55  ;;  %v1724_v63 = vadd.f32 %v1723_v59, %v1722_v56 }
 0x100   : > { %v1062_v0 = vadd.f32 %v2034_v57, %v1023_v60  ;;  %v1078_v1 = vadd.f32 %v2034_v57, %v1039_v61  ;;  %v1024_v2 = vmul.f32 %v1676_v62, %v2029_v51  ;;  %v1040_v3 = vmul.f32 %v1724_v63, %v2029_v51 }
 0x102   : > { %v1063_v4 = vadd.f32 %v2034_v57, %v1024_v2  ;;  %v1079_v5 = vadd.f32 %v2034_v57, %v1040_v3  ;;  %v1677_v6 = vpop.f32.mrb[4].mxu0  ;;  %v1725_v7 = vpop.f32.mrb[4].mxu1  ;;  %v1094_v8 = vmax.f32 %v1062_v0, 0.0  ;;  %v1110_v9 = vmax.f32 %v1078_v1, 0.0 }
 0x103   : > { %v1678_v10 = vpop.f32.mrb[5].mxu0  ;;  %v1726_v11 = vpop.f32.mrb[5].mxu1 }
 0x104   : > { %v1095_v12 = vmax.f32 %v1063_v4, 0.0  ;;  %v1111_v13 = vmax.f32 %v1079_v5, 0.0  ;;  %v1679_v14 = vadd.f32 %v1678_v10, %v1677_v6  ;;  %v1727_v15 = vadd.f32 %v1726_v11, %v1725_v7  ;;  %v1680_v16 = vpop.f32.mrb[6].mxu0  ;;  %v1728_v17 = vpop.f32.mrb[6].mxu1 }
 0x105   : > { %v1681_v18 = vpop.f32.mrb[7].mxu0  ;;  %v1729_v19 = vpop.f32.mrb[7].mxu1 }
 0x106   : > { %v1563_v20 = vpack.c.bf16 %v1095_v12, %v1094_v8  ;;  %v1603_v21 = vpack.c.bf16 %v1111_v13, %v1110_v9  ;;  %v1025_v22 = vmul.f32 %v1679_v14, %v2029_v51  ;;  %v1041_v23 = vmul.f32 %v1727_v15, %v2029_v51 }
 0x107   : > { %v1682_v24 = vadd.f32 %v1681_v18, %v1680_v16  ;;  %v1730_v25 = vadd.f32 %v1729_v19, %v1728_v17 }
 0x108   : > { %1564 = vst [vmem:[%s2048_s21] sm:$0xff] %v1563_v20   ;;  %1647 = vst [vmem:[%s2048_s21 + $0x40] sm:$0xff] %v1603_v21   ;;  %v1064_v26 = vadd.f32 %v2034_v57, %v1025_v22  ;;  %v1080_v27 = vadd.f32 %v2034_v57, %v1041_v23 }
 0x109   : > { %v1026_v28 = vmul.f32 %v1682_v24, %v2029_v51  ;;  %v1042_v29 = vmul.f32 %v1730_v25, %v2029_v51 }
 0x10a   : > { %v1683_v30 = vpop.f32.mrb[8].mxu0  ;;  %v1731_v31 = vpop.f32.mrb[8].mxu1  ;;  %v1096_v40 = vmax.f32 %v1064_v26, 0.0  ;;  %v1112_v41 = vmax.f32 %v1080_v27, 0.0 }
 0x10b   : > { %v1065_v32 = vadd.f32 %v2034_v57, %v1026_v28  ;;  %v1081_v33 = vadd.f32 %v2034_v57, %v1042_v29  ;;  %v1684_v34 = vpop.f32.mrb[9].mxu0  ;;  %v1732_v35 = vpop.f32.mrb[9].mxu1 }
 0x10c   : > { %v1685_v36 = vadd.f32 %v1684_v34, %v1683_v30  ;;  %v1733_v37 = vadd.f32 %v1732_v35, %v1731_v31  ;;  %v1686_v38 = vpop.f32.mrb[10].mxu0  ;;  %v1734_v39 = vpop.f32.mrb[10].mxu1 }
 0x10d   : > { %v1097_v42 = vmax.f32 %v1065_v32, 0.0  ;;  %v1113_v43 = vmax.f32 %v1081_v33, 0.0  ;;  %v1687_v44 = vpop.f32.mrb[11].mxu0  ;;  %v1735_v45 = vpop.f32.mrb[11].mxu1 }
 0x10e   : > { %v1027_v46 = vmul.f32 %v1685_v36, %v2029_v51  ;;  %v1043_v47 = vmul.f32 %v1733_v37, %v2029_v51  ;;  %v1688_v48 = vadd.f32 %v1687_v44, %v1686_v38  ;;  %v1736_v49 = vadd.f32 %v1735_v45, %v1734_v39 }
 0x10f   : > { %v1568_v50 = vpack.c.bf16 %v1097_v42, %v1096_v40  ;;  %v1608_v52 = vpack.c.bf16 %v1113_v43, %v1112_v41 }
 0x110   : > { %v1066_v53 = vadd.f32 %v2034_v57, %v1027_v46  ;;  %v1082_v54 = vadd.f32 %v2034_v57, %v1043_v47  ;;  %v1028_v55 = vmul.f32 %v1688_v48, %v2029_v51  ;;  %v1044_v56 = vmul.f32 %v1736_v49, %v2029_v51 }
 0x111   : > { %1640 = vst [vmem:[%s2048_s21 + $0x8] sm:$0xff] %v1568_v50   ;;  %1648 = vst [vmem:[%s2048_s21 + $0x48] sm:$0xff] %v1608_v52  }
 0x112   : > { %v1067_v58 = vadd.f32 %v2034_v57, %v1028_v55  ;;  %v1083_v59 = vadd.f32 %v2034_v57, %v1044_v56  ;;  %v1689_v60 = vpop.f32.mrb[12].mxu0  ;;  %v1737_v61 = vpop.f32.mrb[12].mxu1  ;;  %v1098_v62 = vmax.f32 %v1066_v53, 0.0  ;;  %v1114_v63 = vmax.f32 %v1082_v54, 0.0 }
 0x113   : > { %v1690_v0 = vpop.f32.mrb[13].mxu0  ;;  %v1738_v1 = vpop.f32.mrb[13].mxu1 }
 0x114   : > { %v1099_v2 = vmax.f32 %v1067_v58, 0.0  ;;  %v1115_v3 = vmax.f32 %v1083_v59, 0.0  ;;  %v1691_v4 = vadd.f32 %v1690_v0, %v1689_v60  ;;  %v1739_v5 = vadd.f32 %v1738_v1, %v1737_v61  ;;  %v1692_v6 = vpop.f32.mrb[14].mxu0  ;;  %v1740_v7 = vpop.f32.mrb[14].mxu1 }
 0x115   : > { %v1693_v8 = vpop.f32.mrb[15].mxu0  ;;  %v1741_v9 = vpop.f32.mrb[15].mxu1 }
 0x116   : > { %v1573_v10 = vpack.c.bf16 %v1099_v2, %v1098_v62  ;;  %v1613_v11 = vpack.c.bf16 %v1115_v3, %v1114_v63  ;;  %v1029_v12 = vmul.f32 %v1691_v4, %v2029_v51  ;;  %v1045_v13 = vmul.f32 %v1739_v5, %v2029_v51 }
 0x117   : > { %v1694_v14 = vadd.f32 %v1693_v8, %v1692_v6  ;;  %v1742_v15 = vadd.f32 %v1741_v9, %v1740_v7 }
 0x118   : > { %1641 = vst [vmem:[%s2048_s21 + $0x10] sm:$0xff] %v1573_v10   ;;  %1649 = vst [vmem:[%s2048_s21 + $0x50] sm:$0xff] %v1613_v11   ;;  %v1068_v16 = vadd.f32 %v2034_v57, %v1029_v12  ;;  %v1084_v17 = vadd.f32 %v2034_v57, %v1045_v13 }
 0x119   : > { %v1030_v18 = vmul.f32 %v1694_v14, %v2029_v51  ;;  %v1046_v19 = vmul.f32 %v1742_v15, %v2029_v51 }
 0x11a   : > { %v1695_v20 = vpop.f32.mrb[16].mxu0  ;;  %v1743_v21 = vpop.f32.mrb[16].mxu1  ;;  %v1100_v30 = vmax.f32 %v1068_v16, 0.0  ;;  %v1116_v31 = vmax.f32 %v1084_v17, 0.0 }
 0x11b   : > { %v1069_v22 = vadd.f32 %v2034_v57, %v1030_v18  ;;  %v1085_v23 = vadd.f32 %v2034_v57, %v1046_v19  ;;  %v1696_v24 = vpop.f32.mrb[17].mxu0  ;;  %v1744_v25 = vpop.f32.mrb[17].mxu1 }
 0x11c   : > { %v1697_v26 = vadd.f32 %v1696_v24, %v1695_v20  ;;  %v1745_v27 = vadd.f32 %v1744_v25, %v1743_v21  ;;  %v1698_v28 = vpop.f32.mrb[18].mxu0  ;;  %v1746_v29 = vpop.f32.mrb[18].mxu1 }
 0x11d   : > { %v1101_v32 = vmax.f32 %v1069_v22, 0.0  ;;  %v1117_v33 = vmax.f32 %v1085_v23, 0.0  ;;  %v1699_v34 = vpop.f32.mrb[19].mxu0  ;;  %v1747_v35 = vpop.f32.mrb[19].mxu1 }
 0x11e   : > { %v1031_v36 = vmul.f32 %v1697_v26, %v2029_v51  ;;  %v1047_v37 = vmul.f32 %v1745_v27, %v2029_v51  ;;  %v1700_v38 = vadd.f32 %v1699_v34, %v1698_v28  ;;  %v1748_v39 = vadd.f32 %v1747_v35, %v1746_v29 }
 0x11f   : > { %v1578_v40 = vpack.c.bf16 %v1101_v32, %v1100_v30  ;;  %v1618_v41 = vpack.c.bf16 %v1117_v33, %v1116_v31 }
 0x120   : > { %v1070_v42 = vadd.f32 %v2034_v57, %v1031_v36  ;;  %v1086_v43 = vadd.f32 %v2034_v57, %v1047_v37  ;;  %v1032_v44 = vmul.f32 %v1700_v38, %v2029_v51  ;;  %v1048_v45 = vmul.f32 %v1748_v39, %v2029_v51 }
 0x121   : > { %1642 = vst [vmem:[%s2048_s21 + $0x18] sm:$0xff] %v1578_v40   ;;  %1650 = vst [vmem:[%s2048_s21 + $0x58] sm:$0xff] %v1618_v41  }
 0x122   : > { %v1071_v46 = vadd.f32 %v2034_v57, %v1032_v44  ;;  %v1087_v47 = vadd.f32 %v2034_v57, %v1048_v45  ;;  %v1701_v48 = vpop.f32.mrb[20].mxu0  ;;  %v1749_v49 = vpop.f32.mrb[20].mxu1  ;;  %v1102_v50 = vmax.f32 %v1070_v42, 0.0  ;;  %v1118_v52 = vmax.f32 %v1086_v43, 0.0 }
 0x123   : > { %v1702_v53 = vpop.f32.mrb[21].mxu0  ;;  %v1750_v54 = vpop.f32.mrb[21].mxu1 }
 0x124   : > { %v1103_v55 = vmax.f32 %v1071_v46, 0.0  ;;  %v1119_v56 = vmax.f32 %v1087_v47, 0.0  ;;  %v1703_v58 = vadd.f32 %v1702_v53, %v1701_v48  ;;  %v1751_v59 = vadd.f32 %v1750_v54, %v1749_v49  ;;  %v1704_v60 = vpop.f32.mrb[22].mxu0  ;;  %v1752_v61 = vpop.f32.mrb[22].mxu1 }
 0x125   : > { %v1705_v62 = vpop.f32.mrb[23].mxu0  ;;  %v1753_v63 = vpop.f32.mrb[23].mxu1 }
 0x126   : > { %v1583_v0 = vpack.c.bf16 %v1103_v55, %v1102_v50  ;;  %v1623_v1 = vpack.c.bf16 %v1119_v56, %v1118_v52  ;;  %v1033_v2 = vmul.f32 %v1703_v58, %v2029_v51  ;;  %v1049_v3 = vmul.f32 %v1751_v59, %v2029_v51 }
 0x127   : > { %v1706_v4 = vadd.f32 %v1705_v62, %v1704_v60  ;;  %v1754_v5 = vadd.f32 %v1753_v63, %v1752_v61 }
 0x128   : > { %1643 = vst [vmem:[%s2048_s21 + $0x20] sm:$0xff] %v1583_v0   ;;  %1651 = vst [vmem:[%s2048_s21 + $0x60] sm:$0xff] %v1623_v1   ;;  %v1072_v6 = vadd.f32 %v2034_v57, %v1033_v2  ;;  %v1088_v7 = vadd.f32 %v2034_v57, %v1049_v3 }
 0x129   : > { %v1034_v8 = vmul.f32 %v1706_v4, %v2029_v51  ;;  %v1050_v9 = vmul.f32 %v1754_v5, %v2029_v51 }
 0x12a   : > { %v1707_v10 = vpop.f32.mrb[24].mxu0  ;;  %v1755_v11 = vpop.f32.mrb[24].mxu1  ;;  %v1104_v20 = vmax.f32 %v1072_v6, 0.0  ;;  %v1120_v21 = vmax.f32 %v1088_v7, 0.0 }
 0x12b   : > { %v1073_v12 = vadd.f32 %v2034_v57, %v1034_v8  ;;  %v1089_v13 = vadd.f32 %v2034_v57, %v1050_v9  ;;  %v1708_v14 = vpop.f32.mrb[25].mxu0  ;;  %v1756_v15 = vpop.f32.mrb[25].mxu1 }
 0x12c   : > { %v1709_v16 = vadd.f32 %v1708_v14, %v1707_v10  ;;  %v1757_v17 = vadd.f32 %v1756_v15, %v1755_v11  ;;  %v1710_v18 = vpop.f32.mrb[26].mxu0  ;;  %v1758_v19 = vpop.f32.mrb[26].mxu1 }
 0x12d   : > { %v1105_v22 = vmax.f32 %v1073_v12, 0.0  ;;  %v1121_v23 = vmax.f32 %v1089_v13, 0.0  ;;  %v1711_v24 = vpop.f32.mrb[27].mxu0  ;;  %v1759_v25 = vpop.f32.mrb[27].mxu1 }
 0x12e   : > { %v1035_v26 = vmul.f32 %v1709_v16, %v2029_v51  ;;  %v1051_v27 = vmul.f32 %v1757_v17, %v2029_v51  ;;  %v1712_v28 = vadd.f32 %v1711_v24, %v1710_v18  ;;  %v1760_v29 = vadd.f32 %v1759_v25, %v1758_v19 }
 0x12f   : > { %v1588_v30 = vpack.c.bf16 %v1105_v22, %v1104_v20  ;;  %v1628_v31 = vpack.c.bf16 %v1121_v23, %v1120_v21 }
 0x130   : > { %v1074_v32 = vadd.f32 %v2034_v57, %v1035_v26  ;;  %v1090_v33 = vadd.f32 %v2034_v57, %v1051_v27  ;;  %v1036_v34 = vmul.f32 %v1712_v28, %v2029_v51  ;;  %v1052_v35 = vmul.f32 %v1760_v29, %v2029_v51 }
 0x131   : > { %1644 = vst [vmem:[%s2048_s21 + $0x28] sm:$0xff] %v1588_v30   ;;  %1652 = vst [vmem:[%s2048_s21 + $0x68] sm:$0xff] %v1628_v31  }
 0x132   : > { %v1075_v36 = vadd.f32 %v2034_v57, %v1036_v34  ;;  %v1091_v37 = vadd.f32 %v2034_v57, %v1052_v35  ;;  %v1713_v38 = vpop.f32.mrb[28].mxu0  ;;  %v1761_v39 = vpop.f32.mrb[28].mxu1  ;;  %v1106_v40 = vmax.f32 %v1074_v32, 0.0  ;;  %v1122_v41 = vmax.f32 %v1090_v33, 0.0 }
 0x133   : > { %v1714_v42 = vpop.f32.mrb[29].mxu0  ;;  %v1762_v43 = vpop.f32.mrb[29].mxu1 }
 0x134   : > { %v1107_v44 = vmax.f32 %v1075_v36, 0.0  ;;  %v1123_v45 = vmax.f32 %v1091_v37, 0.0  ;;  %v1715_v46 = vadd.f32 %v1714_v42, %v1713_v38  ;;  %v1763_v47 = vadd.f32 %v1762_v43, %v1761_v39  ;;  %v1716_v48 = vpop.f32.mrb[30].mxu0  ;;  %v1764_v49 = vpop.f32.mrb[30].mxu1 }
 0x135   : > { %v1717_v50 = vpop.f32.mrb[31].mxu0  ;;  %v1765_v52 = vpop.f32.mrb[31].mxu1 }
 0x136   : > { %v1593_v53 = vpack.c.bf16 %v1107_v44, %v1106_v40  ;;  %v1633_v54 = vpack.c.bf16 %v1123_v45, %v1122_v41  ;;  %v1037_v55 = vmul.f32 %v1715_v46, %v2029_v51  ;;  %v1053_v56 = vmul.f32 %v1763_v47, %v2029_v51 }
 0x137   : > { %v1718_v58 = vadd.f32 %v1717_v50, %v1716_v48  ;;  %v1766_v59 = vadd.f32 %v1765_v52, %v1764_v49 }
 0x138   : > { %1645 = vst [vmem:[%s2048_s21 + $0x30] sm:$0xff] %v1593_v53   ;;  %1653 = vst [vmem:[%s2048_s21 + $0x70] sm:$0xff] %v1633_v54   ;;  %v1076_v60 = vadd.f32 %v2034_v57, %v1037_v55  ;;  %v1092_v61 = vadd.f32 %v2034_v57, %v1053_v56 }
 0x139   : > { %v1038_v62 = vmul.f32 %v1718_v58, %v2029_v51  ;;  %v1054_v63 = vmul.f32 %v1766_v59, %v2029_v51 }
 0x13a   : > { %v1108_v2 = vmax.f32 %v1076_v60, 0.0  ;;  %v1124_v3 = vmax.f32 %v1092_v61, 0.0 }
 0x13b   : > { %v1077_v0 = vadd.f32 %v2034_v57, %v1038_v62  ;;  %v1093_v1 = vadd.f32 %v2034_v57, %v1054_v63 }
 0x13d   : > { %v1109_v4 = vmax.f32 %v1077_v0, 0.0  ;;  %v1125_v5 = vmax.f32 %v1093_v1, 0.0 }
 0x13f   : > { %v1598_v6 = vpack.c.bf16 %v1109_v4, %v1108_v2  ;;  %v1638_v7 = vpack.c.bf16 %v1125_v5, %v1124_v3 }
 0x141   : > { %1646 = vst [vmem:[%s2048_s21 + $0x38] sm:$0xff] %v1598_v6   ;;  %1654 = vst [vmem:[%s2048_s21 + $0x78] sm:$0xff] %v1638_v7  }
 0x142 PF: > { %s14_s17 = sadd.s32 1, %s1893_s17   ;;  %s2136_s15 = smov %s1889_s16 }
 0x143   : > { %p11_p5 = scmp.ge.s32.totalorder %s14_s17, 10   ;;  %s2137_s16 = smov %s2139_s18 }
 0x145   :  { %13 = sbr.rel (!%p11_p5) target bundleno = 2 (0x2), region = 87 }

// kernel: _lambda_.17
= control target key start
LH: loop header
LB: loop body
LE: loop exit
PB: predicated region body
PF: predicated region fallthrough
CT: control target
= control target key end

     0   :  { %s1675_s15 = smov 0   ;;  %s1677_s16 = smov 0   ;;  %s1849_s0 = inlined_call_operand.vmem [shape: bf16[512,128], index: 0, kind: input, shape index: {}]   ;;  %s1850_s1 = inlined_call_operand.vmem [shape: bf16[1,128,128], index: 1, kind: input, shape index: {}]   ;;  %s1851_s2 = inlined_call_operand.vmem [shape: f32[1,1,128], index: 2, kind: input, shape index: {}]   ;;  %s1852_s3 = inlined_call_operand.vmem [shape: f32[1,1,128], index: 3, kind: input, shape index: {}]   ;;  %s1853_s4 = inlined_call_operand.vmem [shape: bf16[512,128], index: 4, kind: output, shape index: {}]  }
   0x1   :  { %s1679_s17 = smov 0  }
   0x2 LB: > { %s40_s18 = sadd.s32 1, %s1644_s16  ;;  %p1298_p0 = scmp.ge.s32.totalorder %s1648_s17, 1  ;;  %s1648_s17 = sphi %s1679_s17, %s14_s17   ;;  %s1644_s16 = sphi %s1677_s16, %s1855_s16   ;;  %s1640_s15 = sphi %s1675_s15, %s1854_s15  }
   0x3   : > { %p42_p1 = scmp.ge.s32.totalorder %s40_s18, 2  ;;  %p250_p2 = scmp.lt.s32.totalorder %s1648_s17, 3 }
   0x5   : > { %s1857_s18 = smov (%p42_p1, %s40_s18), 0  ;;  %p251_p3 = pnand %p1298_p0, %p250_p2 }
   0x6   : > { %v1602_v0 = vld [vmem:[%s1850_s1] sm:$0xff] (!%p251_p3)   ;;  %s1299_s21 = sshll.u32 (!%p251_p3), %s1640_s15, 5  ;;  %v1603_v1 = vld [vmem:[%s1850_s1 + $0x8] sm:$0xff] (!%p251_p3)   ;;  %v1604_v2 = vld [vmem:[%s1850_s1 + $0x10] sm:$0xff] (!%p251_p3)  }
   0x7   : > { %254 = sbr.rel (%p251_p3) target bundleno = 288 (0x120), region = 36  ;;  %p310_p4 = scmp.lt.s32.totalorder (!%p251_p3), %s1299_s21, 63  ;;  %1514 = vmatprep.subr.bf16.mxu0 (!%p251_p3), %v1602_v0  ;;  %1562 = vmatprep.subr.bf16.mxu1 (!%p251_p3), %v1602_v0  ;;  %v1605_v3 = vld [vmem:[%s1850_s1 + $0x18] sm:$0xff] (!%p251_p3)   ;;  %v1606_v6 = vld [vmem:[%s1850_s1 + $0x20] sm:$0xff] (!%p251_p3)   ;;  %v1607_v7 = vld [vmem:[%s1850_s1 + $0x28] sm:$0xff] (!%p251_p3)  }
   0x8   : > { %1515 = vmatpush3.bf16.msra.mxu0 (!%p251_p3), %v1602_v0  ;;  %1570 = vmatpush3.bf16.msra.mxu1 (!%p251_p3), %v1602_v0  ;;  %v1608_v8 = vld [vmem:[%s1850_s1 + $0x30] sm:$0xff] (!%p251_p3)   ;;  %v1609_v9 = vld [vmem:[%s1850_s1 + $0x38] sm:$0xff] (!%p251_p3)   ;;  %v1746_v24 = vld [vmem:[%s1851_s2] ss:$0 sm:$0xff] (!%p251_p3) }
   0x9   : > { %1516 = vmatprep.subr.bf16.mxu0 (!%p251_p3), %v1603_v1  ;;  %1563 = vmatprep.subr.bf16.mxu1 (!%p251_p3), %v1603_v1  ;;  %v1751_v26 = vld [vmem:[%s1852_s3] ss:$0 sm:$0xff] (!%p251_p3) }
   0xc   : > { %1517 = vmatpush3.bf16.msra.mxu0 (!%p251_p3), %v1603_v1  ;;  %1571 = vmatpush3.bf16.msra.mxu1 (!%p251_p3), %v1603_v1 }
   0xd   : > { %1518 = vmatprep.subr.bf16.mxu0 (!%p251_p3), %v1604_v2  ;;  %1564 = vmatprep.subr.bf16.mxu1 (!%p251_p3), %v1604_v2 }
   0xe   : > { %s1859_s21 = smov (!%p310_p4, %s1299_s21), 63 }
   0xf   : > { %s1300_s26 = sshll.u32 %s1859_s21, 2 }
  0x10   : > { %s1710_s29 = scalar_lea.vmem %s1849_s0, %s1300_s26  ;;  %1519 = vmatpush3.bf16.msra.mxu0 %v1604_v2  ;;  %1572 = vmatpush3.bf16.msra.mxu1 %v1604_v2  ;;  %s1774_s24 = scalar_lea.vmem %s1853_s4, %s1300_s26 }
  0x11   : > { %v1610_v4 = vld [vmem:[%s1710_s29] sm:$0xff]   ;;  %1520 = vmatprep.subr.bf16.mxu0 %v1605_v3  ;;  %1565 = vmatprep.subr.bf16.mxu1 %v1605_v3  ;;  %v1612_v10 = vld [vmem:[%s1710_s29 + $0x8] sm:$0xff]   ;;  %v1614_v12 = vld [vmem:[%s1710_s29 + $0x10] sm:$0xff]  }
  0x12   : > { %v1611_v5 = vld [vmem:[%s1710_s29 + $0x40] sm:$0xff]   ;;  %1530 = vmatprep.mubr.bf16.mxu0 %v1610_v4  ;;  %v1613_v11 = vld [vmem:[%s1710_s29 + $0x48] sm:$0xff]   ;;  %v1615_v13 = vld [vmem:[%s1710_s29 + $0x50] sm:$0xff]  }
  0x13   : > { %1546 = vmatprep.mubr.bf16.mxu1 %v1611_v5  ;;  %v1616_v14 = vld [vmem:[%s1710_s29 + $0x18] sm:$0xff]   ;;  %v1618_v16 = vld [vmem:[%s1710_s29 + $0x20] sm:$0xff]   ;;  %v1620_v18 = vld [vmem:[%s1710_s29 + $0x28] sm:$0xff]  }
  0x14   : > { %1521 = vmatpush3.bf16.msra.mxu0 %v1605_v3  ;;  %1573 = vmatpush3.bf16.msra.mxu1 %v1605_v3  ;;  %v1617_v15 = vld [vmem:[%s1710_s29 + $0x58] sm:$0xff]   ;;  %v1619_v17 = vld [vmem:[%s1710_s29 + $0x60] sm:$0xff]   ;;  %v1621_v19 = vld [vmem:[%s1710_s29 + $0x68] sm:$0xff]  }
  0x15   : > { %1522 = vmatprep.subr.bf16.mxu0 %v1606_v6  ;;  %1566 = vmatprep.subr.bf16.mxu1 %v1606_v6  ;;  %v1622_v20 = vld [vmem:[%s1710_s29 + $0x30] sm:$0xff]   ;;  %v1624_v22 = vld [vmem:[%s1710_s29 + $0x38] sm:$0xff]  }
  0x16   : > { %v1623_v21 = vld [vmem:[%s1710_s29 + $0x70] sm:$0xff]   ;;  %v1625_v23 = vld [vmem:[%s1710_s29 + $0x78] sm:$0xff]  }
  0x18   : > { %1523 = vmatpush3.bf16.msra.mxu0 %v1606_v6  ;;  %1574 = vmatpush3.bf16.msra.mxu1 %v1606_v6 }
  0x19   : > { %1524 = vmatprep.subr.bf16.mxu0 %v1607_v7  ;;  %1567 = vmatprep.subr.bf16.mxu1 %v1607_v7 }
  0x1c   : > { %1525 = vmatpush3.bf16.msra.mxu0 %v1607_v7  ;;  %1575 = vmatpush3.bf16.msra.mxu1 %v1607_v7 }
  0x1d   : > { %1526 = vmatprep.subr.bf16.mxu0 %v1608_v8  ;;  %1568 = vmatprep.subr.bf16.mxu1 %v1608_v8 }
  0x20   : > { %1527 = vmatpush3.bf16.msra.mxu0 %v1608_v8  ;;  %1576 = vmatpush3.bf16.msra.mxu1 %v1608_v8 }
  0x21   : > { %1528 = vmatprep.subr.bf16.mxu0 %v1609_v9  ;;  %1569 = vmatprep.subr.bf16.mxu1 %v1609_v9 }
  0x24   : > { %1529 = vmatpush3.bf16.msra.mxu0 %v1609_v9  ;;  %1577 = vmatpush3.bf16.msra.mxu1 %v1609_v9 }
  0x27   : > { %1531 = vmatmul.mubr.bf16.vlgmr.msra.gmra.mrb[0].mxu0 %v1612_v10  ;;  %1547 = vmatmul.mubr.bf16.vlgmr.msra.gmra.mrb[0].mxu1 %v1613_v11 }
  0x28   : > { %1534 = vmatprep.mubr.bf16.mxu0 %v1614_v12  ;;  %1550 = vmatprep.mubr.bf16.mxu1 %v1615_v13 }
  0x2f   : > { %1535 = vmatmul.mubr.bf16.gmra.mrb[4].mxu0 %v1616_v14  ;;  %1551 = vmatmul.mubr.bf16.gmra.mrb[4].mxu1 %v1617_v15 }
  0x30   : > { %1538 = vmatprep.mubr.bf16.mxu0 %v1618_v16  ;;  %1554 = vmatprep.mubr.bf16.mxu1 %v1619_v17 }
  0x37   : > { %1539 = vmatmul.mubr.bf16.gmra.mrb[8].mxu0 %v1620_v18  ;;  %1555 = vmatmul.mubr.bf16.gmra.mrb[8].mxu1 %v1621_v19 }
  0x38   : > { %1542 = vmatprep.mubr.bf16.mxu0 %v1622_v20  ;;  %1558 = vmatprep.mubr.bf16.mxu1 %v1623_v21 }
  0x3f   : > { %1543 = vmatmul.mubr.bf16.gmra.mrb[12].mxu0 %v1624_v22  ;;  %1559 = vmatmul.mubr.bf16.gmra.mrb[12].mxu1 %v1625_v23 }
  0xfa   : > { %v1532_v25 = vpop.f32.mrb[0].mxu0  ;;  %v1548_v27 = vpop.f32.mrb[0].mxu1 }
  0xfb   : > { %v889_v28 = vmul.f32 %v1532_v25, %v1746_v24  ;;  %v905_v29 = vmul.f32 %v1548_v27, %v1746_v24  ;;  %v582_v30 = vpop.f32.mrb[1].mxu0  ;;  %v646_v31 = vpop.f32.mrb[1].mxu1 }
  0xfc   : > { %v887_v32 = vmul.f32 %v1746_v24, %v582_v30  ;;  %v903_v33 = vmul.f32 %v1746_v24, %v646_v31  ;;  %v1533_v34 = vpop.f32.mrb[2].mxu0  ;;  %v1549_v35 = vpop.f32.mrb[2].mxu1 }
  0xfd   : > { %v928_v36 = vadd.f32 %v1751_v26, %v889_v28  ;;  %v944_v37 = vadd.f32 %v1751_v26, %v905_v29  ;;  %v890_v38 = vmul.f32 %v1533_v34, %v1746_v24  ;;  %v906_v39 = vmul.f32 %v1549_v35, %v1746_v24  ;;  %v585_v40 = vpop.f32.mrb[3].mxu0  ;;  %v649_v41 = vpop.f32.mrb[3].mxu1 }
  0xfe   : > { %v926_v42 = vadd.f32 %v1751_v26, %v887_v32  ;;  %v942_v43 = vadd.f32 %v1751_v26, %v903_v33  ;;  %v888_v44 = vmul.f32 %v1746_v24, %v585_v40  ;;  %v904_v45 = vmul.f32 %v1746_v24, %v649_v41 }
  0xff   : > { %v929_v46 = vadd.f32 %v1751_v26, %v890_v38  ;;  %v945_v47 = vadd.f32 %v1751_v26, %v906_v39  ;;  %v960_v50 = vmax.f32 %v928_v36, 0.0  ;;  %v976_v51 = vmax.f32 %v944_v37, 0.0 }
 0x100   : > { %v927_v48 = vadd.f32 %v1751_v26, %v888_v44  ;;  %v943_v49 = vadd.f32 %v1751_v26, %v904_v45  ;;  %v958_v54 = vmax.f32 %v926_v42, 0.0  ;;  %v974_v55 = vmax.f32 %v942_v43, 0.0 }
 0x101   : > { %v961_v52 = vmax.f32 %v929_v46, 0.0  ;;  %v977_v53 = vmax.f32 %v945_v47, 0.0 }
 0x102   : > { %v959_v56 = vmax.f32 %v927_v48, 0.0  ;;  %v975_v57 = vmax.f32 %v943_v49, 0.0  ;;  %v1536_v58 = vpop.f32.mrb[4].mxu0  ;;  %v1552_v59 = vpop.f32.mrb[4].mxu1 }
 0x103   : > { %v1403_v60 = vpack.c.bf16 %v961_v52, %v960_v50  ;;  %v1443_v61 = vpack.c.bf16 %v977_v53, %v976_v51  ;;  %v893_v62 = vmul.f32 %v1536_v58, %v1746_v24  ;;  %v909_v63 = vmul.f32 %v1552_v59, %v1746_v24  ;;  %v598_v0 = vpop.f32.mrb[5].mxu0  ;;  %v662_v1 = vpop.f32.mrb[5].mxu1 }
 0x104   : > { %v1398_v2 = vpack.c.bf16 %v959_v56, %v958_v54  ;;  %v1438_v3 = vpack.c.bf16 %v975_v57, %v974_v55  ;;  %v891_v4 = vmul.f32 %v1746_v24, %v598_v0  ;;  %v907_v5 = vmul.f32 %v1746_v24, %v662_v1  ;;  %v1537_v6 = vpop.f32.mrb[6].mxu0  ;;  %v1553_v7 = vpop.f32.mrb[6].mxu1 }
 0x105   : > { %1475 = vst [vmem:[%s1774_s24 + $0x8] sm:$0xff] %v1403_v60   ;;  %1483 = vst [vmem:[%s1774_s24 + $0x48] sm:$0xff] %v1443_v61   ;;  %v932_v8 = vadd.f32 %v1751_v26, %v893_v62  ;;  %v948_v9 = vadd.f32 %v1751_v26, %v909_v63  ;;  %v894_v10 = vmul.f32 %v1537_v6, %v1746_v24  ;;  %v601_v12 = vpop.f32.mrb[7].mxu0  ;;  %v665_v13 = vpop.f32.mrb[7].mxu1 }
 0x106   : > { %v910_v11 = vmul.f32 %v1553_v7, %v1746_v24  ;;  %1399 = vst [vmem:[%s1774_s24] sm:$0xff] %v1398_v2   ;;  %1482 = vst [vmem:[%s1774_s24 + $0x40] sm:$0xff] %v1438_v3   ;;  %v930_v14 = vadd.f32 %v1751_v26, %v891_v4  ;;  %v946_v15 = vadd.f32 %v1751_v26, %v907_v5 }
 0x107   : > { %v892_v16 = vmul.f32 %v1746_v24, %v601_v12  ;;  %v908_v17 = vmul.f32 %v1746_v24, %v665_v13  ;;  %v933_v18 = vadd.f32 %v1751_v26, %v894_v10  ;;  %v964_v22 = vmax.f32 %v932_v8, 0.0 }
 0x108   : > { %v949_v19 = vadd.f32 %v1751_v26, %v910_v11  ;;  %v980_v23 = vmax.f32 %v948_v9, 0.0  ;;  %v962_v28 = vmax.f32 %v930_v14, 0.0  ;;  %v978_v29 = vmax.f32 %v946_v15, 0.0 }
 0x109   : > { %v931_v20 = vadd.f32 %v1751_v26, %v892_v16  ;;  %v947_v21 = vadd.f32 %v1751_v26, %v908_v17  ;;  %v965_v25 = vmax.f32 %v933_v18, 0.0 }
 0x10a   : > { %v981_v27 = vmax.f32 %v949_v19, 0.0  ;;  %v1540_v32 = vpop.f32.mrb[8].mxu0  ;;  %v1556_v33 = vpop.f32.mrb[8].mxu1 }
 0x10b   : > { %v963_v30 = vmax.f32 %v931_v20, 0.0  ;;  %v979_v31 = vmax.f32 %v947_v21, 0.0  ;;  %v1413_v34 = vpack.c.bf16 %v965_v25, %v964_v22  ;;  %v897_v36 = vmul.f32 %v1540_v32, %v1746_v24  ;;  %v614_v38 = vpop.f32.mrb[9].mxu0  ;;  %v678_v39 = vpop.f32.mrb[9].mxu1 }
 0x10c   : > { %v1453_v35 = vpack.c.bf16 %v981_v27, %v980_v23  ;;  %v913_v37 = vmul.f32 %v1556_v33, %v1746_v24  ;;  %v895_v42 = vmul.f32 %v1746_v24, %v614_v38  ;;  %v911_v43 = vmul.f32 %v1746_v24, %v678_v39  ;;  %v1541_v44 = vpop.f32.mrb[10].mxu0  ;;  %v1557_v45 = vpop.f32.mrb[10].mxu1 }
 0x10d   : > { %v1408_v40 = vpack.c.bf16 %v963_v30, %v962_v28  ;;  %v1448_v41 = vpack.c.bf16 %v979_v31, %v978_v29  ;;  %1477 = vst [vmem:[%s1774_s24 + $0x18] sm:$0xff] %v1413_v34   ;;  %v936_v46 = vadd.f32 %v1751_v26, %v897_v36  ;;  %v898_v48 = vmul.f32 %v1541_v44, %v1746_v24  ;;  %v617_v50 = vpop.f32.mrb[11].mxu0  ;;  %v681_v51 = vpop.f32.mrb[11].mxu1 }
 0x10e   : > { %1485 = vst [vmem:[%s1774_s24 + $0x58] sm:$0xff] %v1453_v35   ;;  %v952_v47 = vadd.f32 %v1751_v26, %v913_v37  ;;  %v914_v49 = vmul.f32 %v1557_v45, %v1746_v24  ;;  %v934_v52 = vadd.f32 %v1751_v26, %v895_v42  ;;  %v950_v53 = vadd.f32 %v1751_v26, %v911_v43 }
 0x10f   : > { %1476 = vst [vmem:[%s1774_s24 + $0x10] sm:$0xff] %v1408_v40   ;;  %1484 = vst [vmem:[%s1774_s24 + $0x50] sm:$0xff] %v1448_v41   ;;  %v896_v54 = vmul.f32 %v1746_v24, %v617_v50  ;;  %v912_v55 = vmul.f32 %v1746_v24, %v681_v51  ;;  %v937_v56 = vadd.f32 %v1751_v26, %v898_v48  ;;  %v968_v60 = vmax.f32 %v936_v46, 0.0 }
 0x110   : > { %v953_v57 = vadd.f32 %v1751_v26, %v914_v49  ;;  %v984_v61 = vmax.f32 %v952_v47, 0.0  ;;  %v966_v0 = vmax.f32 %v934_v52, 0.0  ;;  %v982_v1 = vmax.f32 %v950_v53, 0.0 }
 0x111   : > { %v935_v58 = vadd.f32 %v1751_v26, %v896_v54  ;;  %v951_v59 = vadd.f32 %v1751_v26, %v912_v55  ;;  %v969_v62 = vmax.f32 %v937_v56, 0.0 }
 0x112   : > { %v985_v63 = vmax.f32 %v953_v57, 0.0  ;;  %v1544_v4 = vpop.f32.mrb[12].mxu0  ;;  %v1560_v5 = vpop.f32.mrb[12].mxu1 }
 0x113   : > { %v967_v2 = vmax.f32 %v935_v58, 0.0  ;;  %v983_v3 = vmax.f32 %v951_v59, 0.0  ;;  %v1423_v6 = vpack.c.bf16 %v969_v62, %v968_v60  ;;  %v901_v8 = vmul.f32 %v1544_v4, %v1746_v24  ;;  %v630_v10 = vpop.f32.mrb[13].mxu0  ;;  %v694_v11 = vpop.f32.mrb[13].mxu1 }
 0x114   : > { %v1463_v7 = vpack.c.bf16 %v985_v63, %v984_v61  ;;  %v917_v9 = vmul.f32 %v1560_v5, %v1746_v24  ;;  %v899_v14 = vmul.f32 %v1746_v24, %v630_v10  ;;  %v915_v15 = vmul.f32 %v1746_v24, %v694_v11  ;;  %v1545_v16 = vpop.f32.mrb[14].mxu0  ;;  %v1561_v17 = vpop.f32.mrb[14].mxu1 }
 0x115   : > { %v1418_v12 = vpack.c.bf16 %v967_v2, %v966_v0  ;;  %v1458_v13 = vpack.c.bf16 %v983_v3, %v982_v1  ;;  %1479 = vst [vmem:[%s1774_s24 + $0x28] sm:$0xff] %v1423_v6   ;;  %v940_v18 = vadd.f32 %v1751_v26, %v901_v8  ;;  %v902_v20 = vmul.f32 %v1545_v16, %v1746_v24  ;;  %v633_v22 = vpop.f32.mrb[15].mxu0  ;;  %v697_v23 = vpop.f32.mrb[15].mxu1 }
 0x116   : > { %1487 = vst [vmem:[%s1774_s24 + $0x68] sm:$0xff] %v1463_v7   ;;  %v956_v19 = vadd.f32 %v1751_v26, %v917_v9  ;;  %v918_v21 = vmul.f32 %v1561_v17, %v1746_v24  ;;  %v938_v25 = vadd.f32 %v1751_v26, %v899_v14  ;;  %v954_v27 = vadd.f32 %v1751_v26, %v915_v15 }
 0x117   : > { %1478 = vst [vmem:[%s1774_s24 + $0x20] sm:$0xff] %v1418_v12   ;;  %1486 = vst [vmem:[%s1774_s24 + $0x60] sm:$0xff] %v1458_v13   ;;  %v900_v28 = vmul.f32 %v1746_v24, %v633_v22  ;;  %v916_v29 = vmul.f32 %v1746_v24, %v697_v23  ;;  %v941_v30 = vadd.f32 %v1751_v26, %v902_v20  ;;  %v972_v34 = vmax.f32 %v940_v18, 0.0 }
 0x118   : > { %v957_v31 = vadd.f32 %v1751_v26, %v918_v21  ;;  %v988_v35 = vmax.f32 %v956_v19, 0.0  ;;  %v970_v38 = vmax.f32 %v938_v25, 0.0  ;;  %v986_v39 = vmax.f32 %v954_v27, 0.0 }
 0x119   : > { %v939_v32 = vadd.f32 %v1751_v26, %v900_v28  ;;  %v955_v33 = vadd.f32 %v1751_v26, %v916_v29  ;;  %v973_v36 = vmax.f32 %v941_v30, 0.0 }
 0x11a   : > { %v989_v37 = vmax.f32 %v957_v31, 0.0 }
 0x11b   : > { %v971_v40 = vmax.f32 %v939_v32, 0.0  ;;  %v987_v24 = vmax.f32 %v955_v33, 0.0  ;;  %v1433_v41 = vpack.c.bf16 %v973_v36, %v972_v34 }
 0x11c   : > { %v1473_v42 = vpack.c.bf16 %v989_v37, %v988_v35 }
 0x11d   : > { %v1428_v43 = vpack.c.bf16 %v971_v40, %v970_v38  ;;  %v1468_v44 = vpack.c.bf16 %v987_v24, %v986_v39  ;;  %1481 = vst [vmem:[%s1774_s24 + $0x38] sm:$0xff] %v1433_v41  }
 0x11e   : > { %1489 = vst [vmem:[%s1774_s24 + $0x78] sm:$0xff] %v1473_v42  }
 0x11f   : > { %1480 = vst [vmem:[%s1774_s24 + $0x30] sm:$0xff] %v1428_v43   ;;  %1488 = vst [vmem:[%s1774_s24 + $0x70] sm:$0xff] %v1468_v44  }
 0x120 PF: > { %s14_s17 = sadd.s32 1, %s1648_s17   ;;  %s1854_s15 = smov %s1644_s16 }
 0x121   : > { %p11_p5 = scmp.ge.s32.totalorder %s14_s17, 4   ;;  %s1855_s16 = smov %s1857_s18 }
 0x123   :  { %13 = sbr.rel (!%p11_p5) target bundleno = 2 (0x2), region = 87 }

// kernel: _lambda_.16
= control target key start
LH: loop header
LB: loop body
LE: loop exit
PB: predicated region body
PF: predicated region fallthrough
CT: control target
= control target key end

     0   :  { %s3363_s6 = smov 0   ;;  %s5206_s0 = inlined_call_operand.vmem [shape: bf16[2,34,34,16], index: 0, kind: input, shape index: {}]   ;;  %s5207_s1 = inlined_call_operand.vmem [shape: bf16[2,32,32,16], index: 1, kind: output, shape index: {}]  }
   0x1 LB: > { %s3293_s7 = sadd.s32 4294967295, %s3351_s6   ;;  %p3297_p0 = scmp.ge.s32.totalorder %s3351_s6, 1  ;;  %s3351_s6 = sphi %s3363_s6, %s11_s6  }
   0x2   : > { %p87_p1 = scmp.lt.s32.totalorder %s3351_s6, 3 }
   0x4   : > { %p88_p2 = pnand %p3297_p0, %p87_p1 }
   0x5   : > { %p107_p3 = scmp.lt.s32.totalorder (!%p88_p2), %s3293_s7, 1  ;;  %vm607_vm0 = vsmask.f32 (!%p88_p2), 3328  ;;  %vm608_vm1 = vsmask.f32 (!%p88_p2), 7440  ;;  %vm2434_vm2 = vcmask (!%p88_p2), 1042432  }
   0x6   : > { %91 = sbr.rel (%p88_p2) target bundleno = 506 (0x1fa), region = 24  ;;  %vm2435_vm3 = vcmask (!%p88_p2), 1046532   ;;  %vm3109_vm5 = vcmask (!%p88_p2), 125952   ;;  %vm3440_vm6 = vmor (!%p88_p2), %vm607_vm0, %vm608_vm1 }
   0x7   : > { %vm3423_vm4 = vmor (!%p88_p2), %vm2434_vm2, %vm2435_vm3 }
   0xd   : > { %s5213_s7 = smov (!%p107_p3, %s3293_s7), 1 }
   0xe   : > { %s3336_s8 = smul.u32 680, %s5213_s7  ;;  %s3335_s12 = sshll.u32 %s5213_s7, 9 }
   0xf   : > { %s3473_s15 = scalar_lea.vmem %s5207_s1, %s3335_s12 }
  0x10   : > { %s3377_s11 = scalar_lea.vmem %s5206_s0, %s3336_s8 }
  0x11   : > { %v117_v0 = vld [vmem:[%s3377_s11] sm:$0xf]  ;;  %v118_v1 = vld [vmem:[%s3377_s11 + $0x4] sm:$0xf]  ;;  %v3382_v2 = vld [vmem:[%s3377_s11 + $0x14] sm:$0xf] }
  0x12   : > { %v3385_v3 = vld [vmem:[%s3377_s11 + $0x18] sm:$0xf]  ;;  %v3388_v4 = vld [vmem:[%s3377_s11 + $0x28] sm:$0xf]  ;;  %v3391_v5 = vld [vmem:[%s3377_s11 + $0x2c] sm:$0xf]  ;;  %v287_v6 = vmax.bf16 %v3382_v2, %v117_v0 }
  0x13   : > { %v288_v7 = vmax.bf16 %v3385_v3, %v118_v1  ;;  %v119_v8 = vld [vmem:[%s3377_s11 + $0x8] sm:$0xf]  ;;  %v3397_v9 = vld [vmem:[%s3377_s11 + $0x1c] sm:$0xf]  ;;  %v3400_v10 = vld [vmem:[%s3377_s11 + $0x30] sm:$0xf]  ;;  %v292_v16 = vmax.bf16 %v3388_v4, %v3382_v2  ;;  %v293_v17 = vmax.bf16 %v3391_v5, %v3385_v3 }
  0x14   : > { %v447_v11 = vmax.bf16 %v287_v6, %v3388_v4  ;;  %v289_v12 = vmax.bf16 %v3397_v9, %v119_v8  ;;  %v120_v13 = vld [vmem:[%s3377_s11 + $0xc] sm:$0xf]  ;;  %v3406_v14 = vld [vmem:[%s3377_s11 + $0x20] sm:$0xf]  ;;  %v3409_v15 = vld [vmem:[%s3377_s11 + $0x34] sm:$0xf]  ;;  %v294_v20 = vmax.bf16 %v3400_v10, %v3397_v9 }
  0x15   : > { %v448_v18 = vmax.bf16 %v288_v7, %v3391_v5  ;;  %v290_v19 = vmax.bf16 %v3406_v14, %v120_v13  ;;  %v295_v21 = vmax.bf16 %v3409_v15, %v3406_v14  ;;  %v121_v35 = vld [vmem:[%s3377_s11 + $0x10] sm:$0x1]  ;;  %v3435_v40 = vld [vmem:[%s3377_s11 + $0x24] sm:$0x1]  ;;  %v3448_v53 = vld [vmem:[%s3377_s11 + $0x38] sm:$0x1] }
  0x16   : > { %v611_v22 = vshrl.u32 %v447_v11, 16  ;;  %v614_v23 = vshll.u32 %v447_v11, 16  ;;  %v3301_v25 = vrot.slane %v447_v11, 9  ;;  %v449_v26 = vmax.bf16 %v289_v12, %v3400_v10  ;;  %v3456_v59 = vld [vmem:[%s3377_s11 + $0x3c] sm:$0xf] }
  0x17   : > { %v620_v27 = vshll.u32 %v448_v18, 16  ;;  %v2439_v28 = vrot.slane %v448_v18, 5  ;;  %v624_v29 = vshrl.u32 %v448_v18, 16  ;;  %v3429_v30 = vmax.bf16 %v290_v19, %v3409_v15  ;;  %v3462_v63 = vld [vmem:[%s3377_s11 + $0x40] sm:$0xf] }
  0x18   : > { %v613_v31 = vrot.slane %v611_v22, 4  ;;  %v616_v32 = vrot.slane %v614_v23, 5  ;;  %v630_v33 = vshll.u32 %v449_v26, 16  ;;  %v2442_v34 = vrot.slane %v449_v26, 5 }
  0x19   : > { %v622_v36 = vrot.slane %v620_v27, 5  ;;  %v2440_v37 = vsel %vm3423_vm4, %v3301_v25, %v2439_v28  ;;  %v626_v38 = vrot.slane %v624_v29, 4  ;;  %v2441_v39 = vrot.slane %v2439_v28, 4 }
  0x1a   : > { %v617_v41 = vor.u32 %v616_v32, %v613_v31  ;;  %v632_v42 = vrot.slane %v630_v33, 5  ;;  %v634_v43 = vshrl.u32 %v449_v26, 16  ;;  %v640_v44 = vshll.u32 %v3429_v30, 16  ;;  %v3482_v32 = vld [vmem:[%s3377_s11 + $0x44] sm:$0xf] }
  0x1b   : > { %v627_v46 = vor.u32 %v626_v38, %v622_v36  ;;  %v2443_v47 = vsel %vm3423_vm4, %v2441_v39, %v2442_v34  ;;  %v2444_v48 = vrot.slane %v2442_v34, 4  ;;  %v2445_v49 = vrot.slane %v3429_v30, 5 }
  0x1c   : > { %v618_v50 = vrot.slane %v617_v41, 4  ;;  %v636_v51 = vrot.slane %v634_v43, 4  ;;  %v642_v52 = vrot.slane %v640_v44, 5  ;;  %v291_v54 = vmax.bf16 %v3435_v40, %v121_v35 }
  0x1d   : > { %v628_v55 = vrot.slane %v627_v46, 4  ;;  %v2446_v56 = vsel %vm3423_vm4, %v2444_v48, %v2445_v49  ;;  %v644_v57 = vshrl.u32 %v3429_v30, 16  ;;  %v2447_v58 = vrot.slane %v2445_v49, 4  ;;  %v3501_v48 = vld [vmem:[%s3377_s11 + $0x48] sm:$0xf] }
  0x1e   : > { %v623_v60 = vsel %vm3440_vm6, %v618_v50, %v622_v36  ;;  %v637_v61 = vor.u32 %v636_v51, %v632_v42  ;;  %v451_v62 = vmax.bf16 %v291_v54, %v3448_v53  ;;  %v452_v0 = vmax.bf16 %v292_v16, %v3456_v59 }
  0x1f   : > { %v2146_v1 = vmax.bf16 %v623_v60, %v447_v11  ;;  %v633_v2 = vsel %vm3440_vm6, %v628_v55, %v632_v42  ;;  %v646_v3 = vrot.slane %v644_v57, 4  ;;  %v3468_v6 = vmax.bf16 %v293_v17, %v3462_v63 }
  0x20   : > { %v2147_v7 = vmax.bf16 %v633_v2, %v448_v18  ;;  %v638_v8 = vrot.slane %v637_v61, 4  ;;  %v650_v12 = vshll.u32 %v451_v62, 16  ;;  %v2448_v13 = vrot.slane %v451_v62, 5 }
  0x21   : > { %v2981_v11 = vmax.bf16 %v2440_v37, %v2146_v1  ;;  %v647_v16 = vor.u32 %v646_v3, %v642_v52  ;;  %v655_v19 = vshrl.u32 %v452_v0, 16  ;;  %v658_v22 = vshll.u32 %v452_v0, 16 }
  0x22   : > { %v2982_v23 = vmax.bf16 %v2443_v47, %v2147_v7  ;;  %v643_v17 = vsel %vm3440_vm6, %v638_v8, %v642_v52  ;;  %v652_v25 = vrot.slane %v650_v12, 5  ;;  %v2449_v27 = vsel %vm3423_vm4, %v2447_v58, %v2448_v13  ;;  %v3520_v8 = vld [vmem:[%s3377_s11 + $0x4c] sm:$0x1] }
  0x23   : > { %3110 = vst.msk [vmem:[%s3473_s15] sm:$0xf] %vm3109_vm5, %v2981_v11  ;;  %v2148_v18 = vmax.bf16 %v643_v17, %v449_v26  ;;  %v648_v28 = vrot.slane %v647_v16, 4  ;;  %v657_v29 = vrot.slane %v655_v19, 4  ;;  %v660_v31 = vrot.slane %v658_v22, 5 }
  0x24   : > { %3111 = vst.msk [vmem:[%s3473_s15 + $0x4] sm:$0xf] %vm3109_vm5, %v2982_v23  ;;  %v664_v33 = vshll.u32 %v3468_v6, 16  ;;  %v3302_v34 = vrot.slane %v452_v0, 9  ;;  %v2452_v35 = vrot.slane %v3468_v6, 5  ;;  %v454_v36 = vmax.bf16 %v294_v20, %v3482_v32 }
  0x25   : > { %v2983_v26 = vmax.bf16 %v2446_v56, %v2148_v18  ;;  %v653_v37 = vsel %vm3440_vm6, %v648_v28, %v652_v25  ;;  %v661_v38 = vor.u32 %v660_v31, %v657_v29  ;;  %v668_v39 = vshrl.u32 %v3468_v6, 16  ;;  %v3526_v16 = vld [vmem:[%s3377_s11 + $0x50] sm:$0xf]  ;;  %v3535_v18 = vld [vmem:[%s3377_s11 + $0x54] sm:$0xf] }
  0x26   : > { %v2149_v41 = vmax.bf16 %v653_v37, %v3429_v30  ;;  %v666_v42 = vrot.slane %v664_v33, 5  ;;  %v2453_v43 = vsel %vm3423_vm4, %v3302_v34, %v2452_v35  ;;  %v674_v44 = vshll.u32 %v454_v36, 16 }
  0x27   : > { %3112 = vst.msk [vmem:[%s3473_s15 + $0x8] sm:$0xf] %vm3109_vm5, %v2983_v26  ;;  %v662_v46 = vrot.slane %v661_v38, 4  ;;  %v670_v9 = vrot.slane %v668_v39, 4  ;;  %v2454_v20 = vrot.slane %v2452_v35, 4  ;;  %v2455_v47 = vrot.slane %v454_v36, 5 }
  0x28   : > { %v2984_v49 = vmax.bf16 %v2449_v27, %v2149_v41  ;;  %v676_v50 = vrot.slane %v674_v44, 5  ;;  %v455_v30 = vmax.bf16 %v295_v21, %v3501_v48  ;;  %v678_v51 = vshrl.u32 %v454_v36, 16  ;;  %v3547_v41 = vld [vmem:[%s3377_s11 + $0x58] sm:$0xf] }
  0x29   : > { %v667_v52 = vsel %vm3440_vm6, %v662_v46, %v666_v42  ;;  %v671_v54 = vor.u32 %v670_v9, %v666_v42  ;;  %v2456_v55 = vsel %vm3423_vm4, %v2454_v20, %v2455_v47  ;;  %v2457_v56 = vrot.slane %v2455_v47, 4 }
  0x2a   : > { %3113 = vst.msk [vmem:[%s3473_s15 + $0xc] sm:$0xf] %vm3109_vm5, %v2984_v49  ;;  %v2150_v57 = vmax.bf16 %v667_v52, %v452_v0  ;;  %v680_v58 = vrot.slane %v678_v51, 4  ;;  %v684_v60 = vshll.u32 %v455_v30, 16  ;;  %v2458_v61 = vrot.slane %v455_v30, 5 }
  0x2b   : > { %v672_v14 = vrot.slane %v671_v54, 4  ;;  %v296_v21 = vmax.bf16 %v3448_v53, %v3435_v40  ;;  %v688_v62 = vshrl.u32 %v455_v30, 16  ;;  %v297_v1 = vmax.bf16 %v3456_v59, %v3388_v4 }
  0x2c   : > { %v2985_v2 = vmax.bf16 %v2453_v43, %v2150_v57  ;;  %v681_v3 = vor.u32 %v680_v58, %v676_v50  ;;  %v686_v7 = vrot.slane %v684_v60, 5  ;;  %v2459_v0 = vsel %vm3423_vm4, %v2457_v56, %v2458_v61  ;;  %v3561_v60 = vld [vmem:[%s3377_s11 + $0x5c] sm:$0xf] }
  0x2d   : > { %v677_v12 = vsel %vm3440_vm6, %v672_v14, %v676_v50  ;;  %v456_v13 = vmax.bf16 %v296_v21, %v3520_v8  ;;  %v690_v11 = vrot.slane %v688_v62, 4  ;;  %v2460_v40 = vrot.slane %v2458_v61, 4 }
  0x2e   : > { %3114 = vst.msk [vmem:[%s3473_s15 + $0x10] sm:$0xf] %vm3109_vm5, %v2985_v2  ;;  %v2151_v4 = vmax.bf16 %v677_v12, %v3468_v6  ;;  %v682_v19 = vrot.slane %v681_v3, 4  ;;  %v298_v22 = vmax.bf16 %v3462_v63, %v3391_v5  ;;  %v457_v23 = vmax.bf16 %v297_v1, %v3526_v16 }
  0x2f   : > { %v691_v17 = vor.u32 %v690_v11, %v686_v7  ;;  %v694_v25 = vshll.u32 %v456_v13, 16  ;;  %v2461_v27 = vrot.slane %v456_v13, 5  ;;  %v299_v28 = vmax.bf16 %v3482_v32, %v3400_v10 }
  0x30   : > { %v2986_v29 = vmax.bf16 %v2456_v55, %v2151_v4  ;;  %v687_v6 = vsel %vm3440_vm6, %v682_v19, %v686_v7  ;;  %v458_v31 = vmax.bf16 %v298_v22, %v3535_v18  ;;  %v699_v33 = vshrl.u32 %v457_v23, 16  ;;  %v3577_v4 = vld [vmem:[%s3377_s11 + $0x60] sm:$0x1] }
  0x31   : > { %v2152_v34 = vmax.bf16 %v687_v6, %v454_v36  ;;  %v692_v5 = vrot.slane %v691_v17, 4  ;;  %v696_v35 = vrot.slane %v694_v25, 5  ;;  %v2462_v26 = vsel %vm3423_vm4, %v2460_v40, %v2461_v27 }
  0x32   : > { %3115 = vst.msk [vmem:[%s3473_s15 + $0x14] sm:$0xf] %vm3109_vm5, %v2986_v29  ;;  %v701_v37 = vrot.slane %v699_v33, 4  ;;  %v702_v38 = vshll.u32 %v457_v23, 16  ;;  %v708_v39 = vshll.u32 %v458_v31, 16  ;;  %v3303_v10 = vrot.slane %v457_v23, 9 }
  0x33   : > { %v2987_v42 = vmax.bf16 %v2459_v0, %v2152_v34  ;;  %v697_v43 = vsel %vm3440_vm6, %v692_v5, %v696_v35  ;;  %v2465_v44 = vrot.slane %v458_v31, 5  ;;  %v459_v36 = vmax.bf16 %v299_v28, %v3547_v41  ;;  %v3585_v33 = vld [vmem:[%s3377_s11 + $0x64] sm:$0xf] }
  0x34   : > { %v2153_v46 = vmax.bf16 %v697_v43, %v455_v30  ;;  %v704_v9 = vrot.slane %v702_v38, 5  ;;  %v710_v20 = vrot.slane %v708_v39, 5  ;;  %v712_v47 = vshrl.u32 %v458_v31, 16 }
  0x35   : > { %3116 = vst.msk [vmem:[%s3473_s15 + $0x18] sm:$0xf] %vm3109_vm5, %v2987_v42  ;;  %v2466_v49 = vsel %vm3423_vm4, %v3303_v10, %v2465_v44  ;;  %v718_v50 = vshll.u32 %v459_v36, 16  ;;  %v2467_v51 = vrot.slane %v2465_v44, 4  ;;  %v2468_v52 = vrot.slane %v459_v36, 5 }
  0x36   : > { %v2988_v54 = vmax.bf16 %v2462_v26, %v2153_v46  ;;  %v705_v55 = vor.u32 %v704_v9, %v701_v37  ;;  %v714_v56 = vrot.slane %v712_v47, 4  ;;  %v300_v57 = vmax.bf16 %v3501_v48, %v3409_v15  ;;  %v3593_v37 = vld [vmem:[%s3377_s11 + $0x6c] sm:$0xf] }
  0x37   : > { %v720_v58 = vrot.slane %v718_v50, 5  ;;  %v2469_v30 = vsel %vm3423_vm4, %v2467_v51, %v2468_v52  ;;  %v722_v61 = vshrl.u32 %v459_v36, 16  ;;  %v2470_v14 = vrot.slane %v2468_v52, 4 }
  0x38   : > { %3117 = vst.msk [vmem:[%s3473_s15 + $0x1c] sm:$0xf] %vm3109_vm5, %v2988_v54  ;;  %v706_v21 = vrot.slane %v705_v55, 4  ;;  %v715_v62 = vor.u32 %v714_v56, %v710_v20  ;;  %v460_v1 = vmax.bf16 %v300_v57, %v3561_v60  ;;  %v301_v2 = vmax.bf16 %v3520_v8, %v3448_v53 }
  0x39   : > { %v724_v3 = vrot.slane %v722_v61, 4  ;;  %v302_v15 = vmax.bf16 %v3526_v16, %v3456_v59  ;;  %v303_v7 = vmax.bf16 %v3535_v18, %v3462_v63  ;;  %v304_v0 = vmax.bf16 %v3547_v41, %v3482_v32 }
  0x3a   : > { %v711_v12 = vsel %vm3440_vm6, %v706_v21, %v710_v20  ;;  %v716_v13 = vrot.slane %v715_v62, 4  ;;  %v728_v11 = vshll.u32 %v460_v1, 16  ;;  %v2471_v40 = vrot.slane %v460_v1, 5 }
  0x3b   : > { %v2154_v53 = vmax.bf16 %v711_v12, %v457_v23  ;;  %v725_v19 = vor.u32 %v724_v3, %v720_v58  ;;  %v461_v59 = vmax.bf16 %v301_v2, %v3577_v4  ;;  %v732_v22 = vshrl.u32 %v460_v1, 16  ;;  %v3588_v23 = vld [vmem:[%s3377_s11 + $0x68] sm:$0xf] }
  0x3c   : > { %v721_v63 = vsel %vm3440_vm6, %v716_v13, %v720_v58  ;;  %v730_v32 = vrot.slane %v728_v11, 5  ;;  %v2472_v17 = vsel %vm3423_vm4, %v2470_v14, %v2471_v40  ;;  %v2473_v25 = vrot.slane %v2471_v40, 4 }
  0x3d   : > { %v2989_v27 = vmax.bf16 %v2466_v49, %v2154_v53  ;;  %v2155_v28 = vmax.bf16 %v721_v63, %v458_v31  ;;  %v726_v29 = vrot.slane %v725_v19, 4  ;;  %v734_v6 = vrot.slane %v732_v22, 4  ;;  %v3626_v19 = vld [vmem:[%s3377_s11 + $0x74] sm:$0x1] }
  0x3e   : > { %v738_v34 = vshll.u32 %v461_v59, 16  ;;  %v2474_v5 = vrot.slane %v461_v59, 5  ;;  %v462_v35 = vmax.bf16 %v302_v15, %v3585_v33  ;;  %v463_v26 = vmax.bf16 %v303_v7, %v3588_v23 }
  0x3f   : > { %3118 = vst.msk [vmem:[%s3473_s15 + $0x20] sm:$0xf] %vm3109_vm5, %v2989_v27  ;;  %v2990_v38 = vmax.bf16 %v2469_v30, %v2155_v28  ;;  %v731_v31 = vsel %vm3440_vm6, %v726_v29, %v730_v32  ;;  %v735_v39 = vor.u32 %v734_v6, %v730_v32  ;;  %v3600_v10 = vmax.bf16 %v304_v0, %v3593_v37  ;;  %v3617_v0 = vld [vmem:[%s3377_s11 + $0x70] sm:$0xf] }
  0x40   : > { %v2156_v42 = vmax.bf16 %v731_v31, %v459_v36  ;;  %v740_v43 = vrot.slane %v738_v34, 5  ;;  %v2475_v44 = vsel %vm3423_vm4, %v2473_v25, %v2474_v5  ;;  %v743_v46 = vshrl.u32 %v462_v35, 16 }
  0x41   : > { %3119 = vst.msk [vmem:[%s3473_s15 + $0x24] sm:$0xf] %vm3109_vm5, %v2990_v38  ;;  %v736_v9 = vrot.slane %v735_v39, 4  ;;  %v746_v20 = vshll.u32 %v462_v35, 16  ;;  %v752_v47 = vshll.u32 %v463_v26, 16  ;;  %v3304_v49 = vrot.slane %v462_v35, 9 }
  0x42   : > { %v2991_v50 = vmax.bf16 %v2472_v17, %v2156_v42  ;;  %v745_v51 = vrot.slane %v743_v46, 4  ;;  %v2478_v52 = vrot.slane %v463_v26, 5  ;;  %v756_v54 = vshrl.u32 %v463_v26, 16 }
  0x43   : > { %v741_v36 = vsel %vm3440_vm6, %v736_v9, %v740_v43  ;;  %v748_v55 = vrot.slane %v746_v20, 5  ;;  %v754_v56 = vrot.slane %v752_v47, 5  ;;  %v762_v57 = vshll.u32 %v3600_v10, 16  ;;  %v3640_v9 = vld [vmem:[%s3377_s11 + $0x78] sm:$0xf] }
  0x44   : > { %3120 = vst.msk [vmem:[%s3473_s15 + $0x28] sm:$0xf] %vm3109_vm5, %v2991_v50  ;;  %v2157_v58 = vmax.bf16 %v741_v36, %v460_v1  ;;  %v2479_v30 = vsel %vm3423_vm4, %v3304_v49, %v2478_v52  ;;  %v758_v61 = vrot.slane %v756_v54, 4  ;;  %v2480_v14 = vrot.slane %v2478_v52, 4  ;;  %v3649_v47 = vld [vmem:[%s3377_s11 + $0x7c] sm:$0xf] }
  0x45   : > { %v749_v21 = vor.u32 %v748_v55, %v745_v51  ;;  %v764_v62 = vrot.slane %v762_v57, 5  ;;  %v2481_v2 = vrot.slane %v3600_v10, 5  ;;  %v305_v3 = vmax.bf16 %v3561_v60, %v3501_v48  ;;  %v3663_v55 = vld [vmem:[%s3377_s11 + $0x80] sm:$0xf] }
  0x46   : > { %v2992_v15 = vmax.bf16 %v2475_v44, %v2157_v58  ;;  %v759_v7 = vor.u32 %v758_v61, %v754_v56  ;;  %v766_v1 = vshrl.u32 %v3600_v10, 16  ;;  %v306_v12 = vmax.bf16 %v3577_v4, %v3520_v8 }
  0x47   : > { %v750_v13 = vrot.slane %v749_v21, 4  ;;  %v2482_v11 = vsel %vm3423_vm4, %v2480_v14, %v2481_v2  ;;  %v465_v40 = vmax.bf16 %v305_v3, %v3617_v0  ;;  %v2483_v53 = vrot.slane %v2481_v2, 4 }
  0x48   : > { %3121 = vst.msk [vmem:[%s3473_s15 + $0x2c] sm:$0xf] %vm3109_vm5, %v2992_v15  ;;  %v760_v48 = vrot.slane %v759_v7, 4  ;;  %v768_v59 = vrot.slane %v766_v1, 4  ;;  %v466_v22 = vmax.bf16 %v306_v12, %v3626_v19  ;;  %v307_v63 = vmax.bf16 %v3585_v33, %v3526_v16 }
  0x49   : > { %v755_v8 = vsel %vm3440_vm6, %v750_v13, %v754_v56  ;;  %v772_v32 = vshll.u32 %v465_v40, 16  ;;  %v2484_v17 = vrot.slane %v465_v40, 5  ;;  %v776_v25 = vshrl.u32 %v465_v40, 16 }
  0x4a   : > { %v2158_v27 = vmax.bf16 %v755_v8, %v462_v35  ;;  %v765_v28 = vsel %vm3440_vm6, %v760_v48, %v764_v62  ;;  %v769_v29 = vor.u32 %v768_v59, %v764_v62  ;;  %v782_v6 = vshll.u32 %v466_v22, 16  ;;  %v3673_v48 = vld [vmem:[%s3377_s11 + $0x84] sm:$0xf] }
  0x4b   : > { %v2159_v34 = vmax.bf16 %v765_v28, %v463_v26  ;;  %v774_v5 = vrot.slane %v772_v32, 5  ;;  %v2485_v16 = vsel %vm3423_vm4, %v2483_v53, %v2484_v17  ;;  %v778_v38 = vrot.slane %v776_v25, 4 }
  0x4c   : > { %v2993_v31 = vmax.bf16 %v2479_v30, %v2158_v27  ;;  %v770_v39 = vrot.slane %v769_v29, 4  ;;  %v784_v42 = vrot.slane %v782_v6, 5  ;;  %v2486_v43 = vrot.slane %v2484_v17, 4  ;;  %v3683_v27 = vld [vmem:[%s3377_s11 + $0x88] sm:$0x1] }
  0x4d   : > { %v2994_v44 = vmax.bf16 %v2482_v11, %v2159_v34  ;;  %v779_v35 = vor.u32 %v778_v38, %v774_v5  ;;  %v2487_v46 = vrot.slane %v466_v22, 5  ;;  %v308_v20 = vmax.bf16 %v3588_v23, %v3535_v18 }
  0x4e   : > { %3122 = vst.msk [vmem:[%s3473_s15 + $0x30] sm:$0xf] %vm3109_vm5, %v2993_v31  ;;  %v775_v26 = vsel %vm3440_vm6, %v770_v39, %v774_v5  ;;  %v467_v49 = vmax.bf16 %v307_v63, %v3640_v9  ;;  %v309_v50 = vmax.bf16 %v3593_v37, %v3547_v41  ;;  %v310_v51 = vmax.bf16 %v3617_v0, %v3561_v60 }
  0x4f   : > { %3123 = vst.msk [vmem:[%s3473_s15 + $0x34] sm:$0xf] %vm3109_vm5, %v2994_v44  ;;  %v2160_v52 = vmax.bf16 %v775_v26, %v3600_v10  ;;  %v780_v18 = vrot.slane %v779_v35, 4  ;;  %v2488_v54 = vsel %vm3423_vm4, %v2486_v43, %v2487_v46  ;;  %v468_v36 = vmax.bf16 %v308_v20, %v3649_v47 }
  0x50   : > { %v787_v56 = vshrl.u32 %v467_v49, 16  ;;  %v790_v57 = vshll.u32 %v467_v49, 16  ;;  %v3305_v58 = vrot.slane %v467_v49, 9  ;;  %v469_v41 = vmax.bf16 %v309_v50, %v3663_v55 }
  0x51   : > { %v2995_v30 = vmax.bf16 %v2485_v16, %v2160_v52  ;;  %v785_v60 = vsel %vm3440_vm6, %v780_v18, %v784_v42  ;;  %v796_v10 = vshll.u32 %v468_v36, 16  ;;  %v2491_v61 = vrot.slane %v468_v36, 5 }
  0x52   : > { %v2161_v14 = vmax.bf16 %v785_v60, %v465_v40  ;;  %v789_v21 = vrot.slane %v787_v56, 4  ;;  %v792_v62 = vrot.slane %v790_v57, 5  ;;  %v800_v2 = vshrl.u32 %v468_v36, 16 }
  0x53   : > { %3124 = vst.msk [vmem:[%s3473_s15 + $0x38] sm:$0xf] %vm3109_vm5, %v2995_v30  ;;  %v798_v3 = vrot.slane %v796_v10, 5  ;;  %v2492_v15 = vsel %vm3423_vm4, %v3305_v58, %v2491_v61  ;;  %v806_v7 = vshll.u32 %v469_v41, 16  ;;  %v2493_v1 = vrot.slane %v2491_v61, 4 }
  0x54   : > { %v2996_v12 = vmax.bf16 %v2488_v54, %v2161_v14  ;;  %v793_v13 = vor.u32 %v792_v62, %v789_v21  ;;  %v802_v11 = vrot.slane %v800_v2, 4  ;;  %v2494_v53 = vrot.slane %v469_v41, 5  ;;  %v3707_v30 = vld [vmem:[%s3377_s11 + $0x90] sm:$0xf]  ;;  %v3713_v21 = vld [vmem:[%s3377_s11 + $0x94] sm:$0xf] }
  0x55   : > { %v808_v40 = vrot.slane %v806_v7, 5  ;;  %v470_v59 = vmax.bf16 %v310_v51, %v3673_v48  ;;  %v810_v22 = vshrl.u32 %v469_v41, 16  ;;  %v311_v63 = vmax.bf16 %v3626_v19, %v3577_v4 }
  0x56   : > { %3125 = vst.msk [vmem:[%s3473_s15 + $0x3c] sm:$0xf] %vm3109_vm5, %v2996_v12  ;;  %v794_v8 = vrot.slane %v793_v13, 4  ;;  %v803_v32 = vor.u32 %v802_v11, %v798_v3  ;;  %v2495_v17 = vsel %vm3423_vm4, %v2493_v1, %v2494_v53  ;;  %v2496_v25 = vrot.slane %v2494_v53, 4 }
  0x57   : > { %v812_v28 = vrot.slane %v810_v22, 4  ;;  %v816_v29 = vshll.u32 %v470_v59, 16  ;;  %v2497_v6 = vrot.slane %v470_v59, 5  ;;  %v471_v34 = vmax.bf16 %v311_v63, %v3683_v27 }
  0x58   : > { %v799_v5 = vsel %vm3440_vm6, %v794_v8, %v798_v3  ;;  %v804_v4 = vrot.slane %v803_v32, 4  ;;  %v820_v16 = vshrl.u32 %v470_v59, 16  ;;  %v312_v38 = vmax.bf16 %v3640_v9, %v3585_v33  ;;  %v3695_v33 = vld [vmem:[%s3377_s11 + $0x8c] sm:$0xf] }
  0x59   : > { %v2162_v31 = vmax.bf16 %v799_v5, %v467_v49  ;;  %v813_v39 = vor.u32 %v812_v28, %v808_v40  ;;  %v818_v42 = vrot.slane %v816_v29, 5  ;;  %v2498_v43 = vsel %vm3423_vm4, %v2496_v25, %v2497_v6 }
  0x5a   : > { %v809_v44 = vsel %vm3440_vm6, %v804_v4, %v808_v40  ;;  %v822_v35 = vrot.slane %v820_v16, 4  ;;  %v826_v46 = vshll.u32 %v471_v34, 16  ;;  %v2499_v20 = vrot.slane %v2497_v6, 4  ;;  %v3723_v40 = vld [vmem:[%s3377_s11 + $0x98] sm:$0xf] }
  0x5b   : > { %v2997_v26 = vmax.bf16 %v2492_v15, %v2162_v31  ;;  %v2163_v50 = vmax.bf16 %v809_v44, %v468_v36  ;;  %v814_v51 = vrot.slane %v813_v39, 4  ;;  %v2500_v52 = vrot.slane %v471_v34, 5 }
  0x5c   : > { %v823_v49 = vor.u32 %v822_v35, %v818_v42  ;;  %v828_v18 = vrot.slane %v826_v46, 5  ;;  %v313_v54 = vmax.bf16 %v3649_v47, %v3588_v23  ;;  %v472_v56 = vmax.bf16 %v312_v38, %v3695_v33 }
  0x5d   : > { %3126 = vst.msk [vmem:[%s3473_s15 + $0x40] sm:$0xf] %vm3109_vm5, %v2997_v26  ;;  %v2998_v57 = vmax.bf16 %v2495_v17, %v2163_v50  ;;  %v819_v58 = vsel %vm3440_vm6, %v814_v51, %v818_v42  ;;  %v2501_v36 = vsel %vm3423_vm4, %v2499_v20, %v2500_v52  ;;  %v314_v60 = vmax.bf16 %v3663_v55, %v3593_v37  ;;  %v3741_v20 = vld [vmem:[%s3377_s11 + $0x9c] sm:$0x1] }
  0x5e   : > { %v2164_v10 = vmax.bf16 %v819_v58, %v469_v41  ;;  %v824_v61 = vrot.slane %v823_v49, 4  ;;  %v473_v23 = vmax.bf16 %v313_v54, %v3707_v30  ;;  %v831_v14 = vshrl.u32 %v472_v56, 16 }
  0x5f   : > { %3127 = vst.msk [vmem:[%s3473_s15 + $0x44] sm:$0xf] %vm3109_vm5, %v2998_v57  ;;  %v834_v62 = vshll.u32 %v472_v56, 16  ;;  %v3306_v2 = vrot.slane %v472_v56, 9  ;;  %v474_v3 = vmax.bf16 %v314_v60, %v3713_v21  ;;  %v315_v15 = vmax.bf16 %v3673_v48, %v3617_v0 }
  0x60   : > { %v2999_v7 = vmax.bf16 %v2498_v43, %v2164_v10  ;;  %v829_v37 = vsel %vm3440_vm6, %v824_v61, %v828_v18  ;;  %v833_v41 = vrot.slane %v831_v14, 4  ;;  %v840_v1 = vshll.u32 %v473_v23, 16  ;;  %v3754_v61 = vld [vmem:[%s3377_s11 + $0xa4] sm:$0xf] }
  0x61   : > { %v2165_v12 = vmax.bf16 %v829_v37, %v470_v59  ;;  %v836_v13 = vrot.slane %v834_v62, 5  ;;  %v2504_v11 = vrot.slane %v473_v23, 5  ;;  %v844_v53 = vshrl.u32 %v473_v23, 16 }
  0x62   : > { %3128 = vst.msk [vmem:[%s3473_s15 + $0x48] sm:$0xf] %vm3109_vm5, %v2999_v7  ;;  %v842_v22 = vrot.slane %v840_v1, 5  ;;  %v850_v63 = vshll.u32 %v474_v3, 16  ;;  %v2507_v8 = vrot.slane %v474_v3, 5  ;;  %v475_v0 = vmax.bf16 %v315_v15, %v3723_v40 }
  0x63   : > { %v3000_v32 = vmax.bf16 %v2501_v36, %v2165_v12  ;;  %v837_v17 = vor.u32 %v836_v13, %v833_v41  ;;  %v2505_v25 = vsel %vm3423_vm4, %v3306_v2, %v2504_v11  ;;  %v846_v28 = vrot.slane %v844_v53, 4 }
  0x64   : > { %v852_v59 = vrot.slane %v850_v63, 5  ;;  %v2506_v29 = vrot.slane %v2504_v11, 4  ;;  %v854_v6 = vshrl.u32 %v474_v3, 16  ;;  %v860_v34 = vshll.u32 %v475_v0, 16  ;;  %v3773_v63 = vld [vmem:[%s3377_s11 + $0xa8] sm:$0xf] }
  0x65   : > { %3129 = vst.msk [vmem:[%s3473_s15 + $0x4c] sm:$0xf] %vm3109_vm5, %v3000_v32  ;;  %v838_v5 = vrot.slane %v837_v17, 4  ;;  %v847_v4 = vor.u32 %v846_v28, %v842_v22  ;;  %v2509_v16 = vrot.slane %v2507_v8, 4  ;;  %v2510_v38 = vrot.slane %v475_v0, 5 }
  0x66   : > { %v2508_v31 = vsel %vm3423_vm4, %v2506_v29, %v2507_v8  ;;  %v856_v39 = vrot.slane %v854_v6, 4  ;;  %v862_v42 = vrot.slane %v860_v34, 5  ;;  %v316_v43 = vmax.bf16 %v3683_v27, %v3626_v19 }
  0x67   : > { %v843_v44 = vsel %vm3440_vm6, %v838_v5, %v842_v22  ;;  %v848_v35 = vrot.slane %v847_v4, 4  ;;  %v2511_v46 = vsel %vm3423_vm4, %v2509_v16, %v2510_v38  ;;  %v864_v26 = vshrl.u32 %v475_v0, 16 }
  0x68   : > { %v2166_v50 = vmax.bf16 %v843_v44, %v472_v56  ;;  %v857_v51 = vor.u32 %v856_v39, %v852_v59  ;;  %v476_v52 = vmax.bf16 %v316_v43, %v3741_v20  ;;  %v2512_v49 = vrot.slane %v2510_v38, 4  ;;  %v3751_v56 = vld [vmem:[%s3377_s11 + $0xa0] sm:$0xf]  ;;  %v3788_v43 = vld [vmem:[%s3377_s11 + $0xac] sm:$0xf] }
  0x69   : > { %v853_v19 = vsel %vm3440_vm6, %v848_v35, %v852_v59  ;;  %v866_v18 = vrot.slane %v864_v26, 4  ;;  %v317_v54 = vmax.bf16 %v3695_v33, %v3640_v9  ;;  %v318_v57 = vmax.bf16 %v3707_v30, %v3649_v47 }
  0x6a   : > { %v3001_v58 = vmax.bf16 %v2505_v25, %v2166_v50  ;;  %v2167_v36 = vmax.bf16 %v853_v19, %v473_v23  ;;  %v858_v60 = vrot.slane %v857_v51, 4  ;;  %v870_v10 = vshll.u32 %v476_v52, 16 }
  0x6b   : > { %v867_v14 = vor.u32 %v866_v18, %v862_v42  ;;  %v2513_v62 = vrot.slane %v476_v52, 5  ;;  %v477_v2 = vmax.bf16 %v317_v54, %v3751_v56  ;;  %v3758_v15 = vmax.bf16 %v318_v57, %v3754_v61 }
  0x6c   : > { %3130 = vst.msk [vmem:[%s3473_s15 + $0x50] sm:$0xf] %vm3109_vm5, %v3001_v58  ;;  %v3002_v9 = vmax.bf16 %v2508_v31, %v2167_v36  ;;  %v863_v47 = vsel %vm3440_vm6, %v858_v60, %v862_v42  ;;  %v872_v23 = vrot.slane %v870_v10, 5  ;;  %v319_v7 = vmax.bf16 %v3713_v21, %v3663_v55  ;;  %v3804_v58 = vld [vmem:[%s3377_s11 + $0xb0] sm:$0x1] }
  0x6d   : > { %v2168_v37 = vmax.bf16 %v863_v47, %v474_v3  ;;  %v868_v41 = vrot.slane %v867_v14, 4  ;;  %v2514_v1 = vsel %vm3423_vm4, %v2512_v49, %v2513_v62  ;;  %v875_v12 = vshrl.u32 %v477_v2, 16 }
  0x6e   : > { %3131 = vst.msk [vmem:[%s3473_s15 + $0x54] sm:$0xf] %vm3109_vm5, %v3002_v9  ;;  %v878_v13 = vshll.u32 %v477_v2, 16  ;;  %v884_v11 = vshll.u32 %v3758_v15, 16  ;;  %v3307_v53 = vrot.slane %v477_v2, 9  ;;  %v2517_v22 = vrot.slane %v3758_v15, 5 }
  0x6f   : > { %v3003_v8 = vmax.bf16 %v2511_v46, %v2168_v37  ;;  %v873_v55 = vsel %vm3440_vm6, %v868_v41, %v872_v23  ;;  %v877_v3 = vrot.slane %v875_v12, 4  ;;  %v479_v32 = vmax.bf16 %v319_v7, %v3773_v63  ;;  %v3812_v7 = vld [vmem:[%s3377_s11 + $0xb4] sm:$0xf] }
  0x70   : > { %v2169_v17 = vmax.bf16 %v873_v55, %v475_v0  ;;  %v880_v25 = vrot.slane %v878_v13, 5  ;;  %v886_v28 = vrot.slane %v884_v11, 5  ;;  %v2518_v59 = vsel %vm3423_vm4, %v3307_v53, %v2517_v22 }
  0x71   : > { %3132 = vst.msk [vmem:[%s3473_s15 + $0x58] sm:$0xf] %vm3109_vm5, %v3003_v8  ;;  %v888_v29 = vshrl.u32 %v3758_v15, 16  ;;  %v894_v6 = vshll.u32 %v479_v32, 16  ;;  %v2519_v34 = vrot.slane %v2517_v22, 4  ;;  %v2520_v5 = vrot.slane %v479_v32, 5 }
  0x72   : > { %v3004_v4 = vmax.bf16 %v2514_v1, %v2169_v17  ;;  %v881_v16 = vor.u32 %v880_v25, %v877_v3  ;;  %v320_v38 = vmax.bf16 %v3723_v40, %v3673_v48  ;;  %v898_v0 = vshrl.u32 %v479_v32, 16  ;;  %v3818_v1 = vld [vmem:[%s3377_s11 + $0xb8] sm:$0xf] }
  0x73   : > { %v890_v31 = vrot.slane %v888_v29, 4  ;;  %v896_v39 = vrot.slane %v894_v6, 5  ;;  %v2521_v42 = vsel %vm3423_vm4, %v2519_v34, %v2520_v5  ;;  %v2522_v44 = vrot.slane %v2520_v5, 4  ;;  %v3827_v29 = vld [vmem:[%s3377_s11 + $0xbc] sm:$0xf] }
  0x74   : > { %3133 = vst.msk [vmem:[%s3473_s15 + $0x5c] sm:$0xf] %vm3109_vm5, %v3004_v4  ;;  %v882_v35 = vrot.slane %v881_v16, 4  ;;  %v480_v46 = vmax.bf16 %v320_v38, %v3788_v43  ;;  %v900_v26 = vrot.slane %v898_v0, 4  ;;  %v321_v50 = vmax.bf16 %v3741_v20, %v3683_v27 }
  0x75   : > { %v891_v48 = vor.u32 %v890_v31, %v886_v28  ;;  %v322_v51 = vmax.bf16 %v3751_v56, %v3695_v33  ;;  %v323_v52 = vmax.bf16 %v3754_v61, %v3707_v30  ;;  %v324_v49 = vmax.bf16 %v3773_v63, %v3713_v21 }
  0x76   : > { %v887_v19 = vsel %vm3440_vm6, %v882_v35, %v886_v28  ;;  %v901_v18 = vor.u32 %v900_v26, %v896_v39  ;;  %v904_v54 = vshll.u32 %v480_v46, 16  ;;  %v2523_v57 = vrot.slane %v480_v46, 5  ;;  %v3841_v35 = vld [vmem:[%s3377_s11 + $0xc0] sm:$0xf] }
  0x77   : > { %v2170_v27 = vmax.bf16 %v887_v19, %v477_v2  ;;  %v892_v36 = vrot.slane %v891_v48, 4  ;;  %v481_v33 = vmax.bf16 %v321_v50, %v3804_v58  ;;  %v908_v60 = vshrl.u32 %v480_v46, 16 }
  0x78   : > { %v902_v30 = vrot.slane %v901_v18, 4  ;;  %v906_v10 = vrot.slane %v904_v54, 5  ;;  %v2524_v21 = vsel %vm3423_vm4, %v2522_v44, %v2523_v57  ;;  %v2525_v14 = vrot.slane %v2523_v57, 4 }
  0x79   : > { %v3005_v62 = vmax.bf16 %v2518_v59, %v2170_v27  ;;  %v897_v9 = vsel %vm3440_vm6, %v892_v36, %v896_v39  ;;  %v910_v47 = vrot.slane %v908_v60, 4  ;;  %v914_v23 = vshll.u32 %v481_v33, 16 }
  0x7a   : > { %v2171_v2 = vmax.bf16 %v897_v9, %v3758_v15  ;;  %v907_v37 = vsel %vm3440_vm6, %v902_v30, %v906_v10  ;;  %v2526_v41 = vrot.slane %v481_v33, 5  ;;  %v482_v12 = vmax.bf16 %v322_v51, %v3812_v7 }
  0x7b   : > { %3134 = vst.msk [vmem:[%s3473_s15 + $0x60] sm:$0xf] %vm3109_vm5, %v3005_v62  ;;  %v2172_v13 = vmax.bf16 %v907_v37, %v479_v32  ;;  %v911_v11 = vor.u32 %v910_v47, %v906_v10  ;;  %v916_v53 = vrot.slane %v914_v23, 5  ;;  %v483_v22 = vmax.bf16 %v323_v52, %v3818_v1 }
  0x7c   : > { %v3006_v8 = vmax.bf16 %v2521_v42, %v2171_v2  ;;  %v2527_v15 = vsel %vm3423_vm4, %v2525_v14, %v2526_v41  ;;  %v919_v55 = vshrl.u32 %v482_v12, 16  ;;  %v922_v3 = vshll.u32 %v482_v12, 16  ;;  %v3853_v14 = vld [vmem:[%s3377_s11 + $0xc4] sm:$0x1] }
  0x7d   : > { %v3007_v17 = vmax.bf16 %v2524_v21, %v2172_v13  ;;  %v912_v25 = vrot.slane %v911_v11, 4  ;;  %v928_v28 = vshll.u32 %v483_v22, 16  ;;  %v3308_v59 = vrot.slane %v482_v12, 9 }
  0x7e   : > { %3135 = vst.msk [vmem:[%s3473_s15 + $0x64] sm:$0xf] %vm3109_vm5, %v3006_v8  ;;  %v921_v32 = vrot.slane %v919_v55, 4  ;;  %v924_v6 = vrot.slane %v922_v3, 5  ;;  %v2530_v34 = vrot.slane %v483_v22, 5  ;;  %v484_v5 = vmax.bf16 %v324_v49, %v3827_v29 }
  0x7f   : > { %3136 = vst.msk [vmem:[%s3473_s15 + $0x68] sm:$0xf] %vm3109_vm5, %v3007_v17  ;;  %v917_v4 = vsel %vm3440_vm6, %v912_v25, %v916_v53  ;;  %v930_v16 = vrot.slane %v928_v28, 5  ;;  %v932_v38 = vshrl.u32 %v483_v22, 16  ;;  %v325_v0 = vmax.bf16 %v3788_v43, %v3723_v40 }
  0x80   : > { %v2173_v31 = vmax.bf16 %v917_v4, %v480_v46  ;;  %v925_v39 = vor.u32 %v924_v6, %v921_v32  ;;  %v2531_v42 = vsel %vm3423_vm4, %v3308_v59, %v2530_v34  ;;  %v938_v44 = vshll.u32 %v484_v5, 16  ;;  %v3877_v32 = vld [vmem:[%s3377_s11 + $0xcc] sm:$0xf] }
  0x81   : > { %v934_v26 = vrot.slane %v932_v38, 4  ;;  %v2532_v50 = vrot.slane %v2530_v34, 4  ;;  %v2533_v48 = vrot.slane %v484_v5, 5  ;;  %v485_v51 = vmax.bf16 %v325_v0, %v3841_v35 }
  0x82   : > { %v3008_v52 = vmax.bf16 %v2527_v15, %v2173_v31  ;;  %v926_v49 = vrot.slane %v925_v39, 4  ;;  %v940_v19 = vrot.slane %v938_v44, 5  ;;  %v942_v18 = vshrl.u32 %v484_v5, 16  ;;  %v3863_v15 = vld [vmem:[%s3377_s11 + $0xc8] sm:$0xf] }
  0x83   : > { %v935_v40 = vor.u32 %v934_v26, %v930_v16  ;;  %v2534_v46 = vsel %vm3423_vm4, %v2532_v50, %v2533_v48  ;;  %v948_v54 = vshll.u32 %v485_v51, 16  ;;  %v2535_v57 = vrot.slane %v2533_v48, 4 }
  0x84   : > { %3137 = vst.msk [vmem:[%s3473_s15 + $0x6c] sm:$0xf] %vm3109_vm5, %v3008_v52  ;;  %v931_v27 = vsel %vm3440_vm6, %v926_v49, %v930_v16  ;;  %v944_v36 = vrot.slane %v942_v18, 4  ;;  %v2536_v33 = vrot.slane %v485_v51, 5  ;;  %v326_v60 = vmax.bf16 %v3804_v58, %v3741_v20  ;;  %v3881_v16 = vld [vmem:[%s3377_s11 + $0xd0] sm:$0xf] }
  0x85   : > { %v2174_v30 = vmax.bf16 %v931_v27, %v482_v12  ;;  %v936_v10 = vrot.slane %v935_v40, 4  ;;  %v950_v21 = vrot.slane %v948_v54, 5  ;;  %v952_v62 = vshrl.u32 %v485_v51, 16  ;;  %v3891_v49 = vld [vmem:[%s3377_s11 + $0xd4] sm:$0xf] }
  0x86   : > { %v945_v9 = vor.u32 %v944_v36, %v940_v19  ;;  %v2537_v47 = vsel %vm3423_vm4, %v2535_v57, %v2536_v33  ;;  %v486_v23 = vmax.bf16 %v326_v60, %v3853_v14  ;;  %v2538_v2 = vrot.slane %v2536_v33, 4 }
  0x87   : > { %v3009_v37 = vmax.bf16 %v2531_v42, %v2174_v30  ;;  %v941_v41 = vsel %vm3440_vm6, %v936_v10, %v940_v19  ;;  %v954_v20 = vrot.slane %v952_v62, 4  ;;  %v327_v12 = vmax.bf16 %v3812_v7, %v3751_v56 }
  0x88   : > { %v2175_v13 = vmax.bf16 %v941_v41, %v483_v22  ;;  %v946_v11 = vrot.slane %v945_v9, 4  ;;  %v958_v53 = vshll.u32 %v486_v23, 16  ;;  %v2539_v8 = vrot.slane %v486_v23, 5 }
  0x89   : > { %3138 = vst.msk [vmem:[%s3473_s15 + $0x70] sm:$0xf] %vm3109_vm5, %v3009_v37  ;;  %v955_v55 = vor.u32 %v954_v20, %v950_v21  ;;  %v328_v3 = vmax.bf16 %v3818_v1, %v3754_v61  ;;  %v487_v17 = vmax.bf16 %v327_v12, %v3863_v15  ;;  %v329_v25 = vmax.bf16 %v3827_v29, %v3773_v63  ;;  %v3909_v12 = vld [vmem:[%s3377_s11 + $0xd8] sm:$0x1] }
  0x8a   : > { %v3010_v56 = vmax.bf16 %v2534_v46, %v2175_v13  ;;  %v951_v22 = vsel %vm3440_vm6, %v946_v11, %v950_v21  ;;  %v960_v28 = vrot.slane %v958_v53, 5  ;;  %v2540_v59 = vsel %vm3423_vm4, %v2538_v2, %v2539_v8 }
  0x8b   : > { %v2176_v6 = vmax.bf16 %v951_v22, %v484_v5  ;;  %v956_v34 = vrot.slane %v955_v55, 4  ;;  %v488_v4 = vmax.bf16 %v328_v3, %v3877_v32  ;;  %v963_v61 = vshrl.u32 %v487_v17, 16 }
  0x8c   : > { %3139 = vst.msk [vmem:[%s3473_s15 + $0x74] sm:$0xf] %vm3109_vm5, %v3010_v56  ;;  %v966_v63 = vshll.u32 %v487_v17, 16  ;;  %v3309_v38 = vrot.slane %v487_v17, 9  ;;  %v489_v0 = vmax.bf16 %v329_v25, %v3881_v16  ;;  %v330_v31 = vmax.bf16 %v3841_v35, %v3788_v43 }
  0x8d   : > { %v3011_v39 = vmax.bf16 %v2537_v47, %v2176_v6  ;;  %v961_v5 = vsel %vm3440_vm6, %v956_v34, %v960_v28  ;;  %v965_v42 = vrot.slane %v963_v61, 4  ;;  %v972_v44 = vshll.u32 %v488_v4, 16  ;;  %v3922_v34 = vld [vmem:[%s3377_s11 + $0xe0] sm:$0xf] }
  0x8e   : > { %v2177_v26 = vmax.bf16 %v961_v5, %v485_v51  ;;  %v968_v50 = vrot.slane %v966_v63, 5  ;;  %v2543_v48 = vrot.slane %v488_v4, 5  ;;  %v976_v52 = vshrl.u32 %v488_v4, 16 }
  0x8f   : > { %3140 = vst.msk [vmem:[%s3473_s15 + $0x78] sm:$0xf] %vm3109_vm5, %v3011_v39  ;;  %v974_v19 = vrot.slane %v972_v44, 5  ;;  %v982_v18 = vshll.u32 %v489_v0, 16  ;;  %v2546_v40 = vrot.slane %v489_v0, 5  ;;  %v490_v43 = vmax.bf16 %v330_v31, %v3891_v49 }
  0x90   : > { %v3012_v46 = vmax.bf16 %v2540_v59, %v2177_v26  ;;  %v969_v54 = vor.u32 %v968_v50, %v965_v42  ;;  %v2544_v57 = vsel %vm3423_vm4, %v3309_v38, %v2543_v48  ;;  %v978_v27 = vrot.slane %v976_v52, 4 }
  0x91   : > { %v984_v51 = vrot.slane %v982_v18, 5  ;;  %v2545_v36 = vrot.slane %v2543_v48, 4  ;;  %v986_v33 = vshrl.u32 %v489_v0, 16  ;;  %v992_v60 = vshll.u32 %v490_v43, 16  ;;  %v3941_v18 = vld [vmem:[%s3377_s11 + $0xe4] sm:$0xf] }
  0x92   : > { %3141 = vst.msk [vmem:[%s3473_s15 + $0x7c] sm:$0xf] %vm3109_vm5, %v3012_v46  ;;  %v970_v30 = vrot.slane %v969_v54, 4  ;;  %v979_v10 = vor.u32 %v978_v27, %v974_v19  ;;  %v2548_v21 = vrot.slane %v2546_v40, 4  ;;  %v2549_v62 = vrot.slane %v490_v43, 5 }
  0x93   : > { %v2547_v9 = vsel %vm3423_vm4, %v2545_v36, %v2546_v40  ;;  %v988_v47 = vrot.slane %v986_v33, 4  ;;  %v994_v23 = vrot.slane %v992_v60, 5  ;;  %v331_v2 = vmax.bf16 %v3853_v14, %v3804_v58 }
  0x94   : > { %v975_v37 = vsel %vm3440_vm6, %v970_v30, %v974_v19  ;;  %v980_v41 = vrot.slane %v979_v10, 4  ;;  %v2550_v20 = vsel %vm3423_vm4, %v2548_v21, %v2549_v62  ;;  %v996_v13 = vshrl.u32 %v490_v43, 16 }
  0x95   : > { %v2178_v11 = vmax.bf16 %v975_v37, %v487_v17  ;;  %v989_v53 = vor.u32 %v988_v47, %v984_v51  ;;  %v491_v8 = vmax.bf16 %v331_v2, %v3909_v12  ;;  %v2551_v55 = vrot.slane %v2549_v62, 4  ;;  %v3919_v17 = vld [vmem:[%s3377_s11 + $0xdc] sm:$0xf]  ;;  %v3956_v2 = vld [vmem:[%s3377_s11 + $0xe8] sm:$0xf] }
  0x96   : > { %v985_v58 = vsel %vm3440_vm6, %v980_v41, %v984_v51  ;;  %v998_v3 = vrot.slane %v996_v13, 4  ;;  %v332_v25 = vmax.bf16 %v3863_v15, %v3812_v7  ;;  %v333_v56 = vmax.bf16 %v3877_v32, %v3818_v1 }
  0x97   : > { %v3013_v22 = vmax.bf16 %v2544_v57, %v2178_v11  ;;  %v2179_v28 = vmax.bf16 %v985_v58, %v488_v4  ;;  %v990_v59 = vrot.slane %v989_v53, 4  ;;  %v1002_v6 = vshll.u32 %v491_v8, 16 }
  0x98   : > { %v999_v61 = vor.u32 %v998_v3, %v994_v23  ;;  %v2552_v63 = vrot.slane %v491_v8, 5  ;;  %v492_v38 = vmax.bf16 %v332_v25, %v3919_v17  ;;  %v3926_v31 = vmax.bf16 %v333_v56, %v3922_v34 }
  0x99   : > { %3142 = vst.msk [vmem:[%s3473_s15 + $0x80] sm:$0xf] %vm3109_vm5, %v3013_v22  ;;  %v3014_v7 = vmax.bf16 %v2547_v9, %v2179_v28  ;;  %v995_v1 = vsel %vm3440_vm6, %v990_v59, %v994_v23  ;;  %v1004_v4 = vrot.slane %v1002_v6, 5  ;;  %v334_v39 = vmax.bf16 %v3881_v16, %v3827_v29  ;;  %v3972_v22 = vld [vmem:[%s3377_s11 + $0xec] sm:$0x1] }
  0x9a   : > { %v2180_v5 = vmax.bf16 %v995_v1, %v489_v0  ;;  %v1000_v42 = vrot.slane %v999_v61, 4  ;;  %v2553_v44 = vsel %vm3423_vm4, %v2551_v55, %v2552_v63  ;;  %v1007_v26 = vshrl.u32 %v492_v38, 16 }
  0x9b   : > { %3143 = vst.msk [vmem:[%s3473_s15 + $0x84] sm:$0xf] %vm3109_vm5, %v3014_v7  ;;  %v1010_v50 = vshll.u32 %v492_v38, 16  ;;  %v1016_v48 = vshll.u32 %v3926_v31, 16  ;;  %v3310_v52 = vrot.slane %v492_v38, 9  ;;  %v2556_v19 = vrot.slane %v3926_v31, 5 }
  0x9c   : > { %v3015_v40 = vmax.bf16 %v2550_v20, %v2180_v5  ;;  %v1005_v29 = vsel %vm3440_vm6, %v1000_v42, %v1004_v4  ;;  %v1009_v0 = vrot.slane %v1007_v26, 4  ;;  %v494_v46 = vmax.bf16 %v334_v39, %v3941_v18  ;;  %v3980_v39 = vld [vmem:[%s3377_s11 + $0xf0] sm:$0xf] }
  0x9d   : > { %v2181_v54 = vmax.bf16 %v1005_v29, %v490_v43  ;;  %v1012_v57 = vrot.slane %v1010_v50, 5  ;;  %v1018_v27 = vrot.slane %v1016_v48, 5  ;;  %v2557_v51 = vsel %vm3423_vm4, %v3310_v52, %v2556_v19 }
  0x9e   : > { %3144 = vst.msk [vmem:[%s3473_s15 + $0x88] sm:$0xf] %vm3109_vm5, %v3015_v40  ;;  %v1020_v36 = vshrl.u32 %v3926_v31, 16  ;;  %v1026_v33 = vshll.u32 %v494_v46, 16  ;;  %v2558_v60 = vrot.slane %v2556_v19, 4  ;;  %v2559_v30 = vrot.slane %v494_v46, 5 }
  0x9f   : > { %v3016_v10 = vmax.bf16 %v2553_v44, %v2181_v54  ;;  %v1013_v21 = vor.u32 %v1012_v57, %v1009_v0  ;;  %v335_v62 = vmax.bf16 %v3891_v49, %v3841_v35  ;;  %v1030_v43 = vshrl.u32 %v494_v46, 16  ;;  %v3986_v44 = vld [vmem:[%s3377_s11 + $0xf4] sm:$0xf] }
  0xa0   : > { %v1022_v9 = vrot.slane %v1020_v36, 4  ;;  %v1028_v47 = vrot.slane %v1026_v33, 5  ;;  %v2560_v23 = vsel %vm3423_vm4, %v2558_v60, %v2559_v30  ;;  %v2561_v37 = vrot.slane %v2559_v30, 4  ;;  %v3995_v36 = vld [vmem:[%s3377_s11 + $0xf8] sm:$0xf] }
  0xa1   : > { %3145 = vst.msk [vmem:[%s3473_s15 + $0x8c] sm:$0xf] %vm3109_vm5, %v3016_v10  ;;  %v1014_v41 = vrot.slane %v1013_v21, 4  ;;  %v495_v20 = vmax.bf16 %v335_v62, %v3956_v2  ;;  %v1032_v13 = vrot.slane %v1030_v43, 4  ;;  %v336_v11 = vmax.bf16 %v3909_v12, %v3853_v14 }
  0xa2   : > { %v1023_v35 = vor.u32 %v1022_v9, %v1018_v27  ;;  %v337_v53 = vmax.bf16 %v3919_v17, %v3863_v15  ;;  %v338_v8 = vmax.bf16 %v3922_v34, %v3877_v32  ;;  %v339_v55 = vmax.bf16 %v3941_v18, %v3881_v16 }
  0xa3   : > { %v1019_v58 = vsel %vm3440_vm6, %v1014_v41, %v1018_v27  ;;  %v1033_v3 = vor.u32 %v1032_v13, %v1028_v47  ;;  %v1036_v25 = vshll.u32 %v495_v20, 16  ;;  %v2562_v56 = vrot.slane %v495_v20, 5  ;;  %v4009_v41 = vld [vmem:[%s3377_s11 + $0xfc] sm:$0xf] }
  0xa4   : > { %v2182_v14 = vmax.bf16 %v1019_v58, %v492_v38  ;;  %v1024_v28 = vrot.slane %v1023_v35, 4  ;;  %v496_v15 = vmax.bf16 %v336_v11, %v3972_v22  ;;  %v1040_v59 = vshrl.u32 %v495_v20, 16 }
  0xa5   : > { %v1034_v32 = vrot.slane %v1033_v3, 4  ;;  %v1038_v6 = vrot.slane %v1036_v25, 5  ;;  %v2563_v16 = vsel %vm3423_vm4, %v2561_v37, %v2562_v56  ;;  %v2564_v61 = vrot.slane %v2562_v56, 4 }
  0xa6   : > { %v3017_v63 = vmax.bf16 %v2557_v51, %v2182_v14  ;;  %v1029_v7 = vsel %vm3440_vm6, %v1024_v28, %v1028_v47  ;;  %v1042_v1 = vrot.slane %v1040_v59, 4  ;;  %v1046_v4 = vshll.u32 %v496_v15, 16 }
  0xa7   : > { %v2183_v38 = vmax.bf16 %v1029_v7, %v3926_v31  ;;  %v1039_v5 = vsel %vm3440_vm6, %v1034_v32, %v1038_v6  ;;  %v2565_v42 = vrot.slane %v496_v15, 5  ;;  %v497_v26 = vmax.bf16 %v337_v53, %v3980_v39 }
  0xa8   : > { %3146 = vst.msk [vmem:[%s3473_s15 + $0x90] sm:$0xf] %vm3109_vm5, %v3017_v63  ;;  %v2184_v50 = vmax.bf16 %v1039_v5, %v494_v46  ;;  %v1043_v48 = vor.u32 %v1042_v1, %v1038_v6  ;;  %v1048_v52 = vrot.slane %v1046_v4, 5  ;;  %v498_v19 = vmax.bf16 %v338_v8, %v3986_v44 }
  0xa9   : > { %v3018_v40 = vmax.bf16 %v2560_v23, %v2183_v38  ;;  %v2566_v31 = vsel %vm3423_vm4, %v2564_v61, %v2565_v42  ;;  %v1051_v29 = vshrl.u32 %v497_v26, 16  ;;  %v1054_v0 = vshll.u32 %v497_v26, 16  ;;  %v4021_v61 = vld [vmem:[%s3377_s11 + $0x100] sm:$0x1] }
  0xaa   : > { %v3019_v54 = vmax.bf16 %v2563_v16, %v2184_v50  ;;  %v1044_v57 = vrot.slane %v1043_v48, 4  ;;  %v1060_v27 = vshll.u32 %v498_v19, 16  ;;  %v3311_v51 = vrot.slane %v497_v26, 9 }
  0xab   : > { %3147 = vst.msk [vmem:[%s3473_s15 + $0x94] sm:$0xf] %vm3109_vm5, %v3018_v40  ;;  %v1053_v46 = vrot.slane %v1051_v29, 4  ;;  %v1056_v33 = vrot.slane %v1054_v0, 5  ;;  %v2569_v60 = vrot.slane %v498_v19, 5  ;;  %v499_v30 = vmax.bf16 %v339_v55, %v3995_v36 }
  0xac   : > { %3148 = vst.msk [vmem:[%s3473_s15 + $0x98] sm:$0xf] %vm3109_vm5, %v3019_v54  ;;  %v1049_v10 = vsel %vm3440_vm6, %v1044_v57, %v1048_v52  ;;  %v1062_v21 = vrot.slane %v1060_v27, 5  ;;  %v1064_v62 = vshrl.u32 %v498_v19, 16  ;;  %v340_v43 = vmax.bf16 %v3956_v2, %v3891_v49 }
  0xad   : > { %v2185_v9 = vmax.bf16 %v1049_v10, %v495_v20  ;;  %v1057_v47 = vor.u32 %v1056_v33, %v1053_v46  ;;  %v2570_v23 = vsel %vm3423_vm4, %v3311_v51, %v2569_v60  ;;  %v1070_v37 = vshll.u32 %v499_v30, 16  ;;  %v4045_v46 = vld [vmem:[%s3377_s11 + $0x108] sm:$0xf] }
  0xae   : > { %v1066_v13 = vrot.slane %v1064_v62, 4  ;;  %v2571_v11 = vrot.slane %v2569_v60, 4  ;;  %v2572_v35 = vrot.slane %v499_v30, 5  ;;  %v500_v53 = vmax.bf16 %v340_v43, %v4009_v41 }
  0xaf   : > { %v3020_v8 = vmax.bf16 %v2566_v31, %v2185_v9  ;;  %v1058_v55 = vrot.slane %v1057_v47, 4  ;;  %v1072_v58 = vrot.slane %v1070_v37, 5  ;;  %v1074_v3 = vshrl.u32 %v499_v30, 16  ;;  %v4031_v31 = vld [vmem:[%s3377_s11 + $0x104] sm:$0xf] }
  0xb0   : > { %v1067_v49 = vor.u32 %v1066_v13, %v1062_v21  ;;  %v2573_v20 = vsel %vm3423_vm4, %v2571_v11, %v2572_v35  ;;  %v1080_v25 = vshll.u32 %v500_v53, 16  ;;  %v2574_v56 = vrot.slane %v2572_v35, 4 }
  0xb1   : > { %3149 = vst.msk [vmem:[%s3473_s15 + $0x9c] sm:$0xf] %vm3109_vm5, %v3020_v8  ;;  %v1063_v14 = vsel %vm3440_vm6, %v1058_v55, %v1062_v21  ;;  %v1076_v28 = vrot.slane %v1074_v3, 4  ;;  %v2575_v15 = vrot.slane %v500_v53, 5  ;;  %v341_v59 = vmax.bf16 %v3972_v22, %v3909_v12  ;;  %v4049_v21 = vld [vmem:[%s3377_s11 + $0x10c] sm:$0xf] }
  0xb2   : > { %v2186_v32 = vmax.bf16 %v1063_v14, %v497_v26  ;;  %v1068_v6 = vrot.slane %v1067_v49, 4  ;;  %v1082_v16 = vrot.slane %v1080_v25, 5  ;;  %v1084_v63 = vshrl.u32 %v500_v53, 16  ;;  %v4059_v55 = vld [vmem:[%s3377_s11 + $0x110] sm:$0xf] }
  0xb3   : > { %v1077_v7 = vor.u32 %v1076_v28, %v1072_v58  ;;  %v2576_v1 = vsel %vm3423_vm4, %v2574_v56, %v2575_v15  ;;  %v501_v4 = vmax.bf16 %v341_v59, %v4021_v61  ;;  %v2577_v38 = vrot.slane %v2575_v15, 4 }
  0xb4   : > { %v3021_v5 = vmax.bf16 %v2570_v23, %v2186_v32  ;;  %v1073_v42 = vsel %vm3440_vm6, %v1068_v6, %v1072_v58  ;;  %v1086_v12 = vrot.slane %v1084_v63, 4  ;;  %v342_v26 = vmax.bf16 %v3980_v39, %v3919_v17 }
  0xb5   : > { %v2187_v50 = vmax.bf16 %v1073_v42, %v498_v19  ;;  %v1078_v48 = vrot.slane %v1077_v7, 4  ;;  %v1090_v52 = vshll.u32 %v501_v4, 16  ;;  %v2578_v40 = vrot.slane %v501_v4, 5 }
  0xb6   : > { %3150 = vst.msk [vmem:[%s3473_s15 + $0xa0] sm:$0xf] %vm3109_vm5, %v3021_v5  ;;  %v1087_v29 = vor.u32 %v1086_v12, %v1082_v16  ;;  %v343_v0 = vmax.bf16 %v3986_v44, %v3922_v34  ;;  %v502_v54 = vmax.bf16 %v342_v26, %v4031_v31  ;;  %v344_v57 = vmax.bf16 %v3995_v36, %v3941_v18  ;;  %v4077_v26 = vld [vmem:[%s3377_s11 + $0x114] sm:$0x1] }
  0xb7   : > { %v3022_v17 = vmax.bf16 %v2573_v20, %v2187_v50  ;;  %v1083_v19 = vsel %vm3440_vm6, %v1078_v48, %v1082_v16  ;;  %v1092_v27 = vrot.slane %v1090_v52, 5  ;;  %v2579_v51 = vsel %vm3423_vm4, %v2577_v38, %v2578_v40 }
  0xb8   : > { %v2188_v33 = vmax.bf16 %v1083_v19, %v499_v30  ;;  %v1088_v60 = vrot.slane %v1087_v29, 4  ;;  %v503_v10 = vmax.bf16 %v343_v0, %v4045_v46  ;;  %v1095_v34 = vshrl.u32 %v502_v54, 16 }
  0xb9   : > { %3151 = vst.msk [vmem:[%s3473_s15 + $0xa4] sm:$0xf] %vm3109_vm5, %v3022_v17  ;;  %v1098_v18 = vshll.u32 %v502_v54, 16  ;;  %v3312_v62 = vrot.slane %v502_v54, 9  ;;  %v504_v43 = vmax.bf16 %v344_v57, %v4049_v21  ;;  %v345_v9 = vmax.bf16 %v4009_v41, %v3956_v2 }
  0xba   : > { %v3023_v47 = vmax.bf16 %v2576_v1, %v2188_v33  ;;  %v1093_v30 = vsel %vm3440_vm6, %v1088_v60, %v1092_v27  ;;  %v1097_v23 = vrot.slane %v1095_v34, 4  ;;  %v1104_v37 = vshll.u32 %v503_v10, 16  ;;  %v4090_v60 = vld [vmem:[%s3377_s11 + $0x11c] sm:$0xf] }
  0xbb   : > { %v2189_v13 = vmax.bf16 %v1093_v30, %v500_v53  ;;  %v1100_v11 = vrot.slane %v1098_v18, 5  ;;  %v2582_v35 = vrot.slane %v503_v10, 5  ;;  %v1108_v8 = vshrl.u32 %v503_v10, 16 }
  0xbc   : > { %3152 = vst.msk [vmem:[%s3473_s15 + $0xa8] sm:$0xf] %vm3109_vm5, %v3023_v47  ;;  %v1106_v58 = vrot.slane %v1104_v37, 5  ;;  %v1114_v3 = vshll.u32 %v504_v43, 16  ;;  %v2585_v49 = vrot.slane %v504_v43, 5  ;;  %v505_v2 = vmax.bf16 %v345_v9, %v4059_v55 }
  0xbd   : > { %v3024_v20 = vmax.bf16 %v2579_v51, %v2189_v13  ;;  %v1101_v25 = vor.u32 %v1100_v11, %v1097_v23  ;;  %v2583_v56 = vsel %vm3423_vm4, %v3312_v62, %v2582_v35  ;;  %v1110_v14 = vrot.slane %v1108_v8, 4 }
  0xbe   : > { %v1116_v53 = vrot.slane %v1114_v3, 5  ;;  %v2584_v28 = vrot.slane %v2582_v35, 4  ;;  %v1118_v15 = vshrl.u32 %v504_v43, 16  ;;  %v1124_v59 = vshll.u32 %v505_v2, 16  ;;  %v4109_v3 = vld [vmem:[%s3377_s11 + $0x120] sm:$0xf] }
  0xbf   : > { %3153 = vst.msk [vmem:[%s3473_s15 + $0xac] sm:$0xf] %vm3109_vm5, %v3024_v20  ;;  %v1102_v32 = vrot.slane %v1101_v25, 4  ;;  %v1111_v6 = vor.u32 %v1110_v14, %v1106_v58  ;;  %v2587_v16 = vrot.slane %v2585_v49, 4  ;;  %v2588_v63 = vrot.slane %v505_v2, 5 }
  0xc0   : > { %v2586_v7 = vsel %vm3423_vm4, %v2584_v28, %v2585_v49  ;;  %v1120_v1 = vrot.slane %v1118_v15, 4  ;;  %v1126_v4 = vrot.slane %v1124_v59, 5  ;;  %v346_v38 = vmax.bf16 %v4021_v61, %v3972_v22 }
  0xc1   : > { %v1107_v5 = vsel %vm3440_vm6, %v1102_v32, %v1106_v58  ;;  %v1112_v42 = vrot.slane %v1111_v6, 4  ;;  %v2589_v12 = vsel %vm3423_vm4, %v2587_v16, %v2588_v63  ;;  %v1128_v50 = vshrl.u32 %v505_v2, 16 }
  0xc2   : > { %v2190_v48 = vmax.bf16 %v1107_v5, %v502_v54  ;;  %v1121_v52 = vor.u32 %v1120_v1, %v1116_v53  ;;  %v506_v40 = vmax.bf16 %v346_v38, %v4077_v26  ;;  %v2590_v29 = vrot.slane %v2588_v63, 4  ;;  %v4087_v54 = vld [vmem:[%s3377_s11 + $0x118] sm:$0xf]  ;;  %v4124_v38 = vld [vmem:[%s3377_s11 + $0x124] sm:$0xf] }
  0xc3   : > { %v1117_v22 = vsel %vm3440_vm6, %v1112_v42, %v1116_v53  ;;  %v1130_v0 = vrot.slane %v1128_v50, 4  ;;  %v347_v57 = vmax.bf16 %v4031_v31, %v3980_v39  ;;  %v348_v17 = vmax.bf16 %v4045_v46, %v3986_v44 }
  0xc4   : > { %v3025_v19 = vmax.bf16 %v2583_v56, %v2190_v48  ;;  %v2191_v27 = vmax.bf16 %v1117_v22, %v503_v10  ;;  %v1122_v51 = vrot.slane %v1121_v52, 4  ;;  %v1134_v33 = vshll.u32 %v506_v40, 16 }
  0xc5   : > { %v1131_v34 = vor.u32 %v1130_v0, %v1126_v4  ;;  %v2591_v18 = vrot.slane %v506_v40, 5  ;;  %v507_v62 = vmax.bf16 %v347_v57, %v4087_v54  ;;  %v4094_v9 = vmax.bf16 %v348_v17, %v4090_v60 }
  0xc6   : > { %3154 = vst.msk [vmem:[%s3473_s15 + $0xb0] sm:$0xf] %vm3109_vm5, %v3025_v19  ;;  %v3026_v39 = vmax.bf16 %v2586_v7, %v2191_v27  ;;  %v1127_v44 = vsel %vm3440_vm6, %v1122_v51, %v1126_v4  ;;  %v1136_v10 = vrot.slane %v1134_v33, 5  ;;  %v349_v47 = vmax.bf16 %v4049_v21, %v3995_v36  ;;  %v4140_v19 = vld [vmem:[%s3377_s11 + $0x128] sm:$0x1] }
  0xc7   : > { %v2192_v30 = vmax.bf16 %v1127_v44, %v504_v43  ;;  %v1132_v23 = vrot.slane %v1131_v34, 4  ;;  %v2592_v37 = vsel %vm3423_vm4, %v2590_v29, %v2591_v18  ;;  %v1139_v13 = vshrl.u32 %v507_v62, 16 }
  0xc8   : > { %3155 = vst.msk [vmem:[%s3473_s15 + $0xb4] sm:$0xf] %vm3109_vm5, %v3026_v39  ;;  %v1142_v11 = vshll.u32 %v507_v62, 16  ;;  %v1148_v35 = vshll.u32 %v4094_v9, 16  ;;  %v3313_v8 = vrot.slane %v507_v62, 9  ;;  %v2595_v58 = vrot.slane %v4094_v9, 5 }
  0xc9   : > { %v3027_v49 = vmax.bf16 %v2589_v12, %v2192_v30  ;;  %v1137_v36 = vsel %vm3440_vm6, %v1132_v23, %v1136_v10  ;;  %v1141_v43 = vrot.slane %v1139_v13, 4  ;;  %v509_v20 = vmax.bf16 %v349_v47, %v4109_v3  ;;  %v4148_v47 = vld [vmem:[%s3377_s11 + $0x12c] sm:$0xf] }
  0xca   : > { %v2193_v25 = vmax.bf16 %v1137_v36, %v505_v2  ;;  %v1144_v56 = vrot.slane %v1142_v11, 5  ;;  %v1150_v14 = vrot.slane %v1148_v35, 5  ;;  %v2596_v53 = vsel %vm3423_vm4, %v3313_v8, %v2595_v58 }
  0xcb   : > { %3156 = vst.msk [vmem:[%s3473_s15 + $0xb8] sm:$0xf] %vm3109_vm5, %v3027_v49  ;;  %v1152_v28 = vshrl.u32 %v4094_v9, 16  ;;  %v1158_v15 = vshll.u32 %v509_v20, 16  ;;  %v2597_v59 = vrot.slane %v2595_v58, 4  ;;  %v2598_v32 = vrot.slane %v509_v20, 5 }
  0xcc   : > { %v3028_v6 = vmax.bf16 %v2592_v37, %v2193_v25  ;;  %v1145_v16 = vor.u32 %v1144_v56, %v1141_v43  ;;  %v350_v63 = vmax.bf16 %v4059_v55, %v4009_v41  ;;  %v1162_v2 = vshrl.u32 %v509_v20, 16  ;;  %v4154_v37 = vld [vmem:[%s3377_s11 + $0x130] sm:$0xf] }
  0xcd   : > { %v1154_v7 = vrot.slane %v1152_v28, 4  ;;  %v1160_v1 = vrot.slane %v1158_v15, 5  ;;  %v2599_v4 = vsel %vm3423_vm4, %v2597_v59, %v2598_v32  ;;  %v2600_v5 = vrot.slane %v2598_v32, 4  ;;  %v4163_v28 = vld [vmem:[%s3377_s11 + $0x134] sm:$0xf] }
  0xce   : > { %3157 = vst.msk [vmem:[%s3473_s15 + $0xbc] sm:$0xf] %vm3109_vm5, %v3028_v6  ;;  %v1146_v42 = vrot.slane %v1145_v16, 4  ;;  %v510_v12 = vmax.bf16 %v350_v63, %v4124_v38  ;;  %v1164_v50 = vrot.slane %v1162_v2, 4  ;;  %v351_v48 = vmax.bf16 %v4077_v26, %v4021_v61 }
  0xcf   : > { %v1155_v41 = vor.u32 %v1154_v7, %v1150_v14  ;;  %v352_v52 = vmax.bf16 %v4087_v54, %v4031_v31  ;;  %v353_v40 = vmax.bf16 %v4090_v60, %v4045_v46  ;;  %v354_v29 = vmax.bf16 %v4109_v3, %v4049_v21 }
  0xd0   : > { %v1151_v22 = vsel %vm3440_vm6, %v1146_v42, %v1150_v14  ;;  %v1165_v0 = vor.u32 %v1164_v50, %v1160_v1  ;;  %v1168_v57 = vshll.u32 %v510_v12, 16  ;;  %v2601_v17 = vrot.slane %v510_v12, 5  ;;  %v4177_v42 = vld [vmem:[%s3377_s11 + $0x138] sm:$0xf] }
  0xd1   : > { %v2194_v61 = vmax.bf16 %v1151_v22, %v507_v62  ;;  %v1156_v27 = vrot.slane %v1155_v41, 4  ;;  %v511_v31 = vmax.bf16 %v351_v48, %v4140_v19  ;;  %v1172_v51 = vshrl.u32 %v510_v12, 16 }
  0xd2   : > { %v1166_v46 = vrot.slane %v1165_v0, 4  ;;  %v1170_v33 = vrot.slane %v1168_v57, 5  ;;  %v2602_v21 = vsel %vm3423_vm4, %v2600_v5, %v2601_v17  ;;  %v2603_v34 = vrot.slane %v2601_v17, 4 }
  0xd3   : > { %v3029_v18 = vmax.bf16 %v2596_v53, %v2194_v61  ;;  %v1161_v39 = vsel %vm3440_vm6, %v1156_v27, %v1160_v1  ;;  %v1174_v44 = vrot.slane %v1172_v51, 4  ;;  %v1178_v10 = vshll.u32 %v511_v31, 16 }
  0xd4   : > { %v2195_v62 = vmax.bf16 %v1161_v39, %v4094_v9  ;;  %v1171_v30 = vsel %vm3440_vm6, %v1166_v46, %v1170_v33  ;;  %v2604_v23 = vrot.slane %v511_v31, 5  ;;  %v512_v13 = vmax.bf16 %v352_v52, %v4148_v47 }
  0xd5   : > { %3158 = vst.msk [vmem:[%s3473_s15 + $0xc0] sm:$0xf] %vm3109_vm5, %v3029_v18  ;;  %v2196_v11 = vmax.bf16 %v1171_v30, %v509_v20  ;;  %v1175_v35 = vor.u32 %v1174_v44, %v1170_v33  ;;  %v1180_v8 = vrot.slane %v1178_v10, 5  ;;  %v513_v58 = vmax.bf16 %v353_v40, %v4154_v37 }
  0xd6   : > { %v3030_v49 = vmax.bf16 %v2599_v4, %v2195_v62  ;;  %v2605_v9 = vsel %vm3423_vm4, %v2603_v34, %v2604_v23  ;;  %v1183_v36 = vshrl.u32 %v512_v13, 16  ;;  %v1186_v43 = vshll.u32 %v512_v13, 16  ;;  %v4189_v34 = vld [vmem:[%s3377_s11 + $0x13c] sm:$0x1] }
  0xd7   : > { %v3031_v25 = vmax.bf16 %v2602_v21, %v2196_v11  ;;  %v1176_v56 = vrot.slane %v1175_v35, 4  ;;  %v1192_v14 = vshll.u32 %v513_v58, 16  ;;  %v3314_v53 = vrot.slane %v512_v13, 9 }
  0xd8   : > { %3159 = vst.msk [vmem:[%s3473_s15 + $0xc4] sm:$0xf] %vm3109_vm5, %v3030_v49  ;;  %v1185_v20 = vrot.slane %v1183_v36, 4  ;;  %v1188_v15 = vrot.slane %v1186_v43, 5  ;;  %v2608_v59 = vrot.slane %v513_v58, 5  ;;  %v514_v32 = vmax.bf16 %v354_v29, %v4163_v28 }
  0xd9   : > { %3160 = vst.msk [vmem:[%s3473_s15 + $0xc8] sm:$0xf] %vm3109_vm5, %v3031_v25  ;;  %v1181_v6 = vsel %vm3440_vm6, %v1176_v56, %v1180_v8  ;;  %v1194_v16 = vrot.slane %v1192_v14, 5  ;;  %v1196_v63 = vshrl.u32 %v513_v58, 16  ;;  %v355_v2 = vmax.bf16 %v4124_v38, %v4059_v55 }
  0xda   : > { %v2197_v7 = vmax.bf16 %v1181_v6, %v510_v12  ;;  %v1189_v1 = vor.u32 %v1188_v15, %v1185_v20  ;;  %v2609_v4 = vsel %vm3423_vm4, %v3314_v53, %v2608_v59  ;;  %v1202_v5 = vshll.u32 %v514_v32, 16  ;;  %v4213_v20 = vld [vmem:[%s3377_s11 + $0x144] sm:$0xf] }
  0xdb   : > { %v1198_v50 = vrot.slane %v1196_v63, 4  ;;  %v2610_v48 = vrot.slane %v2608_v59, 4  ;;  %v2611_v41 = vrot.slane %v514_v32, 5  ;;  %v515_v52 = vmax.bf16 %v355_v2, %v4177_v42 }
  0xdc   : > { %v3032_v40 = vmax.bf16 %v2605_v9, %v2197_v7  ;;  %v1190_v29 = vrot.slane %v1189_v1, 4  ;;  %v1204_v22 = vrot.slane %v1202_v5, 5  ;;  %v1206_v0 = vshrl.u32 %v514_v32, 16  ;;  %v4199_v9 = vld [vmem:[%s3377_s11 + $0x140] sm:$0xf] }
  0xdd   : > { %v1199_v55 = vor.u32 %v1198_v50, %v1194_v16  ;;  %v2612_v12 = vsel %vm3423_vm4, %v2610_v48, %v2611_v41  ;;  %v1212_v57 = vshll.u32 %v515_v52, 16  ;;  %v2613_v17 = vrot.slane %v2611_v41, 4 }
  0xde   : > { %3161 = vst.msk [vmem:[%s3473_s15 + $0xcc] sm:$0xf] %vm3109_vm5, %v3032_v40  ;;  %v1195_v61 = vsel %vm3440_vm6, %v1190_v29, %v1194_v16  ;;  %v1208_v27 = vrot.slane %v1206_v0, 4  ;;  %v2614_v31 = vrot.slane %v515_v52, 5  ;;  %v356_v51 = vmax.bf16 %v4140_v19, %v4077_v26  ;;  %v4217_v16 = vld [vmem:[%s3377_s11 + $0x148] sm:$0xf] }
  0xdf   : > { %v2198_v46 = vmax.bf16 %v1195_v61, %v512_v13  ;;  %v1200_v33 = vrot.slane %v1199_v55, 4  ;;  %v1214_v21 = vrot.slane %v1212_v57, 5  ;;  %v1216_v18 = vshrl.u32 %v515_v52, 16  ;;  %v4227_v29 = vld [vmem:[%s3377_s11 + $0x14c] sm:$0xf] }
  0xe0   : > { %v1209_v39 = vor.u32 %v1208_v27, %v1204_v22  ;;  %v2615_v44 = vsel %vm3423_vm4, %v2613_v17, %v2614_v31  ;;  %v516_v10 = vmax.bf16 %v356_v51, %v4189_v34  ;;  %v2616_v62 = vrot.slane %v2614_v31, 4 }
  0xe1   : > { %v3033_v30 = vmax.bf16 %v2609_v4, %v2198_v46  ;;  %v1205_v23 = vsel %vm3440_vm6, %v1200_v33, %v1204_v22  ;;  %v1218_v26 = vrot.slane %v1216_v18, 4  ;;  %v357_v13 = vmax.bf16 %v4148_v47, %v4087_v54 }
  0xe2   : > { %v2199_v11 = vmax.bf16 %v1205_v23, %v513_v58  ;;  %v1210_v35 = vrot.slane %v1209_v39, 4  ;;  %v1222_v8 = vshll.u32 %v516_v10, 16  ;;  %v2617_v49 = vrot.slane %v516_v10, 5 }
  0xe3   : > { %3162 = vst.msk [vmem:[%s3473_s15 + $0xd0] sm:$0xf] %vm3109_vm5, %v3033_v30  ;;  %v1219_v36 = vor.u32 %v1218_v26, %v1214_v21  ;;  %v358_v43 = vmax.bf16 %v4154_v37, %v4090_v60  ;;  %v517_v25 = vmax.bf16 %v357_v13, %v4199_v9  ;;  %v359_v56 = vmax.bf16 %v4163_v28, %v4109_v3  ;;  %v4245_v13 = vld [vmem:[%s3377_s11 + $0x150] sm:$0x1] }
  0xe4   : > { %v3034_v54 = vmax.bf16 %v2612_v12, %v2199_v11  ;;  %v1215_v58 = vsel %vm3440_vm6, %v1210_v35, %v1214_v21  ;;  %v1224_v14 = vrot.slane %v1222_v8, 5  ;;  %v2618_v53 = vsel %vm3423_vm4, %v2616_v62, %v2617_v49 }
  0xe5   : > { %v2200_v15 = vmax.bf16 %v1215_v58, %v514_v32  ;;  %v1220_v59 = vrot.slane %v1219_v36, 4  ;;  %v518_v6 = vmax.bf16 %v358_v43, %v4213_v20  ;;  %v1227_v60 = vshrl.u32 %v517_v25, 16 }
  0xe6   : > { %3163 = vst.msk [vmem:[%s3473_s15 + $0xd4] sm:$0xf] %vm3109_vm5, %v3034_v54  ;;  %v1230_v3 = vshll.u32 %v517_v25, 16  ;;  %v3315_v63 = vrot.slane %v517_v25, 9  ;;  %v519_v2 = vmax.bf16 %v359_v56, %v4217_v16  ;;  %v360_v7 = vmax.bf16 %v4177_v42, %v4124_v38 }
  0xe7   : > { %v3035_v1 = vmax.bf16 %v2615_v44, %v2200_v15  ;;  %v1225_v32 = vsel %vm3440_vm6, %v1220_v59, %v1224_v14  ;;  %v1229_v4 = vrot.slane %v1227_v60, 4  ;;  %v1236_v5 = vshll.u32 %v518_v6, 16  ;;  %v4258_v59 = vld [vmem:[%s3377_s11 + $0x158] sm:$0xf] }
  0xe8   : > { %v2201_v50 = vmax.bf16 %v1225_v32, %v515_v52  ;;  %v1232_v48 = vrot.slane %v1230_v3, 5  ;;  %v2621_v41 = vrot.slane %v518_v6, 5  ;;  %v1240_v40 = vshrl.u32 %v518_v6, 16 }
  0xe9   : > { %3164 = vst.msk [vmem:[%s3473_s15 + $0xd8] sm:$0xf] %vm3109_vm5, %v3035_v1  ;;  %v1238_v22 = vrot.slane %v1236_v5, 5  ;;  %v1246_v0 = vshll.u32 %v519_v2, 16  ;;  %v2624_v55 = vrot.slane %v519_v2, 5  ;;  %v520_v38 = vmax.bf16 %v360_v7, %v4227_v29 }
  0xea   : > { %v3036_v12 = vmax.bf16 %v2618_v53, %v2201_v50  ;;  %v1233_v57 = vor.u32 %v1232_v48, %v1229_v4  ;;  %v2622_v17 = vsel %vm3423_vm4, %v3315_v63, %v2621_v41  ;;  %v1242_v61 = vrot.slane %v1240_v40, 4 }
  0xeb   : > { %v1248_v52 = vrot.slane %v1246_v0, 5  ;;  %v2623_v27 = vrot.slane %v2621_v41, 4  ;;  %v1250_v31 = vshrl.u32 %v519_v2, 16  ;;  %v1256_v51 = vshll.u32 %v520_v38, 16  ;;  %v4277_v0 = vld [vmem:[%s3377_s11 + $0x15c] sm:$0xf] }
  0xec   : > { %3165 = vst.msk [vmem:[%s3473_s15 + $0xdc] sm:$0xf] %vm3109_vm5, %v3036_v12  ;;  %v1234_v46 = vrot.slane %v1233_v57, 4  ;;  %v1243_v33 = vor.u32 %v1242_v61, %v1238_v22  ;;  %v2626_v21 = vrot.slane %v2624_v55, 4  ;;  %v2627_v18 = vrot.slane %v520_v38, 5 }
  0xed   : > { %v2625_v39 = vsel %vm3423_vm4, %v2623_v27, %v2624_v55  ;;  %v1252_v44 = vrot.slane %v1250_v31, 4  ;;  %v1258_v10 = vrot.slane %v1256_v51, 5  ;;  %v361_v62 = vmax.bf16 %v4189_v34, %v4140_v19 }
  0xee   : > { %v1239_v30 = vsel %vm3440_vm6, %v1234_v46, %v1238_v22  ;;  %v1244_v23 = vrot.slane %v1243_v33, 4  ;;  %v2628_v26 = vsel %vm3423_vm4, %v2626_v21, %v2627_v18  ;;  %v1260_v11 = vshrl.u32 %v520_v38, 16 }
  0xef   : > { %v2202_v35 = vmax.bf16 %v1239_v30, %v517_v25  ;;  %v1253_v8 = vor.u32 %v1252_v44, %v1248_v52  ;;  %v521_v49 = vmax.bf16 %v361_v62, %v4245_v13  ;;  %v2629_v36 = vrot.slane %v2627_v18, 4  ;;  %v4255_v25 = vld [vmem:[%s3377_s11 + $0x154] sm:$0xf]  ;;  %v4292_v62 = vld [vmem:[%s3377_s11 + $0x160] sm:$0xf] }
  0xf0   : > { %v1249_v19 = vsel %vm3440_vm6, %v1244_v23, %v1248_v52  ;;  %v1262_v43 = vrot.slane %v1260_v11, 4  ;;  %v362_v56 = vmax.bf16 %v4199_v9, %v4148_v47  ;;  %v363_v54 = vmax.bf16 %v4213_v20, %v4154_v37 }
  0xf1   : > { %v3037_v58 = vmax.bf16 %v2622_v17, %v2202_v35  ;;  %v2203_v14 = vmax.bf16 %v1249_v19, %v518_v6  ;;  %v1254_v53 = vrot.slane %v1253_v8, 4  ;;  %v1266_v15 = vshll.u32 %v521_v49, 16 }
  0xf2   : > { %v1263_v60 = vor.u32 %v1262_v43, %v1258_v10  ;;  %v2630_v3 = vrot.slane %v521_v49, 5  ;;  %v522_v63 = vmax.bf16 %v362_v56, %v4255_v25  ;;  %v4262_v7 = vmax.bf16 %v363_v54, %v4258_v59 }
  0xf3   : > { %3166 = vst.msk [vmem:[%s3473_s15 + $0xe0] sm:$0xf] %vm3109_vm5, %v3037_v58  ;;  %v3038_v47 = vmax.bf16 %v2625_v39, %v2203_v14  ;;  %v1259_v37 = vsel %vm3440_vm6, %v1254_v53, %v1258_v10  ;;  %v1268_v6 = vrot.slane %v1266_v15, 5  ;;  %v364_v1 = vmax.bf16 %v4217_v16, %v4163_v28  ;;  %v4308_v58 = vld [vmem:[%s3377_s11 + $0x164] sm:$0x1] }
  0xf4   : > { %v2204_v32 = vmax.bf16 %v1259_v37, %v519_v2  ;;  %v1264_v4 = vrot.slane %v1263_v60, 4  ;;  %v2631_v5 = vsel %vm3423_vm4, %v2629_v36, %v2630_v3  ;;  %v1271_v50 = vshrl.u32 %v522_v63, 16 }
  0xf5   : > { %3167 = vst.msk [vmem:[%s3473_s15 + $0xe4] sm:$0xf] %vm3109_vm5, %v3038_v47  ;;  %v1274_v48 = vshll.u32 %v522_v63, 16  ;;  %v1280_v41 = vshll.u32 %v4262_v7, 16  ;;  %v3316_v40 = vrot.slane %v522_v63, 9  ;;  %v2634_v22 = vrot.slane %v4262_v7, 5 }
  0xf6   : > { %v3039_v55 = vmax.bf16 %v2628_v26, %v2204_v32  ;;  %v1269_v28 = vsel %vm3440_vm6, %v1264_v4, %v1268_v6  ;;  %v1273_v2 = vrot.slane %v1271_v50, 4  ;;  %v524_v12 = vmax.bf16 %v364_v1, %v4277_v0  ;;  %v4316_v1 = vld [vmem:[%s3377_s11 + $0x168] sm:$0xf] }
  0xf7   : > { %v2205_v57 = vmax.bf16 %v1269_v28, %v520_v38  ;;  %v1276_v17 = vrot.slane %v1274_v48, 5  ;;  %v1282_v61 = vrot.slane %v1280_v41, 5  ;;  %v2635_v52 = vsel %vm3423_vm4, %v3316_v40, %v2634_v22 }
  0xf8   : > { %3168 = vst.msk [vmem:[%s3473_s15 + $0xe8] sm:$0xf] %vm3109_vm5, %v3039_v55  ;;  %v1284_v27 = vshrl.u32 %v4262_v7, 16  ;;  %v1290_v31 = vshll.u32 %v524_v12, 16  ;;  %v2636_v51 = vrot.slane %v2634_v22, 4  ;;  %v2637_v46 = vrot.slane %v524_v12, 5 }
  0xf9   : > { %v3040_v33 = vmax.bf16 %v2631_v5, %v2205_v57  ;;  %v1277_v21 = vor.u32 %v1276_v17, %v1273_v2  ;;  %v365_v18 = vmax.bf16 %v4227_v29, %v4177_v42  ;;  %v1294_v38 = vshrl.u32 %v524_v12, 16  ;;  %v4322_v5 = vld [vmem:[%s3377_s11 + $0x16c] sm:$0xf] }
  0xfa   : > { %v1286_v39 = vrot.slane %v1284_v27, 4  ;;  %v1292_v44 = vrot.slane %v1290_v31, 5  ;;  %v2638_v10 = vsel %vm3423_vm4, %v2636_v51, %v2637_v46  ;;  %v2639_v30 = vrot.slane %v2637_v46, 4  ;;  %v4331_v27 = vld [vmem:[%s3377_s11 + $0x170] sm:$0xf] }
  0xfb   : > { %3169 = vst.msk [vmem:[%s3473_s15 + $0xec] sm:$0xf] %vm3109_vm5, %v3040_v33  ;;  %v1278_v23 = vrot.slane %v1277_v21, 4  ;;  %v525_v26 = vmax.bf16 %v365_v18, %v4292_v62  ;;  %v1296_v11 = vrot.slane %v1294_v38, 4  ;;  %v366_v35 = vmax.bf16 %v4245_v13, %v4189_v34 }
  0xfc   : > { %v1287_v42 = vor.u32 %v1286_v39, %v1282_v61  ;;  %v367_v8 = vmax.bf16 %v4255_v25, %v4199_v9  ;;  %v368_v49 = vmax.bf16 %v4258_v59, %v4213_v20  ;;  %v369_v36 = vmax.bf16 %v4277_v0, %v4217_v16 }
  0xfd   : > { %v1283_v19 = vsel %vm3440_vm6, %v1278_v23, %v1282_v61  ;;  %v1297_v43 = vor.u32 %v1296_v11, %v1292_v44  ;;  %v1300_v56 = vshll.u32 %v525_v26, 16  ;;  %v2640_v54 = vrot.slane %v525_v26, 5  ;;  %v4345_v23 = vld [vmem:[%s3377_s11 + $0x174] sm:$0xf] }
  0xfe   : > { %v2206_v34 = vmax.bf16 %v1283_v19, %v522_v63  ;;  %v1288_v14 = vrot.slane %v1287_v42, 4  ;;  %v526_v9 = vmax.bf16 %v366_v35, %v4308_v58  ;;  %v1304_v53 = vshrl.u32 %v525_v26, 16 }
  0xff   : > { %v1298_v20 = vrot.slane %v1297_v43, 4  ;;  %v1302_v15 = vrot.slane %v1300_v56, 5  ;;  %v2641_v16 = vsel %vm3423_vm4, %v2639_v30, %v2640_v54  ;;  %v2642_v60 = vrot.slane %v2640_v54, 4 }
 0x100   : > { %v3041_v3 = vmax.bf16 %v2635_v52, %v2206_v34  ;;  %v1293_v47 = vsel %vm3440_vm6, %v1288_v14, %v1292_v44  ;;  %v1306_v37 = vrot.slane %v1304_v53, 4  ;;  %v1310_v6 = vshll.u32 %v526_v9, 16 }
 0x101   : > { %v2207_v63 = vmax.bf16 %v1293_v47, %v4262_v7  ;;  %v1303_v32 = vsel %vm3440_vm6, %v1298_v20, %v1302_v15  ;;  %v2643_v4 = vrot.slane %v526_v9, 5  ;;  %v527_v50 = vmax.bf16 %v367_v8, %v4316_v1 }
 0x102   : > { %3170 = vst.msk [vmem:[%s3473_s15 + $0xf0] sm:$0xf] %vm3109_vm5, %v3041_v3  ;;  %v2208_v48 = vmax.bf16 %v1303_v32, %v524_v12  ;;  %v1307_v41 = vor.u32 %v1306_v37, %v1302_v15  ;;  %v1312_v40 = vrot.slane %v1310_v6, 5  ;;  %v528_v22 = vmax.bf16 %v368_v49, %v4322_v5 }
 0x103   : > { %v3042_v55 = vmax.bf16 %v2638_v10, %v2207_v63  ;;  %v2644_v7 = vsel %vm3423_vm4, %v2642_v60, %v2643_v4  ;;  %v1315_v28 = vshrl.u32 %v527_v50, 16  ;;  %v1318_v2 = vshll.u32 %v527_v50, 16  ;;  %v4357_v60 = vld [vmem:[%s3377_s11 + $0x178] sm:$0x1] }
 0x104   : > { %v3043_v57 = vmax.bf16 %v2641_v16, %v2208_v48  ;;  %v1308_v17 = vrot.slane %v1307_v41, 4  ;;  %v1324_v61 = vshll.u32 %v528_v22, 16  ;;  %v3317_v52 = vrot.slane %v527_v50, 9 }
 0x105   : > { %3171 = vst.msk [vmem:[%s3473_s15 + $0xf4] sm:$0xf] %vm3109_vm5, %v3042_v55  ;;  %v1317_v12 = vrot.slane %v1315_v28, 4  ;;  %v1320_v31 = vrot.slane %v1318_v2, 5  ;;  %v2647_v51 = vrot.slane %v528_v22, 5  ;;  %v529_v46 = vmax.bf16 %v369_v36, %v4331_v27 }
 0x106   : > { %3172 = vst.msk [vmem:[%s3473_s15 + $0xf8] sm:$0xf] %vm3109_vm5, %v3043_v57  ;;  %v1313_v33 = vsel %vm3440_vm6, %v1308_v17, %v1312_v40  ;;  %v1326_v21 = vrot.slane %v1324_v61, 5  ;;  %v1328_v18 = vshrl.u32 %v528_v22, 16  ;;  %v370_v38 = vmax.bf16 %v4292_v62, %v4227_v29 }
 0x107   : > { %v2209_v39 = vmax.bf16 %v1313_v33, %v525_v26  ;;  %v1321_v44 = vor.u32 %v1320_v31, %v1317_v12  ;;  %v2648_v10 = vsel %vm3423_vm4, %v3317_v52, %v2647_v51  ;;  %v1334_v30 = vshll.u32 %v529_v46, 16  ;;  %v4381_v12 = vld [vmem:[%s3377_s11 + $0x180] sm:$0xf] }
 0x108   : > { %v1330_v11 = vrot.slane %v1328_v18, 4  ;;  %v2649_v35 = vrot.slane %v2647_v51, 4  ;;  %v2650_v42 = vrot.slane %v529_v46, 5  ;;  %v530_v8 = vmax.bf16 %v370_v38, %v4345_v23 }
 0x109   : > { %v3044_v49 = vmax.bf16 %v2644_v7, %v2209_v39  ;;  %v1322_v36 = vrot.slane %v1321_v44, 4  ;;  %v1336_v19 = vrot.slane %v1334_v30, 5  ;;  %v1338_v43 = vshrl.u32 %v529_v46, 16  ;;  %v4367_v7 = vld [vmem:[%s3377_s11 + $0x17c] sm:$0xf] }
 0x10a   : > { %v1331_v29 = vor.u32 %v1330_v11, %v1326_v21  ;;  %v2651_v26 = vsel %vm3423_vm4, %v2649_v35, %v2650_v42  ;;  %v1344_v56 = vshll.u32 %v530_v8, 16  ;;  %v2652_v54 = vrot.slane %v2650_v42, 4 }
 0x10b   : > { %3173 = vst.msk [vmem:[%s3473_s15 + $0xfc] sm:$0xf] %vm3109_vm5, %v3044_v49  ;;  %v1327_v34 = vsel %vm3440_vm6, %v1322_v36, %v1326_v21  ;;  %v1340_v14 = vrot.slane %v1338_v43, 4  ;;  %v2653_v9 = vrot.slane %v530_v8, 5  ;;  %v371_v53 = vmax.bf16 %v4308_v58, %v4245_v13  ;;  %v4385_v21 = vld [vmem:[%s3377_s11 + $0x184] sm:$0xf] }
 0x10c   : > { %v2210_v20 = vmax.bf16 %v1327_v34, %v527_v50  ;;  %v1332_v15 = vrot.slane %v1331_v29, 4  ;;  %v1346_v16 = vrot.slane %v1344_v56, 5  ;;  %v1348_v3 = vshrl.u32 %v530_v8, 16  ;;  %v4395_v36 = vld [vmem:[%s3377_s11 + $0x188] sm:$0xf] }
 0x10d   : > { %v1341_v47 = vor.u32 %v1340_v14, %v1336_v19  ;;  %v2654_v37 = vsel %vm3423_vm4, %v2652_v54, %v2653_v9  ;;  %v531_v6 = vmax.bf16 %v371_v53, %v4357_v60  ;;  %v2655_v63 = vrot.slane %v2653_v9, 4 }
 0x10e   : > { %v3045_v32 = vmax.bf16 %v2648_v10, %v2210_v20  ;;  %v1337_v4 = vsel %vm3440_vm6, %v1332_v15, %v1336_v19  ;;  %v1350_v13 = vrot.slane %v1348_v3, 4  ;;  %v372_v50 = vmax.bf16 %v4316_v1, %v4255_v25 }
 0x10f   : > { %v2211_v48 = vmax.bf16 %v1337_v4, %v528_v22  ;;  %v1342_v41 = vrot.slane %v1341_v47, 4  ;;  %v1354_v40 = vshll.u32 %v531_v6, 16  ;;  %v2656_v55 = vrot.slane %v531_v6, 5 }
 0x110   : > { %3174 = vst.msk [vmem:[%s3473_s15 + $0x100] sm:$0xf] %vm3109_vm5, %v3045_v32  ;;  %v1351_v28 = vor.u32 %v1350_v13, %v1346_v16  ;;  %v373_v2 = vmax.bf16 %v4322_v5, %v4258_v59  ;;  %v532_v57 = vmax.bf16 %v372_v50, %v4367_v7  ;;  %v374_v17 = vmax.bf16 %v4331_v27, %v4277_v0  ;;  %v4413_v50 = vld [vmem:[%s3377_s11 + $0x18c] sm:$0x1] }
 0x111   : > { %v3046_v25 = vmax.bf16 %v2651_v26, %v2211_v48  ;;  %v1347_v22 = vsel %vm3440_vm6, %v1342_v41, %v1346_v16  ;;  %v1356_v61 = vrot.slane %v1354_v40, 5  ;;  %v2657_v52 = vsel %vm3423_vm4, %v2655_v63, %v2656_v55 }
 0x112   : > { %v2212_v31 = vmax.bf16 %v1347_v22, %v529_v46  ;;  %v1352_v51 = vrot.slane %v1351_v28, 4  ;;  %v533_v33 = vmax.bf16 %v373_v2, %v4381_v12  ;;  %v1359_v59 = vshrl.u32 %v532_v57, 16 }
 0x113   : > { %3175 = vst.msk [vmem:[%s3473_s15 + $0x104] sm:$0xf] %vm3109_vm5, %v3046_v25  ;;  %v1362_v0 = vshll.u32 %v532_v57, 16  ;;  %v3318_v18 = vrot.slane %v532_v57, 9  ;;  %v534_v38 = vmax.bf16 %v374_v17, %v4385_v21  ;;  %v375_v39 = vmax.bf16 %v4345_v23, %v4292_v62 }
 0x114   : > { %v3047_v44 = vmax.bf16 %v2654_v37, %v2212_v31  ;;  %v1357_v46 = vsel %vm3440_vm6, %v1352_v51, %v1356_v61  ;;  %v1361_v10 = vrot.slane %v1359_v59, 4  ;;  %v1368_v30 = vshll.u32 %v533_v33, 16  ;;  %v4426_v51 = vld [vmem:[%s3377_s11 + $0x194] sm:$0xf] }
 0x115   : > { %v2213_v11 = vmax.bf16 %v1357_v46, %v530_v8  ;;  %v1364_v35 = vrot.slane %v1362_v0, 5  ;;  %v2660_v42 = vrot.slane %v533_v33, 5  ;;  %v1372_v49 = vshrl.u32 %v533_v33, 16 }
 0x116   : > { %3176 = vst.msk [vmem:[%s3473_s15 + $0x108] sm:$0xf] %vm3109_vm5, %v3047_v44  ;;  %v1370_v19 = vrot.slane %v1368_v30, 5  ;;  %v1378_v43 = vshll.u32 %v534_v38, 16  ;;  %v2663_v29 = vrot.slane %v534_v38, 5  ;;  %v535_v62 = vmax.bf16 %v375_v39, %v4395_v36 }
 0x117   : > { %v3048_v26 = vmax.bf16 %v2657_v52, %v2213_v11  ;;  %v1365_v56 = vor.u32 %v1364_v35, %v1361_v10  ;;  %v2661_v54 = vsel %vm3423_vm4, %v3318_v18, %v2660_v42  ;;  %v1374_v34 = vrot.slane %v1372_v49, 4 }
 0x118   : > { %v1380_v8 = vrot.slane %v1378_v43, 5  ;;  %v2662_v14 = vrot.slane %v2660_v42, 4  ;;  %v1382_v9 = vshrl.u32 %v534_v38, 16  ;;  %v1388_v53 = vshll.u32 %v535_v62, 16  ;;  %v4445_v43 = vld [vmem:[%s3377_s11 + $0x198] sm:$0xf] }
 0x119   : > { %3177 = vst.msk [vmem:[%s3473_s15 + $0x10c] sm:$0xf] %vm3109_vm5, %v3048_v26  ;;  %v1366_v20 = vrot.slane %v1365_v56, 4  ;;  %v1375_v15 = vor.u32 %v1374_v34, %v1370_v19  ;;  %v2665_v16 = vrot.slane %v2663_v29, 4  ;;  %v2666_v3 = vrot.slane %v535_v62, 5 }
 0x11a   : > { %v2664_v47 = vsel %vm3423_vm4, %v2662_v14, %v2663_v29  ;;  %v1384_v37 = vrot.slane %v1382_v9, 4  ;;  %v1390_v6 = vrot.slane %v1388_v53, 5  ;;  %v376_v63 = vmax.bf16 %v4357_v60, %v4308_v58 }
 0x11b   : > { %v1371_v32 = vsel %vm3440_vm6, %v1366_v20, %v1370_v19  ;;  %v1376_v4 = vrot.slane %v1375_v15, 4  ;;  %v2667_v13 = vsel %vm3423_vm4, %v2665_v16, %v2666_v3  ;;  %v1392_v48 = vshrl.u32 %v535_v62, 16 }
 0x11c   : > { %v2214_v41 = vmax.bf16 %v1371_v32, %v532_v57  ;;  %v1385_v40 = vor.u32 %v1384_v37, %v1380_v8  ;;  %v536_v55 = vmax.bf16 %v376_v63, %v4413_v50  ;;  %v2668_v28 = vrot.slane %v2666_v3, 4  ;;  %v4423_v57 = vld [vmem:[%s3377_s11 + $0x190] sm:$0xf]  ;;  %v4460_v63 = vld [vmem:[%s3377_s11 + $0x19c] sm:$0xf] }
 0x11d   : > { %v1381_v58 = vsel %vm3440_vm6, %v1376_v4, %v1380_v8  ;;  %v1394_v2 = vrot.slane %v1392_v48, 4  ;;  %v377_v17 = vmax.bf16 %v4367_v7, %v4316_v1  ;;  %v378_v25 = vmax.bf16 %v4381_v12, %v4322_v5 }
 0x11e   : > { %v3049_v22 = vmax.bf16 %v2661_v54, %v2214_v41  ;;  %v2215_v61 = vmax.bf16 %v1381_v58, %v533_v33  ;;  %v1386_v52 = vrot.slane %v1385_v40, 4  ;;  %v1398_v31 = vshll.u32 %v536_v55, 16 }
 0x11f   : > { %v1395_v59 = vor.u32 %v1394_v2, %v1390_v6  ;;  %v2669_v0 = vrot.slane %v536_v55, 5  ;;  %v537_v18 = vmax.bf16 %v377_v17, %v4423_v57  ;;  %v4430_v39 = vmax.bf16 %v378_v25, %v4426_v51 }
 0x120   : > { %3178 = vst.msk [vmem:[%s3473_s15 + $0x110] sm:$0xf] %vm3109_vm5, %v3049_v22  ;;  %v3050_v1 = vmax.bf16 %v2664_v47, %v2215_v61  ;;  %v1391_v5 = vsel %vm3440_vm6, %v1386_v52, %v1390_v6  ;;  %v1400_v33 = vrot.slane %v1398_v31, 5  ;;  %v379_v44 = vmax.bf16 %v4385_v21, %v4331_v27  ;;  %v4476_v22 = vld [vmem:[%s3377_s11 + $0x1a0] sm:$0x1] }
 0x121   : > { %v2216_v46 = vmax.bf16 %v1391_v5, %v534_v38  ;;  %v1396_v10 = vrot.slane %v1395_v59, 4  ;;  %v2670_v30 = vsel %vm3423_vm4, %v2668_v28, %v2669_v0  ;;  %v1403_v11 = vshrl.u32 %v537_v18, 16 }
 0x122   : > { %3179 = vst.msk [vmem:[%s3473_s15 + $0x114] sm:$0xf] %vm3109_vm5, %v3050_v1  ;;  %v1406_v35 = vshll.u32 %v537_v18, 16  ;;  %v1412_v42 = vshll.u32 %v4430_v39, 16  ;;  %v3319_v49 = vrot.slane %v537_v18, 9  ;;  %v2673_v19 = vrot.slane %v4430_v39, 5 }
 0x123   : > { %v3051_v29 = vmax.bf16 %v2667_v13, %v2216_v46  ;;  %v1401_v27 = vsel %vm3440_vm6, %v1396_v10, %v1400_v33  ;;  %v1405_v38 = vrot.slane %v1403_v11, 4  ;;  %v539_v26 = vmax.bf16 %v379_v44, %v4445_v43  ;;  %v4484_v44 = vld [vmem:[%s3377_s11 + $0x1a4] sm:$0xf] }
 0x124   : > { %v2217_v56 = vmax.bf16 %v1401_v27, %v535_v62  ;;  %v1408_v54 = vrot.slane %v1406_v35, 5  ;;  %v1414_v34 = vrot.slane %v1412_v42, 5  ;;  %v2674_v8 = vsel %vm3423_vm4, %v3319_v49, %v2673_v19 }
 0x125   : > { %3180 = vst.msk [vmem:[%s3473_s15 + $0x118] sm:$0xf] %vm3109_vm5, %v3051_v29  ;;  %v1416_v14 = vshrl.u32 %v4430_v39, 16  ;;  %v1422_v9 = vshll.u32 %v539_v26, 16  ;;  %v2675_v53 = vrot.slane %v2673_v19, 4  ;;  %v2676_v20 = vrot.slane %v539_v26, 5 }
 0x126   : > { %v3052_v15 = vmax.bf16 %v2670_v30, %v2217_v56  ;;  %v1409_v16 = vor.u32 %v1408_v54, %v1405_v38  ;;  %v380_v3 = vmax.bf16 %v4395_v36, %v4345_v23  ;;  %v1426_v62 = vshrl.u32 %v539_v26, 16  ;;  %v4490_v30 = vld [vmem:[%s3377_s11 + $0x1a8] sm:$0xf] }
 0x127   : > { %v1418_v47 = vrot.slane %v1416_v14, 4  ;;  %v1424_v37 = vrot.slane %v1422_v9, 5  ;;  %v2677_v6 = vsel %vm3423_vm4, %v2675_v53, %v2676_v20  ;;  %v2678_v32 = vrot.slane %v2676_v20, 4  ;;  %v4499_v14 = vld [vmem:[%s3377_s11 + $0x1ac] sm:$0xf] }
 0x128   : > { %3181 = vst.msk [vmem:[%s3473_s15 + $0x11c] sm:$0xf] %vm3109_vm5, %v3052_v15  ;;  %v1410_v4 = vrot.slane %v1409_v16, 4  ;;  %v540_v13 = vmax.bf16 %v380_v3, %v4460_v63  ;;  %v1428_v48 = vrot.slane %v1426_v62, 4  ;;  %v381_v41 = vmax.bf16 %v4413_v50, %v4357_v60 }
 0x129   : > { %v1419_v23 = vor.u32 %v1418_v47, %v1414_v34  ;;  %v382_v40 = vmax.bf16 %v4423_v57, %v4367_v7  ;;  %v383_v55 = vmax.bf16 %v4426_v51, %v4381_v12  ;;  %v384_v28 = vmax.bf16 %v4445_v43, %v4385_v21 }
 0x12a   : > { %v1415_v58 = vsel %vm3440_vm6, %v1410_v4, %v1414_v34  ;;  %v1429_v2 = vor.u32 %v1428_v48, %v1424_v37  ;;  %v1432_v17 = vshll.u32 %v540_v13, 16  ;;  %v2679_v25 = vrot.slane %v540_v13, 5  ;;  %v4513_v4 = vld [vmem:[%s3377_s11 + $0x1b0] sm:$0xf] }
 0x12b   : > { %v2218_v60 = vmax.bf16 %v1415_v58, %v537_v18  ;;  %v1420_v61 = vrot.slane %v1419_v23, 4  ;;  %v541_v7 = vmax.bf16 %v381_v41, %v4476_v22  ;;  %v1436_v52 = vshrl.u32 %v540_v13, 16 }
 0x12c   : > { %v1430_v12 = vrot.slane %v1429_v2, 4  ;;  %v1434_v31 = vrot.slane %v1432_v17, 5  ;;  %v2680_v21 = vsel %vm3423_vm4, %v2678_v32, %v2679_v25  ;;  %v2681_v59 = vrot.slane %v2679_v25, 4 }
 0x12d   : > { %v3053_v0 = vmax.bf16 %v2674_v8, %v2218_v60  ;;  %v1425_v1 = vsel %vm3440_vm6, %v1420_v61, %v1424_v37  ;;  %v1438_v5 = vrot.slane %v1436_v52, 4  ;;  %v1442_v33 = vshll.u32 %v541_v7, 16 }
 0x12e   : > { %v2219_v18 = vmax.bf16 %v1425_v1, %v4430_v39  ;;  %v1435_v46 = vsel %vm3440_vm6, %v1430_v12, %v1434_v31  ;;  %v2682_v10 = vrot.slane %v541_v7, 5  ;;  %v542_v11 = vmax.bf16 %v382_v40, %v4484_v44 }
 0x12f   : > { %3182 = vst.msk [vmem:[%s3473_s15 + $0x120] sm:$0xf] %vm3109_vm5, %v3053_v0  ;;  %v2220_v35 = vmax.bf16 %v1435_v46, %v539_v26  ;;  %v1439_v42 = vor.u32 %v1438_v5, %v1434_v31  ;;  %v1444_v49 = vrot.slane %v1442_v33, 5  ;;  %v543_v19 = vmax.bf16 %v383_v55, %v4490_v30 }
 0x130   : > { %v3054_v29 = vmax.bf16 %v2677_v6, %v2219_v18  ;;  %v2683_v39 = vsel %vm3423_vm4, %v2681_v59, %v2682_v10  ;;  %v1447_v27 = vshrl.u32 %v542_v11, 16  ;;  %v1450_v38 = vshll.u32 %v542_v11, 16  ;;  %v4525_v59 = vld [vmem:[%s3377_s11 + $0x1b4] sm:$0x1] }
 0x131   : > { %v3055_v56 = vmax.bf16 %v2680_v21, %v2220_v35  ;;  %v1440_v54 = vrot.slane %v1439_v42, 4  ;;  %v1456_v34 = vshll.u32 %v543_v19, 16  ;;  %v3320_v8 = vrot.slane %v542_v11, 9 }
 0x132   : > { %3183 = vst.msk [vmem:[%s3473_s15 + $0x124] sm:$0xf] %vm3109_vm5, %v3054_v29  ;;  %v1449_v26 = vrot.slane %v1447_v27, 4  ;;  %v1452_v9 = vrot.slane %v1450_v38, 5  ;;  %v2686_v53 = vrot.slane %v543_v19, 5  ;;  %v544_v20 = vmax.bf16 %v384_v28, %v4499_v14 }
 0x133   : > { %3184 = vst.msk [vmem:[%s3473_s15 + $0x128] sm:$0xf] %vm3109_vm5, %v3055_v56  ;;  %v1445_v15 = vsel %vm3440_vm6, %v1440_v54, %v1444_v49  ;;  %v1458_v16 = vrot.slane %v1456_v34, 5  ;;  %v1460_v3 = vshrl.u32 %v543_v19, 16  ;;  %v385_v62 = vmax.bf16 %v4460_v63, %v4395_v36 }
 0x134   : > { %v2221_v47 = vmax.bf16 %v1445_v15, %v540_v13  ;;  %v1453_v37 = vor.u32 %v1452_v9, %v1449_v26  ;;  %v2687_v6 = vsel %vm3423_vm4, %v3320_v8, %v2686_v53  ;;  %v1466_v32 = vshll.u32 %v544_v20, 16  ;;  %v4549_v26 = vld [vmem:[%s3377_s11 + $0x1bc] sm:$0xf] }
 0x135   : > { %v1462_v48 = vrot.slane %v1460_v3, 4  ;;  %v2688_v41 = vrot.slane %v2686_v53, 4  ;;  %v2689_v23 = vrot.slane %v544_v20, 5  ;;  %v545_v40 = vmax.bf16 %v385_v62, %v4513_v4 }
 0x136   : > { %v3056_v55 = vmax.bf16 %v2683_v39, %v2221_v47  ;;  %v1454_v28 = vrot.slane %v1453_v37, 4  ;;  %v1468_v58 = vrot.slane %v1466_v32, 5  ;;  %v1470_v2 = vshrl.u32 %v544_v20, 16  ;;  %v4535_v39 = vld [vmem:[%s3377_s11 + $0x1b8] sm:$0xf] }
 0x137   : > { %v1463_v36 = vor.u32 %v1462_v48, %v1458_v16  ;;  %v2690_v13 = vsel %vm3423_vm4, %v2688_v41, %v2689_v23  ;;  %v1476_v17 = vshll.u32 %v545_v40, 16  ;;  %v2691_v25 = vrot.slane %v2689_v23, 4 }
 0x138   : > { %3185 = vst.msk [vmem:[%s3473_s15 + $0x12c] sm:$0xf] %vm3109_vm5, %v3056_v55  ;;  %v1459_v60 = vsel %vm3440_vm6, %v1454_v28, %v1458_v16  ;;  %v1472_v61 = vrot.slane %v1470_v2, 4  ;;  %v2692_v7 = vrot.slane %v545_v40, 5  ;;  %v386_v52 = vmax.bf16 %v4476_v22, %v4413_v50  ;;  %v4553_v16 = vld [vmem:[%s3377_s11 + $0x1c0] sm:$0xf] }
 0x139   : > { %v2222_v12 = vmax.bf16 %v1459_v60, %v542_v11  ;;  %v1464_v31 = vrot.slane %v1463_v36, 4  ;;  %v1478_v21 = vrot.slane %v1476_v17, 5  ;;  %v1480_v0 = vshrl.u32 %v545_v40, 16  ;;  %v4563_v28 = vld [vmem:[%s3377_s11 + $0x1c4] sm:$0xf] }
 0x13a   : > { %v1473_v1 = vor.u32 %v1472_v61, %v1468_v58  ;;  %v2693_v5 = vsel %vm3423_vm4, %v2691_v25, %v2692_v7  ;;  %v546_v33 = vmax.bf16 %v386_v52, %v4525_v59  ;;  %v2694_v18 = vrot.slane %v2692_v7, 4 }
 0x13b   : > { %v3057_v46 = vmax.bf16 %v2687_v6, %v2222_v12  ;;  %v1469_v10 = vsel %vm3440_vm6, %v1464_v31, %v1468_v58  ;;  %v1482_v50 = vrot.slane %v1480_v0, 4  ;;  %v387_v11 = vmax.bf16 %v4484_v44, %v4423_v57 }
 0x13c   : > { %v2223_v35 = vmax.bf16 %v1469_v10, %v543_v19  ;;  %v1474_v42 = vrot.slane %v1473_v1, 4  ;;  %v1486_v49 = vshll.u32 %v546_v33, 16  ;;  %v2695_v29 = vrot.slane %v546_v33, 5 }
 0x13d   : > { %3186 = vst.msk [vmem:[%s3473_s15 + $0x130] sm:$0xf] %vm3109_vm5, %v3057_v46  ;;  %v1483_v27 = vor.u32 %v1482_v50, %v1478_v21  ;;  %v388_v38 = vmax.bf16 %v4490_v30, %v4426_v51  ;;  %v547_v56 = vmax.bf16 %v387_v11, %v4535_v39  ;;  %v389_v54 = vmax.bf16 %v4499_v14, %v4445_v43  ;;  %v4581_v11 = vld [vmem:[%s3377_s11 + $0x1c8] sm:$0x1] }
 0x13e   : > { %v3058_v57 = vmax.bf16 %v2690_v13, %v2223_v35  ;;  %v1479_v19 = vsel %vm3440_vm6, %v1474_v42, %v1478_v21  ;;  %v1488_v34 = vrot.slane %v1486_v49, 5  ;;  %v2696_v8 = vsel %vm3423_vm4, %v2694_v18, %v2695_v29 }
 0x13f   : > { %v2224_v9 = vmax.bf16 %v1479_v19, %v544_v20  ;;  %v1484_v53 = vrot.slane %v1483_v27, 4  ;;  %v548_v15 = vmax.bf16 %v388_v38, %v4549_v26  ;;  %v1491_v51 = vshrl.u32 %v547_v56, 16 }
 0x140   : > { %3187 = vst.msk [vmem:[%s3473_s15 + $0x134] sm:$0xf] %vm3109_vm5, %v3058_v57  ;;  %v1494_v43 = vshll.u32 %v547_v56, 16  ;;  %v3321_v3 = vrot.slane %v547_v56, 9  ;;  %v549_v62 = vmax.bf16 %v389_v54, %v4553_v16  ;;  %v390_v47 = vmax.bf16 %v4513_v4, %v4460_v63 }
 0x141   : > { %v3059_v37 = vmax.bf16 %v2693_v5, %v2224_v9  ;;  %v1489_v20 = vsel %vm3440_vm6, %v1484_v53, %v1488_v34  ;;  %v1493_v6 = vrot.slane %v1491_v51, 4  ;;  %v1500_v32 = vshll.u32 %v548_v15, 16  ;;  %v4594_v53 = vld [vmem:[%s3377_s11 + $0x1d0] sm:$0xf] }
 0x142   : > { %v2225_v48 = vmax.bf16 %v1489_v20, %v545_v40  ;;  %v1496_v41 = vrot.slane %v1494_v43, 5  ;;  %v2699_v23 = vrot.slane %v548_v15, 5  ;;  %v1504_v55 = vshrl.u32 %v548_v15, 16 }
 0x143   : > { %3188 = vst.msk [vmem:[%s3473_s15 + $0x138] sm:$0xf] %vm3109_vm5, %v3059_v37  ;;  %v1502_v58 = vrot.slane %v1500_v32, 5  ;;  %v1510_v2 = vshll.u32 %v549_v62, 16  ;;  %v2702_v36 = vrot.slane %v549_v62, 5  ;;  %v550_v63 = vmax.bf16 %v390_v47, %v4563_v28 }
 0x144   : > { %v3060_v13 = vmax.bf16 %v2696_v8, %v2225_v48  ;;  %v1497_v17 = vor.u32 %v1496_v41, %v1493_v6  ;;  %v2700_v25 = vsel %vm3423_vm4, %v3321_v3, %v2699_v23  ;;  %v1506_v60 = vrot.slane %v1504_v55, 4 }
 0x145   : > { %v1512_v40 = vrot.slane %v1510_v2, 5  ;;  %v2701_v61 = vrot.slane %v2699_v23, 4  ;;  %v1514_v7 = vshrl.u32 %v549_v62, 16  ;;  %v1520_v52 = vshll.u32 %v550_v63, 16  ;;  %v4613_v2 = vld [vmem:[%s3377_s11 + $0x1d4] sm:$0xf] }
 0x146   : > { %3189 = vst.msk [vmem:[%s3473_s15 + $0x13c] sm:$0xf] %vm3109_vm5, %v3060_v13  ;;  %v1498_v12 = vrot.slane %v1497_v17, 4  ;;  %v1507_v31 = vor.u32 %v1506_v60, %v1502_v58  ;;  %v2704_v21 = vrot.slane %v2702_v36, 4  ;;  %v2705_v0 = vrot.slane %v550_v63, 5 }
 0x147   : > { %v2703_v1 = vsel %vm3423_vm4, %v2701_v61, %v2702_v36  ;;  %v1516_v5 = vrot.slane %v1514_v7, 4  ;;  %v1522_v33 = vrot.slane %v1520_v52, 5  ;;  %v391_v18 = vmax.bf16 %v4525_v59, %v4476_v22 }
 0x148   : > { %v1503_v46 = vsel %vm3440_vm6, %v1498_v12, %v1502_v58  ;;  %v1508_v10 = vrot.slane %v1507_v31, 4  ;;  %v2706_v50 = vsel %vm3423_vm4, %v2704_v21, %v2705_v0  ;;  %v1524_v35 = vshrl.u32 %v550_v63, 16 }
 0x149   : > { %v2226_v42 = vmax.bf16 %v1503_v46, %v547_v56  ;;  %v1517_v49 = vor.u32 %v1516_v5, %v1512_v40  ;;  %v551_v29 = vmax.bf16 %v391_v18, %v4581_v11  ;;  %v2707_v27 = vrot.slane %v2705_v0, 4  ;;  %v4591_v56 = vld [vmem:[%s3377_s11 + $0x1cc] sm:$0xf]  ;;  %v4628_v18 = vld [vmem:[%s3377_s11 + $0x1d8] sm:$0xf] }
 0x14a   : > { %v1513_v22 = vsel %vm3440_vm6, %v1508_v10, %v1512_v40  ;;  %v1526_v38 = vrot.slane %v1524_v35, 4  ;;  %v392_v54 = vmax.bf16 %v4535_v39, %v4484_v44  ;;  %v393_v57 = vmax.bf16 %v4549_v26, %v4490_v30 }
 0x14b   : > { %v3061_v19 = vmax.bf16 %v2700_v25, %v2226_v42  ;;  %v2227_v34 = vmax.bf16 %v1513_v22, %v548_v15  ;;  %v1518_v8 = vrot.slane %v1517_v49, 4  ;;  %v1530_v9 = vshll.u32 %v551_v29, 16 }
 0x14c   : > { %v1527_v51 = vor.u32 %v1526_v38, %v1522_v33  ;;  %v2708_v43 = vrot.slane %v551_v29, 5  ;;  %v552_v3 = vmax.bf16 %v392_v54, %v4591_v56  ;;  %v4598_v47 = vmax.bf16 %v393_v57, %v4594_v53 }
 0x14d   : > { %3190 = vst.msk [vmem:[%s3473_s15 + $0x140] sm:$0xf] %vm3109_vm5, %v3061_v19  ;;  %v3062_v44 = vmax.bf16 %v2703_v1, %v2227_v34  ;;  %v1523_v30 = vsel %vm3440_vm6, %v1518_v8, %v1522_v33  ;;  %v1532_v15 = vrot.slane %v1530_v9, 5  ;;  %v394_v37 = vmax.bf16 %v4553_v16, %v4499_v14  ;;  %v4644_v19 = vld [vmem:[%s3377_s11 + $0x1dc] sm:$0x1] }
 0x14e   : > { %v2228_v20 = vmax.bf16 %v1523_v30, %v549_v62  ;;  %v1528_v6 = vrot.slane %v1527_v51, 4  ;;  %v2709_v32 = vsel %vm3423_vm4, %v2707_v27, %v2708_v43  ;;  %v1535_v48 = vshrl.u32 %v552_v3, 16 }
 0x14f   : > { %3191 = vst.msk [vmem:[%s3473_s15 + $0x144] sm:$0xf] %vm3109_vm5, %v3062_v44  ;;  %v1538_v41 = vshll.u32 %v552_v3, 16  ;;  %v1544_v23 = vshll.u32 %v4598_v47, 16  ;;  %v3322_v55 = vrot.slane %v552_v3, 9  ;;  %v2712_v58 = vrot.slane %v4598_v47, 5 }
 0x150   : > { %v3063_v36 = vmax.bf16 %v2706_v50, %v2228_v20  ;;  %v1533_v14 = vsel %vm3440_vm6, %v1528_v6, %v1532_v15  ;;  %v1537_v62 = vrot.slane %v1535_v48, 4  ;;  %v554_v13 = vmax.bf16 %v394_v37, %v4613_v2  ;;  %v4652_v37 = vld [vmem:[%s3377_s11 + $0x1e0] sm:$0xf] }
 0x151   : > { %v2229_v17 = vmax.bf16 %v1533_v14, %v550_v63  ;;  %v1540_v25 = vrot.slane %v1538_v41, 5  ;;  %v1546_v60 = vrot.slane %v1544_v23, 5  ;;  %v2713_v40 = vsel %vm3423_vm4, %v3322_v55, %v2712_v58 }
 0x152   : > { %3192 = vst.msk [vmem:[%s3473_s15 + $0x148] sm:$0xf] %vm3109_vm5, %v3063_v36  ;;  %v1548_v61 = vshrl.u32 %v4598_v47, 16  ;;  %v1554_v7 = vshll.u32 %v554_v13, 16  ;;  %v2714_v52 = vrot.slane %v2712_v58, 4  ;;  %v2715_v12 = vrot.slane %v554_v13, 5 }
 0x153   : > { %v3064_v31 = vmax.bf16 %v2709_v32, %v2229_v17  ;;  %v1541_v21 = vor.u32 %v1540_v25, %v1537_v62  ;;  %v395_v0 = vmax.bf16 %v4563_v28, %v4513_v4  ;;  %v1558_v63 = vshrl.u32 %v554_v13, 16  ;;  %v4658_v32 = vld [vmem:[%s3377_s11 + $0x1e4] sm:$0xf] }
 0x154   : > { %v1550_v1 = vrot.slane %v1548_v61, 4  ;;  %v1556_v5 = vrot.slane %v1554_v7, 5  ;;  %v2716_v33 = vsel %vm3423_vm4, %v2714_v52, %v2715_v12  ;;  %v2717_v46 = vrot.slane %v2715_v12, 4  ;;  %v4667_v61 = vld [vmem:[%s3377_s11 + $0x1e8] sm:$0xf] }
 0x155   : > { %3193 = vst.msk [vmem:[%s3473_s15 + $0x14c] sm:$0xf] %vm3109_vm5, %v3064_v31  ;;  %v1542_v10 = vrot.slane %v1541_v21, 4  ;;  %v555_v50 = vmax.bf16 %v395_v0, %v4628_v18  ;;  %v1560_v35 = vrot.slane %v1558_v63, 4  ;;  %v396_v42 = vmax.bf16 %v4581_v11, %v4525_v59 }
 0x156   : > { %v1551_v4 = vor.u32 %v1550_v1, %v1546_v60  ;;  %v397_v49 = vmax.bf16 %v4591_v56, %v4535_v39  ;;  %v398_v29 = vmax.bf16 %v4594_v53, %v4549_v26  ;;  %v399_v27 = vmax.bf16 %v4613_v2, %v4553_v16 }
 0x157   : > { %v1547_v22 = vsel %vm3440_vm6, %v1542_v10, %v1546_v60  ;;  %v1561_v38 = vor.u32 %v1560_v35, %v1556_v5  ;;  %v1564_v54 = vshll.u32 %v555_v50, 16  ;;  %v2718_v57 = vrot.slane %v555_v50, 5  ;;  %v4681_v10 = vld [vmem:[%s3377_s11 + $0x1ec] sm:$0xf] }
 0x158   : > { %v2230_v59 = vmax.bf16 %v1547_v22, %v552_v3  ;;  %v1552_v34 = vrot.slane %v1551_v4, 4  ;;  %v556_v39 = vmax.bf16 %v396_v42, %v4644_v19  ;;  %v1568_v8 = vshrl.u32 %v555_v50, 16 }
 0x159   : > { %v1562_v26 = vrot.slane %v1561_v38, 4  ;;  %v1566_v9 = vrot.slane %v1564_v54, 5  ;;  %v2719_v16 = vsel %vm3423_vm4, %v2717_v46, %v2718_v57  ;;  %v2720_v51 = vrot.slane %v2718_v57, 4 }
 0x15a   : > { %v3065_v43 = vmax.bf16 %v2713_v40, %v2230_v59  ;;  %v1557_v44 = vsel %vm3440_vm6, %v1552_v34, %v1556_v5  ;;  %v1570_v30 = vrot.slane %v1568_v8, 4  ;;  %v1574_v15 = vshll.u32 %v556_v39, 16 }
 0x15b   : > { %v2231_v3 = vmax.bf16 %v1557_v44, %v4598_v47  ;;  %v1567_v20 = vsel %vm3440_vm6, %v1562_v26, %v1566_v9  ;;  %v2721_v6 = vrot.slane %v556_v39, 5  ;;  %v557_v48 = vmax.bf16 %v397_v49, %v4652_v37 }
 0x15c   : > { %3194 = vst.msk [vmem:[%s3473_s15 + $0x150] sm:$0xf] %vm3109_vm5, %v3065_v43  ;;  %v2232_v41 = vmax.bf16 %v1567_v20, %v554_v13  ;;  %v1571_v23 = vor.u32 %v1570_v30, %v1566_v9  ;;  %v1576_v55 = vrot.slane %v1574_v15, 5  ;;  %v558_v58 = vmax.bf16 %v398_v29, %v4658_v32 }
 0x15d   : > { %v3066_v36 = vmax.bf16 %v2716_v33, %v2231_v3  ;;  %v2722_v47 = vsel %vm3423_vm4, %v2720_v51, %v2721_v6  ;;  %v1579_v14 = vshrl.u32 %v557_v48, 16  ;;  %v1582_v62 = vshll.u32 %v557_v48, 16  ;;  %v4693_v51 = vld [vmem:[%s3377_s11 + $0x1f0] sm:$0x1] }
 0x15e   : > { %v3067_v17 = vmax.bf16 %v2719_v16, %v2232_v41  ;;  %v1572_v25 = vrot.slane %v1571_v23, 4  ;;  %v1588_v60 = vshll.u32 %v558_v58, 16  ;;  %v3323_v40 = vrot.slane %v557_v48, 9 }
 0x15f   : > { %3195 = vst.msk [vmem:[%s3473_s15 + $0x154] sm:$0xf] %vm3109_vm5, %v3066_v36  ;;  %v1581_v13 = vrot.slane %v1579_v14, 4  ;;  %v1584_v7 = vrot.slane %v1582_v62, 5  ;;  %v2725_v52 = vrot.slane %v558_v58, 5  ;;  %v559_v12 = vmax.bf16 %v399_v27, %v4667_v61 }
 0x160   : > { %3196 = vst.msk [vmem:[%s3473_s15 + $0x158] sm:$0xf] %vm3109_vm5, %v3067_v17  ;;  %v1577_v31 = vsel %vm3440_vm6, %v1572_v25, %v1576_v55  ;;  %v1590_v21 = vrot.slane %v1588_v60, 5  ;;  %v1592_v0 = vshrl.u32 %v558_v58, 16  ;;  %v400_v63 = vmax.bf16 %v4628_v18, %v4563_v28 }
 0x161   : > { %v2233_v1 = vmax.bf16 %v1577_v31, %v555_v50  ;;  %v1585_v5 = vor.u32 %v1584_v7, %v1581_v13  ;;  %v2726_v33 = vsel %vm3423_vm4, %v3323_v40, %v2725_v52  ;;  %v1598_v46 = vshll.u32 %v559_v12, 16  ;;  %v4717_v13 = vld [vmem:[%s3377_s11 + $0x1f8] sm:$0xf] }
 0x162   : > { %v1594_v35 = vrot.slane %v1592_v0, 4  ;;  %v2727_v42 = vrot.slane %v2725_v52, 4  ;;  %v2728_v4 = vrot.slane %v559_v12, 5  ;;  %v560_v49 = vmax.bf16 %v400_v63, %v4681_v10 }
 0x163   : > { %v3068_v29 = vmax.bf16 %v2722_v47, %v2233_v1  ;;  %v1586_v27 = vrot.slane %v1585_v5, 4  ;;  %v1600_v22 = vrot.slane %v1598_v46, 5  ;;  %v1602_v38 = vshrl.u32 %v559_v12, 16  ;;  %v4703_v47 = vld [vmem:[%s3377_s11 + $0x1f4] sm:$0xf] }
 0x164   : > { %v1595_v28 = vor.u32 %v1594_v35, %v1590_v21  ;;  %v2729_v50 = vsel %vm3423_vm4, %v2727_v42, %v2728_v4  ;;  %v1608_v54 = vshll.u32 %v560_v49, 16  ;;  %v2730_v57 = vrot.slane %v2728_v4, 4 }
 0x165   : > { %3197 = vst.msk [vmem:[%s3473_s15 + $0x15c] sm:$0xf] %vm3109_vm5, %v3068_v29  ;;  %v1591_v59 = vsel %vm3440_vm6, %v1586_v27, %v1590_v21  ;;  %v1604_v34 = vrot.slane %v1602_v38, 4  ;;  %v2731_v39 = vrot.slane %v560_v49, 5  ;;  %v401_v8 = vmax.bf16 %v4644_v19, %v4581_v11  ;;  %v4721_v21 = vld [vmem:[%s3377_s11 + $0x1fc] sm:$0xf] }
 0x166   : > { %v2234_v26 = vmax.bf16 %v1591_v59, %v557_v48  ;;  %v1596_v9 = vrot.slane %v1595_v28, 4  ;;  %v1610_v16 = vrot.slane %v1608_v54, 5  ;;  %v1612_v43 = vshrl.u32 %v560_v49, 16  ;;  %v4731_v27 = vld [vmem:[%s3377_s11 + $0x200] sm:$0xf] }
 0x167   : > { %v1605_v44 = vor.u32 %v1604_v34, %v1600_v22  ;;  %v2732_v30 = vsel %vm3423_vm4, %v2730_v57, %v2731_v39  ;;  %v561_v15 = vmax.bf16 %v401_v8, %v4693_v51  ;;  %v2733_v3 = vrot.slane %v2731_v39, 4 }
 0x168   : > { %v3069_v20 = vmax.bf16 %v2726_v33, %v2234_v26  ;;  %v1601_v6 = vsel %vm3440_vm6, %v1596_v9, %v1600_v22  ;;  %v1614_v11 = vrot.slane %v1612_v43, 4  ;;  %v402_v48 = vmax.bf16 %v4652_v37, %v4591_v56 }
 0x169   : > { %v2235_v41 = vmax.bf16 %v1601_v6, %v558_v58  ;;  %v1606_v23 = vrot.slane %v1605_v44, 4  ;;  %v1618_v55 = vshll.u32 %v561_v15, 16  ;;  %v2734_v36 = vrot.slane %v561_v15, 5 }
 0x16a   : > { %3198 = vst.msk [vmem:[%s3473_s15 + $0x160] sm:$0xf] %vm3109_vm5, %v3069_v20  ;;  %v1615_v14 = vor.u32 %v1614_v11, %v1610_v16  ;;  %v403_v62 = vmax.bf16 %v4658_v32, %v4594_v53  ;;  %v562_v17 = vmax.bf16 %v402_v48, %v4703_v47  ;;  %v404_v25 = vmax.bf16 %v4667_v61, %v4613_v2  ;;  %v4749_v48 = vld [vmem:[%s3377_s11 + $0x204] sm:$0x1] }
 0x16b   : > { %v3070_v56 = vmax.bf16 %v2729_v50, %v2235_v41  ;;  %v1611_v58 = vsel %vm3440_vm6, %v1606_v23, %v1610_v16  ;;  %v1620_v60 = vrot.slane %v1618_v55, 5  ;;  %v2735_v40 = vsel %vm3423_vm4, %v2733_v3, %v2734_v36 }
 0x16c   : > { %v2236_v7 = vmax.bf16 %v1611_v58, %v559_v12  ;;  %v1616_v52 = vrot.slane %v1615_v14, 4  ;;  %v563_v31 = vmax.bf16 %v403_v62, %v4717_v13  ;;  %v1623_v53 = vshrl.u32 %v562_v17, 16 }
 0x16d   : > { %3199 = vst.msk [vmem:[%s3473_s15 + $0x164] sm:$0xf] %vm3109_vm5, %v3070_v56  ;;  %v1626_v2 = vshll.u32 %v562_v17, 16  ;;  %v3324_v0 = vrot.slane %v562_v17, 9  ;;  %v564_v63 = vmax.bf16 %v404_v25, %v4721_v21  ;;  %v405_v1 = vmax.bf16 %v4681_v10, %v4628_v18 }
 0x16e   : > { %v3071_v5 = vmax.bf16 %v2732_v30, %v2236_v7  ;;  %v1621_v12 = vsel %vm3440_vm6, %v1616_v52, %v1620_v60  ;;  %v1625_v33 = vrot.slane %v1623_v53, 4  ;;  %v1632_v46 = vshll.u32 %v563_v31, 16  ;;  %v4762_v52 = vld [vmem:[%s3377_s11 + $0x20c] sm:$0xf] }
 0x16f   : > { %v2237_v35 = vmax.bf16 %v1621_v12, %v560_v49  ;;  %v1628_v42 = vrot.slane %v1626_v2, 5  ;;  %v2738_v4 = vrot.slane %v563_v31, 5  ;;  %v1636_v29 = vshrl.u32 %v563_v31, 16 }
 0x170   : > { %3200 = vst.msk [vmem:[%s3473_s15 + $0x168] sm:$0xf] %vm3109_vm5, %v3071_v5  ;;  %v1634_v22 = vrot.slane %v1632_v46, 5  ;;  %v1642_v38 = vshll.u32 %v564_v63, 16  ;;  %v2741_v28 = vrot.slane %v564_v63, 5  ;;  %v565_v18 = vmax.bf16 %v405_v1, %v4731_v27 }
 0x171   : > { %v3072_v50 = vmax.bf16 %v2735_v40, %v2237_v35  ;;  %v1629_v54 = vor.u32 %v1628_v42, %v1625_v33  ;;  %v2739_v57 = vsel %vm3423_vm4, %v3324_v0, %v2738_v4  ;;  %v1638_v59 = vrot.slane %v1636_v29, 4 }
 0x172   : > { %v1644_v49 = vrot.slane %v1642_v38, 5  ;;  %v2740_v34 = vrot.slane %v2738_v4, 4  ;;  %v1646_v39 = vshrl.u32 %v564_v63, 16  ;;  %v1652_v8 = vshll.u32 %v565_v18, 16  ;;  %v4781_v38 = vld [vmem:[%s3377_s11 + $0x210] sm:$0xf] }
 0x173   : > { %3201 = vst.msk [vmem:[%s3473_s15 + $0x16c] sm:$0xf] %vm3109_vm5, %v3072_v50  ;;  %v1630_v26 = vrot.slane %v1629_v54, 4  ;;  %v1639_v9 = vor.u32 %v1638_v59, %v1634_v22  ;;  %v2743_v16 = vrot.slane %v2741_v28, 4  ;;  %v2744_v43 = vrot.slane %v565_v18, 5 }
 0x174   : > { %v2742_v44 = vsel %vm3423_vm4, %v2740_v34, %v2741_v28  ;;  %v1648_v30 = vrot.slane %v1646_v39, 4  ;;  %v1654_v15 = vrot.slane %v1652_v8, 5  ;;  %v406_v3 = vmax.bf16 %v4693_v51, %v4644_v19 }
 0x175   : > { %v1635_v20 = vsel %vm3440_vm6, %v1630_v26, %v1634_v22  ;;  %v1640_v6 = vrot.slane %v1639_v9, 4  ;;  %v2745_v11 = vsel %vm3423_vm4, %v2743_v16, %v2744_v43  ;;  %v1656_v41 = vshrl.u32 %v565_v18, 16 }
 0x176   : > { %v2238_v23 = vmax.bf16 %v1635_v20, %v562_v17  ;;  %v1649_v55 = vor.u32 %v1648_v30, %v1644_v49  ;;  %v566_v36 = vmax.bf16 %v406_v3, %v4749_v48  ;;  %v2746_v14 = vrot.slane %v2744_v43, 4  ;;  %v4759_v17 = vld [vmem:[%s3377_s11 + $0x208] sm:$0xf]  ;;  %v4796_v3 = vld [vmem:[%s3377_s11 + $0x214] sm:$0xf] }
 0x177   : > { %v1645_v19 = vsel %vm3440_vm6, %v1640_v6, %v1644_v49  ;;  %v1658_v62 = vrot.slane %v1656_v41, 4  ;;  %v407_v25 = vmax.bf16 %v4703_v47, %v4652_v37  ;;  %v408_v56 = vmax.bf16 %v4717_v13, %v4658_v32 }
 0x178   : > { %v3073_v58 = vmax.bf16 %v2739_v57, %v2238_v23  ;;  %v2239_v60 = vmax.bf16 %v1645_v19, %v563_v31  ;;  %v1650_v40 = vrot.slane %v1649_v55, 4  ;;  %v1662_v7 = vshll.u32 %v566_v36, 16 }
 0x179   : > { %v1659_v53 = vor.u32 %v1658_v62, %v1654_v15  ;;  %v2747_v2 = vrot.slane %v566_v36, 5  ;;  %v567_v0 = vmax.bf16 %v407_v25, %v4759_v17  ;;  %v4766_v1 = vmax.bf16 %v408_v56, %v4762_v52 }
 0x17a   : > { %3202 = vst.msk [vmem:[%s3473_s15 + $0x170] sm:$0xf] %vm3109_vm5, %v3073_v58  ;;  %v3074_v37 = vmax.bf16 %v2742_v44, %v2239_v60  ;;  %v1655_v32 = vsel %vm3440_vm6, %v1650_v40, %v1654_v15  ;;  %v1664_v31 = vrot.slane %v1662_v7, 5  ;;  %v409_v5 = vmax.bf16 %v4721_v21, %v4667_v61  ;;  %v4812_v58 = vld [vmem:[%s3377_s11 + $0x218] sm:$0x1] }
 0x17b   : > { %v2240_v12 = vmax.bf16 %v1655_v32, %v564_v63  ;;  %v1660_v33 = vrot.slane %v1659_v53, 4  ;;  %v2748_v46 = vsel %vm3423_vm4, %v2746_v14, %v2747_v2  ;;  %v1667_v35 = vshrl.u32 %v567_v0, 16 }
 0x17c   : > { %3203 = vst.msk [vmem:[%s3473_s15 + $0x174] sm:$0xf] %vm3109_vm5, %v3074_v37  ;;  %v1670_v42 = vshll.u32 %v567_v0, 16  ;;  %v1676_v4 = vshll.u32 %v4766_v1, 16  ;;  %v3325_v29 = vrot.slane %v567_v0, 9  ;;  %v2751_v22 = vrot.slane %v4766_v1, 5 }
 0x17d   : > { %v3075_v28 = vmax.bf16 %v2745_v11, %v2240_v12  ;;  %v1665_v61 = vsel %vm3440_vm6, %v1660_v33, %v1664_v31  ;;  %v1669_v63 = vrot.slane %v1667_v35, 4  ;;  %v569_v50 = vmax.bf16 %v409_v5, %v4781_v38  ;;  %v4820_v5 = vld [vmem:[%s3377_s11 + $0x21c] sm:$0xf] }
 0x17e   : > { %v2241_v54 = vmax.bf16 %v1665_v61, %v565_v18  ;;  %v1672_v57 = vrot.slane %v1670_v42, 5  ;;  %v1678_v59 = vrot.slane %v1676_v4, 5  ;;  %v2752_v49 = vsel %vm3423_vm4, %v3325_v29, %v2751_v22 }
 0x17f   : > { %3204 = vst.msk [vmem:[%s3473_s15 + $0x178] sm:$0xf] %vm3109_vm5, %v3075_v28  ;;  %v1680_v34 = vshrl.u32 %v4766_v1, 16  ;;  %v1686_v39 = vshll.u32 %v569_v50, 16  ;;  %v2753_v8 = vrot.slane %v2751_v22, 4  ;;  %v2754_v26 = vrot.slane %v569_v50, 5 }
 0x180   : > { %v3076_v9 = vmax.bf16 %v2748_v46, %v2241_v54  ;;  %v1673_v16 = vor.u32 %v1672_v57, %v1669_v63  ;;  %v410_v43 = vmax.bf16 %v4731_v27, %v4681_v10  ;;  %v1690_v18 = vshrl.u32 %v569_v50, 16  ;;  %v4826_v46 = vld [vmem:[%s3377_s11 + $0x220] sm:$0xf] }
 0x181   : > { %v1682_v44 = vrot.slane %v1680_v34, 4  ;;  %v1688_v30 = vrot.slane %v1686_v39, 5  ;;  %v2755_v15 = vsel %vm3423_vm4, %v2753_v8, %v2754_v26  ;;  %v2756_v20 = vrot.slane %v2754_v26, 4  ;;  %v4835_v34 = vld [vmem:[%s3377_s11 + $0x224] sm:$0xf] }
 0x182   : > { %3205 = vst.msk [vmem:[%s3473_s15 + $0x17c] sm:$0xf] %vm3109_vm5, %v3076_v9  ;;  %v1674_v6 = vrot.slane %v1673_v16, 4  ;;  %v570_v11 = vmax.bf16 %v410_v43, %v4796_v3  ;;  %v1692_v41 = vrot.slane %v1690_v18, 4  ;;  %v411_v23 = vmax.bf16 %v4749_v48, %v4693_v51 }
 0x183   : > { %v1683_v10 = vor.u32 %v1682_v44, %v1678_v59  ;;  %v412_v55 = vmax.bf16 %v4759_v17, %v4703_v47  ;;  %v413_v36 = vmax.bf16 %v4762_v52, %v4717_v13  ;;  %v414_v14 = vmax.bf16 %v4781_v38, %v4721_v21 }
 0x184   : > { %v1679_v19 = vsel %vm3440_vm6, %v1674_v6, %v1678_v59  ;;  %v1693_v62 = vor.u32 %v1692_v41, %v1688_v30  ;;  %v1696_v25 = vshll.u32 %v570_v11, 16  ;;  %v2757_v56 = vrot.slane %v570_v11, 5  ;;  %v4849_v6 = vld [vmem:[%s3377_s11 + $0x228] sm:$0xf] }
 0x185   : > { %v2242_v51 = vmax.bf16 %v1679_v19, %v567_v0  ;;  %v1684_v60 = vrot.slane %v1683_v10, 4  ;;  %v571_v47 = vmax.bf16 %v411_v23, %v4812_v58  ;;  %v1700_v40 = vshrl.u32 %v570_v11, 16 }
 0x186   : > { %v1694_v13 = vrot.slane %v1693_v62, 4  ;;  %v1698_v7 = vrot.slane %v1696_v25, 5  ;;  %v2758_v21 = vsel %vm3423_vm4, %v2756_v20, %v2757_v56  ;;  %v2759_v53 = vrot.slane %v2757_v56, 4 }
 0x187   : > { %v3077_v2 = vmax.bf16 %v2752_v49, %v2242_v51  ;;  %v1689_v37 = vsel %vm3440_vm6, %v1684_v60, %v1688_v30  ;;  %v1702_v32 = vrot.slane %v1700_v40, 4  ;;  %v1706_v31 = vshll.u32 %v571_v47, 16 }
 0x188   : > { %v2243_v0 = vmax.bf16 %v1689_v37, %v4766_v1  ;;  %v1699_v12 = vsel %vm3440_vm6, %v1694_v13, %v1698_v7  ;;  %v2760_v33 = vrot.slane %v571_v47, 5  ;;  %v572_v35 = vmax.bf16 %v412_v55, %v4820_v5 }
 0x189   : > { %3206 = vst.msk [vmem:[%s3473_s15 + $0x180] sm:$0xf] %vm3109_vm5, %v3077_v2  ;;  %v2244_v42 = vmax.bf16 %v1699_v12, %v569_v50  ;;  %v1703_v4 = vor.u32 %v1702_v32, %v1698_v7  ;;  %v1708_v29 = vrot.slane %v1706_v31, 5  ;;  %v573_v22 = vmax.bf16 %v413_v36, %v4826_v46 }
 0x18a   : > { %v3078_v28 = vmax.bf16 %v2755_v15, %v2243_v0  ;;  %v2761_v1 = vsel %vm3423_vm4, %v2759_v53, %v2760_v33  ;;  %v1711_v61 = vshrl.u32 %v572_v35, 16  ;;  %v1714_v63 = vshll.u32 %v572_v35, 16  ;;  %v4861_v53 = vld [vmem:[%s3377_s11 + $0x22c] sm:$0x1] }
 0x18b   : > { %v3079_v54 = vmax.bf16 %v2758_v21, %v2244_v42  ;;  %v1704_v57 = vrot.slane %v1703_v4, 4  ;;  %v1720_v59 = vshll.u32 %v573_v22, 16  ;;  %v3326_v49 = vrot.slane %v572_v35, 9 }
 0x18c   : > { %3207 = vst.msk [vmem:[%s3473_s15 + $0x184] sm:$0xf] %vm3109_vm5, %v3078_v28  ;;  %v1713_v50 = vrot.slane %v1711_v61, 4  ;;  %v1716_v39 = vrot.slane %v1714_v63, 5  ;;  %v2764_v8 = vrot.slane %v573_v22, 5  ;;  %v574_v26 = vmax.bf16 %v414_v14, %v4835_v34 }
 0x18d   : > { %3208 = vst.msk [vmem:[%s3473_s15 + $0x188] sm:$0xf] %vm3109_vm5, %v3079_v54  ;;  %v1709_v9 = vsel %vm3440_vm6, %v1704_v57, %v1708_v29  ;;  %v1722_v16 = vrot.slane %v1720_v59, 5  ;;  %v1724_v43 = vshrl.u32 %v573_v22, 16  ;;  %v415_v18 = vmax.bf16 %v4796_v3, %v4731_v27 }
 0x18e   : > { %v2245_v44 = vmax.bf16 %v1709_v9, %v570_v11  ;;  %v1717_v30 = vor.u32 %v1716_v39, %v1713_v50  ;;  %v2765_v15 = vsel %vm3423_vm4, %v3326_v49, %v2764_v8  ;;  %v1730_v20 = vshll.u32 %v574_v26, 16  ;;  %v4885_v50 = vld [vmem:[%s3377_s11 + $0x234] sm:$0xf] }
 0x18f   : > { %v1726_v41 = vrot.slane %v1724_v43, 4  ;;  %v2766_v23 = vrot.slane %v2764_v8, 4  ;;  %v2767_v10 = vrot.slane %v574_v26, 5  ;;  %v575_v55 = vmax.bf16 %v415_v18, %v4849_v6 }
 0x190   : > { %v3080_v36 = vmax.bf16 %v2761_v1, %v2245_v44  ;;  %v1718_v14 = vrot.slane %v1717_v30, 4  ;;  %v1732_v19 = vrot.slane %v1730_v20, 5  ;;  %v1734_v62 = vshrl.u32 %v574_v26, 16  ;;  %v4871_v1 = vld [vmem:[%s3377_s11 + $0x230] sm:$0xf] }
 0x191   : > { %v1727_v27 = vor.u32 %v1726_v41, %v1722_v16  ;;  %v2768_v11 = vsel %vm3423_vm4, %v2766_v23, %v2767_v10  ;;  %v1740_v25 = vshll.u32 %v575_v55, 16  ;;  %v2769_v56 = vrot.slane %v2767_v10, 4 }
 0x192   : > { %3209 = vst.msk [vmem:[%s3473_s15 + $0x18c] sm:$0xf] %vm3109_vm5, %v3080_v36  ;;  %v1723_v51 = vsel %vm3440_vm6, %v1718_v14, %v1722_v16  ;;  %v1736_v60 = vrot.slane %v1734_v62, 4  ;;  %v2770_v47 = vrot.slane %v575_v55, 5  ;;  %v416_v40 = vmax.bf16 %v4812_v58, %v4749_v48  ;;  %v4889_v16 = vld [vmem:[%s3377_s11 + $0x238] sm:$0xf] }
 0x193   : > { %v2246_v13 = vmax.bf16 %v1723_v51, %v572_v35  ;;  %v1728_v7 = vrot.slane %v1727_v27, 4  ;;  %v1742_v21 = vrot.slane %v1740_v25, 5  ;;  %v1744_v2 = vshrl.u32 %v575_v55, 16  ;;  %v4899_v14 = vld [vmem:[%s3377_s11 + $0x23c] sm:$0xf] }
 0x194   : > { %v1737_v37 = vor.u32 %v1736_v60, %v1732_v19  ;;  %v2771_v32 = vsel %vm3423_vm4, %v2769_v56, %v2770_v47  ;;  %v576_v31 = vmax.bf16 %v416_v40, %v4861_v53  ;;  %v2772_v0 = vrot.slane %v2770_v47, 4 }
 0x195   : > { %v3081_v12 = vmax.bf16 %v2765_v15, %v2246_v13  ;;  %v1733_v33 = vsel %vm3440_vm6, %v1728_v7, %v1732_v19  ;;  %v1746_v48 = vrot.slane %v1744_v2, 4  ;;  %v417_v35 = vmax.bf16 %v4820_v5, %v4759_v17 }
 0x196   : > { %v2247_v42 = vmax.bf16 %v1733_v33, %v573_v22  ;;  %v1738_v4 = vrot.slane %v1737_v37, 4  ;;  %v1750_v29 = vshll.u32 %v576_v31, 16  ;;  %v2773_v28 = vrot.slane %v576_v31, 5 }
 0x197   : > { %3210 = vst.msk [vmem:[%s3473_s15 + $0x190] sm:$0xf] %vm3109_vm5, %v3081_v12  ;;  %v1747_v61 = vor.u32 %v1746_v48, %v1742_v21  ;;  %v418_v63 = vmax.bf16 %v4826_v46, %v4762_v52  ;;  %v577_v54 = vmax.bf16 %v417_v35, %v4871_v1  ;;  %v419_v57 = vmax.bf16 %v4835_v34, %v4781_v38  ;;  %v4917_v35 = vld [vmem:[%s3377_s11 + $0x240] sm:$0x1] }
 0x198   : > { %v3082_v17 = vmax.bf16 %v2768_v11, %v2247_v42  ;;  %v1743_v22 = vsel %vm3440_vm6, %v1738_v4, %v1742_v21  ;;  %v1752_v59 = vrot.slane %v1750_v29, 5  ;;  %v2774_v49 = vsel %vm3423_vm4, %v2772_v0, %v2773_v28 }
 0x199   : > { %v2248_v39 = vmax.bf16 %v1743_v22, %v574_v26  ;;  %v1748_v8 = vrot.slane %v1747_v61, 4  ;;  %v578_v9 = vmax.bf16 %v418_v63, %v4885_v50  ;;  %v1755_v52 = vshrl.u32 %v577_v54, 16 }
 0x19a   : > { %3211 = vst.msk [vmem:[%s3473_s15 + $0x194] sm:$0xf] %vm3109_vm5, %v3082_v17  ;;  %v1758_v38 = vshll.u32 %v577_v54, 16  ;;  %v3327_v43 = vrot.slane %v577_v54, 9  ;;  %v579_v18 = vmax.bf16 %v419_v57, %v4889_v16  ;;  %v420_v44 = vmax.bf16 %v4849_v6, %v4796_v3 }
 0x19b   : > { %v3083_v30 = vmax.bf16 %v2771_v32, %v2248_v39  ;;  %v1753_v26 = vsel %vm3440_vm6, %v1748_v8, %v1752_v59  ;;  %v1757_v15 = vrot.slane %v1755_v52, 4  ;;  %v1764_v20 = vshll.u32 %v578_v9, 16  ;;  %v4930_v8 = vld [vmem:[%s3377_s11 + $0x248] sm:$0xf] }
 0x19c   : > { %v2249_v41 = vmax.bf16 %v1753_v26, %v575_v55  ;;  %v1760_v23 = vrot.slane %v1758_v38, 5  ;;  %v2777_v10 = vrot.slane %v578_v9, 5  ;;  %v1768_v36 = vshrl.u32 %v578_v9, 16 }
 0x19d   : > { %3212 = vst.msk [vmem:[%s3473_s15 + $0x198] sm:$0xf] %vm3109_vm5, %v3083_v30  ;;  %v1766_v19 = vrot.slane %v1764_v20, 5  ;;  %v1774_v62 = vshll.u32 %v579_v18, 16  ;;  %v2780_v27 = vrot.slane %v579_v18, 5  ;;  %v580_v3 = vmax.bf16 %v420_v44, %v4899_v14 }
 0x19e   : > { %v3084_v11 = vmax.bf16 %v2774_v49, %v2249_v41  ;;  %v1761_v25 = vor.u32 %v1760_v23, %v1757_v15  ;;  %v2778_v56 = vsel %vm3423_vm4, %v3327_v43, %v2777_v10  ;;  %v1770_v51 = vrot.slane %v1768_v36, 4 }
 0x19f   : > { %v1776_v55 = vrot.slane %v1774_v62, 5  ;;  %v2779_v60 = vrot.slane %v2777_v10, 4  ;;  %v1778_v47 = vshrl.u32 %v579_v18, 16  ;;  %v1784_v40 = vshll.u32 %v580_v3, 16  ;;  %v4949_v62 = vld [vmem:[%s3377_s11 + $0x24c] sm:$0xf] }
 0x1a0   : > { %3213 = vst.msk [vmem:[%s3473_s15 + $0x19c] sm:$0xf] %vm3109_vm5, %v3084_v11  ;;  %v1762_v13 = vrot.slane %v1761_v25, 4  ;;  %v1771_v7 = vor.u32 %v1770_v51, %v1766_v19  ;;  %v2782_v21 = vrot.slane %v2780_v27, 4  ;;  %v2783_v2 = vrot.slane %v580_v3, 5 }
 0x1a1   : > { %v2781_v37 = vsel %vm3423_vm4, %v2779_v60, %v2780_v27  ;;  %v1780_v32 = vrot.slane %v1778_v47, 4  ;;  %v1786_v31 = vrot.slane %v1784_v40, 5  ;;  %v421_v0 = vmax.bf16 %v4861_v53, %v4812_v58 }
 0x1a2   : > { %v1767_v12 = vsel %vm3440_vm6, %v1762_v13, %v1766_v19  ;;  %v1772_v33 = vrot.slane %v1771_v7, 4  ;;  %v2784_v48 = vsel %vm3423_vm4, %v2782_v21, %v2783_v2  ;;  %v1788_v42 = vshrl.u32 %v580_v3, 16 }
 0x1a3   : > { %v2250_v4 = vmax.bf16 %v1767_v12, %v577_v54  ;;  %v1781_v29 = vor.u32 %v1780_v32, %v1776_v55  ;;  %v581_v28 = vmax.bf16 %v421_v0, %v4917_v35  ;;  %v2785_v61 = vrot.slane %v2783_v2, 4  ;;  %v4927_v54 = vld [vmem:[%s3377_s11 + $0x244] sm:$0xf]  ;;  %v4964_v0 = vld [vmem:[%s3377_s11 + $0x250] sm:$0xf] }
 0x1a4   : > { %v1777_v58 = vsel %vm3440_vm6, %v1772_v33, %v1776_v55  ;;  %v1790_v63 = vrot.slane %v1788_v42, 4  ;;  %v422_v57 = vmax.bf16 %v4871_v1, %v4820_v5  ;;  %v423_v17 = vmax.bf16 %v4885_v50, %v4826_v46 }
 0x1a5   : > { %v3085_v22 = vmax.bf16 %v2778_v56, %v2250_v4  ;;  %v2251_v59 = vmax.bf16 %v1777_v58, %v578_v9  ;;  %v1782_v49 = vrot.slane %v1781_v29, 4  ;;  %v1794_v39 = vshll.u32 %v581_v28, 16 }
 0x1a6   : > { %v1791_v52 = vor.u32 %v1790_v63, %v1786_v31  ;;  %v2786_v38 = vrot.slane %v581_v28, 5  ;;  %v582_v43 = vmax.bf16 %v422_v57, %v4927_v54  ;;  %v4934_v44 = vmax.bf16 %v423_v17, %v4930_v8 }
 0x1a7   : > { %3214 = vst.msk [vmem:[%s3473_s15 + $0x1a0] sm:$0xf] %vm3109_vm5, %v3085_v22  ;;  %v3086_v5 = vmax.bf16 %v2781_v37, %v2251_v59  ;;  %v1787_v46 = vsel %vm3440_vm6, %v1782_v49, %v1786_v31  ;;  %v1796_v9 = vrot.slane %v1794_v39, 5  ;;  %v424_v30 = vmax.bf16 %v4889_v16, %v4835_v34  ;;  %v4980_v22 = vld [vmem:[%s3377_s11 + $0x254] sm:$0x1] }
 0x1a8   : > { %v2252_v26 = vmax.bf16 %v1787_v46, %v579_v18  ;;  %v1792_v15 = vrot.slane %v1791_v52, 4  ;;  %v2787_v20 = vsel %vm3423_vm4, %v2785_v61, %v2786_v38  ;;  %v1799_v41 = vshrl.u32 %v582_v43, 16 }
 0x1a9   : > { %3215 = vst.msk [vmem:[%s3473_s15 + $0x1a4] sm:$0xf] %vm3109_vm5, %v3086_v5  ;;  %v1802_v23 = vshll.u32 %v582_v43, 16  ;;  %v1808_v10 = vshll.u32 %v4934_v44, 16  ;;  %v3328_v36 = vrot.slane %v582_v43, 9  ;;  %v2790_v19 = vrot.slane %v4934_v44, 5 }
 0x1aa   : > { %v3087_v27 = vmax.bf16 %v2784_v48, %v2252_v26  ;;  %v1797_v34 = vsel %vm3440_vm6, %v1792_v15, %v1796_v9  ;;  %v1801_v18 = vrot.slane %v1799_v41, 4  ;;  %v584_v11 = vmax.bf16 %v424_v30, %v4949_v62  ;;  %v4988_v30 = vld [vmem:[%s3377_s11 + $0x258] sm:$0xf] }
 0x1ab   : > { %v2253_v25 = vmax.bf16 %v1797_v34, %v580_v3  ;;  %v1804_v56 = vrot.slane %v1802_v23, 5  ;;  %v1810_v51 = vrot.slane %v1808_v10, 5  ;;  %v2791_v55 = vsel %vm3423_vm4, %v3328_v36, %v2790_v19 }
 0x1ac   : > { %3216 = vst.msk [vmem:[%s3473_s15 + $0x1a8] sm:$0xf] %vm3109_vm5, %v3087_v27  ;;  %v1812_v60 = vshrl.u32 %v4934_v44, 16  ;;  %v1818_v47 = vshll.u32 %v584_v11, 16  ;;  %v2792_v40 = vrot.slane %v2790_v19, 4  ;;  %v2793_v13 = vrot.slane %v584_v11, 5 }
 0x1ad   : > { %v3088_v7 = vmax.bf16 %v2787_v20, %v2253_v25  ;;  %v1805_v21 = vor.u32 %v1804_v56, %v1801_v18  ;;  %v425_v2 = vmax.bf16 %v4899_v14, %v4849_v6  ;;  %v1822_v3 = vshrl.u32 %v584_v11, 16  ;;  %v4994_v20 = vld [vmem:[%s3377_s11 + $0x25c] sm:$0xf] }
 0x1ae   : > { %v1814_v37 = vrot.slane %v1812_v60, 4  ;;  %v1820_v32 = vrot.slane %v1818_v47, 5  ;;  %v2794_v31 = vsel %vm3423_vm4, %v2792_v40, %v2793_v13  ;;  %v2795_v12 = vrot.slane %v2793_v13, 4  ;;  %v5003_v60 = vld [vmem:[%s3377_s11 + $0x260] sm:$0xf] }
 0x1af   : > { %3217 = vst.msk [vmem:[%s3473_s15 + $0x1ac] sm:$0xf] %vm3109_vm5, %v3088_v7  ;;  %v1806_v33 = vrot.slane %v1805_v21, 4  ;;  %v585_v48 = vmax.bf16 %v425_v2, %v4964_v0  ;;  %v1824_v42 = vrot.slane %v1822_v3, 4  ;;  %v426_v4 = vmax.bf16 %v4917_v35, %v4861_v53 }
 0x1b0   : > { %v1815_v6 = vor.u32 %v1814_v37, %v1810_v51  ;;  %v427_v29 = vmax.bf16 %v4927_v54, %v4871_v1  ;;  %v428_v28 = vmax.bf16 %v4930_v8, %v4885_v50  ;;  %v429_v61 = vmax.bf16 %v4949_v62, %v4889_v16 }
 0x1b1   : > { %v1811_v58 = vsel %vm3440_vm6, %v1806_v33, %v1810_v51  ;;  %v1825_v63 = vor.u32 %v1824_v42, %v1820_v32  ;;  %v1828_v57 = vshll.u32 %v585_v48, 16  ;;  %v2796_v17 = vrot.slane %v585_v48, 5  ;;  %v5017_v33 = vld [vmem:[%s3377_s11 + $0x264] sm:$0xf] }
 0x1b2   : > { %v2254_v53 = vmax.bf16 %v1811_v58, %v582_v43  ;;  %v1816_v59 = vrot.slane %v1815_v6, 4  ;;  %v586_v1 = vmax.bf16 %v426_v4, %v4980_v22  ;;  %v1832_v49 = vshrl.u32 %v585_v48, 16 }
 0x1b3   : > { %v1826_v50 = vrot.slane %v1825_v63, 4  ;;  %v1830_v39 = vrot.slane %v1828_v57, 5  ;;  %v2797_v16 = vsel %vm3423_vm4, %v2795_v12, %v2796_v17  ;;  %v2798_v52 = vrot.slane %v2796_v17, 4 }
 0x1b4   : > { %v3089_v38 = vmax.bf16 %v2791_v55, %v2254_v53  ;;  %v1821_v5 = vsel %vm3440_vm6, %v1816_v59, %v1820_v32  ;;  %v1834_v46 = vrot.slane %v1832_v49, 4  ;;  %v1838_v9 = vshll.u32 %v586_v1, 16 }
 0x1b5   : > { %v2255_v43 = vmax.bf16 %v1821_v5, %v4934_v44  ;;  %v1831_v26 = vsel %vm3440_vm6, %v1826_v50, %v1830_v39  ;;  %v2799_v15 = vrot.slane %v586_v1, 5  ;;  %v587_v41 = vmax.bf16 %v427_v29, %v4988_v30 }
 0x1b6   : > { %3218 = vst.msk [vmem:[%s3473_s15 + $0x1b0] sm:$0xf] %vm3109_vm5, %v3089_v38  ;;  %v2256_v23 = vmax.bf16 %v1831_v26, %v584_v11  ;;  %v1835_v10 = vor.u32 %v1834_v46, %v1830_v39  ;;  %v1840_v36 = vrot.slane %v1838_v9, 5  ;;  %v588_v19 = vmax.bf16 %v428_v28, %v4994_v20 }
 0x1b7   : > { %v3090_v27 = vmax.bf16 %v2794_v31, %v2255_v43  ;;  %v2800_v44 = vsel %vm3423_vm4, %v2798_v52, %v2799_v15  ;;  %v1843_v34 = vshrl.u32 %v587_v41, 16  ;;  %v1846_v18 = vshll.u32 %v587_v41, 16  ;;  %v5029_v52 = vld [vmem:[%s3377_s11 + $0x268] sm:$0x1] }
 0x1b8   : > { %v3091_v25 = vmax.bf16 %v2797_v16, %v2256_v23  ;;  %v1836_v56 = vrot.slane %v1835_v10, 4  ;;  %v1852_v51 = vshll.u32 %v588_v19, 16  ;;  %v3329_v55 = vrot.slane %v587_v41, 9 }
 0x1b9   : > { %3219 = vst.msk [vmem:[%s3473_s15 + $0x1b4] sm:$0xf] %vm3109_vm5, %v3090_v27  ;;  %v1845_v11 = vrot.slane %v1843_v34, 4  ;;  %v1848_v47 = vrot.slane %v1846_v18, 5  ;;  %v2803_v40 = vrot.slane %v588_v19, 5  ;;  %v589_v13 = vmax.bf16 %v429_v61, %v5003_v60 }
 0x1ba   : > { %3220 = vst.msk [vmem:[%s3473_s15 + $0x1b8] sm:$0xf] %vm3109_vm5, %v3091_v25  ;;  %v1841_v7 = vsel %vm3440_vm6, %v1836_v56, %v1840_v36  ;;  %v1854_v21 = vrot.slane %v1852_v51, 5  ;;  %v1856_v2 = vshrl.u32 %v588_v19, 16  ;;  %v430_v3 = vmax.bf16 %v4964_v0, %v4899_v14 }
 0x1bb   : > { %v2257_v37 = vmax.bf16 %v1841_v7, %v585_v48  ;;  %v1849_v32 = vor.u32 %v1848_v47, %v1845_v11  ;;  %v2804_v31 = vsel %vm3423_vm4, %v3329_v55, %v2803_v40  ;;  %v1862_v12 = vshll.u32 %v589_v13, 16  ;;  %v5053_v11 = vld [vmem:[%s3377_s11 + $0x270] sm:$0xf] }
 0x1bc   : > { %v1858_v42 = vrot.slane %v1856_v2, 4  ;;  %v2805_v4 = vrot.slane %v2803_v40, 4  ;;  %v2806_v6 = vrot.slane %v589_v13, 5  ;;  %v590_v29 = vmax.bf16 %v430_v3, %v5017_v33 }
 0x1bd   : > { %v3092_v28 = vmax.bf16 %v2800_v44, %v2257_v37  ;;  %v1850_v61 = vrot.slane %v1849_v32, 4  ;;  %v1864_v58 = vrot.slane %v1862_v12, 5  ;;  %v1866_v63 = vshrl.u32 %v589_v13, 16  ;;  %v5039_v44 = vld [vmem:[%s3377_s11 + $0x26c] sm:$0xf] }
 0x1be   : > { %v1859_v14 = vor.u32 %v1858_v42, %v1854_v21  ;;  %v2807_v48 = vsel %vm3423_vm4, %v2805_v4, %v2806_v6  ;;  %v1872_v57 = vshll.u32 %v590_v29, 16  ;;  %v2808_v17 = vrot.slane %v2806_v6, 4 }
 0x1bf   : > { %3221 = vst.msk [vmem:[%s3473_s15 + $0x1bc] sm:$0xf] %vm3109_vm5, %v3092_v28  ;;  %v1855_v53 = vsel %vm3440_vm6, %v1850_v61, %v1854_v21  ;;  %v1868_v59 = vrot.slane %v1866_v63, 4  ;;  %v2809_v1 = vrot.slane %v590_v29, 5  ;;  %v431_v49 = vmax.bf16 %v4980_v22, %v4917_v35  ;;  %v5057_v21 = vld [vmem:[%s3377_s11 + $0x274] sm:$0xf] }
 0x1c0   : > { %v2258_v50 = vmax.bf16 %v1855_v53, %v587_v41  ;;  %v1860_v39 = vrot.slane %v1859_v14, 4  ;;  %v1874_v16 = vrot.slane %v1872_v57, 5  ;;  %v1876_v38 = vshrl.u32 %v590_v29, 16  ;;  %v5067_v61 = vld [vmem:[%s3377_s11 + $0x278] sm:$0xf] }
 0x1c1   : > { %v1869_v5 = vor.u32 %v1868_v59, %v1864_v58  ;;  %v2810_v46 = vsel %vm3423_vm4, %v2808_v17, %v2809_v1  ;;  %v591_v9 = vmax.bf16 %v431_v49, %v5029_v52  ;;  %v2811_v43 = vrot.slane %v2809_v1, 4 }
 0x1c2   : > { %v3093_v26 = vmax.bf16 %v2804_v31, %v2258_v50  ;;  %v1865_v15 = vsel %vm3440_vm6, %v1860_v39, %v1864_v58  ;;  %v1878_v35 = vrot.slane %v1876_v38, 4  ;;  %v432_v41 = vmax.bf16 %v4988_v30, %v4927_v54 }
 0x1c3   : > { %v2259_v23 = vmax.bf16 %v1865_v15, %v588_v19  ;;  %v1870_v10 = vrot.slane %v1869_v5, 4  ;;  %v1882_v36 = vshll.u32 %v591_v9, 16  ;;  %v2812_v27 = vrot.slane %v591_v9, 5 }
 0x1c4   : > { %3222 = vst.msk [vmem:[%s3473_s15 + $0x1c0] sm:$0xf] %vm3109_vm5, %v3093_v26  ;;  %v1879_v34 = vor.u32 %v1878_v35, %v1874_v16  ;;  %v433_v18 = vmax.bf16 %v4994_v20, %v4930_v8  ;;  %v592_v25 = vmax.bf16 %v432_v41, %v5039_v44  ;;  %v434_v56 = vmax.bf16 %v5003_v60, %v4949_v62  ;;  %v5085_v41 = vld [vmem:[%s3377_s11 + $0x27c] sm:$0x1] }
 0x1c5   : > { %v3094_v54 = vmax.bf16 %v2807_v48, %v2259_v23  ;;  %v1875_v19 = vsel %vm3440_vm6, %v1870_v10, %v1874_v16  ;;  %v1884_v51 = vrot.slane %v1882_v36, 5  ;;  %v2813_v55 = vsel %vm3423_vm4, %v2811_v43, %v2812_v27 }
 0x1c6   : > { %v2260_v47 = vmax.bf16 %v1875_v19, %v589_v13  ;;  %v1880_v40 = vrot.slane %v1879_v34, 4  ;;  %v593_v7 = vmax.bf16 %v433_v18, %v5053_v11  ;;  %v1887_v8 = vshrl.u32 %v592_v25, 16 }
 0x1c7   : > { %3223 = vst.msk [vmem:[%s3473_s15 + $0x1c4] sm:$0xf] %vm3109_vm5, %v3094_v54  ;;  %v1890_v62 = vshll.u32 %v592_v25, 16  ;;  %v3330_v2 = vrot.slane %v592_v25, 9  ;;  %v594_v3 = vmax.bf16 %v434_v56, %v5057_v21  ;;  %v435_v37 = vmax.bf16 %v5017_v33, %v4964_v0 }
 0x1c8   : > { %v3095_v32 = vmax.bf16 %v2810_v46, %v2260_v47  ;;  %v1885_v13 = vsel %vm3440_vm6, %v1880_v40, %v1884_v51  ;;  %v1889_v31 = vrot.slane %v1887_v8, 4  ;;  %v1896_v12 = vshll.u32 %v593_v7, 16  ;;  %v5098_v40 = vld [vmem:[%s3377_s11 + $0x284] sm:$0xf] }
 0x1c9   : > { %v2261_v42 = vmax.bf16 %v1885_v13, %v590_v29  ;;  %v1892_v4 = vrot.slane %v1890_v62, 5  ;;  %v2816_v6 = vrot.slane %v593_v7, 5  ;;  %v1900_v28 = vshrl.u32 %v593_v7, 16 }
 0x1ca   : > { %3224 = vst.msk [vmem:[%s3473_s15 + $0x1c8] sm:$0xf] %vm3109_vm5, %v3095_v32  ;;  %v1898_v58 = vrot.slane %v1896_v12, 5  ;;  %v1906_v63 = vshll.u32 %v594_v3, 16  ;;  %v2819_v14 = vrot.slane %v594_v3, 5  ;;  %v595_v0 = vmax.bf16 %v435_v37, %v5067_v61 }
 0x1cb   : > { %v3096_v48 = vmax.bf16 %v2813_v55, %v2261_v42  ;;  %v1893_v57 = vor.u32 %v1892_v4, %v1889_v31  ;;  %v2817_v17 = vsel %vm3423_vm4, %v3330_v2, %v2816_v6  ;;  %v1902_v53 = vrot.slane %v1900_v28, 4 }
 0x1cc   : > { %v1908_v29 = vrot.slane %v1906_v63, 5  ;;  %v2818_v59 = vrot.slane %v2816_v6, 4  ;;  %v1910_v1 = vshrl.u32 %v594_v3, 16  ;;  %v1916_v49 = vshll.u32 %v595_v0, 16  ;;  %v5117_v63 = vld [vmem:[%s3377_s11 + $0x288] sm:$0xf] }
 0x1cd   : > { %3225 = vst.msk [vmem:[%s3473_s15 + $0x1cc] sm:$0xf] %vm3109_vm5, %v3096_v48  ;;  %v1894_v50 = vrot.slane %v1893_v57, 4  ;;  %v1903_v39 = vor.u32 %v1902_v53, %v1898_v58  ;;  %v2821_v16 = vrot.slane %v2819_v14, 4  ;;  %v2822_v38 = vrot.slane %v595_v0, 5 }
 0x1ce   : > { %v2820_v5 = vsel %vm3423_vm4, %v2818_v59, %v2819_v14  ;;  %v1912_v46 = vrot.slane %v1910_v1, 4  ;;  %v1918_v9 = vrot.slane %v1916_v49, 5  ;;  %v436_v43 = vmax.bf16 %v5029_v52, %v4980_v22 }
 0x1cf   : > { %v1899_v26 = vsel %vm3440_vm6, %v1894_v50, %v1898_v58  ;;  %v1904_v15 = vrot.slane %v1903_v39, 4  ;;  %v2823_v35 = vsel %vm3423_vm4, %v2821_v16, %v2822_v38  ;;  %v1920_v23 = vshrl.u32 %v595_v0, 16 }
 0x1d0   : > { %v2262_v10 = vmax.bf16 %v1899_v26, %v592_v25  ;;  %v1913_v36 = vor.u32 %v1912_v46, %v1908_v29  ;;  %v596_v27 = vmax.bf16 %v436_v43, %v5085_v41  ;;  %v2824_v34 = vrot.slane %v2822_v38, 4  ;;  %v5095_v25 = vld [vmem:[%s3377_s11 + $0x280] sm:$0xf]  ;;  %v5132_v43 = vld [vmem:[%s3377_s11 + $0x28c] sm:$0xf] }
 0x1d1   : > { %v1909_v22 = vsel %vm3440_vm6, %v1904_v15, %v1908_v29  ;;  %v1922_v18 = vrot.slane %v1920_v23, 4  ;;  %v437_v56 = vmax.bf16 %v5039_v44, %v4988_v30  ;;  %v438_v54 = vmax.bf16 %v5053_v11, %v4994_v20 }
 0x1d2   : > { %v3097_v19 = vmax.bf16 %v2817_v17, %v2262_v10  ;;  %v2263_v51 = vmax.bf16 %v1909_v22, %v593_v7  ;;  %v1914_v55 = vrot.slane %v1913_v36, 4  ;;  %v1926_v47 = vshll.u32 %v596_v27, 16 }
 0x1d3   : > { %v1923_v8 = vor.u32 %v1922_v18, %v1918_v9  ;;  %v2825_v62 = vrot.slane %v596_v27, 5  ;;  %v597_v2 = vmax.bf16 %v437_v56, %v5095_v25  ;;  %v5102_v37 = vmax.bf16 %v438_v54, %v5098_v40 }
 0x1d4   : > { %3226 = vst.msk [vmem:[%s3473_s15 + $0x1d0] sm:$0xf] %vm3109_vm5, %v3097_v19  ;;  %v3098_v30 = vmax.bf16 %v2820_v5, %v2263_v51  ;;  %v1919_v20 = vsel %vm3440_vm6, %v1914_v55, %v1918_v9  ;;  %v1928_v7 = vrot.slane %v1926_v47, 5  ;;  %v439_v32 = vmax.bf16 %v5057_v21, %v5003_v60  ;;  %v5148_v19 = vld [vmem:[%s3377_s11 + $0x290] sm:$0x1] }
 0x1d5   : > { %v2264_v13 = vmax.bf16 %v1919_v20, %v594_v3  ;;  %v1924_v31 = vrot.slane %v1923_v8, 4  ;;  %v2826_v12 = vsel %vm3423_vm4, %v2824_v34, %v2825_v62  ;;  %v1931_v42 = vshrl.u32 %v597_v2, 16  ;;  %v282_v47 = vld [vmem:[%s3377_s11 + $0x294] sm:$0xf]  ;;  %v283_v8 = vld [vmem:[%s3377_s11 + $0x298] sm:$0xf] }
 0x1d6   : > { %3227 = vst.msk [vmem:[%s3473_s15 + $0x1d4] sm:$0xf] %vm3109_vm5, %v3098_v30  ;;  %v1934_v4 = vshll.u32 %v597_v2, 16  ;;  %v1940_v6 = vshll.u32 %v5102_v37, 16  ;;  %v3331_v28 = vrot.slane %v597_v2, 9  ;;  %v2829_v58 = vrot.slane %v5102_v37, 5 }
 0x1d7   : > { %v3099_v14 = vmax.bf16 %v2823_v35, %v2264_v13  ;;  %v1929_v60 = vsel %vm3440_vm6, %v1924_v31, %v1928_v7  ;;  %v1933_v3 = vrot.slane %v1931_v42, 4  ;;  %v599_v48 = vmax.bf16 %v439_v32, %v5117_v63 }
 0x1d8   : > { %v2265_v57 = vmax.bf16 %v1929_v60, %v595_v0  ;;  %v1936_v17 = vrot.slane %v1934_v4, 5  ;;  %v1942_v53 = vrot.slane %v1940_v6, 5  ;;  %v2830_v29 = vsel %vm3423_vm4, %v3331_v28, %v2829_v58  ;;  %v284_v28 = vld [vmem:[%s3377_s11 + $0x29c] sm:$0xf] }
 0x1d9   : > { %3228 = vst.msk [vmem:[%s3473_s15 + $0x1d8] sm:$0xf] %vm3109_vm5, %v3099_v14  ;;  %v1944_v59 = vshrl.u32 %v5102_v37, 16  ;;  %v1950_v1 = vshll.u32 %v599_v48, 16  ;;  %v2831_v49 = vrot.slane %v2829_v58, 4  ;;  %v2832_v50 = vrot.slane %v599_v48, 5 }
 0x1da   : > { %v3100_v39 = vmax.bf16 %v2826_v12, %v2265_v57  ;;  %v1937_v16 = vor.u32 %v1936_v17, %v1933_v3  ;;  %v440_v38 = vmax.bf16 %v5067_v61, %v5017_v33  ;;  %v1954_v0 = vshrl.u32 %v599_v48, 16 }
 0x1db   : > { %v1946_v5 = vrot.slane %v1944_v59, 4  ;;  %v1952_v46 = vrot.slane %v1950_v1, 5  ;;  %v2833_v9 = vsel %vm3423_vm4, %v2831_v49, %v2832_v50  ;;  %v2834_v26 = vrot.slane %v2832_v50, 4  ;;  %v285_v1 = vld [vmem:[%s3377_s11 + $0x2a0] sm:$0xf] }
 0x1dc   : > { %3229 = vst.msk [vmem:[%s3473_s15 + $0x1dc] sm:$0xf] %vm3109_vm5, %v3100_v39  ;;  %v1938_v15 = vrot.slane %v1937_v16, 4  ;;  %v600_v35 = vmax.bf16 %v440_v38, %v5132_v43  ;;  %v1956_v23 = vrot.slane %v1954_v0, 4  ;;  %v441_v33 = vmax.bf16 %v5085_v41, %v5029_v52 }
 0x1dd   : > { %v1947_v10 = vor.u32 %v1946_v5, %v1942_v53  ;;  %v442_v36 = vmax.bf16 %v5095_v25, %v5039_v44  ;;  %v443_v27 = vmax.bf16 %v5098_v40, %v5053_v11  ;;  %v444_v34 = vmax.bf16 %v5117_v63, %v5057_v21 }
 0x1de   : > { %v1943_v22 = vsel %vm3440_vm6, %v1938_v15, %v1942_v53  ;;  %v1957_v18 = vor.u32 %v1956_v23, %v1952_v46  ;;  %v1960_v56 = vshll.u32 %v600_v35, 16  ;;  %v2835_v54 = vrot.slane %v600_v35, 5 }
 0x1df   : > { %v2266_v52 = vmax.bf16 %v1943_v22, %v597_v2  ;;  %v1948_v51 = vrot.slane %v1947_v10, 4  ;;  %v601_v55 = vmax.bf16 %v441_v33, %v5148_v19  ;;  %v1964_v44 = vshrl.u32 %v600_v35, 16 }
 0x1e0   : > { %v1958_v11 = vrot.slane %v1957_v18, 4  ;;  %v1962_v25 = vrot.slane %v1960_v56, 5  ;;  %v2836_v21 = vsel %vm3423_vm4, %v2834_v26, %v2835_v54  ;;  %v2837_v40 = vrot.slane %v2835_v54, 4  ;;  %v286_v18 = vld [vmem:[%s3377_s11 + $0x2a4] sm:$0x1] }
 0x1e1   : > { %v3101_v62 = vmax.bf16 %v2830_v29, %v2266_v52  ;;  %v1953_v30 = vsel %vm3440_vm6, %v1948_v51, %v1952_v46  ;;  %v1966_v20 = vrot.slane %v1964_v44, 4  ;;  %v1970_v2 = vshll.u32 %v601_v55, 16 }
 0x1e2   : > { %v2267_v7 = vmax.bf16 %v1953_v30, %v5102_v37  ;;  %v1963_v32 = vsel %vm3440_vm6, %v1958_v11, %v1962_v25  ;;  %v2838_v13 = vrot.slane %v601_v55, 5  ;;  %v602_v31 = vmax.bf16 %v442_v36, %v282_v47 }
 0x1e3   : > { %3230 = vst.msk [vmem:[%s3473_s15 + $0x1e0] sm:$0xf] %vm3109_vm5, %v3101_v62  ;;  %v2268_v12 = vmax.bf16 %v1963_v32, %v599_v48  ;;  %v1967_v42 = vor.u32 %v1966_v20, %v1962_v25  ;;  %v1972_v4 = vrot.slane %v1970_v2, 5  ;;  %v603_v6 = vmax.bf16 %v443_v27, %v283_v8 }
 0x1e4   : > { %v3102_v58 = vmax.bf16 %v2833_v9, %v2267_v7  ;;  %v2839_v63 = vsel %vm3423_vm4, %v2837_v40, %v2838_v13  ;;  %v1975_v37 = vshrl.u32 %v602_v31, 16  ;;  %v1978_v14 = vshll.u32 %v602_v31, 16 }
 0x1e5   : > { %v3103_v60 = vmax.bf16 %v2836_v21, %v2268_v12  ;;  %v1968_v3 = vrot.slane %v1967_v42, 4  ;;  %v1984_v57 = vshll.u32 %v603_v6, 16  ;;  %v3332_v17 = vrot.slane %v602_v31, 9 }
 0x1e6   : > { %3231 = vst.msk [vmem:[%s3473_s15 + $0x1e4] sm:$0xf] %vm3109_vm5, %v3102_v58  ;;  %v1977_v53 = vrot.slane %v1975_v37, 4  ;;  %v1980_v48 = vrot.slane %v1978_v14, 5  ;;  %v2842_v29 = vrot.slane %v603_v6, 5  ;;  %v604_v59 = vmax.bf16 %v444_v34, %v284_v28 }
 0x1e7   : > { %3232 = vst.msk [vmem:[%s3473_s15 + $0x1e8] sm:$0xf] %vm3109_vm5, %v3103_v60  ;;  %v1973_v49 = vsel %vm3440_vm6, %v1968_v3, %v1972_v4  ;;  %v1986_v50 = vrot.slane %v1984_v57, 5  ;;  %v1988_v39 = vshrl.u32 %v603_v6, 16  ;;  %v445_v16 = vmax.bf16 %v5132_v43, %v5067_v61 }
 0x1e8   : > { %v2269_v38 = vmax.bf16 %v1973_v49, %v600_v35  ;;  %v1981_v0 = vor.u32 %v1980_v48, %v1977_v53  ;;  %v1994_v5 = vshll.u32 %v604_v59, 16  ;;  %v2845_v9 = vrot.slane %v604_v59, 5 }
 0x1e9   : > { %v1990_v46 = vrot.slane %v1988_v39, 4  ;;  %v605_v26 = vmax.bf16 %v445_v16, %v285_v1  ;;  %v1998_v10 = vshrl.u32 %v604_v59, 16  ;;  %v2843_v36 = vsel %vm3423_vm4, %v3332_v17, %v2842_v29 }
 0x1ea   : > { %v3104_v15 = vmax.bf16 %v2839_v63, %v2269_v38  ;;  %v1982_v23 = vrot.slane %v1981_v0, 4  ;;  %v1996_v33 = vrot.slane %v1994_v5, 5  ;;  %v2844_v34 = vrot.slane %v2842_v29, 4 }
 0x1eb   : > { %v1991_v27 = vor.u32 %v1990_v46, %v1986_v50  ;;  %v2004_v22 = vshll.u32 %v605_v26, 16  ;;  %v2000_v43 = vrot.slane %v1998_v10, 4  ;;  %v2848_v35 = vrot.slane %v605_v26, 5 }
 0x1ec   : > { %3233 = vst.msk [vmem:[%s3473_s15 + $0x1ec] sm:$0xf] %vm3109_vm5, %v3104_v15  ;;  %v1987_v61 = vsel %vm3440_vm6, %v1982_v23, %v1986_v50  ;;  %v446_v56 = vmax.bf16 %v5148_v19, %v5085_v41  ;;  %v2008_v55 = vshrl.u32 %v605_v26, 16  ;;  %v2847_v47 = vrot.slane %v2845_v9, 4 }
 0x1ed   : > { %v2270_v54 = vmax.bf16 %v1987_v61, %v602_v31  ;;  %v1992_v52 = vrot.slane %v1991_v27, 4  ;;  %v2006_v51 = vrot.slane %v2004_v22, 5  ;;  %v2001_v44 = vor.u32 %v2000_v43, %v1996_v33 }
 0x1ee   : > { %v606_v11 = vmax.bf16 %v446_v56, %v286_v18  ;;  %v2846_v40 = vsel %vm3423_vm4, %v2844_v34, %v2845_v9  ;;  %v2010_v8 = vrot.slane %v2008_v55, 4  ;;  %v2850_v19 = vrot.slane %v2848_v35, 4 }
 0x1ef   : > { %v3105_v25 = vmax.bf16 %v2843_v36, %v2270_v54  ;;  %v1997_v21 = vsel %vm3440_vm6, %v1992_v52, %v1996_v33  ;;  %v2002_v30 = vrot.slane %v2001_v44, 4  ;;  %v2849_v13 = vsel %vm3423_vm4, %v2847_v47, %v2848_v35 }
 0x1f0   : > { %v2271_v62 = vmax.bf16 %v1997_v21, %v603_v6  ;;  %v2014_v20 = vshll.u32 %v606_v11, 16  ;;  %v2011_v41 = vor.u32 %v2010_v8, %v2006_v51  ;;  %v2851_v2 = vrot.slane %v606_v11, 5 }
 0x1f1   : > { %3234 = vst.msk [vmem:[%s3473_s15 + $0x1f0] sm:$0xf] %vm3109_vm5, %v3105_v25  ;;  %v2007_v32 = vsel %vm3440_vm6, %v2002_v30, %v2006_v51 }
 0x1f2   : > { %v3106_v7 = vmax.bf16 %v2846_v40, %v2271_v62  ;;  %v2016_v31 = vrot.slane %v2014_v20, 5  ;;  %v2272_v12 = vmax.bf16 %v2007_v32, %v604_v59  ;;  %v2012_v42 = vrot.slane %v2011_v41, 4 }
 0x1f3   : > { %v2852_v28 = vsel %vm3423_vm4, %v2850_v19, %v2851_v2 }
 0x1f4   : > { %3235 = vst.msk [vmem:[%s3473_s15 + $0x1f4] sm:$0xf] %vm3109_vm5, %v3106_v7  ;;  %v3107_v4 = vmax.bf16 %v2849_v13, %v2272_v12  ;;  %v2017_v6 = vsel %vm3440_vm6, %v2012_v42, %v2016_v31 }
 0x1f5   : > { %v2273_v58 = vmax.bf16 %v2017_v6, %v605_v26 }
 0x1f6   : > { %3236 = vst.msk [vmem:[%s3473_s15 + $0x1f8] sm:$0xf] %vm3109_vm5, %v3107_v4 }
 0x1f7   : > { %v3108_v63 = vmax.bf16 %v2852_v28, %v2273_v58 }
 0x1f9   : > { %3237 = vst.msk [vmem:[%s3473_s15 + $0x1fc] sm:$0xf] %vm3109_vm5, %v3108_v63 }
 0x1fa PF: > { %s11_s6 = sadd.s32 1, %s3351_s6  }
 0x1fb   : > { %p8_p4 = scmp.ge.s32.totalorder %s11_s6, 4  }
 0x1fd   :  { %10 = sbr.rel (!%p8_p4) target bundleno = 1 (0x1), region = 54 }

// kernel: _lambda_.19
= control target key start
LH: loop header
LB: loop body
LE: loop exit
PB: predicated region body
PF: predicated region fallthrough
CT: control target
= control target key end

     0   :  { %s1643_s15 = smov 0   ;;  %s1645_s16 = smov 0   ;;  %s1817_s0 = inlined_call_operand.vmem [shape: bf16[512,128], index: 0, kind: input, shape index: {}]   ;;  %s1818_s1 = inlined_call_operand.vmem [shape: bf16[1,128,128], index: 1, kind: input, shape index: {}]   ;;  %s1819_s2 = inlined_call_operand.vmem [shape: f32[1,1,128], index: 2, kind: input, shape index: {}]   ;;  %s1820_s3 = inlined_call_operand.vmem [shape: f32[1,1,128], index: 3, kind: input, shape index: {}]   ;;  %s1821_s4 = inlined_call_operand.vmem [shape: bf16[512,128], index: 4, kind: output, shape index: {}]  }
   0x1   :  { %s1647_s17 = smov 0  }
   0x2 LB: > { %s40_s18 = sadd.s32 1, %s1612_s16  ;;  %p1266_p0 = scmp.ge.s32.totalorder %s1616_s17, 1  ;;  %s1616_s17 = sphi %s1647_s17, %s14_s17   ;;  %s1612_s16 = sphi %s1645_s16, %s1823_s16   ;;  %s1608_s15 = sphi %s1643_s15, %s1822_s15  }
   0x3   : > { %p42_p1 = scmp.ge.s32.totalorder %s40_s18, 2  ;;  %p250_p2 = scmp.lt.s32.totalorder %s1616_s17, 3 }
   0x5   : > { %s1825_s18 = smov (%p42_p1, %s40_s18), 0  ;;  %p251_p3 = pnand %p1266_p0, %p250_p2 }
   0x6   : > { %v1570_v0 = vld [vmem:[%s1818_s1] sm:$0xff] (!%p251_p3)   ;;  %s1267_s21 = sshll.u32 (!%p251_p3), %s1608_s15, 5  ;;  %v1571_v1 = vld [vmem:[%s1818_s1 + $0x8] sm:$0xff] (!%p251_p3)   ;;  %v1572_v2 = vld [vmem:[%s1818_s1 + $0x10] sm:$0xff] (!%p251_p3)  }
   0x7   : > { %254 = sbr.rel (%p251_p3) target bundleno = 285 (0x11d), region = 36  ;;  %p310_p4 = scmp.lt.s32.totalorder (!%p251_p3), %s1267_s21, 63  ;;  %1482 = vmatprep.subr.bf16.mxu0 (!%p251_p3), %v1570_v0  ;;  %1530 = vmatprep.subr.bf16.mxu1 (!%p251_p3), %v1570_v0  ;;  %v1573_v3 = vld [vmem:[%s1818_s1 + $0x18] sm:$0xff] (!%p251_p3)   ;;  %v1574_v6 = vld [vmem:[%s1818_s1 + $0x20] sm:$0xff] (!%p251_p3)   ;;  %v1575_v7 = vld [vmem:[%s1818_s1 + $0x28] sm:$0xff] (!%p251_p3)  }
   0x8   : > { %1483 = vmatpush3.bf16.msra.mxu0 (!%p251_p3), %v1570_v0  ;;  %1538 = vmatpush3.bf16.msra.mxu1 (!%p251_p3), %v1570_v0  ;;  %v1576_v8 = vld [vmem:[%s1818_s1 + $0x30] sm:$0xff] (!%p251_p3)   ;;  %v1577_v9 = vld [vmem:[%s1818_s1 + $0x38] sm:$0xff] (!%p251_p3)   ;;  %v1714_v24 = vld [vmem:[%s1819_s2] ss:$0 sm:$0xff] (!%p251_p3) }
   0x9   : > { %1484 = vmatprep.subr.bf16.mxu0 (!%p251_p3), %v1571_v1  ;;  %1531 = vmatprep.subr.bf16.mxu1 (!%p251_p3), %v1571_v1  ;;  %v1721_v31 = vld [vmem:[%s1820_s3] ss:$0 sm:$0xff] (!%p251_p3) }
   0xc   : > { %1485 = vmatpush3.bf16.msra.mxu0 (!%p251_p3), %v1571_v1  ;;  %1539 = vmatpush3.bf16.msra.mxu1 (!%p251_p3), %v1571_v1 }
   0xd   : > { %1486 = vmatprep.subr.bf16.mxu0 (!%p251_p3), %v1572_v2  ;;  %1532 = vmatprep.subr.bf16.mxu1 (!%p251_p3), %v1572_v2 }
   0xe   : > { %s1827_s21 = smov (!%p310_p4, %s1267_s21), 63 }
   0xf   : > { %s1268_s26 = sshll.u32 %s1827_s21, 2 }
  0x10   : > { %s1678_s29 = scalar_lea.vmem %s1817_s0, %s1268_s26  ;;  %1487 = vmatpush3.bf16.msra.mxu0 %v1572_v2  ;;  %1540 = vmatpush3.bf16.msra.mxu1 %v1572_v2  ;;  %s1740_s24 = scalar_lea.vmem %s1821_s4, %s1268_s26 }
  0x11   : > { %v1578_v4 = vld [vmem:[%s1678_s29] sm:$0xff]   ;;  %1488 = vmatprep.subr.bf16.mxu0 %v1573_v3  ;;  %1533 = vmatprep.subr.bf16.mxu1 %v1573_v3  ;;  %v1580_v10 = vld [vmem:[%s1678_s29 + $0x8] sm:$0xff]   ;;  %v1582_v12 = vld [vmem:[%s1678_s29 + $0x10] sm:$0xff]  }
  0x12   : > { %v1579_v5 = vld [vmem:[%s1678_s29 + $0x40] sm:$0xff]   ;;  %1498 = vmatprep.mubr.bf16.mxu0 %v1578_v4  ;;  %v1581_v11 = vld [vmem:[%s1678_s29 + $0x48] sm:$0xff]   ;;  %v1583_v13 = vld [vmem:[%s1678_s29 + $0x50] sm:$0xff]  }
  0x13   : > { %1514 = vmatprep.mubr.bf16.mxu1 %v1579_v5  ;;  %v1584_v14 = vld [vmem:[%s1678_s29 + $0x18] sm:$0xff]   ;;  %v1586_v16 = vld [vmem:[%s1678_s29 + $0x20] sm:$0xff]   ;;  %v1588_v18 = vld [vmem:[%s1678_s29 + $0x28] sm:$0xff]  }
  0x14   : > { %1489 = vmatpush3.bf16.msra.mxu0 %v1573_v3  ;;  %1541 = vmatpush3.bf16.msra.mxu1 %v1573_v3  ;;  %v1585_v15 = vld [vmem:[%s1678_s29 + $0x58] sm:$0xff]   ;;  %v1587_v17 = vld [vmem:[%s1678_s29 + $0x60] sm:$0xff]   ;;  %v1589_v19 = vld [vmem:[%s1678_s29 + $0x68] sm:$0xff]  }
  0x15   : > { %1490 = vmatprep.subr.bf16.mxu0 %v1574_v6  ;;  %1534 = vmatprep.subr.bf16.mxu1 %v1574_v6  ;;  %v1590_v20 = vld [vmem:[%s1678_s29 + $0x30] sm:$0xff]   ;;  %v1592_v22 = vld [vmem:[%s1678_s29 + $0x38] sm:$0xff]  }
  0x16   : > { %v1591_v21 = vld [vmem:[%s1678_s29 + $0x70] sm:$0xff]   ;;  %v1593_v23 = vld [vmem:[%s1678_s29 + $0x78] sm:$0xff]  }
  0x18   : > { %1491 = vmatpush3.bf16.msra.mxu0 %v1574_v6  ;;  %1542 = vmatpush3.bf16.msra.mxu1 %v1574_v6 }
  0x19   : > { %1492 = vmatprep.subr.bf16.mxu0 %v1575_v7  ;;  %1535 = vmatprep.subr.bf16.mxu1 %v1575_v7 }
  0x1c   : > { %1493 = vmatpush3.bf16.msra.mxu0 %v1575_v7  ;;  %1543 = vmatpush3.bf16.msra.mxu1 %v1575_v7 }
  0x1d   : > { %1494 = vmatprep.subr.bf16.mxu0 %v1576_v8  ;;  %1536 = vmatprep.subr.bf16.mxu1 %v1576_v8 }
  0x20   : > { %1495 = vmatpush3.bf16.msra.mxu0 %v1576_v8  ;;  %1544 = vmatpush3.bf16.msra.mxu1 %v1576_v8 }
  0x21   : > { %1496 = vmatprep.subr.bf16.mxu0 %v1577_v9  ;;  %1537 = vmatprep.subr.bf16.mxu1 %v1577_v9 }
  0x24   : > { %1497 = vmatpush3.bf16.msra.mxu0 %v1577_v9  ;;  %1545 = vmatpush3.bf16.msra.mxu1 %v1577_v9 }
  0x27   : > { %1499 = vmatmul.mubr.bf16.vlgmr.msra.gmra.mrb[0].mxu0 %v1580_v10  ;;  %1515 = vmatmul.mubr.bf16.vlgmr.msra.gmra.mrb[0].mxu1 %v1581_v11 }
  0x28   : > { %1502 = vmatprep.mubr.bf16.mxu0 %v1582_v12  ;;  %1518 = vmatprep.mubr.bf16.mxu1 %v1583_v13 }
  0x2f   : > { %1503 = vmatmul.mubr.bf16.gmra.mrb[4].mxu0 %v1584_v14  ;;  %1519 = vmatmul.mubr.bf16.gmra.mrb[4].mxu1 %v1585_v15 }
  0x30   : > { %1506 = vmatprep.mubr.bf16.mxu0 %v1586_v16  ;;  %1522 = vmatprep.mubr.bf16.mxu1 %v1587_v17 }
  0x37   : > { %1507 = vmatmul.mubr.bf16.gmra.mrb[8].mxu0 %v1588_v18  ;;  %1523 = vmatmul.mubr.bf16.gmra.mrb[8].mxu1 %v1589_v19 }
  0x38   : > { %1510 = vmatprep.mubr.bf16.mxu0 %v1590_v20  ;;  %1526 = vmatprep.mubr.bf16.mxu1 %v1591_v21 }
  0x3f   : > { %1511 = vmatmul.mubr.bf16.gmra.mrb[12].mxu0 %v1592_v22  ;;  %1527 = vmatmul.mubr.bf16.gmra.mrb[12].mxu1 %v1593_v23 }
  0xfa   : > { %v1500_v25 = vpop.f32.mrb[0].mxu0  ;;  %v1516_v26 = vpop.f32.mrb[0].mxu1 }
  0xfb   : > { %v889_v27 = vmul.f32 %v1500_v25, %v1714_v24  ;;  %v905_v28 = vmul.f32 %v1516_v26, %v1714_v24  ;;  %v582_v29 = vpop.f32.mrb[1].mxu0  ;;  %v646_v30 = vpop.f32.mrb[1].mxu1 }
  0xfc   : > { %v887_v32 = vmul.f32 %v1714_v24, %v582_v29  ;;  %v903_v33 = vmul.f32 %v1714_v24, %v646_v30  ;;  %v1501_v34 = vpop.f32.mrb[2].mxu0  ;;  %v1517_v35 = vpop.f32.mrb[2].mxu1 }
  0xfd   : > { %v890_v36 = vmul.f32 %v1501_v34, %v1714_v24  ;;  %v906_v37 = vmul.f32 %v1517_v35, %v1714_v24  ;;  %v585_v38 = vpop.f32.mrb[3].mxu0  ;;  %v649_v39 = vpop.f32.mrb[3].mxu1  ;;  %v928_v42 = vadd.f32 %v1721_v31, %v889_v27  ;;  %v944_v43 = vadd.f32 %v1721_v31, %v905_v28 }
  0xfe   : > { %v888_v40 = vmul.f32 %v1714_v24, %v585_v38  ;;  %v904_v41 = vmul.f32 %v1714_v24, %v649_v39  ;;  %v926_v46 = vadd.f32 %v1721_v31, %v887_v32  ;;  %v942_v47 = vadd.f32 %v1721_v31, %v903_v33 }
  0xff   : > { %v929_v44 = vadd.f32 %v1721_v31, %v890_v36  ;;  %v945_v45 = vadd.f32 %v1721_v31, %v906_v37 }
 0x100   : > { %v927_v48 = vadd.f32 %v1721_v31, %v888_v40  ;;  %v943_v49 = vadd.f32 %v1721_v31, %v904_v41 }
 0x101   : > { %v1371_v50 = vpack.c.bf16 %v929_v44, %v928_v42  ;;  %v1411_v51 = vpack.c.bf16 %v945_v45, %v944_v43 }
 0x102   : > { %v1366_v52 = vpack.c.bf16 %v927_v48, %v926_v46  ;;  %v1406_v53 = vpack.c.bf16 %v943_v49, %v942_v47  ;;  %v1504_v54 = vpop.f32.mrb[4].mxu0  ;;  %v1520_v55 = vpop.f32.mrb[4].mxu1 }
 0x103   : > { %1443 = vst [vmem:[%s1740_s24 + $0x8] sm:$0xff] %v1371_v50   ;;  %1451 = vst [vmem:[%s1740_s24 + $0x48] sm:$0xff] %v1411_v51   ;;  %v893_v56 = vmul.f32 %v1504_v54, %v1714_v24  ;;  %v909_v57 = vmul.f32 %v1520_v55, %v1714_v24  ;;  %v598_v58 = vpop.f32.mrb[5].mxu0  ;;  %v662_v59 = vpop.f32.mrb[5].mxu1 }
 0x104   : > { %1367 = vst [vmem:[%s1740_s24] sm:$0xff] %v1366_v52   ;;  %1450 = vst [vmem:[%s1740_s24 + $0x40] sm:$0xff] %v1406_v53   ;;  %v891_v60 = vmul.f32 %v1714_v24, %v598_v58  ;;  %v907_v61 = vmul.f32 %v1714_v24, %v662_v59  ;;  %v1505_v62 = vpop.f32.mrb[6].mxu0  ;;  %v1521_v63 = vpop.f32.mrb[6].mxu1 }
 0x105   : > { %v894_v0 = vmul.f32 %v1505_v62, %v1714_v24  ;;  %v910_v1 = vmul.f32 %v1521_v63, %v1714_v24  ;;  %v601_v2 = vpop.f32.mrb[7].mxu0  ;;  %v665_v3 = vpop.f32.mrb[7].mxu1  ;;  %v932_v6 = vadd.f32 %v1721_v31, %v893_v56  ;;  %v948_v7 = vadd.f32 %v1721_v31, %v909_v57 }
 0x106   : > { %v892_v4 = vmul.f32 %v1714_v24, %v601_v2  ;;  %v908_v5 = vmul.f32 %v1714_v24, %v665_v3  ;;  %v930_v10 = vadd.f32 %v1721_v31, %v891_v60  ;;  %v946_v11 = vadd.f32 %v1721_v31, %v907_v61 }
 0x107   : > { %v933_v8 = vadd.f32 %v1721_v31, %v894_v0  ;;  %v949_v9 = vadd.f32 %v1721_v31, %v910_v1 }
 0x108   : > { %v931_v12 = vadd.f32 %v1721_v31, %v892_v4  ;;  %v947_v13 = vadd.f32 %v1721_v31, %v908_v5 }
 0x109   : > { %v1381_v14 = vpack.c.bf16 %v933_v8, %v932_v6  ;;  %v1421_v15 = vpack.c.bf16 %v949_v9, %v948_v7 }
 0x10a   : > { %v1376_v16 = vpack.c.bf16 %v931_v12, %v930_v10  ;;  %v1416_v17 = vpack.c.bf16 %v947_v13, %v946_v11  ;;  %v1508_v18 = vpop.f32.mrb[8].mxu0  ;;  %v1524_v19 = vpop.f32.mrb[8].mxu1 }
 0x10b   : > { %1445 = vst [vmem:[%s1740_s24 + $0x18] sm:$0xff] %v1381_v14   ;;  %1453 = vst [vmem:[%s1740_s24 + $0x58] sm:$0xff] %v1421_v15   ;;  %v897_v20 = vmul.f32 %v1508_v18, %v1714_v24  ;;  %v913_v21 = vmul.f32 %v1524_v19, %v1714_v24  ;;  %v614_v22 = vpop.f32.mrb[9].mxu0  ;;  %v678_v23 = vpop.f32.mrb[9].mxu1 }
 0x10c   : > { %1444 = vst [vmem:[%s1740_s24 + $0x10] sm:$0xff] %v1376_v16   ;;  %1452 = vst [vmem:[%s1740_s24 + $0x50] sm:$0xff] %v1416_v17   ;;  %v895_v25 = vmul.f32 %v1714_v24, %v614_v22  ;;  %v911_v26 = vmul.f32 %v1714_v24, %v678_v23  ;;  %v1509_v27 = vpop.f32.mrb[10].mxu0  ;;  %v1525_v28 = vpop.f32.mrb[10].mxu1 }
 0x10d   : > { %v898_v29 = vmul.f32 %v1509_v27, %v1714_v24  ;;  %v914_v30 = vmul.f32 %v1525_v28, %v1714_v24  ;;  %v617_v32 = vpop.f32.mrb[11].mxu0  ;;  %v681_v33 = vpop.f32.mrb[11].mxu1  ;;  %v936_v36 = vadd.f32 %v1721_v31, %v897_v20  ;;  %v952_v37 = vadd.f32 %v1721_v31, %v913_v21 }
 0x10e   : > { %v896_v34 = vmul.f32 %v1714_v24, %v617_v32  ;;  %v912_v35 = vmul.f32 %v1714_v24, %v681_v33  ;;  %v934_v40 = vadd.f32 %v1721_v31, %v895_v25  ;;  %v950_v41 = vadd.f32 %v1721_v31, %v911_v26 }
 0x10f   : > { %v937_v38 = vadd.f32 %v1721_v31, %v898_v29  ;;  %v953_v39 = vadd.f32 %v1721_v31, %v914_v30 }
 0x110   : > { %v935_v42 = vadd.f32 %v1721_v31, %v896_v34  ;;  %v951_v43 = vadd.f32 %v1721_v31, %v912_v35 }
 0x111   : > { %v1391_v44 = vpack.c.bf16 %v937_v38, %v936_v36  ;;  %v1431_v45 = vpack.c.bf16 %v953_v39, %v952_v37 }
 0x112   : > { %v1386_v46 = vpack.c.bf16 %v935_v42, %v934_v40  ;;  %v1426_v47 = vpack.c.bf16 %v951_v43, %v950_v41  ;;  %v1512_v48 = vpop.f32.mrb[12].mxu0  ;;  %v1528_v49 = vpop.f32.mrb[12].mxu1 }
 0x113   : > { %1447 = vst [vmem:[%s1740_s24 + $0x28] sm:$0xff] %v1391_v44   ;;  %1455 = vst [vmem:[%s1740_s24 + $0x68] sm:$0xff] %v1431_v45   ;;  %v901_v50 = vmul.f32 %v1512_v48, %v1714_v24  ;;  %v917_v51 = vmul.f32 %v1528_v49, %v1714_v24  ;;  %v630_v52 = vpop.f32.mrb[13].mxu0  ;;  %v694_v53 = vpop.f32.mrb[13].mxu1 }
 0x114   : > { %1446 = vst [vmem:[%s1740_s24 + $0x20] sm:$0xff] %v1386_v46   ;;  %1454 = vst [vmem:[%s1740_s24 + $0x60] sm:$0xff] %v1426_v47   ;;  %v899_v54 = vmul.f32 %v1714_v24, %v630_v52  ;;  %v915_v55 = vmul.f32 %v1714_v24, %v694_v53  ;;  %v1513_v56 = vpop.f32.mrb[14].mxu0  ;;  %v1529_v57 = vpop.f32.mrb[14].mxu1 }
 0x115   : > { %v902_v58 = vmul.f32 %v1513_v56, %v1714_v24  ;;  %v918_v59 = vmul.f32 %v1529_v57, %v1714_v24  ;;  %v633_v60 = vpop.f32.mrb[15].mxu0  ;;  %v697_v61 = vpop.f32.mrb[15].mxu1  ;;  %v940_v0 = vadd.f32 %v1721_v31, %v901_v50  ;;  %v956_v1 = vadd.f32 %v1721_v31, %v917_v51 }
 0x116   : > { %v900_v62 = vmul.f32 %v1714_v24, %v633_v60  ;;  %v916_v63 = vmul.f32 %v1714_v24, %v697_v61  ;;  %v938_v4 = vadd.f32 %v1721_v31, %v899_v54  ;;  %v954_v5 = vadd.f32 %v1721_v31, %v915_v55 }
 0x117   : > { %v941_v2 = vadd.f32 %v1721_v31, %v902_v58  ;;  %v957_v3 = vadd.f32 %v1721_v31, %v918_v59 }
 0x118   : > { %v939_v6 = vadd.f32 %v1721_v31, %v900_v62  ;;  %v955_v7 = vadd.f32 %v1721_v31, %v916_v63 }
 0x119   : > { %v1401_v8 = vpack.c.bf16 %v941_v2, %v940_v0  ;;  %v1441_v9 = vpack.c.bf16 %v957_v3, %v956_v1 }
 0x11a   : > { %v1396_v24 = vpack.c.bf16 %v939_v6, %v938_v4  ;;  %v1436_v10 = vpack.c.bf16 %v955_v7, %v954_v5 }
 0x11b   : > { %1449 = vst [vmem:[%s1740_s24 + $0x38] sm:$0xff] %v1401_v8   ;;  %1457 = vst [vmem:[%s1740_s24 + $0x78] sm:$0xff] %v1441_v9  }
 0x11c   : > { %1448 = vst [vmem:[%s1740_s24 + $0x30] sm:$0xff] %v1396_v24   ;;  %1456 = vst [vmem:[%s1740_s24 + $0x70] sm:$0xff] %v1436_v10  }
 0x11d PF: > { %s14_s17 = sadd.s32 1, %s1616_s17   ;;  %s1822_s15 = smov %s1612_s16 }
 0x11e   : > { %p11_p5 = scmp.ge.s32.totalorder %s14_s17, 4   ;;  %s1823_s16 = smov %s1825_s18 }
 0x120   :  { %13 = sbr.rel (!%p11_p5) target bundleno = 2 (0x2), region = 87 }

// kernel: _lambda_.20
= control target key start
LH: loop header
LB: loop body
LE: loop exit
PB: predicated region body
PF: predicated region fallthrough
CT: control target
= control target key end

     0   :  { %s921_s18 = smov 0   ;;  %s923_s19 = smov 0   ;;  %s1080_s0 = inlined_call_operand.vmem [shape: bf16[2,256,16], index: 0, kind: input, shape index: {}]   ;;  %s1081_s1 = inlined_call_operand.vmem [shape: f32[16,128], index: 1, kind: input, shape index: {}]   ;;  %s1082_s2 = inlined_call_operand.vmem [shape: f32[1,128], index: 2, kind: input, shape index: {}]   ;;  %s1083_s3 = inlined_call_operand.vmem [shape: f32[128,16], index: 3, kind: input, shape index: {}]   ;;  %s1084_s4 = inlined_call_operand.vmem [shape: f32[1,16], index: 4, kind: input, shape index: {}]   ;;  %s1085_s5 = inlined_call_operand.vmem [shape: f32[2,1,16], index: 5, kind: output, shape index: {}]  }
   0x1   :  { %s925_s20 = smov 0  }
   0x2 LB: > { %s27_s21 = sadd.s32 1, %s882_s19  ;;  %p655_p0 = scmp.ge.s32.totalorder %s886_s20, 1  ;;  %s886_s20 = sphi %s925_s20, %s15_s20   ;;  %s882_s19 = sphi %s923_s19, %s1087_s19   ;;  %s878_s18 = sphi %s921_s18, %s1086_s18  }
   0x3   : > { %p29_p1 = scmp.ge.s32.totalorder %s27_s21, 2  ;;  %p206_p2 = scmp.lt.s32.totalorder %s886_s20, 3 }
   0x5   : > { %s1089_s21 = smov (%p29_p1, %s27_s21), 0  ;;  %p207_p3 = pnand %p655_p0, %p206_p2 }
   0x6   : > { %v407_v0 = vld [vmem:[%s1081_s1] sm:$0xff] (!%p207_p3)  ;;  %v408_v1 = vld [vmem:[%s1081_s1 + $0x8] sm:$0xff] (!%p207_p3)  ;;  %p237_p4 = scmp.lt.s32.totalorder (!%p207_p3), %s878_s18, 1  ;;  %v888_v2 = vmov (!%p207_p3), 0.0|0.0   ;;  %vm889_vm0 = vmmov (!%p207_p3), 0   ;;  %v890_v4 = vmov (!%p207_p3), 0.0  }
   0x7   : > { %210 = sbr.rel (%p207_p3) target bundleno = 564 (0x234), region = 40  ;;  %806 = vmatprep.subr.bf16.mxu0 (!%p207_p3), %v888_v2  ;;  %v807_v3 = vpack.c.bf16 (!%p207_p3), %v408_v1, %v407_v0  ;;  %768 = vmatprep.mubr.msk.f32.mxu0 (!%p207_p3), %vm889_vm0, %v890_v4  ;;  %v489_v5 = vld [vmem:[%s1083_s3] sm:$0xff] (!%p207_p3)  ;;  %v490_v6 = vld [vmem:[%s1083_s3 + $0x8] sm:$0xff] (!%p207_p3)  ;;  %v491_v7 = vld [vmem:[%s1083_s3 + $0x10] sm:$0xff] (!%p207_p3)  ;;  %vm313_vm1 = vcmask (!%p207_p3), 130048   ;;  %vm387_vm2 = vcmask (!%p207_p3), 122880  }
   0x8   : > { %809 = vmatprep.subr.bf16.mxu1 (!%p207_p3), %v888_v2  ;;  %v810_v8 = vpack.c.bf16 (!%p207_p3), %v490_v6, %v489_v5  ;;  %v492_v9 = vld [vmem:[%s1083_s3 + $0x18] sm:$0xff] (!%p207_p3)  ;;  %803 = vmatprep.mubr.msk.f32.mxu1 (!%p207_p3), %vm889_vm0, %v890_v4  ;;  %v493_v11 = vld [vmem:[%s1083_s3 + $0x20] sm:$0xff] (!%p207_p3)  ;;  %v494_v12 = vld [vmem:[%s1083_s3 + $0x28] sm:$0xff] (!%p207_p3) }
   0x9   : > { %808 = vmatpush3.bf16.msra.mxu0 (!%p207_p3), %v807_v3  ;;  %v813_v10 = vpack.c.bf16 (!%p207_p3), %v492_v9, %v491_v7  ;;  %v816_v15 = vpack.c.bf16 (!%p207_p3), %v494_v12, %v493_v11  ;;  %v495_v16 = vld [vmem:[%s1083_s3 + $0x30] sm:$0xff] (!%p207_p3)  ;;  %v496_v17 = vld [vmem:[%s1083_s3 + $0x38] sm:$0xff] (!%p207_p3)  ;;  %v497_v24 = vld [vmem:[%s1083_s3 + $0x40] sm:$0xff] (!%p207_p3) }
   0xa   : > { %811 = vmatpush3.bf16.msra.mxu1 (!%p207_p3), %v810_v8  ;;  %v819_v22 = vpack.c.bf16 (!%p207_p3), %v496_v17, %v495_v16  ;;  %v498_v25 = vld [vmem:[%s1083_s3 + $0x48] sm:$0xff] (!%p207_p3)  ;;  %v499_v35 = vld [vmem:[%s1083_s3 + $0x50] sm:$0xff] (!%p207_p3)  ;;  %v500_v36 = vld [vmem:[%s1083_s3 + $0x58] sm:$0xff] (!%p207_p3) }
   0xb   : > { %812 = vmatprep.subr.bf16.mxu1 (!%p207_p3), %v888_v2  ;;  %v822_v32 = vpack.c.bf16 (!%p207_p3), %v498_v25, %v497_v24  ;;  %v825_v42 = vpack.c.bf16 (!%p207_p3), %v500_v36, %v499_v35  ;;  %v501_v45 = vld [vmem:[%s1083_s3 + $0x60] sm:$0xff] (!%p207_p3)  ;;  %v502_v46 = vld [vmem:[%s1083_s3 + $0x68] sm:$0xff] (!%p207_p3) }
   0xc   : > { %v828_v52 = vpack.c.bf16 (!%p207_p3), %v502_v46, %v501_v45 }
   0xe   : > { %s1091_s18 = smov (!%p237_p4, %s878_s18), 1  ;;  %814 = vmatpush3.bf16.msra.mxu1 %v813_v10 }
   0xf   : > { %s664_s9 = sshll.u32 %s1091_s18, 7  ;;  %815 = vmatprep.subr.bf16.mxu1 %v888_v2  ;;  %s248_s26 = scalar_lea.vmem %s1085_s5, %s1091_s18 }
  0x10   : > { %s965_s12 = scalar_lea.vmem %s1080_s0, %s664_s9 }
  0x11   : > { %v666_v13 = vld [vmem:[%s965_s12] sm:$0xff]   ;;  %v729_v14 = vld [vmem:[%s965_s12 + $0x8] sm:$0xff]   ;;  %v730_v21 = vld [vmem:[%s965_s12 + $0x10] sm:$0xff]  }
  0x12   : > { %v667_v18 = vunpack.c.l.bf16 %v666_v13  ;;  %v668_v19 = vunpack.c.h.bf16 %v666_v13  ;;  %v671_v20 = vunpack.c.l.bf16 %v729_v14  ;;  %817 = vmatpush3.bf16.msra.mxu1 %v816_v15  ;;  %v672_v23 = vunpack.c.h.bf16 %v729_v14  ;;  %v731_v30 = vld [vmem:[%s965_s12 + $0x18] sm:$0xff]   ;;  %v732_v40 = vld [vmem:[%s965_s12 + $0x20] sm:$0xff]   ;;  %v733_v50 = vld [vmem:[%s965_s12 + $0x28] sm:$0xff]  }
  0x13   : > { %818 = vmatprep.subr.bf16.mxu1 %v888_v2  ;;  %v675_v26 = vunpack.c.l.bf16 %v730_v21  ;;  %v676_v33 = vunpack.c.h.bf16 %v730_v21  ;;  %v679_v38 = vunpack.c.l.bf16 %v731_v30  ;;  %v680_v43 = vunpack.c.h.bf16 %v731_v30  ;;  %v734_v58 = vld [vmem:[%s965_s12 + $0x30] sm:$0xff]   ;;  %v735_v1 = vld [vmem:[%s965_s12 + $0x38] sm:$0xff]   ;;  %v736_v9 = vld [vmem:[%s965_s12 + $0x40] sm:$0xff]  }
  0x14   : > { %v314_v27 = vsel %vm313_vm1, %v667_v18, 0.0  ;;  %v315_v28 = vsel %vm313_vm1, %v668_v19, 0.0  ;;  %v317_v29 = vsel %vm313_vm1, %v671_v20, 0.0  ;;  %v319_v34 = vsel %vm313_vm1, %v672_v23, 0.0  ;;  %v737_v15 = vld [vmem:[%s965_s12 + $0x48] sm:$0xff]   ;;  %v740_v36 = vld [vmem:[%s965_s12 + $0x60] sm:$0xff]  }
  0x15   : > { %v316_v31 = vadd.f32 %v315_v28, %v314_v27  ;;  %v321_v39 = vsel %vm313_vm1, %v675_v26, 0.0  ;;  %v323_v44 = vsel %vm313_vm1, %v676_v33, 0.0  ;;  %v683_v48 = vunpack.c.l.bf16 %v732_v40 }
  0x16   : > { %820 = vmatpush3.bf16.msra.mxu1 %v819_v22  ;;  %v325_v49 = vsel %vm313_vm1, %v679_v38, 0.0  ;;  %v684_v53 = vunpack.c.h.bf16 %v732_v40  ;;  %v327_v54 = vsel %vm313_vm1, %v680_v43, 0.0  ;;  %v687_v56 = vunpack.c.l.bf16 %v733_v50  ;;  %v738_v22 = vld [vmem:[%s965_s12 + $0x50] sm:$0xff]   ;;  %v741_v43 = vld [vmem:[%s965_s12 + $0x68] sm:$0xff]  }
  0x17   : > { %821 = vmatprep.subr.bf16.mxu1 %v888_v2  ;;  %v318_v37 = vadd.f32 %v317_v29, %v316_v31  ;;  %v329_v57 = vsel %vm313_vm1, %v683_v48, 0.0  ;;  %v688_v60 = vunpack.c.h.bf16 %v733_v50  ;;  %v691_v63 = vunpack.c.l.bf16 %v734_v58  ;;  %v739_v29 = vld [vmem:[%s965_s12 + $0x58] sm:$0xff]   ;;  %v742_v50 = vld [vmem:[%s965_s12 + $0x70] sm:$0xff]  }
  0x18   : > { %v331_v61 = vsel %vm313_vm1, %v684_v53, 0.0  ;;  %v333_v0 = vsel %vm313_vm1, %v687_v56, 0.0  ;;  %v692_v4 = vunpack.c.h.bf16 %v734_v58  ;;  %v695_v7 = vunpack.c.l.bf16 %v735_v1 }
  0x19   : > { %v320_v41 = vadd.f32 %v319_v34, %v318_v37  ;;  %v335_v5 = vsel %vm313_vm1, %v688_v60, 0.0  ;;  %v337_v8 = vsel %vm313_vm1, %v691_v63, 0.0  ;;  %v696_v11 = vunpack.c.h.bf16 %v735_v1 }
  0x1a   : > { %823 = vmatpush3.bf16.msra.mxu1 %v822_v32  ;;  %v699_v13 = vunpack.c.l.bf16 %v736_v9  ;;  %v341_v14 = vsel %vm313_vm1, %v695_v7, 0.0  ;;  %v700_v17 = vunpack.c.h.bf16 %v736_v9  ;;  %v703_v20 = vunpack.c.l.bf16 %v737_v15 }
  0x1b   : > { %824 = vmatprep.subr.bf16.mxu1 %v888_v2  ;;  %v322_v47 = vadd.f32 %v321_v39, %v320_v41  ;;  %v343_v18 = vsel %vm313_vm1, %v696_v11, 0.0  ;;  %v704_v24 = vunpack.c.h.bf16 %v737_v15  ;;  %v707_v27 = vunpack.c.l.bf16 %v738_v22 }
  0x1c   : > { %v345_v21 = vsel %vm313_vm1, %v699_v13, 0.0  ;;  %v347_v25 = vsel %vm313_vm1, %v700_v17, 0.0  ;;  %v349_v28 = vsel %vm313_vm1, %v703_v20, 0.0  ;;  %v708_v31 = vunpack.c.h.bf16 %v738_v22  ;;  %v504_v22 = vld [vmem:[%s1083_s3 + $0x78] sm:$0xff] }
  0x1d   : > { %v324_v51 = vadd.f32 %v323_v44, %v322_v47  ;;  %v351_v32 = vsel %vm313_vm1, %v704_v24, 0.0  ;;  %v711_v34 = vunpack.c.l.bf16 %v739_v29  ;;  %v353_v35 = vsel %vm313_vm1, %v707_v27, 0.0  ;;  %v658_v24 = vld [vmem:[%s1082_s2] ss:$0 sm:$0xff] }
  0x1e   : > { %826 = vmatpush3.bf16.msra.mxu1 %v825_v42  ;;  %v712_v38 = vunpack.c.h.bf16 %v739_v29  ;;  %v355_v39 = vsel %vm313_vm1, %v708_v31, 0.0  ;;  %v715_v41 = vunpack.c.l.bf16 %v740_v36  ;;  %v716_v45 = vunpack.c.h.bf16 %v740_v36  ;;  %v660_v29 = vld [vmem:[%s1084_s4] ss:$0 sm:$0xff] }
  0x1f   : > { %827 = vmatprep.subr.bf16.mxu1 %v888_v2  ;;  %v326_v55 = vadd.f32 %v325_v49, %v324_v51  ;;  %v357_v42 = vsel %vm313_vm1, %v711_v34, 0.0  ;;  %v719_v48 = vunpack.c.l.bf16 %v741_v43  ;;  %v403_v15 = vlaneseq }
  0x20   : > { %v359_v46 = vsel %vm313_vm1, %v712_v38, 0.0  ;;  %v361_v49 = vsel %vm313_vm1, %v715_v41, 0.0  ;;  %v363_v53 = vsel %vm313_vm1, %v716_v45, 0.0 }
  0x21   : > { %v328_v59 = vadd.f32 %v327_v54, %v326_v55  ;;  %v723_v55 = vunpack.c.l.bf16 %v742_v50  ;;  %v365_v56 = vsel %vm313_vm1, %v719_v48, 0.0 }
  0x22   : > { %829 = vmatpush3.bf16.msra.mxu1 %v828_v52  ;;  %v720_v52 = vunpack.c.h.bf16 %v741_v43 }
  0x23   : > { %830 = vmatprep.subr.bf16.mxu1 %v888_v2  ;;  %v330_v62 = vadd.f32 %v329_v57, %v328_v59  ;;  %v339_v2 = vsel %vm313_vm1, %v692_v4, 0.0  ;;  %v743_v57 = vld [vmem:[%s965_s12 + $0x78] sm:$0xff]   ;;  %v724_v59 = vunpack.c.h.bf16 %v742_v50  ;;  %v369_v63 = vsel %vm313_vm1, %v723_v55, 0.0 }
  0x24   : > { %v367_v60 = vsel %vm313_vm1, %v720_v52, 0.0  ;;  %v728_v1 = vunpack.c.h.bf16 %v743_v57 }
  0x25   : > { %v332_v3 = vadd.f32 %v331_v61, %v330_v62  ;;  %v727_v62 = vunpack.c.l.bf16 %v743_v57 }
  0x26   : > { %v375_v7 = vsel %vm313_vm1, %v728_v1, 0.0 }
  0x27   : > { %v334_v6 = vadd.f32 %v333_v0, %v332_v3  ;;  %v371_v3 = vsel %vm313_vm1, %v724_v59, 0.0 }
  0x29   : > { %v336_v10 = vadd.f32 %v335_v5, %v334_v6  ;;  %v373_v5 = vsel %vm313_vm1, %v727_v62, 0.0 }
  0x2b   : > { %v338_v12 = vadd.f32 %v337_v8, %v336_v10 }
  0x2d   : > { %v340_v16 = vadd.f32 %v339_v2, %v338_v12 }
  0x2f   : > { %v342_v19 = vadd.f32 %v341_v14, %v340_v16  ;;  %v404_v16 = vshrl.u32 %v403_v15, 7 }
  0x31   : > { %v344_v23 = vadd.f32 %v343_v18, %v342_v19  ;;  %v405_v17 = vsub.s32 0, %v404_v16 }
  0x33   : > { %v346_v26 = vadd.f32 %v345_v21, %v344_v23  ;;  %v503_v21 = vld [vmem:[%s1083_s3 + $0x70] sm:$0xff] }
  0x34   : > { %v831_v23 = vpack.c.bf16 %v504_v22, %v503_v21 }
  0x35   : > { %v348_v30 = vadd.f32 %v347_v25, %v346_v26 }
  0x36   : > { %832 = vmatpush3.bf16.msra.mxu1 %v831_v23 }
  0x37   : > { %v350_v33 = vadd.f32 %v349_v28, %v348_v30 }
  0x39   : > { %v352_v37 = vadd.f32 %v351_v32, %v350_v33 }
  0x3b   : > { %v354_v40 = vadd.f32 %v353_v35, %v352_v37 }
  0x3d   : > { %v356_v44 = vadd.f32 %v355_v39, %v354_v40 }
  0x3f   : > { %v358_v47 = vadd.f32 %v357_v42, %v356_v44 }
  0x41   : > { %v360_v51 = vadd.f32 %v359_v46, %v358_v47 }
  0x43   : > { %v362_v54 = vadd.f32 %v361_v49, %v360_v51 }
  0x45   : > { %v364_v58 = vadd.f32 %v363_v53, %v362_v54 }
  0x47   : > { %v366_v61 = vadd.f32 %v365_v56, %v364_v58 }
  0x49   : > { %v368_v0 = vadd.f32 %v367_v60, %v366_v61 }
  0x4b   : > { %v370_v4 = vadd.f32 %v369_v63, %v368_v0 }
  0x4d   : > { %v372_v6 = vadd.f32 %v371_v3, %v370_v4 }
  0x4f   : > { %v374_v8 = vadd.f32 %v373_v5, %v372_v6 }
  0x51   : > { %v376_v9 = vadd.f32 %v375_v7, %v374_v8 }
  0x53   : > { %v377_v10 = vrot.slane %v376_v9, 4 }
  0x55   : > { %v378_v11 = vadd.f32 %v377_v10, %v376_v9 }
  0x57   : > { %v379_v2 = vrot.slane %v378_v11, 2 }
  0x59   : > { %v380_v12 = vadd.f32 %v379_v2, %v378_v11 }
  0x5b   : > { %v381_v13 = vrot.slane %v380_v12, 1 }
  0x5d   : > { %v382_v14 = vadd.f32 %v381_v13, %v380_v12 }
  0x5f   : > { %388 = vst.msk [vmem:[#allocation2] sm:$0x1] %vm387_vm2, %v382_v14 }
  0x66   : > { %v400_v18 = vld [vmem:[#allocation2] sm:$0x1] }
  0x67   : > { %v401_v19 = vmul.f32 0.00390625, %v400_v18 }
  0x69   : > { %v406_v20 = vrot.slane %v401_v19, %v405_v17 }
  0x6b   : > { %769 = vmatmul.mubr.msk.f32.vlgmr.msra.gmra.mrb[0].mxu0 %vm313_vm1, %v406_v20 }
 0x13e   : > { %v484_v25 = vpop.f32.mrb[0].mxu0 }
 0x13f   : > { %v485_v26 = vadd.f32 %v658_v24, %v484_v25  ;;  %v770_v27 = vpop.f32.mrb[1].mxu0 }
 0x141   : > { %v488_v28 = vmax.f32 %v485_v26, 0.0 }
 0x143   : > { %804 = vmatmul.mubr.f32.vlgmr.msra.gmra.mrb[0].mxu1 %v488_v28 }
 0x216   : > { %v578_v30 = vpop.f32.mrb[0].mxu1 }
 0x217   : > { %v579_v31 = vadd.f32 %v660_v29, %v578_v30  ;;  %v805_v32 = vpop.f32.mrb[1].mxu1 }
 0x219   : > { %v661_v33 = vmul.f32 -1.442695, %v579_v31 }
 0x21b   : > { %860 = vpow2.f32 %v661_v33 }
 0x225   : > { %v861_v34 = vpop.eup %860 }
 0x226   : > { %v585_v35 = vadd.f32 1.0, %v861_v34 }
 0x228   : > { %862 = vrcp.f32 %v585_v35 }
 0x232   : > { %v863_v36 = vpop.eup %862 }
 0x233   : > { %589 = vst.msk [vmem:[%s248_s26] sm:$0x1] %vm387_vm2, %v863_v36 }
 0x234 PF: > { %s15_s20 = sadd.s32 1, %s886_s20   ;;  %s1086_s18 = smov %s882_s19 }
 0x235   : > { %p12_p5 = scmp.ge.s32.totalorder %s15_s20, 4   ;;  %s1087_s19 = smov %s1089_s21 }
 0x237   :  { %14 = sbr.rel (!%p12_p5) target bundleno = 2 (0x2), region = 82 }

// kernel: _lambda_.21
= control target key start
LH: loop header
LB: loop body
LE: loop exit
PB: predicated region body
PF: predicated region fallthrough
CT: control target
= control target key end

     0   :  { %s1073_s12 = smov 0   ;;  %s1075_s13 = smov 0   ;;  %s1253_s0 = inlined_call_operand.vmem [shape: bf16[2,256,16], index: 0, kind: input, shape index: {}]   ;;  %s1254_s1 = inlined_call_operand.vmem [shape: f32[2,1,16], index: 1, kind: input, shape index: {}]   ;;  %s1255_s2 = inlined_call_operand.vmem [shape: bf16[2,256,16], index: 2, kind: input, shape index: {}]   ;;  %s1256_s3 = inlined_call_operand.vmem [shape: bf16[2,256,16], index: 3, kind: output, shape index: {}]  }
   0x1   :  { %s1077_s14 = smov 0  }
   0x2 LB: > { %s25_s15 = sadd.s32 1, %s1047_s13  ;;  %p770_p0 = scmp.ge.s32.totalorder %s1051_s14, 1  ;;  %s1051_s14 = sphi %s1077_s14, %s13_s14   ;;  %s1047_s13 = sphi %s1075_s13, %s1258_s13   ;;  %s1043_s12 = sphi %s1073_s12, %s1257_s12  }
   0x3   : > { %p27_p1 = scmp.ge.s32.totalorder %s25_s15, 2  ;;  %p183_p2 = scmp.lt.s32.totalorder %s1051_s14, 3 }
   0x5   : > { %s1260_s15 = smov (%p27_p1, %s25_s15), 0  ;;  %p184_p3 = pnand %p770_p0, %p183_p2 }
   0x6   : > { %p228_p4 = scmp.lt.s32.totalorder (!%p184_p3), %s1043_s12, 1  ;;  %vm619_vm0 = vcmask (!%p184_p3), 125952  }
   0x7   : > { %187 = sbr.rel (%p184_p3) target bundleno = 72 (0x48), region = 32 }
   0xe   : > { %s1262_s12 = smov (!%p228_p4, %s1043_s12), 1 }
   0xf   : > { %s1091_s16 = sshll.u32 %s1262_s12, 7  ;;  %s239_s19 = scalar_lea.vmem %s1254_s1, %s1262_s12 }
  0x10   : > { %s1100_s22 = scalar_lea.vmem %s1253_s0, %s1091_s16  ;;  %s1106_s25 = scalar_lea.vmem %s1255_s2, %s1091_s16  ;;  %v1108_v0 = vld [vmem:[%s239_s19] ss:$0 sm:$0xff] }
  0x11   : > { %v848_v1 = vld [vmem:[%s1100_s22] sm:$0xff]   ;;  %v975_v3 = vld [vmem:[%s1100_s22 + $0x8] sm:$0xff]   ;;  %v976_v9 = vld [vmem:[%s1100_s22 + $0x10] sm:$0xff]   ;;  %s1129_s28 = scalar_lea.vmem %s1256_s3, %s1091_s16 }
  0x12   : > { %v912_v2 = vld [vmem:[%s1106_s25] sm:$0xff]   ;;  %v849_v4 = vunpack.c.l.bf16 %v848_v1  ;;  %v850_v6 = vunpack.c.h.bf16 %v848_v1  ;;  %v990_v8 = vld [vmem:[%s1106_s25 + $0x8] sm:$0xff]   ;;  %v991_v10 = vld [vmem:[%s1106_s25 + $0x10] sm:$0xff]   ;;  %v853_v11 = vunpack.c.l.bf16 %v975_v3  ;;  %v854_v13 = vunpack.c.h.bf16 %v975_v3 }
  0x13   : > { %v913_v5 = vunpack.c.l.bf16 %v912_v2  ;;  %v914_v7 = vunpack.c.h.bf16 %v912_v2  ;;  %v917_v12 = vunpack.c.l.bf16 %v990_v8  ;;  %v918_v14 = vunpack.c.h.bf16 %v990_v8  ;;  %v977_v15 = vld [vmem:[%s1100_s22 + $0x18] sm:$0xff]   ;;  %v978_v41 = vld [vmem:[%s1100_s22 + $0x20] sm:$0xff]   ;;  %v979_v51 = vld [vmem:[%s1100_s22 + $0x28] sm:$0xff]  }
  0x14   : > { %v331_v16 = vmul.f32 %v849_v4, %v1108_v0  ;;  %v332_v17 = vmul.f32 %v850_v6, %v1108_v0  ;;  %v857_v18 = vunpack.c.l.bf16 %v976_v9  ;;  %v921_v19 = vunpack.c.l.bf16 %v991_v10  ;;  %v992_v20 = vld [vmem:[%s1106_s25 + $0x18] sm:$0xff]   ;;  %v993_v46 = vld [vmem:[%s1106_s25 + $0x20] sm:$0xff]   ;;  %v994_v56 = vld [vmem:[%s1106_s25 + $0x28] sm:$0xff]  }
  0x15   : > { %v333_v21 = vmul.f32 %v853_v11, %v1108_v0  ;;  %v334_v22 = vmul.f32 %v854_v13, %v1108_v0  ;;  %v858_v23 = vunpack.c.h.bf16 %v976_v9  ;;  %v922_v24 = vunpack.c.h.bf16 %v991_v10  ;;  %v980_v61 = vld [vmem:[%s1100_s22 + $0x30] sm:$0xff]  }
  0x16   : > { %v427_v25 = vadd.f32 %v913_v5, %v331_v16  ;;  %v428_v26 = vadd.f32 %v914_v7, %v332_v17  ;;  %v335_v27 = vmul.f32 %v857_v18, %v1108_v0  ;;  %v861_v28 = vunpack.c.l.bf16 %v977_v15  ;;  %v995_v3 = vld [vmem:[%s1106_s25 + $0x30] sm:$0xff]   ;;  %v981_v16 = vld [vmem:[%s1100_s22 + $0x38] sm:$0xff]  }
  0x17   : > { %v429_v29 = vadd.f32 %v917_v12, %v333_v21  ;;  %v430_v30 = vadd.f32 %v918_v14, %v334_v22  ;;  %v336_v31 = vmul.f32 %v858_v23, %v1108_v0  ;;  %v925_v32 = vunpack.c.l.bf16 %v992_v20  ;;  %v996_v21 = vld [vmem:[%s1106_s25 + $0x38] sm:$0xff]  }
  0x18   : > { %v459_v33 = vmax.f32 %v427_v25, 0.0  ;;  %v460_v34 = vmax.f32 %v428_v26, 0.0  ;;  %v431_v35 = vadd.f32 %v921_v19, %v335_v27  ;;  %v337_v36 = vmul.f32 %v861_v28, %v1108_v0 }
  0x19   : > { %v461_v37 = vmax.f32 %v429_v29, 0.0  ;;  %v462_v38 = vmax.f32 %v430_v30, 0.0  ;;  %v432_v39 = vadd.f32 %v922_v24, %v336_v31  ;;  %v862_v40 = vunpack.c.h.bf16 %v977_v15  ;;  %v982_v30 = vld [vmem:[%s1100_s22 + $0x40] sm:$0xff]  }
  0x1a   : > { %v815_v42 = vpack.c.bf16 %v459_v33, %v459_v33  ;;  %v816_v43 = vpack.c.bf16 %v460_v34, %v460_v34  ;;  %v463_v44 = vmax.f32 %v431_v35, 0.0  ;;  %v433_v45 = vadd.f32 %v925_v32, %v337_v36  ;;  %v997_v35 = vld [vmem:[%s1106_s25 + $0x40] sm:$0xff]  }
  0x1b   : > { %v817_v47 = vpack.c.bf16 %v461_v37, %v461_v37  ;;  %v818_v48 = vpack.c.bf16 %v462_v38, %v462_v38  ;;  %v464_v49 = vmax.f32 %v432_v39, 0.0  ;;  %v338_v50 = vmul.f32 %v862_v40, %v1108_v0 }
  0x1c   : > { %620 = vst.msk [vmem:[%s1129_s28] sm:$0xf] %vm619_vm0, %v815_v42  ;;  %621 = vst.msk [vmem:[%s1129_s28 + $0x4] sm:$0xf] %vm619_vm0, %v816_v43  ;;  %v819_v52 = vpack.c.bf16 %v463_v44, %v463_v44  ;;  %v465_v53 = vmax.f32 %v433_v45, 0.0  ;;  %v926_v54 = vunpack.c.h.bf16 %v992_v20  ;;  %v865_v55 = vunpack.c.l.bf16 %v978_v41  ;;  %v983_v44 = vld [vmem:[%s1100_s22 + $0x48] sm:$0xff]  }
  0x1d   : > { %622 = vst.msk [vmem:[%s1129_s28 + $0x8] sm:$0xf] %vm619_vm0, %v817_v47  ;;  %623 = vst.msk [vmem:[%s1129_s28 + $0xc] sm:$0xf] %vm619_vm0, %v818_v48  ;;  %v820_v57 = vpack.c.bf16 %v464_v49, %v464_v49  ;;  %v929_v58 = vunpack.c.l.bf16 %v993_v46  ;;  %v866_v59 = vunpack.c.h.bf16 %v978_v41  ;;  %v930_v60 = vunpack.c.h.bf16 %v993_v46  ;;  %v998_v45 = vld [vmem:[%s1106_s25 + $0x48] sm:$0xff]  }
  0x1e   : > { %624 = vst.msk [vmem:[%s1129_s28 + $0x10] sm:$0xf] %vm619_vm0, %v819_v52  ;;  %v821_v62 = vpack.c.bf16 %v465_v53, %v465_v53  ;;  %v434_v63 = vadd.f32 %v926_v54, %v338_v50  ;;  %v339_v1 = vmul.f32 %v865_v55, %v1108_v0  ;;  %v869_v2 = vunpack.c.l.bf16 %v979_v51  ;;  %v984_v54 = vld [vmem:[%s1100_s22 + $0x50] sm:$0xff]  }
  0x1f   : > { %625 = vst.msk [vmem:[%s1129_s28 + $0x14] sm:$0xf] %vm619_vm0, %v820_v57  ;;  %v340_v4 = vmul.f32 %v866_v59, %v1108_v0  ;;  %v933_v5 = vunpack.c.l.bf16 %v994_v56  ;;  %v870_v6 = vunpack.c.h.bf16 %v979_v51  ;;  %v934_v7 = vunpack.c.h.bf16 %v994_v56  ;;  %v999_v59 = vld [vmem:[%s1106_s25 + $0x50] sm:$0xff]  }
  0x20   : > { %626 = vst.msk [vmem:[%s1129_s28 + $0x18] sm:$0xf] %vm619_vm0, %v821_v62  ;;  %v466_v8 = vmax.f32 %v434_v63, 0.0  ;;  %v435_v9 = vadd.f32 %v929_v58, %v339_v1  ;;  %v341_v10 = vmul.f32 %v869_v2, %v1108_v0  ;;  %v873_v11 = vunpack.c.l.bf16 %v980_v61 }
  0x21   : > { %v436_v12 = vadd.f32 %v930_v60, %v340_v4  ;;  %v342_v13 = vmul.f32 %v870_v6, %v1108_v0  ;;  %v937_v14 = vunpack.c.l.bf16 %v995_v3  ;;  %v874_v15 = vunpack.c.h.bf16 %v980_v61 }
  0x22   : > { %v822_v17 = vpack.c.bf16 %v466_v8, %v466_v8  ;;  %v467_v18 = vmax.f32 %v435_v9, 0.0  ;;  %v437_v19 = vadd.f32 %v933_v5, %v341_v10  ;;  %v343_v20 = vmul.f32 %v873_v11, %v1108_v0  ;;  %v985_v9 = vld [vmem:[%s1100_s22 + $0x58] sm:$0xff]  }
  0x23   : > { %v468_v22 = vmax.f32 %v436_v12, 0.0  ;;  %v438_v23 = vadd.f32 %v934_v7, %v342_v13  ;;  %v344_v24 = vmul.f32 %v874_v15, %v1108_v0  ;;  %v938_v25 = vunpack.c.h.bf16 %v995_v3 }
  0x24   : > { %627 = vst.msk [vmem:[%s1129_s28 + $0x1c] sm:$0xf] %vm619_vm0, %v822_v17  ;;  %v823_v26 = vpack.c.bf16 %v467_v18, %v467_v18  ;;  %v469_v27 = vmax.f32 %v437_v19, 0.0  ;;  %v439_v28 = vadd.f32 %v937_v14, %v343_v20  ;;  %v877_v29 = vunpack.c.l.bf16 %v981_v16  ;;  %v1000_v14 = vld [vmem:[%s1106_s25 + $0x58] sm:$0xff]  }
  0x25   : > { %v824_v31 = vpack.c.bf16 %v468_v22, %v468_v22  ;;  %v470_v32 = vmax.f32 %v438_v23, 0.0  ;;  %v440_v33 = vadd.f32 %v938_v25, %v344_v24  ;;  %v941_v34 = vunpack.c.l.bf16 %v996_v21  ;;  %v986_v23 = vld [vmem:[%s1100_s22 + $0x60] sm:$0xff]  }
  0x26   : > { %628 = vst.msk [vmem:[%s1129_s28 + $0x20] sm:$0xf] %vm619_vm0, %v823_v26  ;;  %v825_v36 = vpack.c.bf16 %v469_v27, %v469_v27  ;;  %v471_v37 = vmax.f32 %v439_v28, 0.0  ;;  %v345_v38 = vmul.f32 %v877_v29, %v1108_v0  ;;  %v878_v39 = vunpack.c.h.bf16 %v981_v16  ;;  %v1001_v28 = vld [vmem:[%s1106_s25 + $0x60] sm:$0xff]  }
  0x27   : > { %629 = vst.msk [vmem:[%s1129_s28 + $0x24] sm:$0xf] %vm619_vm0, %v824_v31  ;;  %v826_v40 = vpack.c.bf16 %v470_v32, %v470_v32  ;;  %v472_v41 = vmax.f32 %v440_v33, 0.0  ;;  %v942_v42 = vunpack.c.h.bf16 %v996_v21  ;;  %v881_v43 = vunpack.c.l.bf16 %v982_v30 }
  0x28   : > { %630 = vst.msk [vmem:[%s1129_s28 + $0x28] sm:$0xf] %vm619_vm0, %v825_v36  ;;  %v827_v46 = vpack.c.bf16 %v471_v37, %v471_v37  ;;  %v441_v47 = vadd.f32 %v941_v34, %v345_v38  ;;  %v346_v48 = vmul.f32 %v878_v39, %v1108_v0  ;;  %v945_v49 = vunpack.c.l.bf16 %v997_v35  ;;  %v987_v37 = vld [vmem:[%s1100_s22 + $0x68] sm:$0xff]  }
  0x29   : > { %631 = vst.msk [vmem:[%s1129_s28 + $0x2c] sm:$0xf] %vm619_vm0, %v826_v40  ;;  %v828_v50 = vpack.c.bf16 %v472_v41, %v472_v41  ;;  %v347_v51 = vmul.f32 %v881_v43, %v1108_v0  ;;  %v882_v52 = vunpack.c.h.bf16 %v982_v30  ;;  %v946_v53 = vunpack.c.h.bf16 %v997_v35  ;;  %v1002_v38 = vld [vmem:[%s1106_s25 + $0x68] sm:$0xff]  }
  0x2a   : > { %632 = vst.msk [vmem:[%s1129_s28 + $0x30] sm:$0xf] %vm619_vm0, %v827_v46  ;;  %v473_v55 = vmax.f32 %v441_v47, 0.0  ;;  %v442_v56 = vadd.f32 %v942_v42, %v346_v48  ;;  %v885_v57 = vunpack.c.l.bf16 %v983_v44  ;;  %v949_v58 = vunpack.c.l.bf16 %v998_v45  ;;  %v988_v47 = vld [vmem:[%s1100_s22 + $0x70] sm:$0xff]  }
  0x2b   : > { %633 = vst.msk [vmem:[%s1129_s28 + $0x34] sm:$0xf] %vm619_vm0, %v828_v50  ;;  %v443_v60 = vadd.f32 %v945_v49, %v347_v51  ;;  %v348_v61 = vmul.f32 %v882_v52, %v1108_v0  ;;  %v886_v62 = vunpack.c.h.bf16 %v983_v44  ;;  %v950_v63 = vunpack.c.h.bf16 %v998_v45 }
  0x2c   : > { %v829_v1 = vpack.c.bf16 %v473_v55, %v473_v55  ;;  %v474_v2 = vmax.f32 %v442_v56, 0.0  ;;  %v349_v3 = vmul.f32 %v885_v57, %v1108_v0  ;;  %v889_v4 = vunpack.c.l.bf16 %v984_v54  ;;  %v1003_v56 = vld [vmem:[%s1106_s25 + $0x70] sm:$0xff]  }
  0x2d   : > { %v475_v5 = vmax.f32 %v443_v60, 0.0  ;;  %v444_v6 = vadd.f32 %v946_v53, %v348_v61  ;;  %v350_v7 = vmul.f32 %v886_v62, %v1108_v0  ;;  %v953_v8 = vunpack.c.l.bf16 %v999_v59 }
  0x2e   : > { %634 = vst.msk [vmem:[%s1129_s28 + $0x38] sm:$0xf] %vm619_vm0, %v829_v1  ;;  %v830_v10 = vpack.c.bf16 %v474_v2, %v474_v2  ;;  %v445_v11 = vadd.f32 %v949_v58, %v349_v3  ;;  %v351_v12 = vmul.f32 %v889_v4, %v1108_v0  ;;  %v890_v13 = vunpack.c.h.bf16 %v984_v54  ;;  %v989_v2 = vld [vmem:[%s1100_s22 + $0x78] sm:$0xff]  }
  0x2f   : > { %v831_v15 = vpack.c.bf16 %v475_v5, %v475_v5  ;;  %v476_v16 = vmax.f32 %v444_v6, 0.0  ;;  %v446_v17 = vadd.f32 %v950_v63, %v350_v7  ;;  %v954_v18 = vunpack.c.h.bf16 %v999_v59  ;;  %v1004_v7 = vld [vmem:[%s1106_s25 + $0x78] sm:$0xff]  }
  0x30   : > { %635 = vst.msk [vmem:[%s1129_s28 + $0x3c] sm:$0xf] %vm619_vm0, %v830_v10  ;;  %v477_v19 = vmax.f32 %v445_v11, 0.0  ;;  %v447_v20 = vadd.f32 %v953_v8, %v351_v12  ;;  %v352_v21 = vmul.f32 %v890_v13, %v1108_v0  ;;  %v893_v22 = vunpack.c.l.bf16 %v985_v9 }
  0x31   : > { %636 = vst.msk [vmem:[%s1129_s28 + $0x40] sm:$0xf] %vm619_vm0, %v831_v15  ;;  %v832_v24 = vpack.c.bf16 %v476_v16, %v476_v16  ;;  %v478_v25 = vmax.f32 %v446_v17, 0.0  ;;  %v957_v26 = vunpack.c.l.bf16 %v1000_v14  ;;  %v894_v27 = vunpack.c.h.bf16 %v985_v9 }
  0x32   : > { %v833_v29 = vpack.c.bf16 %v477_v19, %v477_v19  ;;  %v479_v30 = vmax.f32 %v447_v20, 0.0  ;;  %v448_v31 = vadd.f32 %v954_v18, %v352_v21  ;;  %v353_v32 = vmul.f32 %v893_v22, %v1108_v0 }
  0x33   : > { %637 = vst.msk [vmem:[%s1129_s28 + $0x44] sm:$0xf] %vm619_vm0, %v832_v24  ;;  %v834_v33 = vpack.c.bf16 %v478_v25, %v478_v25  ;;  %v354_v34 = vmul.f32 %v894_v27, %v1108_v0  ;;  %v958_v35 = vunpack.c.h.bf16 %v1000_v14  ;;  %v897_v36 = vunpack.c.l.bf16 %v986_v23 }
  0x34   : > { %638 = vst.msk [vmem:[%s1129_s28 + $0x48] sm:$0xf] %vm619_vm0, %v833_v29  ;;  %v835_v39 = vpack.c.bf16 %v479_v30, %v479_v30  ;;  %v480_v40 = vmax.f32 %v448_v31, 0.0  ;;  %v449_v41 = vadd.f32 %v957_v26, %v353_v32  ;;  %v961_v42 = vunpack.c.l.bf16 %v1001_v28 }
  0x35   : > { %639 = vst.msk [vmem:[%s1129_s28 + $0x4c] sm:$0xf] %vm619_vm0, %v834_v33  ;;  %v450_v43 = vadd.f32 %v958_v35, %v354_v34  ;;  %v355_v44 = vmul.f32 %v897_v36, %v1108_v0  ;;  %v898_v45 = vunpack.c.h.bf16 %v986_v23  ;;  %v962_v46 = vunpack.c.h.bf16 %v1001_v28 }
  0x36   : > { %640 = vst.msk [vmem:[%s1129_s28 + $0x50] sm:$0xf] %vm619_vm0, %v835_v39  ;;  %v836_v48 = vpack.c.bf16 %v480_v40, %v480_v40  ;;  %v481_v49 = vmax.f32 %v449_v41, 0.0  ;;  %v901_v50 = vunpack.c.l.bf16 %v987_v37  ;;  %v965_v51 = vunpack.c.l.bf16 %v1002_v38 }
  0x37   : > { %v482_v52 = vmax.f32 %v450_v43, 0.0  ;;  %v451_v53 = vadd.f32 %v961_v42, %v355_v44  ;;  %v356_v54 = vmul.f32 %v898_v45, %v1108_v0  ;;  %v902_v55 = vunpack.c.h.bf16 %v987_v37 }
  0x38   : > { %641 = vst.msk [vmem:[%s1129_s28 + $0x54] sm:$0xf] %vm619_vm0, %v836_v48  ;;  %v837_v57 = vpack.c.bf16 %v481_v49, %v481_v49  ;;  %v357_v58 = vmul.f32 %v901_v50, %v1108_v0  ;;  %v966_v59 = vunpack.c.h.bf16 %v1002_v38  ;;  %v905_v60 = vunpack.c.l.bf16 %v988_v47 }
  0x39   : > { %v838_v61 = vpack.c.bf16 %v482_v52, %v482_v52  ;;  %v483_v62 = vmax.f32 %v451_v53, 0.0  ;;  %v452_v63 = vadd.f32 %v962_v46, %v356_v54  ;;  %v358_v1 = vmul.f32 %v902_v55, %v1108_v0 }
  0x3a   : > { %642 = vst.msk [vmem:[%s1129_s28 + $0x58] sm:$0xf] %vm619_vm0, %v837_v57  ;;  %v453_v3 = vadd.f32 %v965_v51, %v357_v58  ;;  %v359_v4 = vmul.f32 %v905_v60, %v1108_v0  ;;  %v969_v5 = vunpack.c.l.bf16 %v1003_v56  ;;  %v906_v6 = vunpack.c.h.bf16 %v988_v47 }
  0x3b   : > { %643 = vst.msk [vmem:[%s1129_s28 + $0x5c] sm:$0xf] %vm619_vm0, %v838_v61  ;;  %v839_v8 = vpack.c.bf16 %v483_v62, %v483_v62  ;;  %v484_v9 = vmax.f32 %v452_v63, 0.0  ;;  %v454_v10 = vadd.f32 %v966_v59, %v358_v1  ;;  %v970_v11 = vunpack.c.h.bf16 %v1003_v56 }
  0x3c   : > { %v485_v12 = vmax.f32 %v453_v3, 0.0  ;;  %v455_v13 = vadd.f32 %v969_v5, %v359_v4  ;;  %v360_v14 = vmul.f32 %v906_v6, %v1108_v0  ;;  %v909_v15 = vunpack.c.l.bf16 %v989_v2 }
  0x3d   : > { %644 = vst.msk [vmem:[%s1129_s28 + $0x60] sm:$0xf] %vm619_vm0, %v839_v8  ;;  %v840_v16 = vpack.c.bf16 %v484_v9, %v484_v9  ;;  %v486_v17 = vmax.f32 %v454_v10, 0.0  ;;  %v973_v18 = vunpack.c.l.bf16 %v1004_v7  ;;  %v910_v19 = vunpack.c.h.bf16 %v989_v2 }
  0x3e   : > { %v841_v20 = vpack.c.bf16 %v485_v12, %v485_v12  ;;  %v487_v21 = vmax.f32 %v455_v13, 0.0  ;;  %v456_v22 = vadd.f32 %v970_v11, %v360_v14  ;;  %v361_v23 = vmul.f32 %v909_v15, %v1108_v0 }
  0x3f   : > { %645 = vst.msk [vmem:[%s1129_s28 + $0x64] sm:$0xf] %vm619_vm0, %v840_v16  ;;  %v842_v24 = vpack.c.bf16 %v486_v17, %v486_v17  ;;  %v362_v25 = vmul.f32 %v910_v19, %v1108_v0  ;;  %v974_v26 = vunpack.c.h.bf16 %v1004_v7 }
  0x40   : > { %646 = vst.msk [vmem:[%s1129_s28 + $0x68] sm:$0xf] %vm619_vm0, %v841_v20  ;;  %v843_v27 = vpack.c.bf16 %v487_v21, %v487_v21  ;;  %v488_v28 = vmax.f32 %v456_v22, 0.0  ;;  %v457_v29 = vadd.f32 %v973_v18, %v361_v23 }
  0x41   : > { %647 = vst.msk [vmem:[%s1129_s28 + $0x6c] sm:$0xf] %vm619_vm0, %v842_v24  ;;  %v458_v30 = vadd.f32 %v974_v26, %v362_v25 }
  0x42   : > { %648 = vst.msk [vmem:[%s1129_s28 + $0x70] sm:$0xf] %vm619_vm0, %v843_v27  ;;  %v844_v31 = vpack.c.bf16 %v488_v28, %v488_v28  ;;  %v489_v32 = vmax.f32 %v457_v29, 0.0 }
  0x43   : > { %v490_v33 = vmax.f32 %v458_v30, 0.0 }
  0x44   : > { %649 = vst.msk [vmem:[%s1129_s28 + $0x74] sm:$0xf] %vm619_vm0, %v844_v31  ;;  %v845_v34 = vpack.c.bf16 %v489_v32, %v489_v32 }
  0x45   : > { %v846_v35 = vpack.c.bf16 %v490_v33, %v490_v33 }
  0x46   : > { %650 = vst.msk [vmem:[%s1129_s28 + $0x78] sm:$0xf] %vm619_vm0, %v845_v34 }
  0x47   : > { %651 = vst.msk [vmem:[%s1129_s28 + $0x7c] sm:$0xf] %vm619_vm0, %v846_v35 }
  0x48 PF: > { %s13_s14 = sadd.s32 1, %s1051_s14   ;;  %s1257_s12 = smov %s1047_s13 }
  0x49   : > { %p10_p5 = scmp.ge.s32.totalorder %s13_s14, 4   ;;  %s1258_s13 = smov %s1260_s15 }
  0x4b   :  { %12 = sbr.rel (!%p10_p5) target bundleno = 2 (0x2), region = 68 }

// kernel: _lambda_.24
= control target key start
LH: loop header
LB: loop body
LE: loop exit
PB: predicated region body
PF: predicated region fallthrough
CT: control target
= control target key end

     0   :  { %s1054_s1 = inlined_call_operand.vmem [shape: bf16[1,256,128], index: 1, kind: input, shape index: {}]   ;;  %s1055_s0 = inlined_call_operand.vmem [shape: bf16[128,256], index: 0, kind: input, shape index: {}]   ;;  %s1056_s2 = inlined_call_operand.vmem [shape: f32[1,1,128], index: 2, kind: input, shape index: {}]   ;;  %s1057_s3 = inlined_call_operand.vmem [shape: f32[1,1,128], index: 3, kind: input, shape index: {}]   ;;  %s1058_s4 = inlined_call_operand.vmem [shape: bf16[128,128], index: 4, kind: output, shape index: {}]  }
   0x1   :  { %v827_v0 = vld [vmem:[%s1054_s1 + $0x40] sm:$0xff]   ;;  %v829_v2 = vld [vmem:[%s1054_s1 + $0x48] sm:$0xff]   ;;  %v831_v4 = vld [vmem:[%s1054_s1 + $0x50] sm:$0xff]  }
   0x2   :  { %v828_v1 = vld [vmem:[%s1054_s1] sm:$0xff]   ;;  %747 = vmatprep.subr.bf16.mxu0 %v827_v0  ;;  %811 = vmatprep.subr.bf16.mxu1 %v827_v0  ;;  %v830_v3 = vld [vmem:[%s1054_s1 + $0x8] sm:$0xff]   ;;  %v832_v5 = vld [vmem:[%s1054_s1 + $0x10] sm:$0xff]  }
   0x3   :  { %748 = vmatpush3.bf16.msra.mxu0 %v828_v1  ;;  %819 = vmatpush3.bf16.msra.mxu1 %v828_v1  ;;  %v833_v6 = vld [vmem:[%s1054_s1 + $0x58] sm:$0xff]   ;;  %v835_v8 = vld [vmem:[%s1054_s1 + $0x60] sm:$0xff]   ;;  %v837_v10 = vld [vmem:[%s1054_s1 + $0x68] sm:$0xff]  }
   0x4   :  { %749 = vmatprep.subr.bf16.mxu0 %v829_v2  ;;  %812 = vmatprep.subr.bf16.mxu1 %v829_v2  ;;  %v834_v7 = vld [vmem:[%s1054_s1 + $0x18] sm:$0xff]   ;;  %v836_v9 = vld [vmem:[%s1054_s1 + $0x20] sm:$0xff]   ;;  %v838_v13 = vld [vmem:[%s1054_s1 + $0x28] sm:$0xff]  }
   0x5   :  { %v845_v11 = vld [vmem:[%s1055_s0 + $0x4] ss:$8 sps:$4 sm:$0xff]   ;;  %v839_v14 = vld [vmem:[%s1054_s1 + $0x70] sm:$0xff]   ;;  %v841_v16 = vld [vmem:[%s1054_s1 + $0x78] sm:$0xff]  }
   0x6   :  { %v848_v12 = vld [vmem:[%s1055_s0 + $0x44] ss:$8 sps:$4 sm:$0xff]   ;;  %307 = vmatprep.mubr.bf16.mxu0 %v845_v11  ;;  %v840_v15 = vld [vmem:[%s1054_s1 + $0x30] sm:$0xff]   ;;  %v842_v17 = vld [vmem:[%s1054_s1 + $0x38] sm:$0xff]  }
   0x7   :  { %750 = vmatpush3.bf16.msra.mxu0 %v830_v3  ;;  %820 = vmatpush3.bf16.msra.mxu1 %v830_v3  ;;  %v843_v18 = vld [vmem:[%s1055_s0] ss:$8 sps:$4 sm:$0xff]   ;;  %v849_v20 = vld [vmem:[%s1055_s0 + $0x14] ss:$8 sps:$4 sm:$0xff]   ;;  %v853_v22 = vld [vmem:[%s1055_s0 + $0x10] ss:$8 sps:$4 sm:$0xff]  }
   0x8   :  { %751 = vmatprep.subr.bf16.mxu0 %v831_v4  ;;  %813 = vmatprep.subr.bf16.mxu1 %v831_v4  ;;  %v846_v19 = vld [vmem:[%s1055_s0 + $0x40] ss:$8 sps:$4 sm:$0xff]   ;;  %v851_v21 = vld [vmem:[%s1055_s0 + $0x54] ss:$8 sps:$4 sm:$0xff]   ;;  %v854_v23 = vld [vmem:[%s1055_s0 + $0x50] ss:$8 sps:$4 sm:$0xff]  }
   0x9   :  { %339 = vmatprep.mubr.bf16.mxu1 %v848_v12  ;;  %v855_v24 = vld [vmem:[%s1055_s0 + $0x24] ss:$8 sps:$4 sm:$0xff]   ;;  %v859_v26 = vld [vmem:[%s1055_s0 + $0x20] ss:$8 sps:$4 sm:$0xff]   ;;  %v861_v28 = vld [vmem:[%s1055_s0 + $0x34] ss:$8 sps:$4 sm:$0xff]  }
   0xa   :  { %v857_v25 = vld [vmem:[%s1055_s0 + $0x64] ss:$8 sps:$4 sm:$0xff]   ;;  %v860_v27 = vld [vmem:[%s1055_s0 + $0x60] ss:$8 sps:$4 sm:$0xff]   ;;  %v863_v29 = vld [vmem:[%s1055_s0 + $0x74] ss:$8 sps:$4 sm:$0xff]  }
   0xb   :  { %752 = vmatpush3.bf16.msra.mxu0 %v832_v5  ;;  %821 = vmatpush3.bf16.msra.mxu1 %v832_v5  ;;  %v865_v30 = vld [vmem:[%s1055_s0 + $0x30] ss:$8 sps:$4 sm:$0xff]   ;;  %v991_v35 = vld [vmem:[%s1056_s2] ss:$0 sm:$0xff] }
   0xc   :  { %753 = vmatprep.subr.bf16.mxu0 %v833_v6  ;;  %814 = vmatprep.subr.bf16.mxu1 %v833_v6  ;;  %v866_v31 = vld [vmem:[%s1055_s0 + $0x70] ss:$8 sps:$4 sm:$0xff]   ;;  %v996_v41 = vld [vmem:[%s1057_s3] ss:$0 sm:$0xff] }
   0xf   :  { %754 = vmatpush3.bf16.msra.mxu0 %v834_v7  ;;  %822 = vmatpush3.bf16.msra.mxu1 %v834_v7 }
  0x10   :  { %755 = vmatprep.subr.bf16.mxu0 %v835_v8  ;;  %815 = vmatprep.subr.bf16.mxu1 %v835_v8 }
  0x13   :  { %756 = vmatpush3.bf16.msra.mxu0 %v836_v9  ;;  %823 = vmatpush3.bf16.msra.mxu1 %v836_v9 }
  0x14   :  { %757 = vmatprep.subr.bf16.mxu0 %v837_v10  ;;  %816 = vmatprep.subr.bf16.mxu1 %v837_v10 }
  0x17   :  { %758 = vmatpush3.bf16.msra.mxu0 %v838_v13  ;;  %824 = vmatpush3.bf16.msra.mxu1 %v838_v13 }
  0x18   :  { %759 = vmatprep.subr.bf16.mxu0 %v839_v14  ;;  %817 = vmatprep.subr.bf16.mxu1 %v839_v14 }
  0x1b   :  { %760 = vmatpush3.bf16.msra.mxu0 %v840_v15  ;;  %825 = vmatpush3.bf16.msra.mxu1 %v840_v15 }
  0x1c   :  { %761 = vmatprep.subr.bf16.mxu0 %v841_v16  ;;  %818 = vmatprep.subr.bf16.mxu1 %v841_v16 }
  0x1f   :  { %762 = vmatpush3.bf16.msra.mxu0 %v842_v17  ;;  %826 = vmatpush3.bf16.msra.mxu1 %v842_v17 }
  0x22   :  { %308 = vmatmul.mubr.bf16.vlgmr.msra.gmra.mrb[0].mxu0 %v843_v18  ;;  %340 = vmatmul.mubr.bf16.vlgmr.msra.gmra.mrb[0].mxu1 %v846_v19 }
  0x23   :  { %315 = vmatprep.mubr.bf16.mxu0 %v849_v20  ;;  %347 = vmatprep.mubr.bf16.mxu1 %v851_v21 }
  0x2a   :  { %316 = vmatmul.mubr.bf16.gmra.mrb[4].mxu0 %v853_v22  ;;  %348 = vmatmul.mubr.bf16.gmra.mrb[4].mxu1 %v854_v23 }
  0x2b   :  { %323 = vmatprep.mubr.bf16.mxu0 %v855_v24  ;;  %355 = vmatprep.mubr.bf16.mxu1 %v857_v25 }
  0x32   :  { %324 = vmatmul.mubr.bf16.gmra.mrb[8].mxu0 %v859_v26  ;;  %356 = vmatmul.mubr.bf16.gmra.mrb[8].mxu1 %v860_v27 }
  0x33   :  { %331 = vmatprep.mubr.bf16.mxu0 %v861_v28  ;;  %363 = vmatprep.mubr.bf16.mxu1 %v863_v29 }
  0x3a   :  { %332 = vmatmul.mubr.bf16.gmra.mrb[12].mxu0 %v865_v30  ;;  %364 = vmatmul.mubr.bf16.gmra.mrb[12].mxu1 %v866_v31 }
  0xf5   :  { %v763_v32 = vpop.f32.mrb[0].mxu0  ;;  %v787_v33 = vpop.f32.mrb[0].mxu1 }
  0xf6   :  { %v764_v34 = vpop.f32.mrb[1].mxu0  ;;  %v788_v36 = vpop.f32.mrb[1].mxu1 }
  0xf7   :  { %v765_v37 = vadd.f32 %v764_v34, %v763_v32  ;;  %v789_v38 = vadd.f32 %v788_v36, %v787_v33  ;;  %v766_v39 = vpop.f32.mrb[2].mxu0  ;;  %v790_v40 = vpop.f32.mrb[2].mxu1 }
  0xf8   :  { %v767_v42 = vpop.f32.mrb[3].mxu0  ;;  %v791_v43 = vpop.f32.mrb[3].mxu1 }
  0xf9   :  { %v470_v44 = vmul.f32 %v765_v37, %v991_v35  ;;  %v478_v45 = vmul.f32 %v789_v38, %v991_v35  ;;  %v768_v46 = vadd.f32 %v767_v42, %v766_v39  ;;  %v792_v47 = vadd.f32 %v791_v43, %v790_v40 }
  0xfb   :  { %v493_v48 = vadd.f32 %v996_v41, %v470_v44  ;;  %v501_v49 = vadd.f32 %v996_v41, %v478_v45  ;;  %v471_v50 = vmul.f32 %v768_v46, %v991_v35  ;;  %v479_v51 = vmul.f32 %v792_v47, %v991_v35 }
  0xfd   :  { %v494_v52 = vadd.f32 %v996_v41, %v471_v50  ;;  %v502_v53 = vadd.f32 %v996_v41, %v479_v51  ;;  %v769_v54 = vpop.f32.mrb[4].mxu0  ;;  %v793_v55 = vpop.f32.mrb[4].mxu1  ;;  %v509_v56 = vmax.f32 %v493_v48, 0.0  ;;  %v517_v57 = vmax.f32 %v501_v49, 0.0 }
  0xfe   :  { %v770_v58 = vpop.f32.mrb[5].mxu0  ;;  %v794_v59 = vpop.f32.mrb[5].mxu1 }
  0xff   :  { %v510_v60 = vmax.f32 %v494_v52, 0.0  ;;  %v518_v61 = vmax.f32 %v502_v53, 0.0  ;;  %v771_v62 = vadd.f32 %v770_v58, %v769_v54  ;;  %v795_v63 = vadd.f32 %v794_v59, %v793_v55  ;;  %v772_v0 = vpop.f32.mrb[6].mxu0  ;;  %v796_v1 = vpop.f32.mrb[6].mxu1 }
 0x100   :  { %v773_v2 = vpop.f32.mrb[7].mxu0  ;;  %v797_v3 = vpop.f32.mrb[7].mxu1 }
 0x101   :  { %v703_v4 = vpack.c.bf16 %v510_v60, %v509_v56  ;;  %v723_v5 = vpack.c.bf16 %v518_v61, %v517_v57  ;;  %v472_v6 = vmul.f32 %v771_v62, %v991_v35  ;;  %v480_v7 = vmul.f32 %v795_v63, %v991_v35 }
 0x102   :  { %v774_v8 = vadd.f32 %v773_v2, %v772_v0  ;;  %v798_v9 = vadd.f32 %v797_v3, %v796_v1 }
 0x103   :  { %704 = vst [vmem:[%s1058_s4] sm:$0xff] %v703_v4   ;;  %743 = vst [vmem:[%s1058_s4 + $0x20] sm:$0xff] %v723_v5   ;;  %v495_v10 = vadd.f32 %v996_v41, %v472_v6  ;;  %v503_v11 = vadd.f32 %v996_v41, %v480_v7 }
 0x104   :  { %v473_v12 = vmul.f32 %v774_v8, %v991_v35  ;;  %v481_v13 = vmul.f32 %v798_v9, %v991_v35 }
 0x105   :  { %v775_v14 = vpop.f32.mrb[8].mxu0  ;;  %v799_v15 = vpop.f32.mrb[8].mxu1  ;;  %v511_v24 = vmax.f32 %v495_v10, 0.0  ;;  %v519_v25 = vmax.f32 %v503_v11, 0.0 }
 0x106   :  { %v496_v16 = vadd.f32 %v996_v41, %v473_v12  ;;  %v504_v17 = vadd.f32 %v996_v41, %v481_v13  ;;  %v776_v18 = vpop.f32.mrb[9].mxu0  ;;  %v800_v19 = vpop.f32.mrb[9].mxu1 }
 0x107   :  { %v777_v20 = vadd.f32 %v776_v18, %v775_v14  ;;  %v801_v21 = vadd.f32 %v800_v19, %v799_v15  ;;  %v778_v22 = vpop.f32.mrb[10].mxu0  ;;  %v802_v23 = vpop.f32.mrb[10].mxu1 }
 0x108   :  { %v512_v26 = vmax.f32 %v496_v16, 0.0  ;;  %v520_v27 = vmax.f32 %v504_v17, 0.0  ;;  %v779_v28 = vpop.f32.mrb[11].mxu0  ;;  %v803_v29 = vpop.f32.mrb[11].mxu1 }
 0x109   :  { %v474_v30 = vmul.f32 %v777_v20, %v991_v35  ;;  %v482_v31 = vmul.f32 %v801_v21, %v991_v35  ;;  %v780_v32 = vadd.f32 %v779_v28, %v778_v22  ;;  %v804_v33 = vadd.f32 %v803_v29, %v802_v23 }
 0x10a   :  { %v708_v34 = vpack.c.bf16 %v512_v26, %v511_v24  ;;  %v728_v36 = vpack.c.bf16 %v520_v27, %v519_v25 }
 0x10b   :  { %v497_v37 = vadd.f32 %v996_v41, %v474_v30  ;;  %v505_v38 = vadd.f32 %v996_v41, %v482_v31  ;;  %v475_v39 = vmul.f32 %v780_v32, %v991_v35  ;;  %v483_v40 = vmul.f32 %v804_v33, %v991_v35 }
 0x10c   :  { %740 = vst [vmem:[%s1058_s4 + $0x8] sm:$0xff] %v708_v34   ;;  %744 = vst [vmem:[%s1058_s4 + $0x28] sm:$0xff] %v728_v36  }
 0x10d   :  { %v498_v42 = vadd.f32 %v996_v41, %v475_v39  ;;  %v506_v43 = vadd.f32 %v996_v41, %v483_v40  ;;  %v781_v44 = vpop.f32.mrb[12].mxu0  ;;  %v805_v45 = vpop.f32.mrb[12].mxu1  ;;  %v513_v46 = vmax.f32 %v497_v37, 0.0  ;;  %v521_v47 = vmax.f32 %v505_v38, 0.0 }
 0x10e   :  { %v782_v48 = vpop.f32.mrb[13].mxu0  ;;  %v806_v49 = vpop.f32.mrb[13].mxu1 }
 0x10f   :  { %v514_v50 = vmax.f32 %v498_v42, 0.0  ;;  %v522_v51 = vmax.f32 %v506_v43, 0.0  ;;  %v783_v52 = vadd.f32 %v782_v48, %v781_v44  ;;  %v807_v53 = vadd.f32 %v806_v49, %v805_v45  ;;  %v784_v54 = vpop.f32.mrb[14].mxu0  ;;  %v808_v55 = vpop.f32.mrb[14].mxu1 }
 0x110   :  { %v785_v56 = vpop.f32.mrb[15].mxu0  ;;  %v809_v57 = vpop.f32.mrb[15].mxu1 }
 0x111   :  { %v713_v58 = vpack.c.bf16 %v514_v50, %v513_v46  ;;  %v733_v59 = vpack.c.bf16 %v522_v51, %v521_v47  ;;  %v476_v60 = vmul.f32 %v783_v52, %v991_v35  ;;  %v484_v61 = vmul.f32 %v807_v53, %v991_v35 }
 0x112   :  { %v786_v62 = vadd.f32 %v785_v56, %v784_v54  ;;  %v810_v63 = vadd.f32 %v809_v57, %v808_v55 }
 0x113   :  { %741 = vst [vmem:[%s1058_s4 + $0x10] sm:$0xff] %v713_v58   ;;  %745 = vst [vmem:[%s1058_s4 + $0x30] sm:$0xff] %v733_v59   ;;  %v499_v0 = vadd.f32 %v996_v41, %v476_v60  ;;  %v507_v1 = vadd.f32 %v996_v41, %v484_v61 }
 0x114   :  { %v477_v2 = vmul.f32 %v786_v62, %v991_v35  ;;  %v485_v3 = vmul.f32 %v810_v63, %v991_v35 }
 0x115   :  { %v515_v6 = vmax.f32 %v499_v0, 0.0  ;;  %v523_v7 = vmax.f32 %v507_v1, 0.0 }
 0x116   :  { %v500_v4 = vadd.f32 %v996_v41, %v477_v2  ;;  %v508_v5 = vadd.f32 %v996_v41, %v485_v3 }
 0x118   :  { %v516_v8 = vmax.f32 %v500_v4, 0.0  ;;  %v524_v9 = vmax.f32 %v508_v5, 0.0 }
 0x11a   :  { %v718_v10 = vpack.c.bf16 %v516_v8, %v515_v6  ;;  %v738_v11 = vpack.c.bf16 %v524_v9, %v523_v7 }
 0x11c   :  { %742 = vst [vmem:[%s1058_s4 + $0x18] sm:$0xff] %v718_v10   ;;  %746 = vst [vmem:[%s1058_s4 + $0x38] sm:$0xff] %v738_v11  }

// kernel: _lambda_.25
= control target key start
LH: loop header
LB: loop body
LE: loop exit
PB: predicated region body
PF: predicated region fallthrough
CT: control target
= control target key end

     0   :  { %s797_s1 = inlined_call_operand.vmem [shape: bf16[1,128,128], index: 1, kind: input, shape index: {}]   ;;  %s798_s0 = inlined_call_operand.vmem [shape: bf16[128,128], index: 0, kind: input, shape index: {}]   ;;  %s799_s2 = inlined_call_operand.vmem [shape: f32[1,1,128], index: 2, kind: input, shape index: {}]   ;;  %s800_s3 = inlined_call_operand.vmem [shape: f32[1,1,128], index: 3, kind: input, shape index: {}]   ;;  %s801_s4 = inlined_call_operand.vmem [shape: bf16[128,128], index: 4, kind: output, shape index: {}]  }
   0x1   :  { %v678_v0 = vld [vmem:[%s797_s1] sm:$0xff]   ;;  %v679_v1 = vld [vmem:[%s797_s1 + $0x8] sm:$0xff]   ;;  %v680_v2 = vld [vmem:[%s797_s1 + $0x10] sm:$0xff]  }
   0x2   :  { %630 = vmatprep.subr.bf16.mxu0 %v678_v0  ;;  %662 = vmatprep.subr.bf16.mxu1 %v678_v0  ;;  %v681_v3 = vld [vmem:[%s797_s1 + $0x18] sm:$0xff]   ;;  %v686_v4 = vld [vmem:[%s798_s0] sm:$0xff]   ;;  %v683_v7 = vld [vmem:[%s797_s1 + $0x28] sm:$0xff]  }
   0x3   :  { %631 = vmatpush3.bf16.msra.mxu0 %v678_v0  ;;  %670 = vmatpush3.bf16.msra.mxu1 %v678_v0  ;;  %v687_v5 = vld [vmem:[%s798_s0 + $0x20] sm:$0xff]   ;;  %v684_v8 = vld [vmem:[%s797_s1 + $0x30] sm:$0xff]   ;;  %v685_v9 = vld [vmem:[%s797_s1 + $0x38] sm:$0xff]  }
   0x4   :  { %632 = vmatprep.subr.bf16.mxu0 %v679_v1  ;;  %663 = vmatprep.subr.bf16.mxu1 %v679_v1  ;;  %v682_v6 = vld [vmem:[%s797_s1 + $0x20] sm:$0xff]   ;;  %v688_v10 = vld [vmem:[%s798_s0 + $0x8] sm:$0xff]   ;;  %v690_v12 = vld [vmem:[%s798_s0 + $0x10] sm:$0xff]  }
   0x5   :  { %646 = vmatprep.mubr.bf16.mxu0 %v686_v4  ;;  %654 = vmatprep.mubr.bf16.mxu1 %v687_v5  ;;  %v689_v11 = vld [vmem:[%s798_s0 + $0x28] sm:$0xff]   ;;  %v691_v13 = vld [vmem:[%s798_s0 + $0x30] sm:$0xff]   ;;  %v692_v14 = vld [vmem:[%s798_s0 + $0x18] sm:$0xff]  }
   0x6   :  { %v693_v15 = vld [vmem:[%s798_s0 + $0x38] sm:$0xff]   ;;  %v533_v16 = vld [vmem:[%s799_s2] ss:$0 sm:$0xff] }
   0x7   :  { %633 = vmatpush3.bf16.msra.mxu0 %v679_v1  ;;  %671 = vmatpush3.bf16.msra.mxu1 %v679_v1  ;;  %v534_v23 = vld [vmem:[%s800_s3] ss:$0 sm:$0xff] }
   0x8   :  { %634 = vmatprep.subr.bf16.mxu0 %v680_v2  ;;  %664 = vmatprep.subr.bf16.mxu1 %v680_v2 }
   0xb   :  { %635 = vmatpush3.bf16.msra.mxu0 %v680_v2  ;;  %672 = vmatpush3.bf16.msra.mxu1 %v680_v2 }
   0xc   :  { %636 = vmatprep.subr.bf16.mxu0 %v681_v3  ;;  %665 = vmatprep.subr.bf16.mxu1 %v681_v3 }
   0xf   :  { %637 = vmatpush3.bf16.msra.mxu0 %v681_v3  ;;  %673 = vmatpush3.bf16.msra.mxu1 %v681_v3 }
  0x10   :  { %638 = vmatprep.subr.bf16.mxu0 %v682_v6  ;;  %666 = vmatprep.subr.bf16.mxu1 %v682_v6 }
  0x13   :  { %639 = vmatpush3.bf16.msra.mxu0 %v682_v6  ;;  %674 = vmatpush3.bf16.msra.mxu1 %v682_v6 }
  0x14   :  { %640 = vmatprep.subr.bf16.mxu0 %v683_v7  ;;  %667 = vmatprep.subr.bf16.mxu1 %v683_v7 }
  0x17   :  { %641 = vmatpush3.bf16.msra.mxu0 %v683_v7  ;;  %675 = vmatpush3.bf16.msra.mxu1 %v683_v7 }
  0x18   :  { %642 = vmatprep.subr.bf16.mxu0 %v684_v8  ;;  %668 = vmatprep.subr.bf16.mxu1 %v684_v8 }
  0x1b   :  { %643 = vmatpush3.bf16.msra.mxu0 %v684_v8  ;;  %676 = vmatpush3.bf16.msra.mxu1 %v684_v8 }
  0x1c   :  { %644 = vmatprep.subr.bf16.mxu0 %v685_v9  ;;  %669 = vmatprep.subr.bf16.mxu1 %v685_v9 }
  0x1f   :  { %645 = vmatpush3.bf16.msra.mxu0 %v685_v9  ;;  %677 = vmatpush3.bf16.msra.mxu1 %v685_v9 }
  0x22   :  { %647 = vmatmul.mubr.bf16.vlgmr.msra.gmra.mrb[0].mxu0 %v688_v10  ;;  %655 = vmatmul.mubr.bf16.vlgmr.msra.gmra.mrb[0].mxu1 %v689_v11 }
  0x23   :  { %650 = vmatprep.mubr.bf16.mxu0 %v690_v12  ;;  %658 = vmatprep.mubr.bf16.mxu1 %v691_v13 }
  0x2a   :  { %651 = vmatmul.mubr.bf16.gmra.mrb[4].mxu0 %v692_v14  ;;  %659 = vmatmul.mubr.bf16.gmra.mrb[4].mxu1 %v693_v15 }
  0xf5   :  { %v648_v17 = vpop.f32.mrb[0].mxu0  ;;  %v656_v18 = vpop.f32.mrb[0].mxu1 }
  0xf6   :  { %v371_v19 = vmul.f32 %v648_v17, %v533_v16  ;;  %v379_v20 = vmul.f32 %v656_v18, %v533_v16  ;;  %v208_v21 = vpop.f32.mrb[1].mxu0  ;;  %v240_v22 = vpop.f32.mrb[1].mxu1 }
  0xf7   :  { %v369_v24 = vmul.f32 %v533_v16, %v208_v21  ;;  %v377_v25 = vmul.f32 %v533_v16, %v240_v22  ;;  %v649_v26 = vpop.f32.mrb[2].mxu0  ;;  %v657_v27 = vpop.f32.mrb[2].mxu1 }
  0xf8   :  { %v372_v28 = vmul.f32 %v649_v26, %v533_v16  ;;  %v380_v29 = vmul.f32 %v657_v27, %v533_v16  ;;  %v211_v30 = vpop.f32.mrb[3].mxu0  ;;  %v243_v31 = vpop.f32.mrb[3].mxu1  ;;  %v394_v34 = vadd.f32 %v534_v23, %v371_v19  ;;  %v402_v35 = vadd.f32 %v534_v23, %v379_v20 }
  0xf9   :  { %v370_v32 = vmul.f32 %v533_v16, %v211_v30  ;;  %v378_v33 = vmul.f32 %v533_v16, %v243_v31  ;;  %v392_v38 = vadd.f32 %v534_v23, %v369_v24  ;;  %v400_v39 = vadd.f32 %v534_v23, %v377_v25 }
  0xfa   :  { %v395_v36 = vadd.f32 %v534_v23, %v372_v28  ;;  %v403_v37 = vadd.f32 %v534_v23, %v380_v29 }
  0xfb   :  { %v393_v40 = vadd.f32 %v534_v23, %v370_v32  ;;  %v401_v41 = vadd.f32 %v534_v23, %v378_v33 }
  0xfc   :  { %v575_v42 = vpack.c.bf16 %v395_v36, %v394_v34  ;;  %v595_v43 = vpack.c.bf16 %v403_v37, %v402_v35 }
  0xfd   :  { %v570_v44 = vpack.c.bf16 %v393_v40, %v392_v38  ;;  %v590_v45 = vpack.c.bf16 %v401_v41, %v400_v39  ;;  %v652_v46 = vpop.f32.mrb[4].mxu0  ;;  %v660_v47 = vpop.f32.mrb[4].mxu1 }
  0xfe   :  { %607 = vst [vmem:[%s801_s4 + $0x8] sm:$0xff] %v575_v42   ;;  %611 = vst [vmem:[%s801_s4 + $0x28] sm:$0xff] %v595_v43   ;;  %v375_v48 = vmul.f32 %v652_v46, %v533_v16  ;;  %v383_v49 = vmul.f32 %v660_v47, %v533_v16  ;;  %v224_v50 = vpop.f32.mrb[5].mxu0  ;;  %v256_v51 = vpop.f32.mrb[5].mxu1 }
  0xff   :  { %571 = vst [vmem:[%s801_s4] sm:$0xff] %v570_v44   ;;  %610 = vst [vmem:[%s801_s4 + $0x20] sm:$0xff] %v590_v45   ;;  %v373_v52 = vmul.f32 %v533_v16, %v224_v50  ;;  %v381_v53 = vmul.f32 %v533_v16, %v256_v51  ;;  %v653_v54 = vpop.f32.mrb[6].mxu0  ;;  %v661_v55 = vpop.f32.mrb[6].mxu1 }
 0x100   :  { %v376_v56 = vmul.f32 %v653_v54, %v533_v16  ;;  %v384_v57 = vmul.f32 %v661_v55, %v533_v16  ;;  %v227_v58 = vpop.f32.mrb[7].mxu0  ;;  %v259_v59 = vpop.f32.mrb[7].mxu1  ;;  %v398_v62 = vadd.f32 %v534_v23, %v375_v48  ;;  %v406_v63 = vadd.f32 %v534_v23, %v383_v49 }
 0x101   :  { %v374_v60 = vmul.f32 %v533_v16, %v227_v58  ;;  %v382_v61 = vmul.f32 %v533_v16, %v259_v59  ;;  %v396_v2 = vadd.f32 %v534_v23, %v373_v52  ;;  %v404_v3 = vadd.f32 %v534_v23, %v381_v53 }
 0x102   :  { %v399_v0 = vadd.f32 %v534_v23, %v376_v56  ;;  %v407_v1 = vadd.f32 %v534_v23, %v384_v57 }
 0x103   :  { %v397_v4 = vadd.f32 %v534_v23, %v374_v60  ;;  %v405_v5 = vadd.f32 %v534_v23, %v382_v61 }
 0x104   :  { %v585_v6 = vpack.c.bf16 %v399_v0, %v398_v62  ;;  %v605_v7 = vpack.c.bf16 %v407_v1, %v406_v63 }
 0x105   :  { %v580_v8 = vpack.c.bf16 %v397_v4, %v396_v2  ;;  %v600_v9 = vpack.c.bf16 %v405_v5, %v404_v3 }
 0x106   :  { %609 = vst [vmem:[%s801_s4 + $0x18] sm:$0xff] %v585_v6   ;;  %613 = vst [vmem:[%s801_s4 + $0x38] sm:$0xff] %v605_v7  }
 0x107   :  { %608 = vst [vmem:[%s801_s4 + $0x10] sm:$0xff] %v580_v8   ;;  %612 = vst [vmem:[%s801_s4 + $0x30] sm:$0xff] %v600_v9  }

// kernel: _lambda_.26
= control target key start
LH: loop header
LB: loop body
LE: loop exit
PB: predicated region body
PF: predicated region fallthrough
CT: control target
= control target key end

     0   :  { %s776_s18 = smov 0   ;;  %s778_s19 = smov 0   ;;  %s904_s0 = inlined_call_operand.vmem [shape: bf16[2,64,32], index: 0, kind: input, shape index: {}]   ;;  %s905_s1 = inlined_call_operand.vmem [shape: f32[32,128], index: 1, kind: input, shape index: {}]   ;;  %s906_s2 = inlined_call_operand.vmem [shape: f32[1,128], index: 2, kind: input, shape index: {}]   ;;  %s907_s3 = inlined_call_operand.vmem [shape: f32[128,32], index: 3, kind: input, shape index: {}]   ;;  %s908_s4 = inlined_call_operand.vmem [shape: f32[1,32], index: 4, kind: input, shape index: {}]   ;;  %s909_s5 = inlined_call_operand.vmem [shape: f32[2,1,32], index: 5, kind: output, shape index: {}]  }
   0x1   :  { %s780_s20 = smov 0  }
   0x2 LB: > { %s27_s21 = sadd.s32 1, %s737_s19  ;;  %p561_p0 = scmp.ge.s32.totalorder %s741_s20, 1  ;;  %s741_s20 = sphi %s780_s20, %s15_s20   ;;  %s737_s19 = sphi %s778_s19, %s911_s19   ;;  %s733_s18 = sphi %s776_s18, %s910_s18  }
   0x3   : > { %p29_p1 = scmp.ge.s32.totalorder %s27_s21, 2  ;;  %p206_p2 = scmp.lt.s32.totalorder %s741_s20, 3 }
   0x5   : > { %s913_s21 = smov (%p29_p1, %s27_s21), 0  ;;  %p207_p3 = pnand %p561_p0, %p206_p2 }
   0x6   : > { %v311_v0 = vld [vmem:[%s905_s1] sm:$0xff] (!%p207_p3)  ;;  %v312_v1 = vld [vmem:[%s905_s1 + $0x8] sm:$0xff] (!%p207_p3)  ;;  %v313_v2 = vld [vmem:[%s905_s1 + $0x10] sm:$0xff] (!%p207_p3)  ;;  %v743_v3 = vmov (!%p207_p3), 0.0|0.0   ;;  %vm744_vm0 = vmmov (!%p207_p3), 0   ;;  %v745_v6 = vmov (!%p207_p3), 0.0   ;;  %v307_v62 = vlaneseq (!%p207_p3) }
   0x7   : > { %210 = sbr.rel (%p207_p3) target bundleno = 516 (0x204), region = 40  ;;  %658 = vmatprep.subr.bf16.mxu0 (!%p207_p3), %v743_v3  ;;  %v659_v4 = vpack.c.bf16 (!%p207_p3), %v312_v1, %v311_v0  ;;  %v314_v5 = vld [vmem:[%s905_s1 + $0x18] sm:$0xff] (!%p207_p3)  ;;  %620 = vmatprep.mubr.msk.f32.mxu0 (!%p207_p3), %vm744_vm0, %v745_v6  ;;  %p237_p4 = scmp.lt.s32.totalorder (!%p207_p3), %s733_s18, 1  ;;  %v395_v7 = vld [vmem:[%s907_s3] sm:$0xff] (!%p207_p3)  ;;  %v396_v8 = vld [vmem:[%s907_s3 + $0x8] sm:$0xff] (!%p207_p3)  ;;  %vm265_vm1 = vcmask (!%p207_p3), 261120  }
   0x8   : > { %664 = vmatprep.subr.bf16.mxu1 (!%p207_p3), %v743_v3  ;;  %v665_v9 = vpack.c.bf16 (!%p207_p3), %v396_v8, %v395_v7  ;;  %v397_v10 = vld [vmem:[%s907_s3 + $0x10] sm:$0xff] (!%p207_p3)  ;;  %v398_v11 = vld [vmem:[%s907_s3 + $0x18] sm:$0xff] (!%p207_p3)  ;;  %655 = vmatprep.mubr.msk.f32.mxu1 (!%p207_p3), %vm744_vm0, %v745_v6  ;;  %v662_v12 = vpack.c.bf16 (!%p207_p3), %v314_v5, %v313_v2  ;;  %v399_v14 = vld [vmem:[%s907_s3 + $0x20] sm:$0xff] (!%p207_p3)  ;;  %vm291_vm2 = vcmask (!%p207_p3), 253952   ;;  %v308_v63 = vshrl.u32 (!%p207_p3), %v307_v62, 7 }
   0x9   : > { %660 = vmatpush3.bf16.msra.mxu0 (!%p207_p3), %v659_v4  ;;  %v668_v13 = vpack.c.bf16 (!%p207_p3), %v398_v11, %v397_v10  ;;  %v400_v15 = vld [vmem:[%s907_s3 + $0x28] sm:$0xff] (!%p207_p3)  ;;  %v401_v24 = vld [vmem:[%s907_s3 + $0x30] sm:$0xff] (!%p207_p3)  ;;  %v402_v25 = vld [vmem:[%s907_s3 + $0x38] sm:$0xff] (!%p207_p3) }
   0xa   : > { %661 = vmatprep.subr.bf16.mxu0 (!%p207_p3), %v743_v3  ;;  %666 = vmatpush3.bf16.msra.mxu1 (!%p207_p3), %v665_v9  ;;  %v671_v19 = vpack.c.bf16 (!%p207_p3), %v400_v15, %v399_v14  ;;  %v674_v34 = vpack.c.bf16 (!%p207_p3), %v402_v25, %v401_v24  ;;  %v403_v36 = vld [vmem:[%s907_s3 + $0x40] sm:$0xff] (!%p207_p3)  ;;  %v404_v37 = vld [vmem:[%s907_s3 + $0x48] sm:$0xff] (!%p207_p3)  ;;  %v405_v45 = vld [vmem:[%s907_s3 + $0x50] sm:$0xff] (!%p207_p3)  ;;  %v309_v0 = vsub.s32 (!%p207_p3), 0, %v308_v63 }
   0xb   : > { %667 = vmatprep.subr.bf16.mxu1 (!%p207_p3), %v743_v3  ;;  %v677_v43 = vpack.c.bf16 (!%p207_p3), %v404_v37, %v403_v36  ;;  %v406_v46 = vld [vmem:[%s907_s3 + $0x58] sm:$0xff] (!%p207_p3)  ;;  %v407_v52 = vld [vmem:[%s907_s3 + $0x60] sm:$0xff] (!%p207_p3)  ;;  %v408_v53 = vld [vmem:[%s907_s3 + $0x68] sm:$0xff] (!%p207_p3) }
   0xc   : > { %v680_v50 = vpack.c.bf16 (!%p207_p3), %v406_v46, %v405_v45  ;;  %v683_v55 = vpack.c.bf16 (!%p207_p3), %v408_v53, %v407_v52  ;;  %v409_v5 = vld [vmem:[%s907_s3 + $0x70] sm:$0xff] (!%p207_p3)  ;;  %v564_v7 = vld [vmem:[%s906_s2] ss:$0 sm:$0xff] (!%p207_p3) }
   0xd   : > { %663 = vmatpush3.bf16.msra.mxu0 (!%p207_p3), %v662_v12  ;;  %v566_v12 = vld [vmem:[%s908_s4] ss:$0 sm:$0xff] (!%p207_p3) }
   0xe   : > { %s915_s18 = smov (!%p237_p4, %s733_s18), 1  ;;  %669 = vmatpush3.bf16.msra.mxu1 %v668_v13 }
   0xf   : > { %s570_s17 = sshll.u32 %s915_s18, 5  ;;  %670 = vmatprep.subr.bf16.mxu1 %v743_v3  ;;  %s248_s30 = scalar_lea.vmem %s909_s5, %s915_s18 }
  0x10   : > { %s244_s24 = scalar_lea.vmem %s904_s0, %s570_s17 }
  0x11   : > { %v572_v16 = vld [vmem:[%s244_s24] sm:$0xff]   ;;  %v587_v17 = vld [vmem:[%s244_s24 + $0x8] sm:$0xff]   ;;  %v588_v18 = vld [vmem:[%s244_s24 + $0x10] sm:$0xff]  }
  0x12   : > { %v573_v20 = vunpack.c.l.bf16 %v572_v16  ;;  %v574_v21 = vunpack.c.h.bf16 %v572_v16  ;;  %v577_v22 = vunpack.c.l.bf16 %v587_v17  ;;  %v578_v23 = vunpack.c.h.bf16 %v587_v17  ;;  %v589_v30 = vld [vmem:[%s244_s24 + $0x18] sm:$0xff]   ;;  %672 = vmatpush3.bf16.msra.mxu1 %v671_v19 }
  0x13   : > { %v581_v26 = vunpack.c.l.bf16 %v588_v18  ;;  %v582_v32 = vunpack.c.h.bf16 %v588_v18  ;;  %673 = vmatprep.subr.bf16.mxu1 %v743_v3  ;;  %v585_v38 = vunpack.c.l.bf16 %v589_v30  ;;  %v586_v41 = vunpack.c.h.bf16 %v589_v30 }
  0x14   : > { %v266_v27 = vsel %vm265_vm1, %v573_v20, 0.0  ;;  %v267_v28 = vsel %vm265_vm1, %v574_v21, 0.0  ;;  %v269_v29 = vsel %vm265_vm1, %v577_v22, 0.0  ;;  %v271_v33 = vsel %vm265_vm1, %v578_v23, 0.0 }
  0x15   : > { %v268_v31 = vadd.f32 %v267_v28, %v266_v27  ;;  %v273_v39 = vsel %vm265_vm1, %v581_v26, 0.0  ;;  %v275_v42 = vsel %vm265_vm1, %v582_v32, 0.0  ;;  %v277_v47 = vsel %vm265_vm1, %v585_v38, 0.0 }
  0x16   : > { %675 = vmatpush3.bf16.msra.mxu1 %v674_v34  ;;  %v279_v49 = vsel %vm265_vm1, %v586_v41, 0.0 }
  0x17   : > { %v270_v35 = vadd.f32 %v269_v29, %v268_v31  ;;  %676 = vmatprep.subr.bf16.mxu1 %v743_v3 }
  0x19   : > { %v272_v40 = vadd.f32 %v271_v33, %v270_v35 }
  0x1a   : > { %678 = vmatpush3.bf16.msra.mxu1 %v677_v43 }
  0x1b   : > { %v274_v44 = vadd.f32 %v273_v39, %v272_v40  ;;  %679 = vmatprep.subr.bf16.mxu1 %v743_v3 }
  0x1d   : > { %v276_v48 = vadd.f32 %v275_v42, %v274_v44 }
  0x1e   : > { %681 = vmatpush3.bf16.msra.mxu1 %v680_v50 }
  0x1f   : > { %v278_v51 = vadd.f32 %v277_v47, %v276_v48  ;;  %682 = vmatprep.subr.bf16.mxu1 %v743_v3 }
  0x21   : > { %v280_v54 = vadd.f32 %v279_v49, %v278_v51 }
  0x22   : > { %684 = vmatpush3.bf16.msra.mxu1 %v683_v55 }
  0x23   : > { %v281_v56 = vrot.slane %v280_v54, 4  ;;  %685 = vmatprep.subr.bf16.mxu1 %v743_v3  ;;  %v410_v3 = vld [vmem:[%s907_s3 + $0x78] sm:$0xff] }
  0x24   : > { %v686_v6 = vpack.c.bf16 %v410_v3, %v409_v5 }
  0x25   : > { %v282_v57 = vadd.f32 %v281_v56, %v280_v54 }
  0x26   : > { %687 = vmatpush3.bf16.msra.mxu1 %v686_v6 }
  0x27   : > { %v283_v58 = vrot.slane %v282_v57, 2 }
  0x29   : > { %v284_v59 = vadd.f32 %v283_v58, %v282_v57 }
  0x2b   : > { %v285_v60 = vrot.slane %v284_v59, 1 }
  0x2d   : > { %v286_v61 = vadd.f32 %v285_v60, %v284_v59 }
  0x2f   : > { %292 = vst.msk [vmem:[#allocation2] sm:$0x1] %vm291_vm2, %v286_v61 }
  0x36   : > { %v304_v1 = vld [vmem:[#allocation2] sm:$0x1] }
  0x37   : > { %v305_v2 = vmul.f32 0.015625, %v304_v1 }
  0x39   : > { %v310_v4 = vrot.slane %v305_v2, %v309_v0 }
  0x3b   : > { %621 = vmatmul.mubr.msk.f32.vlgmr.msra.gmra.mrb[0].mxu0 %vm265_vm1, %v310_v4 }
 0x10e   : > { %v390_v8 = vpop.f32.mrb[0].mxu0 }
 0x10f   : > { %v391_v9 = vadd.f32 %v564_v7, %v390_v8  ;;  %v622_v10 = vpop.f32.mrb[1].mxu0 }
 0x111   : > { %v394_v11 = vmax.f32 %v391_v9, 0.0 }
 0x113   : > { %656 = vmatmul.mubr.f32.vlgmr.msra.gmra.mrb[0].mxu1 %v394_v11 }
 0x1e6   : > { %v484_v13 = vpop.f32.mrb[0].mxu1 }
 0x1e7   : > { %v485_v14 = vadd.f32 %v566_v12, %v484_v13  ;;  %v657_v15 = vpop.f32.mrb[1].mxu1 }
 0x1e9   : > { %v567_v16 = vmul.f32 -1.442695, %v485_v14 }
 0x1eb   : > { %715 = vpow2.f32 %v567_v16 }
 0x1f5   : > { %v716_v17 = vpop.eup %715 }
 0x1f6   : > { %v491_v18 = vadd.f32 1.0, %v716_v17 }
 0x1f8   : > { %717 = vrcp.f32 %v491_v18 }
 0x202   : > { %v718_v19 = vpop.eup %717 }
 0x203   : > { %495 = vst.msk [vmem:[%s248_s30] sm:$0x1] %vm291_vm2, %v718_v19 }
 0x204 PF: > { %s15_s20 = sadd.s32 1, %s741_s20   ;;  %s910_s18 = smov %s737_s19 }
 0x205   : > { %p12_p5 = scmp.ge.s32.totalorder %s15_s20, 4   ;;  %s911_s19 = smov %s913_s21 }
 0x207   :  { %14 = sbr.rel (!%p12_p5) target bundleno = 2 (0x2), region = 82 }

// kernel: _lambda_.27
= control target key start
LH: loop header
LB: loop body
LE: loop exit
PB: predicated region body
PF: predicated region fallthrough
CT: control target
= control target key end

     0   :  { %s617_s12 = smov 0   ;;  %s619_s13 = smov 0   ;;  %s669_s0 = inlined_call_operand.vmem [shape: bf16[2,64,32], index: 0, kind: input, shape index: {}]   ;;  %s670_s1 = inlined_call_operand.vmem [shape: f32[2,1,32], index: 1, kind: input, shape index: {}]   ;;  %s671_s2 = inlined_call_operand.vmem [shape: bf16[2,64,32], index: 2, kind: input, shape index: {}]   ;;  %s672_s3 = inlined_call_operand.vmem [shape: bf16[2,64,32], index: 3, kind: output, shape index: {}]  }
   0x1   :  { %s621_s14 = smov 0  }
   0x2 LB: > { %s25_s15 = sadd.s32 1, %s591_s13  ;;  %p482_p0 = scmp.ge.s32.totalorder %s595_s14, 1  ;;  %s595_s14 = sphi %s621_s14, %s13_s14   ;;  %s591_s13 = sphi %s619_s13, %s674_s13   ;;  %s587_s12 = sphi %s617_s12, %s673_s12  }
   0x3   : > { %p27_p1 = scmp.ge.s32.totalorder %s25_s15, 2  ;;  %p183_p2 = scmp.lt.s32.totalorder %s595_s14, 3 }
   0x5   : > { %s676_s15 = smov (%p27_p1, %s25_s15), 0  ;;  %p184_p3 = pnand %p482_p0, %p183_p2 }
   0x6   : > { %p228_p4 = scmp.lt.s32.totalorder (!%p184_p3), %s587_s12, 1  ;;  %vm355_vm0 = vcmask (!%p184_p3), 257024  }
   0x7   : > { %187 = sbr.rel (%p184_p3) target bundleno = 37 (0x25), region = 32 }
   0xe   : > { %s678_s12 = smov (!%p228_p4, %s587_s12), 1 }
   0xf   : > { %s635_s16 = sshll.u32 %s678_s12, 5  ;;  %s239_s19 = scalar_lea.vmem %s670_s1, %s678_s12 }
  0x10   : > { %s235_s22 = scalar_lea.vmem %s669_s0, %s635_s16  ;;  %s248_s25 = scalar_lea.vmem %s671_s2, %s635_s16  ;;  %v489_v0 = vld [vmem:[%s239_s19] ss:$0 sm:$0xff] }
  0x11   : > { %v512_v1 = vld [vmem:[%s235_s22] sm:$0xff]   ;;  %v543_v3 = vld [vmem:[%s235_s22 + $0x8] sm:$0xff]   ;;  %v544_v9 = vld [vmem:[%s235_s22 + $0x10] sm:$0xff]   ;;  %s258_s28 = scalar_lea.vmem %s672_s3, %s635_s16 }
  0x12   : > { %v528_v2 = vld [vmem:[%s248_s25] sm:$0xff]   ;;  %v513_v4 = vunpack.c.l.bf16 %v512_v1  ;;  %v514_v6 = vunpack.c.h.bf16 %v512_v1  ;;  %v546_v8 = vld [vmem:[%s248_s25 + $0x8] sm:$0xff]   ;;  %v547_v10 = vld [vmem:[%s248_s25 + $0x10] sm:$0xff]   ;;  %v517_v11 = vunpack.c.l.bf16 %v543_v3  ;;  %v518_v13 = vunpack.c.h.bf16 %v543_v3 }
  0x13   : > { %v529_v5 = vunpack.c.l.bf16 %v528_v2  ;;  %v530_v7 = vunpack.c.h.bf16 %v528_v2  ;;  %v533_v12 = vunpack.c.l.bf16 %v546_v8  ;;  %v534_v14 = vunpack.c.h.bf16 %v546_v8  ;;  %v545_v15 = vld [vmem:[%s235_s22 + $0x18] sm:$0xff]  }
  0x14   : > { %v283_v16 = vmul.f32 %v513_v4, %v489_v0  ;;  %v284_v17 = vmul.f32 %v514_v6, %v489_v0  ;;  %v521_v18 = vunpack.c.l.bf16 %v544_v9  ;;  %v537_v19 = vunpack.c.l.bf16 %v547_v10  ;;  %v548_v20 = vld [vmem:[%s248_s25 + $0x18] sm:$0xff]  }
  0x15   : > { %v285_v21 = vmul.f32 %v517_v11, %v489_v0  ;;  %v286_v22 = vmul.f32 %v518_v13, %v489_v0  ;;  %v522_v23 = vunpack.c.h.bf16 %v544_v9  ;;  %v538_v24 = vunpack.c.h.bf16 %v547_v10 }
  0x16   : > { %v307_v25 = vadd.f32 %v529_v5, %v283_v16  ;;  %v308_v26 = vadd.f32 %v530_v7, %v284_v17  ;;  %v287_v27 = vmul.f32 %v521_v18, %v489_v0  ;;  %v525_v28 = vunpack.c.l.bf16 %v545_v15 }
  0x17   : > { %v309_v29 = vadd.f32 %v533_v12, %v285_v21  ;;  %v310_v30 = vadd.f32 %v534_v14, %v286_v22  ;;  %v288_v31 = vmul.f32 %v522_v23, %v489_v0  ;;  %v541_v32 = vunpack.c.l.bf16 %v548_v20 }
  0x18   : > { %v315_v33 = vmax.f32 %v307_v25, 0.0  ;;  %v316_v34 = vmax.f32 %v308_v26, 0.0  ;;  %v311_v35 = vadd.f32 %v537_v19, %v287_v27  ;;  %v289_v36 = vmul.f32 %v525_v28, %v489_v0 }
  0x19   : > { %v317_v37 = vmax.f32 %v309_v29, 0.0  ;;  %v318_v38 = vmax.f32 %v310_v30, 0.0  ;;  %v312_v39 = vadd.f32 %v538_v24, %v288_v31  ;;  %v526_v40 = vunpack.c.h.bf16 %v545_v15 }
  0x1a   : > { %v503_v41 = vpack.c.bf16 %v315_v33, %v315_v33  ;;  %v504_v42 = vpack.c.bf16 %v316_v34, %v316_v34  ;;  %v319_v43 = vmax.f32 %v311_v35, 0.0  ;;  %v313_v44 = vadd.f32 %v541_v32, %v289_v36 }
  0x1b   : > { %v505_v45 = vpack.c.bf16 %v317_v37, %v317_v37  ;;  %v506_v46 = vpack.c.bf16 %v318_v38, %v318_v38  ;;  %v320_v47 = vmax.f32 %v312_v39, 0.0  ;;  %v290_v48 = vmul.f32 %v526_v40, %v489_v0 }
  0x1c   : > { %356 = vst.msk [vmem:[%s258_s28] sm:$0xf] %vm355_vm0, %v503_v41  ;;  %357 = vst.msk [vmem:[%s258_s28 + $0x4] sm:$0xf] %vm355_vm0, %v504_v42  ;;  %v507_v49 = vpack.c.bf16 %v319_v43, %v319_v43  ;;  %v321_v50 = vmax.f32 %v313_v44, 0.0  ;;  %v542_v51 = vunpack.c.h.bf16 %v548_v20 }
  0x1d   : > { %358 = vst.msk [vmem:[%s258_s28 + $0x8] sm:$0xf] %vm355_vm0, %v505_v45  ;;  %359 = vst.msk [vmem:[%s258_s28 + $0xc] sm:$0xf] %vm355_vm0, %v506_v46  ;;  %v508_v52 = vpack.c.bf16 %v320_v47, %v320_v47 }
  0x1e   : > { %360 = vst.msk [vmem:[%s258_s28 + $0x10] sm:$0xf] %vm355_vm0, %v507_v49  ;;  %v509_v53 = vpack.c.bf16 %v321_v50, %v321_v50  ;;  %v314_v54 = vadd.f32 %v542_v51, %v290_v48 }
  0x1f   : > { %361 = vst.msk [vmem:[%s258_s28 + $0x14] sm:$0xf] %vm355_vm0, %v508_v52 }
  0x20   : > { %362 = vst.msk [vmem:[%s258_s28 + $0x18] sm:$0xf] %vm355_vm0, %v509_v53  ;;  %v322_v55 = vmax.f32 %v314_v54, 0.0 }
  0x22   : > { %v510_v56 = vpack.c.bf16 %v322_v55, %v322_v55 }
  0x24   : > { %363 = vst.msk [vmem:[%s258_s28 + $0x1c] sm:$0xf] %vm355_vm0, %v510_v56 }
  0x25 PF: > { %s13_s14 = sadd.s32 1, %s595_s14   ;;  %s673_s12 = smov %s591_s13 }
  0x26   : > { %p10_p5 = scmp.ge.s32.totalorder %s13_s14, 4   ;;  %s674_s13 = smov %s676_s15 }
  0x28   :  { %12 = sbr.rel (!%p10_p5) target bundleno = 2 (0x2), region = 68 }

// kernel: _lambda_.28
= control target key start
LH: loop header
LB: loop body
LE: loop exit
PB: predicated region body
PF: predicated region fallthrough
CT: control target
= control target key end

     0   :  { %s301_s6 = smov 0   ;;  %s322_s0 = inlined_call_operand.vmem [shape: bf16[2,8,8,32], index: 0, kind: input, shape index: {}]   ;;  %s323_s1 = inlined_call_operand.vmem [shape: f32[2,2,2,32], index: 1, kind: output, shape index: {}]  }
   0x1 LB: > { %s243_s7 = sadd.s32 4294967295, %s289_s6   ;;  %p247_p0 = scmp.ge.s32.totalorder %s289_s6, 1  ;;  %s289_s6 = sphi %s301_s6, %s11_s6  }
   0x2   : > { %p87_p1 = scmp.lt.s32.totalorder %s289_s6, 3 }
   0x4   : > { %p88_p2 = pnand %p247_p0, %p87_p1 }
   0x5   : > { %p107_p3 = scmp.lt.s32.totalorder (!%p88_p2), %s243_s7, 1  ;;  %vm185_vm0 = vcmask (!%p88_p2), 254976  }
   0x6   : > { %91 = sbr.rel (%p88_p2) target bundleno = 48 (0x30), region = 24 }
   0xd   : > { %s325_s7 = smov (!%p107_p3, %s243_s7), 1 }
   0xe   : > { %s254_s8 = sshll.u32 %s325_s7, 5  ;;  %s255_s12 = sshll.u32 %s325_s7, 2 }
   0xf   : > { %s111_s11 = scalar_lea.vmem %s322_s0, %s254_s8  ;;  %s116_s15 = scalar_lea.vmem %s323_s1, %s255_s12 }
  0x10   : > { %v257_v0 = vld [vmem:[%s111_s11] sm:$0xff]   ;;  %v272_v1 = vld [vmem:[%s111_s11 + $0x8] sm:$0xff]   ;;  %v273_v2 = vld [vmem:[%s111_s11 + $0x10] sm:$0xff]  }
  0x11   : > { %v258_v3 = vunpack.c.l.bf16 %v257_v0  ;;  %v259_v4 = vunpack.c.h.bf16 %v257_v0  ;;  %v262_v5 = vunpack.c.l.bf16 %v272_v1  ;;  %v263_v6 = vunpack.c.h.bf16 %v272_v1  ;;  %v274_v10 = vld [vmem:[%s111_s11 + $0x18] sm:$0xff]  }
  0x12   : > { %v266_v7 = vunpack.c.l.bf16 %v273_v2  ;;  %v267_v11 = vunpack.c.h.bf16 %v273_v2  ;;  %v270_v14 = vunpack.c.l.bf16 %v274_v10  ;;  %v271_v17 = vunpack.c.h.bf16 %v274_v10 }
  0x13   : > { %v133_v8 = vadd.f32 %v259_v4, %v258_v3  ;;  %v134_v9 = vadd.f32 %v262_v5, %v259_v4 }
  0x15   : > { %v135_v12 = vadd.f32 %v262_v5, %v133_v8  ;;  %v136_v13 = vadd.f32 %v263_v6, %v134_v9 }
  0x17   : > { %v137_v15 = vadd.f32 %v263_v6, %v135_v12  ;;  %v138_v16 = vadd.f32 %v266_v7, %v136_v13 }
  0x19   : > { %v139_v18 = vadd.f32 %v266_v7, %v137_v15  ;;  %v140_v19 = vadd.f32 %v267_v11, %v138_v16 }
  0x1b   : > { %v141_v20 = vadd.f32 %v267_v11, %v139_v18  ;;  %v142_v21 = vadd.f32 %v270_v14, %v140_v19 }
  0x1d   : > { %v143_v22 = vadd.f32 %v270_v14, %v141_v20  ;;  %v144_v23 = vadd.f32 %v271_v17, %v142_v21 }
  0x1f   : > { %v147_v24 = vrot.slane %v143_v22, 1  ;;  %v153_v25 = vrot.slane %v143_v22, 2  ;;  %v148_v26 = vrot.slane %v144_v23, 1  ;;  %v154_v27 = vrot.slane %v144_v23, 2 }
  0x20   : > { %v159_v29 = vrot.slane %v143_v22, 3  ;;  %v160_v31 = vrot.slane %v144_v23, 3  ;;  %v165_v33 = vrot.slane %v143_v22, 4  ;;  %v166_v35 = vrot.slane %v144_v23, 4 }
  0x21   : > { %v151_v28 = vadd.f32 %v147_v24, %v143_v22  ;;  %v152_v30 = vadd.f32 %v148_v26, %v144_v23  ;;  %v171_v37 = vrot.slane %v143_v22, 5  ;;  %v172_v39 = vrot.slane %v144_v23, 5 }
  0x22   : > { %v177_v41 = vrot.slane %v143_v22, 6  ;;  %v178_v43 = vrot.slane %v144_v23, 6 }
  0x23   : > { %v157_v32 = vadd.f32 %v153_v25, %v151_v28  ;;  %v158_v34 = vadd.f32 %v154_v27, %v152_v30 }
  0x25   : > { %v163_v36 = vadd.f32 %v159_v29, %v157_v32  ;;  %v164_v38 = vadd.f32 %v160_v31, %v158_v34 }
  0x27   : > { %v169_v40 = vadd.f32 %v165_v33, %v163_v36  ;;  %v170_v42 = vadd.f32 %v166_v35, %v164_v38 }
  0x29   : > { %v175_v44 = vadd.f32 %v171_v37, %v169_v40  ;;  %v176_v45 = vadd.f32 %v172_v39, %v170_v42 }
  0x2b   : > { %v181_v46 = vadd.f32 %v177_v41, %v175_v44  ;;  %v182_v47 = vadd.f32 %v178_v43, %v176_v45 }
  0x2d   : > { %v183_v48 = vmul.f32 0.020408163, %v181_v46  ;;  %v184_v49 = vmul.f32 0.020408163, %v182_v47 }
  0x2f   : > { %186 = vst.msk [vmem:[%s116_s15] sm:$0x3] %vm185_vm0, %v183_v48  ;;  %187 = vst.msk [vmem:[%s116_s15 + $0x2] sm:$0x3] %vm185_vm0, %v184_v49 }
  0x30 PF: > { %s11_s6 = sadd.s32 1, %s289_s6  }
  0x31   : > { %p8_p4 = scmp.ge.s32.totalorder %s11_s6, 4  }
  0x33   :  { %10 = sbr.rel (!%p8_p4) target bundleno = 1 (0x1), region = 54 }

// kernel: _lambda_.29
= control target key start
LH: loop header
LB: loop body
LE: loop exit
PB: predicated region body
PF: predicated region fallthrough
CT: control target
= control target key end

     0   :  { %v262_v0 = vmov 0.0   ;;  %vm263_vm0 = vmmov 0   ;;  %s325_s1 = inlined_call_operand.vmem [shape: bf16[1,128,128], index: 1, kind: input, shape index: {}]   ;;  %s326_s0 = inlined_call_operand.vmem [shape: bf16[8,128], index: 0, kind: input, shape index: {}]   ;;  %s327_s2 = inlined_call_operand.vmem [shape: f32[1,1,128], index: 2, kind: input, shape index: {}]   ;;  %s328_s3 = inlined_call_operand.vmem [shape: f32[1,1,128], index: 3, kind: input, shape index: {}]   ;;  %s329_s4 = inlined_call_operand.vmem [shape: f32[8,128], index: 4, kind: output, shape index: {}]  }
   0x1   :  { %232 = vmatprep.subr.bf16.mxu0 %v262_v0  ;;  %v254_v1 = vld [vmem:[%s325_s1] sm:$0xff]   ;;  %248 = vmatprep.mubr.msk.bf16.mxu0 %vm263_vm0, %v262_v0  ;;  %v255_v2 = vld [vmem:[%s325_s1 + $0x8] sm:$0xff]   ;;  %v256_v3 = vld [vmem:[%s325_s1 + $0x10] sm:$0xff]  }
   0x2   :  { %233 = vmatpush3.bf16.msra.mxu0 %v254_v1  ;;  %v257_v4 = vld [vmem:[%s325_s1 + $0x18] sm:$0xff]   ;;  %v258_v5 = vld [vmem:[%s325_s1 + $0x20] sm:$0xff]   ;;  %v259_v6 = vld [vmem:[%s325_s1 + $0x28] sm:$0xff]  }
   0x3   :  { %234 = vmatprep.subr.bf16.mxu0 %v262_v0  ;;  %v260_v7 = vld [vmem:[%s325_s1 + $0x30] sm:$0xff]   ;;  %v261_v8 = vld [vmem:[%s325_s1 + $0x38] sm:$0xff]   ;;  %v46_v9 = vld [vmem:[%s326_s0] sm:$0xf] }
   0x4   :  { %v221_v10 = vld [vmem:[%s327_s2] ss:$0 sm:$0xff] }
   0x5   :  { %v222_v12 = vld [vmem:[%s328_s3] ss:$0 sm:$0xff] }
   0x6   :  { %235 = vmatpush3.bf16.msra.mxu0 %v255_v2 }
   0x7   :  { %236 = vmatprep.subr.bf16.mxu0 %v262_v0 }
   0xa   :  { %237 = vmatpush3.bf16.msra.mxu0 %v256_v3 }
   0xb   :  { %238 = vmatprep.subr.bf16.mxu0 %v262_v0 }
   0xe   :  { %239 = vmatpush3.bf16.msra.mxu0 %v257_v4 }
   0xf   :  { %240 = vmatprep.subr.bf16.mxu0 %v262_v0 }
  0x12   :  { %241 = vmatpush3.bf16.msra.mxu0 %v258_v5 }
  0x13   :  { %242 = vmatprep.subr.bf16.mxu0 %v262_v0 }
  0x16   :  { %243 = vmatpush3.bf16.msra.mxu0 %v259_v6 }
  0x17   :  { %244 = vmatprep.subr.bf16.mxu0 %v262_v0 }
  0x1a   :  { %245 = vmatpush3.bf16.msra.mxu0 %v260_v7 }
  0x1b   :  { %246 = vmatprep.subr.bf16.mxu0 %v262_v0 }
  0x1e   :  { %247 = vmatpush3.bf16.msra.mxu0 %v261_v8 }
  0x21   :  { %249 = vmatmul.mubr.bf16.vlgmr.msra.gmra.mrb[0].mxu0 %v46_v9 }
  0xf4   :  { %v145_v11 = vpop.f32.mrb[0].mxu0 }
  0xf5   :  { %v174_v13 = vmul.f32 %v221_v10, %v145_v11  ;;  %v250_v14 = vpop.f32.mrb[1].mxu0 }
  0xf6   :  { %v148_v15 = vpop.f32.mrb[2].mxu0 }
  0xf7   :  { %v182_v16 = vadd.f32 %v222_v12, %v174_v13  ;;  %v251_v17 = vpop.f32.mrb[3].mxu0 }
  0xf9   :  { %183 = vst [vmem:[%s329_s4] sm:$0xff] %v182_v16 }

</bundles_post_ra>
